<compile_context>
chip_gen: v6e
topology: v6e:2x2x1
jax: 0.10.0
libtpu: 0.0.40
codegen_flags: <defaults>
</compile_context>

<pallas_src>
import math
import functools

import jax
import jax.numpy as jnp
from jax import lax
from jax.experimental import pallas as pl
from jax.experimental.pallas import tpu as pltpu

LANE = 128
SUB = 8
NEG = -1e9


def rup(x, m):
    return ((x + m - 1) // m) * m


def pad_to(x, shape):
    return jnp.pad(x, [(0, s - d) for d, s in zip(x.shape, shape)])


# --------------------------------------------------------------------------
# In-kernel helpers (operate on values; everything stays in VMEM / vregs)
# --------------------------------------------------------------------------

def _mm(x, w, b=None):
    """Matmul with activations cast to the (bf16) weight dtype, f32 accumulation."""
    acc = jnp.dot(x.astype(w.dtype), w, preferred_element_type=jnp.float32)
    return acc if b is None else acc + b


def _ln(h, g, b, valid, eps=1e-5):
    """Row LayerNorm over the first `valid` lanes; padded lanes of h are zero,
    padded lanes of g/b are zero so the output's padded lanes stay zero."""
    inv_n = 1.0 / valid
    mu = jnp.sum(h, axis=-1, keepdims=True) * inv_n
    var = jnp.maximum(jnp.sum(h * h, axis=-1, keepdims=True) * inv_n - mu * mu, 0.0)
    return (h - mu) * lax.rsqrt(var + eps) * g + b


def _mha(q, k, v, bias, *, nhead, hd):
    """All-heads attention.  q:(Lq,EP), k,v:(Lk,EP) f32 with heads living in
    lanes [0, nhead*hd) and the 1/sqrt(hd) scale pre-folded into q.
    bias:(Lq,Lk) f32 additive (attn mask + key-padding, already combined).
    Heads are stacked head-major along SUBLANES (q replicated with per-head
    lane masks), so QK^T and PV are two full-depth MXU matmuls, softmax
    reduces along the natural lane axis, and the output is reassembled into
    concatenated-head lane layout with a handful of VPU mul/adds."""
    Lq, EP = q.shape
    lane = lax.broadcasted_iota(jnp.int32, (1, EP), 1)
    masks = [((lane >= h * hd) & (lane < (h + 1) * hd)).astype(jnp.float32)
             for h in range(nhead)]
    qbd = jnp.concatenate([q * masks[h] for h in range(nhead)], axis=0)   # (H*Lq, EP)
    s = lax.dot_general(qbd, k, (((1,), (1,)), ((), ())),
                        preferred_element_type=jnp.float32)               # (H*Lq, Lk)
    s = s + jnp.concatenate([bias] * nhead, axis=0)
    s = s - jnp.max(s, axis=-1, keepdims=True)
    p = jnp.exp(s)
    p = p / jnp.sum(p, axis=-1, keepdims=True)                            # exact
    o_st = jnp.dot(p, v, preferred_element_type=jnp.float32)              # (H*Lq, EP)
    o = o_st[:Lq] * masks[0]
    for h in range(1, nhead):
        o = o + o_st[h * Lq:(h + 1) * Lq, :] * masks[h]
    return o                                                              # (Lq, EP)


# --------------------------------------------------------------------------
# The single fused kernel: one batch element per grid step
# --------------------------------------------------------------------------

def _fused_transformer_kernel(*refs, b_def, w_def, nb, nw,
                              nhead, hd, e_valid, n_enc, n_dec, qp):
    bi = jax.tree_util.tree_unflatten(b_def, refs[:nb])          # per-batch inputs
    wt = jax.tree_util.tree_unflatten(w_def, refs[nb:nb + nw])   # shared weights
    o_ref = refs[nb + nw]

    # ---- wav embedding: windowed-DFT power + (mel . linear) + bias + PE ----
    frames = bi["frames"][0]                                     # (SP, NFP) bf16
    spec = _mm(frames, wt["dft"][...])                           # (SP, 2*QP) f32
    re, im = spec[:, :qp], spec[:, qp:]
    power = re * re + im * im                                    # |DFT|^2
    pe = bi["pe"][0].astype(jnp.float32)                         # (1, EP)
    x = _mm(power, wt["melproj"][...], wt["wav_b"][...]) + pe    # (SP, EP) f32
    EP = x.shape[-1]

    bias_src = bi["bias_src"][0]                                 # (SP, SP) f32
    bias_tgt = bi["bias_tgt"][0]                                 # (TP, TP)
    bias_mem = bi["bias_mem"][0]                                 # (TP, SP)

    # ---- encoder stack (post-LN, relu FFN) ----
    enc = wt["enc"]
    for l in range(n_enc):
        ngb = enc["ngb"][l]                                      # (4, EP) f32
        qkv = _mm(x, enc["wqkv"][l], enc["bqkv"][l])             # (SP, 3*EP) f32
        q, k, v = qkv[:, :EP], qkv[:, EP:2 * EP], qkv[:, 2 * EP:]
        a = _mha(q, k, v, bias_src, nhead=nhead, hd=hd)
        x1 = _ln(_mm(a, enc["wo"][l], enc["bo"][l]) + x,
                 ngb[0:1], ngb[1:2], e_valid)
        f = jnp.maximum(_mm(x1, enc["w1"][l], enc["b1"][l]), 0.0)
        x = _ln(_mm(f, enc["w2"][l], enc["b2"][l]) + x1,
                ngb[2:3], ngb[3:4], e_valid)
    en = wt["enc_norm"][...]
    mem = _ln(x, en[0:1], en[1:2], e_valid)                      # encoder memory

    # ---- decoder stack ----
    y = bi["tgt"][0].astype(jnp.float32)                         # (TP, EP)
    dec = wt["dec"]
    for l in range(n_dec):
        ngb = dec["ngb"][l]                                      # (6, EP)
        qkv = _mm(y, dec["wqkv"][l], dec["bqkv"][l])             # masked self-attn
        q, k, v = qkv[:, :EP], qkv[:, EP:2 * EP], qkv[:, 2 * EP:]
        a1 = _mha(q, k, v, bias_tgt, nhead=nhead, hd=hd)
        x1 = _ln(_mm(a1, dec["wo"][l], dec["bo"][l]) + y,
                 ngb[0:1], ngb[1:2], e_valid)
        qc = _mm(x1, dec["wq"][l], dec["bq"][l])                 # cross-attn
        kv = _mm(mem, dec["wkv"][l], dec["bkv"][l])              # (SP, 2*EP)
        kc, vc = kv[:, :EP], kv[:, EP:]
        a2 = _mha(qc, kc, vc, bias_mem, nhead=nhead, hd=hd)
        x2 = _ln(_mm(a2, dec["woc"][l], dec["boc"][l]) + x1,
                 ngb[2:3], ngb[3:4], e_valid)
        f = jnp.maximum(_mm(x2, dec["w1"][l], dec["b1"][l]), 0.0)
        y = _ln(_mm(f, dec["w2"][l], dec["b2"][l]) + x2,
                ngb[4:5], ngb[5:6], e_valid)
    dn = wt["dec_norm"][...]
    y = _ln(y, dn[0:1], dn[1:2], e_valid)

    # ---- generator ----
    o_ref[0] = _mm(y, wt["gen_w"][...], wt["gen_b"][...]).astype(o_ref.dtype)


def fused_forward_call(batch_inputs, weights, *, B, TP, VP,
                       nhead, hd, e_valid, n_enc, n_dec, qp):
    b_leaves, b_def = jax.tree_util.tree_flatten(batch_inputs)
    w_leaves, w_def = jax.tree_util.tree_flatten(weights)
    nb, nw = len(b_leaves), len(w_leaves)

    def batch_spec(x):
        nd = x.ndim
        return pl.BlockSpec((1,) + x.shape[1:],
                            lambda b, _n=nd: (b,) + (0,) * (_n - 1))

    def shared_spec(x):
        nd = x.ndim
        return pl.BlockSpec(x.shape, lambda b, _n=nd: (0,) * _n)

    kernel = functools.partial(
        _fused_transformer_kernel, b_def=b_def, w_def=w_def, nb=nb, nw=nw,
        nhead=nhead, hd=hd, e_valid=e_valid, n_enc=n_enc, n_dec=n_dec, qp=qp)

    # TODO(synk): if emb/ffdim/vocab ever grow past a single-VMEM-block size,
    # add K/N reduction grid axes with an f32 accumulator and size tiles
    # against v7x's 64 MiB / v5e's 16 MiB scoped VMEM (not v6e's 128 MiB).
    return pl.pallas_call(
        kernel,
        out_shape=jax.ShapeDtypeStruct((B, TP, VP), jnp.float32),
        grid=(B,),
        in_specs=[batch_spec(x) for x in b_leaves]
                 + [shared_spec(x) for x in w_leaves],
        out_specs=pl.BlockSpec((1, TP, VP), lambda b: (b, 0, 0)),
        compiler_params=pltpu.CompilerParams(dimension_semantics=("parallel",)),
    )(*b_leaves, *w_leaves)


# --------------------------------------------------------------------------
# Forward wrapper (only tiny XLA glue: frame gather, token gather, masks)
# --------------------------------------------------------------------------

def transformer_forward(pp, src, tgt, src_mask, tgt_mask, src_pad, tgt_pad, mem_pad, cfg):
    E, nhead, V = cfg["emb"], cfg["nhead"], cfg["vocab"]
    n_fft, hop = cfg["n_fft"], cfg["hop"]
    hd = E // nhead
    EP, VP = rup(E, LANE), rup(V, LANE)
    NFP = rup(n_fft, LANE)
    B, n_samples = src.shape
    T = tgt.shape[0]
    S = 1 + n_samples // hop
    SP, TP = rup(S, SUB), rup(T, SUB)

    # faithful to the reference module's pos_embedding[:size(0)] (== batch) broadcast
    pe_b = pp["pos_emb"][:B][:, None, :]                         # (B, 1, EP)

    # ---- frame extraction (tiny XLA gather; frames become lane-dense) ----
    # TODO(synk): reflect pad + strided frame gather kept in XLA (small, one op).
    pad = n_fft // 2
    xw = jnp.pad(src, ((0, 0), (pad, pad)), mode="reflect")      # center=True
    idx = jnp.arange(S)[:, None] * hop + jnp.arange(n_fft)[None, :]
    frames = jnp.take(xw, idx, axis=1)                           # (B, S, n_fft)
    frames = pad_to(frames, (B, SP, NFP)).astype(jnp.bfloat16)

    # ---- token embedding (gather in XLA; sqrt(E) folded into the table) ----
    # TODO(synk): embedding gather kept in XLA (jnp.take); no clean Pallas win at this size.
    tok = tgt.T                                                  # (T,B) -> (B,T)
    tgt_e = jnp.take(pp["tok_emb"], tok, axis=0) + pe_b          # (B, T, EP) f32
    tgt_e = pad_to(tgt_e, (B, TP, EP))

    # ---- combined additive attention biases (mask + key padding, per batch) ----
    def kpb(mask, LP):
        m = jnp.pad(mask, ((0, 0), (0, LP - mask.shape[1])), constant_values=True)
        return jnp.where(m, NEG, 0.0).astype(jnp.float32)[:, None, :]   # (B,1,LP)

    bias_src = pad_to(src_mask.astype(jnp.float32), (SP, SP))[None] + kpb(src_pad, SP)
    bias_tgt = pad_to(tgt_mask.astype(jnp.float32), (TP, TP))[None] + kpb(tgt_pad, TP)
    bias_mem = jnp.broadcast_to(kpb(mem_pad, SP), (B, TP, SP))   # memory_mask = None

    batch_inputs = {"frames": frames, "tgt": tgt_e, "pe": pe_b,
                    "bias_src": bias_src, "bias_tgt": bias_tgt, "bias_mem": bias_mem}

    y = fused_forward_call(batch_inputs, pp["weights"], B=B, TP=TP, VP=VP,
                           nhead=nhead, hd=hd, e_valid=E,
                           n_enc=cfg["n_enc"], n_dec=cfg["n_dec"], qp=LANE)
    return jnp.transpose(y[:, :T, :V], (1, 0, 2))                # (T, B, V) seq-first


# --------------------------------------------------------------------------
# Parameter / constant setup (semantics identical to the reference module)
# --------------------------------------------------------------------------

class KeyGen:
    def __init__(self, key):
        self.key = key

    def __call__(self):
        self.key, sub = jax.random.split(self.key)
        return sub


def uinit(kg, shape, scale=0.1):
    return jax.random.uniform(kg(), shape, jnp.float32, -scale, scale)


def make_attn_params(kg, E):
    return {"in_W": uinit(kg, (3 * E, E)), "in_b": uinit(kg, (3 * E,)),
            "out_W": uinit(kg, (E, E)), "out_b": uinit(kg, (E,))}


def make_enc_layer(kg, E, F):
    return {"self": make_attn_params(kg, E),
            "lin1_W": uinit(kg, (F, E)), "lin1_b": uinit(kg, (F,)),
            "lin2_W": uinit(kg, (E, F)), "lin2_b": uinit(kg, (E,)),
            "n1_g": jnp.ones((E,)), "n1_b": jnp.zeros((E,)),
            "n2_g": jnp.ones((E,)), "n2_b": jnp.zeros((E,))}


def make_dec_layer(kg, E, F):
    p = make_enc_layer(kg, E, F)
    p["cross"] = make_attn_params(kg, E)
    p["n3_g"] = jnp.ones((E,))
    p["n3_b"] = jnp.zeros((E,))
    return p


def init_params(key, cfg):
    kg = KeyGen(key)
    E, F, V, nm = cfg["emb"], cfg["ffdim"], cfg["vocab"], cfg["n_mels"]
    return {
        "wav_W": uinit(kg, (E, nm)), "wav_b": uinit(kg, (E,)),
        "tok_emb": uinit(kg, (V, E), scale=1.0),
        "enc_layers": [make_enc_layer(kg, E, F) for _ in range(cfg["n_enc"])],
        "dec_layers": [make_dec_layer(kg, E, F) for _ in range(cfg["n_dec"])],
        "enc_norm_g": jnp.ones((E,)), "enc_norm_b": jnp.zeros((E,)),
        "dec_norm_g": jnp.ones((E,)), "dec_norm_b": jnp.zeros((E,)),
        "gen_W": uinit(kg, (V, E)), "gen_b": uinit(kg, (V,)),
    }


def init_consts(cfg):
    E, n_fft, win, n_mels, sr, maxlen = (cfg["emb"], cfg["n_fft"], cfg["win"],
                                         cfg["n_mels"], cfg["sr"], cfg["maxlen"])
    assert win == n_fft  # TODO(synk): zero-padded window for win_length < n_fft not needed here
    n = jnp.arange(n_fft, dtype=jnp.float32)
    window = 0.5 - 0.5 * jnp.cos(2.0 * math.pi * n / win)        # periodic hann
    n_freq = n_fft // 2 + 1
    f = jnp.arange(n_freq, dtype=jnp.float32)
    ang = 2.0 * math.pi * n[:, None] * f[None, :] / n_fft
    cos_m, sin_m = jnp.cos(ang), jnp.sin(ang)
    # HTK mel filterbank, norm=None (torchaudio defaults)
    hz2mel = lambda h: 2595.0 * jnp.log10(1.0 + h / 700.0)
    mel2hz = lambda m: 700.0 * (10.0 ** (m / 2595.0) - 1.0)
    all_freqs = jnp.linspace(0.0, sr / 2.0, n_freq)
    m_pts = jnp.linspace(hz2mel(jnp.float32(0.0)), hz2mel(jnp.float32(sr / 2.0)), n_mels + 2)
    f_pts = mel2hz(m_pts)
    f_diff = f_pts[1:] - f_pts[:-1]
    slopes = f_pts[None, :] - all_freqs[:, None]
    down = -slopes[:, :-2] / f_diff[:-1]
    up = slopes[:, 2:] / f_diff[1:]
    fbank = jnp.maximum(0.0, jnp.minimum(down, up))              # (n_freq, n_mels)
    # sinusoidal positional table (maxlen, 1, E), exactly like the module buffer
    den = jnp.exp(-jnp.arange(0, E, 2, dtype=jnp.float32) * math.log(10000.0) / E)
    pos = jnp.arange(maxlen, dtype=jnp.float32)[:, None]
    pe = jnp.zeros((maxlen, E), jnp.float32)
    pe = pe.at[:, 0::2].set(jnp.sin(pos * den))
    pe = pe.at[:, 1::2].set(jnp.cos(pos * den))
    return {"window": window, "cos": cos_m, "sin": sin_m, "fbank": fbank,
            "pos_emb": pe[:, None, :]}


def prepare_padded(params, consts, cfg):
    """One-time prep: transpose weights to (in,out), pad to lane tiles, cast
    matmul operands to bf16, fold 1/sqrt(head_dim) into the Q projections,
    fold the Hann window into the DFT matrix, fold the mel filterbank into the
    wav linear, fold sqrt(E) into the token table, and stack per-layer weights
    so the whole stack is a handful of VMEM-resident kernel inputs."""
    E, F, V = cfg["emb"], cfg["ffdim"], cfg["vocab"]
    nhead = cfg["nhead"]
    hd = E // nhead
    n_fft = cfg["n_fft"]
    EP, FP, VP, QP = rup(E, LANE), rup(F, LANE), rup(V, LANE), LANE
    NFP = rup(n_fft, LANE)
    n_freq = n_fft // 2 + 1
    bf = jnp.bfloat16
    scale = 1.0 / math.sqrt(hd)

    def prep_self(p):
        # packed [Wq*scale | Wk | Wv] -> one (EP, 3*EP) matmul
        w = jnp.zeros((EP, 3 * EP), jnp.float32)
        b = jnp.zeros((1, 3 * EP), jnp.float32)
        for c, sc in enumerate((scale, 1.0, 1.0)):
            Wc = p["in_W"][c * E:(c + 1) * E] * sc
            bc = p["in_b"][c * E:(c + 1) * E] * sc
            w = w.at[:E, c * EP:c * EP + E].set(Wc.T)
            b = b.at[0, c * EP:c * EP + E].set(bc)
        return {"wqkv": w.astype(bf), "bqkv": b,
                "wo": pad_to(p["out_W"].T, (EP, EP)).astype(bf),
                "bo": pad_to(p["out_b"][None, :], (1, EP))}

    def prep_cross(p):
        Wq, Wk, Wv = (p["in_W"][c * E:(c + 1) * E] for c in range(3))
        bq, bk, bv = (p["in_b"][c * E:(c + 1) * E] for c in range(3))
        wkv = jnp.zeros((EP, 2 * EP), jnp.float32)
        bkv = jnp.zeros((1, 2 * EP), jnp.float32)
        wkv = wkv.at[:E, :E].set(Wk.T).at[:E, EP:EP + E].set(Wv.T)
        bkv = bkv.at[0, :E].set(bk).at[0, EP:EP + E].set(bv)
        return {"wq": pad_to(Wq.T * scale, (EP, EP)).astype(bf),
                "bq": pad_to(bq[None, :] * scale, (1, EP)),
                "wkv": wkv.astype(bf), "bkv": bkv,
                "woc": pad_to(p["out_W"].T, (EP, EP)).astype(bf),
                "boc": pad_to(p["out_b"][None, :], (1, EP))}

    def prep_ffn(p):
        return {"w1": pad_to(p["lin1_W"].T, (EP, FP)).astype(bf),
                "b1": pad_to(p["lin1_b"][None, :], (1, FP)),
                "w2": pad_to(p["lin2_W"].T, (FP, EP)).astype(bf),
                "b2": pad_to(p["lin2_b"][None, :], (1, EP))}

    def prep_enc(p):
        d = {}
        d.update(prep_self(p["self"]))
        d.update(prep_ffn(p))
        d["ngb"] = jnp.stack([pad_to(p[k], (EP,))
                              for k in ("n1_g", "n1_b", "n2_g", "n2_b")])   # (4, EP)
        return d

    def prep_dec(p):
        d = {}
        d.update(prep_self(p["self"]))
        d.update(prep_cross(p["cross"]))
        d.update(prep_ffn(p))
        d["ngb"] = jnp.stack([pad_to(p[k], (EP,))
                              for k in ("n1_g", "n1_b", "n2_g", "n2_b", "n3_g", "n3_b")])
        return d

    def stack_layers(dicts):
        return {k: jnp.stack([d[k] for d in dicts]) for k in dicts[0].keys()}

    enc_stack = stack_layers([prep_enc(p) for p in params["enc_layers"]])
    dec_stack = stack_layers([prep_dec(p) for p in params["dec_layers"]])

    # combined windowed DFT matrix (frames @ dft -> [Re | Im]); rows >= n_fft zero
    win = consts["window"][:, None]
    dft = jnp.zeros((NFP, 2 * QP), jnp.float32)
    dft = dft.at[:n_fft, :n_freq].set(win * consts["cos"])
    dft = dft.at[:n_fft, QP:QP + n_freq].set(win * consts["sin"])
    # (power @ fbank) @ W^T == power @ (fbank @ W^T): fold mel fbank into wav linear
    melproj = consts["fbank"] @ params["wav_W"].T                # (n_freq, E)

    weights = {
        "dft": dft.astype(bf),
        "melproj": pad_to(melproj, (QP, EP)).astype(bf),
        "wav_b": pad_to(params["wav_b"][None, :], (1, EP)),
        "enc": enc_stack,
        "enc_norm": jnp.stack([pad_to(params["enc_norm_g"], (EP,)),
                               pad_to(params["enc_norm_b"], (EP,))]),
        "dec": dec_stack,
        "dec_norm": jnp.stack([pad_to(params["dec_norm_g"], (EP,)),
                               pad_to(params["dec_norm_b"], (EP,))]),
        "gen_w": pad_to(params["gen_W"].T, (EP, VP)).astype(bf),
        "gen_b": pad_to(params["gen_b"][None, :], (1, VP)),
    }
    return {
        "weights": weights,
        "tok_emb": pad_to(params["tok_emb"] * math.sqrt(E), (V, EP)),
        "pos_emb": pad_to(consts["pos_emb"][:, 0, :], (cfg["maxlen"], EP)),
    }


# --------------------------------------------------------------------------
# main
# --------------------------------------------------------------------------

if __name__ == "__main__":
    cfg = dict(n_enc=2, n_dec=2, emb=32, nhead=4, vocab=50, ffdim=64,
               n_fft=64, win=64, hop=32, n_mels=16, sr=800, maxlen=64)

    key = jax.random.PRNGKey(0)
    k_p, k_src, k_tgt = jax.random.split(key, 3)

    params = init_params(k_p, cfg)
    consts = init_consts(cfg)
    pp = prepare_padded(params, consts, cfg)          # one-time pad/transpose/bf16/stack

    B, n_samples, T_tgt = 2, 256, 8
    S = 1 + n_samples // cfg["hop"]                   # 9 spectrogram frames

    src = jax.random.normal(k_src, (B, n_samples), jnp.float32)
    tgt = jax.random.randint(k_tgt, (T_tgt, B), 0, cfg["vocab"], jnp.int32)

    src_mask = jnp.zeros((S, S), jnp.float32)
    tgt_mask = jnp.triu(jnp.ones((T_tgt, T_tgt), jnp.float32), k=1) * NEG
    src_padding_mask = jnp.zeros((B, S), bool)
    tgt_padding_mask = jnp.zeros((B, T_tgt), bool)
    memory_key_padding_mask = jnp.zeros((B, S), bool)

    fwd = jax.jit(functools.partial(transformer_forward, cfg=cfg))
    y = fwd(pp, src, tgt, src_mask, tgt_mask,
            src_padding_mask, tgt_padding_mask, memory_key_padding_mask)
    y = jax.block_until_ready(y)

    assert y.shape == (T_tgt, B, cfg["vocab"]), y.shape
    assert bool(jnp.all(jnp.isfinite(y)))
    print("KERNEL_OK")
</pallas_src>

<mosaic_0001>
module attributes {stable_mosaic.version = 11 : i64} {
  func.func @_fused_transformer_kernel(%arg0: i32, %arg1: memref<1x8x16xf32, #tpu.memory_space<vmem>>, %arg2: memref<1x16x16xf32, #tpu.memory_space<vmem>>, %arg3: memref<1x8x8xf32, #tpu.memory_space<vmem>>, %arg4: memref<1x16x128xbf16, #tpu.memory_space<vmem>>, %arg5: memref<1x1x128xf32, #tpu.memory_space<vmem>>, %arg6: memref<1x8x128xf32, #tpu.memory_space<vmem>>, %arg7: memref<2x1x128xf32, #tpu.memory_space<vmem>>, %arg8: memref<2x1x128xf32, #tpu.memory_space<vmem>>, %arg9: memref<2x1x256xf32, #tpu.memory_space<vmem>>, %arg10: memref<2x1x128xf32, #tpu.memory_space<vmem>>, %arg11: memref<2x1x128xf32, #tpu.memory_space<vmem>>, %arg12: memref<2x1x128xf32, #tpu.memory_space<vmem>>, %arg13: memref<2x1x384xf32, #tpu.memory_space<vmem>>, %arg14: memref<2x6x128xf32, #tpu.memory_space<vmem>>, %arg15: memref<2x128x128xbf16, #tpu.memory_space<vmem>>, %arg16: memref<2x128x128xbf16, #tpu.memory_space<vmem>>, %arg17: memref<2x128x256xbf16, #tpu.memory_space<vmem>>, %arg18: memref<2x128x128xbf16, #tpu.memory_space<vmem>>, %arg19: memref<2x128x128xbf16, #tpu.memory_space<vmem>>, %arg20: memref<2x128x128xbf16, #tpu.memory_space<vmem>>, %arg21: memref<2x128x384xbf16, #tpu.memory_space<vmem>>, %arg22: memref<2x128xf32, #tpu.memory_space<vmem>>, %arg23: memref<128x256xbf16, #tpu.memory_space<vmem>>, %arg24: memref<2x1x128xf32, #tpu.memory_space<vmem>>, %arg25: memref<2x1x128xf32, #tpu.memory_space<vmem>>, %arg26: memref<2x1x128xf32, #tpu.memory_space<vmem>>, %arg27: memref<2x1x384xf32, #tpu.memory_space<vmem>>, %arg28: memref<2x4x128xf32, #tpu.memory_space<vmem>>, %arg29: memref<2x128x128xbf16, #tpu.memory_space<vmem>>, %arg30: memref<2x128x128xbf16, #tpu.memory_space<vmem>>, %arg31: memref<2x128x128xbf16, #tpu.memory_space<vmem>>, %arg32: memref<2x128x384xbf16, #tpu.memory_space<vmem>>, %arg33: memref<2x128xf32, #tpu.memory_space<vmem>>, %arg34: memref<1x128xf32, #tpu.memory_space<vmem>>, %arg35: memref<128x128xbf16, #tpu.memory_space<vmem>>, %arg36: memref<128x128xbf16, #tpu.memory_space<vmem>>, %arg37: memref<1x128xf32, #tpu.memory_space<vmem>>, %arg38: memref<1x8x128xf32, #tpu.memory_space<vmem>>) attributes {dimension_semantics = [#tpu.dimension_semantics<parallel>], iteration_bounds = array<i64: 2>, scalar_prefetch = 0 : i64, scratch_operands = 0 : i64, tpu.core_type = #tpu.core_type<tc>, window_params = [{transform_indices = @transform_0, window_bounds = array<i64: 1, 8, 16>}, {transform_indices = @transform_1, window_bounds = array<i64: 1, 16, 16>}, {transform_indices = @transform_2, window_bounds = array<i64: 1, 8, 8>}, {transform_indices = @transform_3, window_bounds = array<i64: 1, 16, 128>}, {transform_indices = @transform_4, window_bounds = array<i64: 1, 1, 128>}, {transform_indices = @transform_5, window_bounds = array<i64: 1, 8, 128>}, {pipeline_mode = #tpu.pipeline_mode<synchronous>, transform_indices = @transform_6, window_bounds = array<i64: 2, 1, 128>}, {pipeline_mode = #tpu.pipeline_mode<synchronous>, transform_indices = @transform_7, window_bounds = array<i64: 2, 1, 128>}, {pipeline_mode = #tpu.pipeline_mode<synchronous>, transform_indices = @transform_8, window_bounds = array<i64: 2, 1, 256>}, {pipeline_mode = #tpu.pipeline_mode<synchronous>, transform_indices = @transform_9, window_bounds = array<i64: 2, 1, 128>}, {pipeline_mode = #tpu.pipeline_mode<synchronous>, transform_indices = @transform_10, window_bounds = array<i64: 2, 1, 128>}, {pipeline_mode = #tpu.pipeline_mode<synchronous>, transform_indices = @transform_11, window_bounds = array<i64: 2, 1, 128>}, {pipeline_mode = #tpu.pipeline_mode<synchronous>, transform_indices = @transform_12, window_bounds = array<i64: 2, 1, 384>}, {pipeline_mode = #tpu.pipeline_mode<synchronous>, transform_indices = @transform_13, window_bounds = array<i64: 2, 6, 128>}, {pipeline_mode = #tpu.pipeline_mode<synchronous>, transform_indices = @transform_14, window_bounds = array<i64: 2, 128, 128>}, {pipeline_mode = #tpu.pipeline_mode<synchronous>, transform_indices = @transform_15, window_bounds = array<i64: 2, 128, 128>}, {pipeline_mode = #tpu.pipeline_mode<synchronous>, transform_indices = @transform_16, window_bounds = array<i64: 2, 128, 256>}, {pipeline_mode = #tpu.pipeline_mode<synchronous>, transform_indices = @transform_17, window_bounds = array<i64: 2, 128, 128>}, {pipeline_mode = #tpu.pipeline_mode<synchronous>, transform_indices = @transform_18, window_bounds = array<i64: 2, 128, 128>}, {pipeline_mode = #tpu.pipeline_mode<synchronous>, transform_indices = @transform_19, window_bounds = array<i64: 2, 128, 128>}, {pipeline_mode = #tpu.pipeline_mode<synchronous>, transform_indices = @transform_20, window_bounds = array<i64: 2, 128, 384>}, {pipeline_mode = #tpu.pipeline_mode<synchronous>, transform_indices = @transform_21, window_bounds = array<i64: 2, 128>}, {pipeline_mode = #tpu.pipeline_mode<synchronous>, transform_indices = @transform_22, window_bounds = array<i64: 128, 256>}, {pipeline_mode = #tpu.pipeline_mode<synchronous>, transform_indices = @transform_23, window_bounds = array<i64: 2, 1, 128>}, {pipeline_mode = #tpu.pipeline_mode<synchronous>, transform_indices = @transform_24, window_bounds = array<i64: 2, 1, 128>}, {pipeline_mode = #tpu.pipeline_mode<synchronous>, transform_indices = @transform_25, window_bounds = array<i64: 2, 1, 128>}, {pipeline_mode = #tpu.pipeline_mode<synchronous>, transform_indices = @transform_26, window_bounds = array<i64: 2, 1, 384>}, {pipeline_mode = #tpu.pipeline_mode<synchronous>, transform_indices = @transform_27, window_bounds = array<i64: 2, 4, 128>}, {pipeline_mode = #tpu.pipeline_mode<synchronous>, transform_indices = @transform_28, window_bounds = array<i64: 2, 128, 128>}, {pipeline_mode = #tpu.pipeline_mode<synchronous>, transform_indices = @transform_29, window_bounds = array<i64: 2, 128, 128>}, {pipeline_mode = #tpu.pipeline_mode<synchronous>, transform_indices = @transform_30, window_bounds = array<i64: 2, 128, 128>}, {pipeline_mode = #tpu.pipeline_mode<synchronous>, transform_indices = @transform_31, window_bounds = array<i64: 2, 128, 384>}, {pipeline_mode = #tpu.pipeline_mode<synchronous>, transform_indices = @transform_32, window_bounds = array<i64: 2, 128>}, {pipeline_mode = #tpu.pipeline_mode<synchronous>, transform_indices = @transform_33, window_bounds = array<i64: 1, 128>}, {pipeline_mode = #tpu.pipeline_mode<synchronous>, transform_indices = @transform_34, window_bounds = array<i64: 128, 128>}, {pipeline_mode = #tpu.pipeline_mode<synchronous>, transform_indices = @transform_35, window_bounds = array<i64: 128, 128>}, {pipeline_mode = #tpu.pipeline_mode<synchronous>, transform_indices = @transform_36, window_bounds = array<i64: 1, 128>}, {transform_indices = @transform_37, window_bounds = array<i64: 1, 8, 128>}]} {
    %c0 = arith.constant 0 : index
    %c0_0 = arith.constant 0 : index
    %c0_1 = arith.constant 0 : index
    %0 = vector.load %arg4[%c0, %c0_0, %c0_1] : memref<1x16x128xbf16, #tpu.memory_space<vmem>>, vector<1x16x128xbf16>
    %1 = vector.shape_cast %0 : vector<1x16x128xbf16> to vector<16x128xbf16>
    %c0_2 = arith.constant 0 : index
    %c0_3 = arith.constant 0 : index
    %2 = vector.load %arg23[%c0_2, %c0_3] : memref<128x256xbf16, #tpu.memory_space<vmem>>, vector<128x256xbf16>
    %cst = arith.constant dense<0.000000e+00> : vector<16x256xf32>
    %3 = tpu.matmul %1, %2, %cst {dimension_numbers = #tpu.dot_dimension_numbers<[1], [0], [0], [1], [0, 0, 1, 1], [], []>} : vector<16x128xbf16>, vector<128x256xbf16>, vector<16x256xf32> -> vector<16x256xf32>
    %4 = vector.extract_strided_slice %3 {offsets = [0, 0], sizes = [16, 128], strides = [1, 1]} : vector<16x256xf32> to vector<16x128xf32>
    %5 = vector.extract_strided_slice %3 {offsets = [0, 128], sizes = [16, 128], strides = [1, 1]} : vector<16x256xf32> to vector<16x128xf32>
    %6 = arith.mulf %4, %4 : vector<16x128xf32>
    %7 = arith.mulf %5, %5 : vector<16x128xf32>
    %8 = arith.addf %6, %7 : vector<16x128xf32>
    %c0_4 = arith.constant 0 : index
    %c0_5 = arith.constant 0 : index
    %c0_6 = arith.constant 0 : index
    %9 = vector.load %arg5[%c0_4, %c0_5, %c0_6] : memref<1x1x128xf32, #tpu.memory_space<vmem>>, vector<1x1x128xf32>
    %10 = vector.shape_cast %9 : vector<1x1x128xf32> to vector<1x128xf32>
    %c0_7 = arith.constant 0 : index
    %c0_8 = arith.constant 0 : index
    %11 = vector.load %arg36[%c0_7, %c0_8] : memref<128x128xbf16, #tpu.memory_space<vmem>>, vector<128x128xbf16>
    %c0_9 = arith.constant 0 : index
    %c0_10 = arith.constant 0 : index
    %12 = vector.load %arg37[%c0_9, %c0_10] : memref<1x128xf32, #tpu.memory_space<vmem>>, vector<1x128xf32>
    %13 = arith.truncf %8 : vector<16x128xf32> to vector<16x128xbf16>
    %cst_11 = arith.constant dense<0.000000e+00> : vector<16x128xf32>
    %14 = tpu.matmul %13, %11, %cst_11 {dimension_numbers = #tpu.dot_dimension_numbers<[1], [0], [0], [1], [0, 0, 1, 1], [], []>} : vector<16x128xbf16>, vector<128x128xbf16>, vector<16x128xf32> -> vector<16x128xf32>
    %15 = vector.broadcast %12 : vector<1x128xf32> to vector<16x128xf32>
    %16 = arith.addf %14, %15 : vector<16x128xf32>
    %17 = vector.broadcast %10 : vector<1x128xf32> to vector<16x128xf32>
    %18 = arith.addf %16, %17 : vector<16x128xf32>
    %c0_12 = arith.constant 0 : index
    %c0_13 = arith.constant 0 : index
    %c0_14 = arith.constant 0 : index
    %19 = vector.load %arg2[%c0_12, %c0_13, %c0_14] : memref<1x16x16xf32, #tpu.memory_space<vmem>>, vector<1x16x16xf32>
    %20 = vector.shape_cast %19 : vector<1x16x16xf32> to vector<16x16xf32>
    %c0_15 = arith.constant 0 : index
    %c0_16 = arith.constant 0 : index
    %c0_17 = arith.constant 0 : index
    %21 = vector.load %arg3[%c0_15, %c0_16, %c0_17] : memref<1x8x8xf32, #tpu.memory_space<vmem>>, vector<1x8x8xf32>
    %22 = vector.shape_cast %21 : vector<1x8x8xf32> to vector<8x8xf32>
    %c0_18 = arith.constant 0 : index
    %c0_19 = arith.constant 0 : index
    %c0_20 = arith.constant 0 : index
    %23 = vector.load %arg1[%c0_18, %c0_19, %c0_20] : memref<1x8x16xf32, #tpu.memory_space<vmem>>, vector<1x8x16xf32>
    %24 = vector.shape_cast %23 : vector<1x8x16xf32> to vector<8x16xf32>
    %c0_21 = arith.constant 0 : index
    %c0_22 = arith.constant 0 : index
    %c0_23 = arith.constant 0 : index
    %25 = vector.load %arg28[%c0_21, %c0_22, %c0_23] : memref<2x4x128xf32, #tpu.memory_space<vmem>>, vector<1x4x128xf32>
    %26 = vector.shape_cast %25 : vector<1x4x128xf32> to vector<4x128xf32>
    %c0_24 = arith.constant 0 : index
    %c0_25 = arith.constant 0 : index
    %c0_26 = arith.constant 0 : index
    %27 = vector.load %arg32[%c0_24, %c0_25, %c0_26] : memref<2x128x384xbf16, #tpu.memory_space<vmem>>, vector<1x128x384xbf16>
    %28 = vector.shape_cast %27 : vector<1x128x384xbf16> to vector<128x384xbf16>
    %c0_27 = arith.constant 0 : index
    %c0_28 = arith.constant 0 : index
    %c0_29 = arith.constant 0 : index
    %29 = vector.load %arg27[%c0_27, %c0_28, %c0_29] : memref<2x1x384xf32, #tpu.memory_space<vmem>>, vector<1x1x384xf32>
    %30 = vector.shape_cast %29 : vector<1x1x384xf32> to vector<1x384xf32>
    %31 = arith.truncf %18 : vector<16x128xf32> to vector<16x128xbf16>
    %cst_30 = arith.constant dense<0.000000e+00> : vector<16x384xf32>
    %32 = tpu.matmul %31, %28, %cst_30 {dimension_numbers = #tpu.dot_dimension_numbers<[1], [0], [0], [1], [0, 0, 1, 1], [], []>} : vector<16x128xbf16>, vector<128x384xbf16>, vector<16x384xf32> -> vector<16x384xf32>
    %33 = vector.broadcast %30 : vector<1x384xf32> to vector<16x384xf32>
    %34 = arith.addf %32, %33 : vector<16x384xf32>
    %35 = vector.extract_strided_slice %34 {offsets = [0, 0], sizes = [16, 128], strides = [1, 1]} : vector<16x384xf32> to vector<16x128xf32>
    %36 = vector.extract_strided_slice %34 {offsets = [0, 128], sizes = [16, 128], strides = [1, 1]} : vector<16x384xf32> to vector<16x128xf32>
    %37 = vector.extract_strided_slice %34 {offsets = [0, 256], sizes = [16, 128], strides = [1, 1]} : vector<16x384xf32> to vector<16x128xf32>
    %38 = tpu.iota {dimensions = array<i32: 1>} : vector<1x128xi32>
    %c0_i32 = arith.constant 0 : i32
    %39 = vector.broadcast %c0_i32 : i32 to vector<1x128xi32>
    %40 = arith.cmpi sge, %38, %39 : vector<1x128xi32>
    %c8_i32 = arith.constant 8 : i32
    %41 = vector.broadcast %c8_i32 : i32 to vector<1x128xi32>
    %42 = arith.cmpi slt, %38, %41 : vector<1x128xi32>
    %43 = arith.andi %40, %42 : vector<1x128xi1>
    %44 = arith.extui %43 : vector<1x128xi1> to vector<1x128xi32>
    %45 = arith.sitofp %44 : vector<1x128xi32> to vector<1x128xf32>
    %c8_i32_31 = arith.constant 8 : i32
    %46 = vector.broadcast %c8_i32_31 : i32 to vector<1x128xi32>
    %47 = arith.cmpi sge, %38, %46 : vector<1x128xi32>
    %c16_i32 = arith.constant 16 : i32
    %48 = vector.broadcast %c16_i32 : i32 to vector<1x128xi32>
    %49 = arith.cmpi slt, %38, %48 : vector<1x128xi32>
    %50 = arith.andi %47, %49 : vector<1x128xi1>
    %51 = arith.extui %50 : vector<1x128xi1> to vector<1x128xi32>
    %52 = arith.sitofp %51 : vector<1x128xi32> to vector<1x128xf32>
    %c16_i32_32 = arith.constant 16 : i32
    %53 = vector.broadcast %c16_i32_32 : i32 to vector<1x128xi32>
    %54 = arith.cmpi sge, %38, %53 : vector<1x128xi32>
    %c24_i32 = arith.constant 24 : i32
    %55 = vector.broadcast %c24_i32 : i32 to vector<1x128xi32>
    %56 = arith.cmpi slt, %38, %55 : vector<1x128xi32>
    %57 = arith.andi %54, %56 : vector<1x128xi1>
    %58 = arith.extui %57 : vector<1x128xi1> to vector<1x128xi32>
    %59 = arith.sitofp %58 : vector<1x128xi32> to vector<1x128xf32>
    %c24_i32_33 = arith.constant 24 : i32
    %60 = vector.broadcast %c24_i32_33 : i32 to vector<1x128xi32>
    %61 = arith.cmpi sge, %38, %60 : vector<1x128xi32>
    %c32_i32 = arith.constant 32 : i32
    %62 = vector.broadcast %c32_i32 : i32 to vector<1x128xi32>
    %63 = arith.cmpi slt, %38, %62 : vector<1x128xi32>
    %64 = arith.andi %61, %63 : vector<1x128xi1>
    %65 = arith.extui %64 : vector<1x128xi1> to vector<1x128xi32>
    %66 = arith.sitofp %65 : vector<1x128xi32> to vector<1x128xf32>
    %67 = vector.broadcast %45 : vector<1x128xf32> to vector<16x128xf32>
    %68 = arith.mulf %35, %67 : vector<16x128xf32>
    %69 = vector.broadcast %52 : vector<1x128xf32> to vector<16x128xf32>
    %70 = arith.mulf %35, %69 : vector<16x128xf32>
    %71 = vector.broadcast %59 : vector<1x128xf32> to vector<16x128xf32>
    %72 = arith.mulf %35, %71 : vector<16x128xf32>
    %73 = vector.broadcast %66 : vector<1x128xf32> to vector<16x128xf32>
    %74 = arith.mulf %35, %73 : vector<16x128xf32>
    %75 = tpu.concatenate %68, %70, %72, %74 in 0 : vector<16x128xf32>, vector<16x128xf32>, vector<16x128xf32>, vector<16x128xf32> -> vector<64x128xf32>
    %cst_34 = arith.constant dense<0.000000e+00> : vector<64x16xf32>
    %76 = tpu.matmul %75, %36, %cst_34 {dimension_numbers = #tpu.dot_dimension_numbers<[1], [1], [0], [0], [0, 0, 1, 0], [], []>} : vector<64x128xf32>, vector<16x128xf32>, vector<64x16xf32> -> vector<64x16xf32>
    %77 = tpu.concatenate %20, %20, %20, %20 in 0 : vector<16x16xf32>, vector<16x16xf32>, vector<16x16xf32>, vector<16x16xf32> -> vector<64x16xf32>
    %78 = arith.addf %76, %77 : vector<64x16xf32>
    %cst_35 = arith.constant dense<0xFF800000> : vector<64xf32>
    %79 = vector.multi_reduction <maximumf>, %78, %cst_35 [1] : vector<64x16xf32> to vector<64xf32>
    %80 = vector.shape_cast %79 : vector<64xf32> to vector<64x1xf32>
    %81 = vector.broadcast %80 : vector<64x1xf32> to vector<64x16xf32>
    %82 = arith.subf %78, %81 : vector<64x16xf32>
    %83 = math.exp %82 : vector<64x16xf32>
    %cst_36 = arith.constant dense<0.000000e+00> : vector<64xf32>
    %84 = vector.multi_reduction <add>, %83, %cst_36 [1] : vector<64x16xf32> to vector<64xf32>
    %85 = vector.shape_cast %84 : vector<64xf32> to vector<64x1xf32>
    %86 = vector.broadcast %85 : vector<64x1xf32> to vector<64x16xf32>
    %87 = arith.divf %83, %86 : vector<64x16xf32>
    %cst_37 = arith.constant dense<0.000000e+00> : vector<64x128xf32>
    %88 = tpu.matmul %87, %37, %cst_37 {dimension_numbers = #tpu.dot_dimension_numbers<[1], [0], [0], [1], [0, 0, 1, 1], [], []>} : vector<64x16xf32>, vector<16x128xf32>, vector<64x128xf32> -> vector<64x128xf32>
    %89 = vector.extract_strided_slice %88 {offsets = [0, 0], sizes = [16, 128], strides = [1, 1]} : vector<64x128xf32> to vector<16x128xf32>
    %90 = vector.broadcast %45 : vector<1x128xf32> to vector<16x128xf32>
    %91 = arith.mulf %89, %90 : vector<16x128xf32>
    %92 = vector.extract_strided_slice %88 {offsets = [16, 0], sizes = [16, 128], strides = [1, 1]} : vector<64x128xf32> to vector<16x128xf32>
    %93 = vector.broadcast %52 : vector<1x128xf32> to vector<16x128xf32>
    %94 = arith.mulf %92, %93 : vector<16x128xf32>
    %95 = arith.addf %91, %94 : vector<16x128xf32>
    %96 = vector.extract_strided_slice %88 {offsets = [32, 0], sizes = [16, 128], strides = [1, 1]} : vector<64x128xf32> to vector<16x128xf32>
    %97 = vector.broadcast %59 : vector<1x128xf32> to vector<16x128xf32>
    %98 = arith.mulf %96, %97 : vector<16x128xf32>
    %99 = arith.addf %95, %98 : vector<16x128xf32>
    %100 = vector.extract_strided_slice %88 {offsets = [48, 0], sizes = [16, 128], strides = [1, 1]} : vector<64x128xf32> to vector<16x128xf32>
    %101 = vector.broadcast %66 : vector<1x128xf32> to vector<16x128xf32>
    %102 = arith.mulf %100, %101 : vector<16x128xf32>
    %103 = arith.addf %99, %102 : vector<16x128xf32>
    %c0_38 = arith.constant 0 : index
    %c0_39 = arith.constant 0 : index
    %c0_40 = arith.constant 0 : index
    %104 = vector.load %arg31[%c0_38, %c0_39, %c0_40] : memref<2x128x128xbf16, #tpu.memory_space<vmem>>, vector<1x128x128xbf16>
    %105 = vector.shape_cast %104 : vector<1x128x128xbf16> to vector<128x128xbf16>
    %c0_41 = arith.constant 0 : index
    %c0_42 = arith.constant 0 : index
    %c0_43 = arith.constant 0 : index
    %106 = vector.load %arg26[%c0_41, %c0_42, %c0_43] : memref<2x1x128xf32, #tpu.memory_space<vmem>>, vector<1x1x128xf32>
    %107 = vector.shape_cast %106 : vector<1x1x128xf32> to vector<1x128xf32>
    %108 = arith.truncf %103 : vector<16x128xf32> to vector<16x128xbf16>
    %cst_44 = arith.constant dense<0.000000e+00> : vector<16x128xf32>
    %109 = tpu.matmul %108, %105, %cst_44 {dimension_numbers = #tpu.dot_dimension_numbers<[1], [0], [0], [1], [0, 0, 1, 1], [], []>} : vector<16x128xbf16>, vector<128x128xbf16>, vector<16x128xf32> -> vector<16x128xf32>
    %110 = vector.broadcast %107 : vector<1x128xf32> to vector<16x128xf32>
    %111 = arith.addf %109, %110 : vector<16x128xf32>
    %112 = arith.addf %111, %18 : vector<16x128xf32>
    %113 = vector.extract_strided_slice %26 {offsets = [0, 0], sizes = [1, 128], strides = [1, 1]} : vector<4x128xf32> to vector<1x128xf32>
    %114 = vector.extract_strided_slice %26 {offsets = [1, 0], sizes = [1, 128], strides = [1, 1]} : vector<4x128xf32> to vector<1x128xf32>
    %cst_45 = arith.constant dense<0.000000e+00> : vector<16xf32>
    %115 = vector.multi_reduction <add>, %112, %cst_45 [1] : vector<16x128xf32> to vector<16xf32>
    %116 = vector.shape_cast %115 : vector<16xf32> to vector<16x1xf32>
    %cst_46 = arith.constant 3.125000e-02 : f32
    %117 = vector.broadcast %cst_46 : f32 to vector<16x1xf32>
    %118 = arith.mulf %116, %117 : vector<16x1xf32>
    %119 = arith.mulf %112, %112 : vector<16x128xf32>
    %cst_47 = arith.constant dense<0.000000e+00> : vector<16xf32>
    %120 = vector.multi_reduction <add>, %119, %cst_47 [1] : vector<16x128xf32> to vector<16xf32>
    %121 = vector.shape_cast %120 : vector<16xf32> to vector<16x1xf32>
    %cst_48 = arith.constant 3.125000e-02 : f32
    %122 = vector.broadcast %cst_48 : f32 to vector<16x1xf32>
    %123 = arith.mulf %121, %122 : vector<16x1xf32>
    %124 = arith.mulf %118, %118 : vector<16x1xf32>
    %125 = arith.subf %123, %124 : vector<16x1xf32>
    %cst_49 = arith.constant 0.000000e+00 : f32
    %126 = vector.broadcast %cst_49 : f32 to vector<16x1xf32>
    %127 = arith.maximumf %125, %126 : vector<16x1xf32>
    %128 = vector.broadcast %118 : vector<16x1xf32> to vector<16x128xf32>
    %129 = arith.subf %112, %128 : vector<16x128xf32>
    %cst_50 = arith.constant 9.99999974E-6 : f32
    %130 = vector.broadcast %cst_50 : f32 to vector<16x1xf32>
    %131 = arith.addf %127, %130 : vector<16x1xf32>
    %132 = math.rsqrt %131 : vector<16x1xf32>
    %133 = vector.broadcast %132 : vector<16x1xf32> to vector<16x128xf32>
    %134 = arith.mulf %129, %133 : vector<16x128xf32>
    %135 = vector.broadcast %113 : vector<1x128xf32> to vector<16x128xf32>
    %136 = arith.mulf %134, %135 : vector<16x128xf32>
    %137 = vector.broadcast %114 : vector<1x128xf32> to vector<16x128xf32>
    %138 = arith.addf %136, %137 : vector<16x128xf32>
    %c0_51 = arith.constant 0 : index
    %c0_52 = arith.constant 0 : index
    %c0_53 = arith.constant 0 : index
    %139 = vector.load %arg29[%c0_51, %c0_52, %c0_53] : memref<2x128x128xbf16, #tpu.memory_space<vmem>>, vector<1x128x128xbf16>
    %140 = vector.shape_cast %139 : vector<1x128x128xbf16> to vector<128x128xbf16>
    %c0_54 = arith.constant 0 : index
    %c0_55 = arith.constant 0 : index
    %c0_56 = arith.constant 0 : index
    %141 = vector.load %arg24[%c0_54, %c0_55, %c0_56] : memref<2x1x128xf32, #tpu.memory_space<vmem>>, vector<1x1x128xf32>
    %142 = vector.shape_cast %141 : vector<1x1x128xf32> to vector<1x128xf32>
    %143 = arith.truncf %138 : vector<16x128xf32> to vector<16x128xbf16>
    %cst_57 = arith.constant dense<0.000000e+00> : vector<16x128xf32>
    %144 = tpu.matmul %143, %140, %cst_57 {dimension_numbers = #tpu.dot_dimension_numbers<[1], [0], [0], [1], [0, 0, 1, 1], [], []>} : vector<16x128xbf16>, vector<128x128xbf16>, vector<16x128xf32> -> vector<16x128xf32>
    %145 = vector.broadcast %142 : vector<1x128xf32> to vector<16x128xf32>
    %146 = arith.addf %144, %145 : vector<16x128xf32>
    %cst_58 = arith.constant 0.000000e+00 : f32
    %147 = vector.broadcast %cst_58 : f32 to vector<16x128xf32>
    %148 = arith.maximumf %146, %147 : vector<16x128xf32>
    %c0_59 = arith.constant 0 : index
    %c0_60 = arith.constant 0 : index
    %c0_61 = arith.constant 0 : index
    %149 = vector.load %arg30[%c0_59, %c0_60, %c0_61] : memref<2x128x128xbf16, #tpu.memory_space<vmem>>, vector<1x128x128xbf16>
    %150 = vector.shape_cast %149 : vector<1x128x128xbf16> to vector<128x128xbf16>
    %c0_62 = arith.constant 0 : index
    %c0_63 = arith.constant 0 : index
    %c0_64 = arith.constant 0 : index
    %151 = vector.load %arg25[%c0_62, %c0_63, %c0_64] : memref<2x1x128xf32, #tpu.memory_space<vmem>>, vector<1x1x128xf32>
    %152 = vector.shape_cast %151 : vector<1x1x128xf32> to vector<1x128xf32>
    %153 = arith.truncf %148 : vector<16x128xf32> to vector<16x128xbf16>
    %cst_65 = arith.constant dense<0.000000e+00> : vector<16x128xf32>
    %154 = tpu.matmul %153, %150, %cst_65 {dimension_numbers = #tpu.dot_dimension_numbers<[1], [0], [0], [1], [0, 0, 1, 1], [], []>} : vector<16x128xbf16>, vector<128x128xbf16>, vector<16x128xf32> -> vector<16x128xf32>
    %155 = vector.broadcast %152 : vector<1x128xf32> to vector<16x128xf32>
    %156 = arith.addf %154, %155 : vector<16x128xf32>
    %157 = arith.addf %156, %138 : vector<16x128xf32>
    %158 = vector.extract_strided_slice %26 {offsets = [2, 0], sizes = [1, 128], strides = [1, 1]} : vector<4x128xf32> to vector<1x128xf32>
    %159 = vector.extract_strided_slice %26 {offsets = [3, 0], sizes = [1, 128], strides = [1, 1]} : vector<4x128xf32> to vector<1x128xf32>
    %cst_66 = arith.constant dense<0.000000e+00> : vector<16xf32>
    %160 = vector.multi_reduction <add>, %157, %cst_66 [1] : vector<16x128xf32> to vector<16xf32>
    %161 = vector.shape_cast %160 : vector<16xf32> to vector<16x1xf32>
    %cst_67 = arith.constant 3.125000e-02 : f32
    %162 = vector.broadcast %cst_67 : f32 to vector<16x1xf32>
    %163 = arith.mulf %161, %162 : vector<16x1xf32>
    %164 = arith.mulf %157, %157 : vector<16x128xf32>
    %cst_68 = arith.constant dense<0.000000e+00> : vector<16xf32>
    %165 = vector.multi_reduction <add>, %164, %cst_68 [1] : vector<16x128xf32> to vector<16xf32>
    %166 = vector.shape_cast %165 : vector<16xf32> to vector<16x1xf32>
    %cst_69 = arith.constant 3.125000e-02 : f32
    %167 = vector.broadcast %cst_69 : f32 to vector<16x1xf32>
    %168 = arith.mulf %166, %167 : vector<16x1xf32>
    %169 = arith.mulf %163, %163 : vector<16x1xf32>
    %170 = arith.subf %168, %169 : vector<16x1xf32>
    %cst_70 = arith.constant 0.000000e+00 : f32
    %171 = vector.broadcast %cst_70 : f32 to vector<16x1xf32>
    %172 = arith.maximumf %170, %171 : vector<16x1xf32>
    %173 = vector.broadcast %163 : vector<16x1xf32> to vector<16x128xf32>
    %174 = arith.subf %157, %173 : vector<16x128xf32>
    %cst_71 = arith.constant 9.99999974E-6 : f32
    %175 = vector.broadcast %cst_71 : f32 to vector<16x1xf32>
    %176 = arith.addf %172, %175 : vector<16x1xf32>
    %177 = math.rsqrt %176 : vector<16x1xf32>
    %178 = vector.broadcast %177 : vector<16x1xf32> to vector<16x128xf32>
    %179 = arith.mulf %174, %178 : vector<16x128xf32>
    %180 = vector.broadcast %158 : vector<1x128xf32> to vector<16x128xf32>
    %181 = arith.mulf %179, %180 : vector<16x128xf32>
    %182 = vector.broadcast %159 : vector<1x128xf32> to vector<16x128xf32>
    %183 = arith.addf %181, %182 : vector<16x128xf32>
    %c1 = arith.constant 1 : index
    %c0_72 = arith.constant 0 : index
    %c0_73 = arith.constant 0 : index
    %184 = vector.load %arg28[%c1, %c0_72, %c0_73] : memref<2x4x128xf32, #tpu.memory_space<vmem>>, vector<1x4x128xf32>
    %185 = vector.shape_cast %184 : vector<1x4x128xf32> to vector<4x128xf32>
    %c1_74 = arith.constant 1 : index
    %c0_75 = arith.constant 0 : index
    %c0_76 = arith.constant 0 : index
    %186 = vector.load %arg32[%c1_74, %c0_75, %c0_76] : memref<2x128x384xbf16, #tpu.memory_space<vmem>>, vector<1x128x384xbf16>
    %187 = vector.shape_cast %186 : vector<1x128x384xbf16> to vector<128x384xbf16>
    %c1_77 = arith.constant 1 : index
    %c0_78 = arith.constant 0 : index
    %c0_79 = arith.constant 0 : index
    %188 = vector.load %arg27[%c1_77, %c0_78, %c0_79] : memref<2x1x384xf32, #tpu.memory_space<vmem>>, vector<1x1x384xf32>
    %189 = vector.shape_cast %188 : vector<1x1x384xf32> to vector<1x384xf32>
    %190 = arith.truncf %183 : vector<16x128xf32> to vector<16x128xbf16>
    %cst_80 = arith.constant dense<0.000000e+00> : vector<16x384xf32>
    %191 = tpu.matmul %190, %187, %cst_80 {dimension_numbers = #tpu.dot_dimension_numbers<[1], [0], [0], [1], [0, 0, 1, 1], [], []>} : vector<16x128xbf16>, vector<128x384xbf16>, vector<16x384xf32> -> vector<16x384xf32>
    %192 = vector.broadcast %189 : vector<1x384xf32> to vector<16x384xf32>
    %193 = arith.addf %191, %192 : vector<16x384xf32>
    %194 = vector.extract_strided_slice %193 {offsets = [0, 0], sizes = [16, 128], strides = [1, 1]} : vector<16x384xf32> to vector<16x128xf32>
    %195 = vector.extract_strided_slice %193 {offsets = [0, 128], sizes = [16, 128], strides = [1, 1]} : vector<16x384xf32> to vector<16x128xf32>
    %196 = vector.extract_strided_slice %193 {offsets = [0, 256], sizes = [16, 128], strides = [1, 1]} : vector<16x384xf32> to vector<16x128xf32>
    %197 = tpu.iota {dimensions = array<i32: 1>} : vector<1x128xi32>
    %c0_i32_81 = arith.constant 0 : i32
    %198 = vector.broadcast %c0_i32_81 : i32 to vector<1x128xi32>
    %199 = arith.cmpi sge, %197, %198 : vector<1x128xi32>
    %c8_i32_82 = arith.constant 8 : i32
    %200 = vector.broadcast %c8_i32_82 : i32 to vector<1x128xi32>
    %201 = arith.cmpi slt, %197, %200 : vector<1x128xi32>
    %202 = arith.andi %199, %201 : vector<1x128xi1>
    %203 = arith.extui %202 : vector<1x128xi1> to vector<1x128xi32>
    %204 = arith.sitofp %203 : vector<1x128xi32> to vector<1x128xf32>
    %c8_i32_83 = arith.constant 8 : i32
    %205 = vector.broadcast %c8_i32_83 : i32 to vector<1x128xi32>
    %206 = arith.cmpi sge, %197, %205 : vector<1x128xi32>
    %c16_i32_84 = arith.constant 16 : i32
    %207 = vector.broadcast %c16_i32_84 : i32 to vector<1x128xi32>
    %208 = arith.cmpi slt, %197, %207 : vector<1x128xi32>
    %209 = arith.andi %206, %208 : vector<1x128xi1>
    %210 = arith.extui %209 : vector<1x128xi1> to vector<1x128xi32>
    %211 = arith.sitofp %210 : vector<1x128xi32> to vector<1x128xf32>
    %c16_i32_85 = arith.constant 16 : i32
    %212 = vector.broadcast %c16_i32_85 : i32 to vector<1x128xi32>
    %213 = arith.cmpi sge, %197, %212 : vector<1x128xi32>
    %c24_i32_86 = arith.constant 24 : i32
    %214 = vector.broadcast %c24_i32_86 : i32 to vector<1x128xi32>
    %215 = arith.cmpi slt, %197, %214 : vector<1x128xi32>
    %216 = arith.andi %213, %215 : vector<1x128xi1>
    %217 = arith.extui %216 : vector<1x128xi1> to vector<1x128xi32>
    %218 = arith.sitofp %217 : vector<1x128xi32> to vector<1x128xf32>
    %c24_i32_87 = arith.constant 24 : i32
    %219 = vector.broadcast %c24_i32_87 : i32 to vector<1x128xi32>
    %220 = arith.cmpi sge, %197, %219 : vector<1x128xi32>
    %c32_i32_88 = arith.constant 32 : i32
    %221 = vector.broadcast %c32_i32_88 : i32 to vector<1x128xi32>
    %222 = arith.cmpi slt, %197, %221 : vector<1x128xi32>
    %223 = arith.andi %220, %222 : vector<1x128xi1>
    %224 = arith.extui %223 : vector<1x128xi1> to vector<1x128xi32>
    %225 = arith.sitofp %224 : vector<1x128xi32> to vector<1x128xf32>
    %226 = vector.broadcast %204 : vector<1x128xf32> to vector<16x128xf32>
    %227 = arith.mulf %194, %226 : vector<16x128xf32>
    %228 = vector.broadcast %211 : vector<1x128xf32> to vector<16x128xf32>
    %229 = arith.mulf %194, %228 : vector<16x128xf32>
    %230 = vector.broadcast %218 : vector<1x128xf32> to vector<16x128xf32>
    %231 = arith.mulf %194, %230 : vector<16x128xf32>
    %232 = vector.broadcast %225 : vector<1x128xf32> to vector<16x128xf32>
    %233 = arith.mulf %194, %232 : vector<16x128xf32>
    %234 = tpu.concatenate %227, %229, %231, %233 in 0 : vector<16x128xf32>, vector<16x128xf32>, vector<16x128xf32>, vector<16x128xf32> -> vector<64x128xf32>
    %cst_89 = arith.constant dense<0.000000e+00> : vector<64x16xf32>
    %235 = tpu.matmul %234, %195, %cst_89 {dimension_numbers = #tpu.dot_dimension_numbers<[1], [1], [0], [0], [0, 0, 1, 0], [], []>} : vector<64x128xf32>, vector<16x128xf32>, vector<64x16xf32> -> vector<64x16xf32>
    %236 = tpu.concatenate %20, %20, %20, %20 in 0 : vector<16x16xf32>, vector<16x16xf32>, vector<16x16xf32>, vector<16x16xf32> -> vector<64x16xf32>
    %237 = arith.addf %235, %236 : vector<64x16xf32>
    %cst_90 = arith.constant dense<0xFF800000> : vector<64xf32>
    %238 = vector.multi_reduction <maximumf>, %237, %cst_90 [1] : vector<64x16xf32> to vector<64xf32>
    %239 = vector.shape_cast %238 : vector<64xf32> to vector<64x1xf32>
    %240 = vector.broadcast %239 : vector<64x1xf32> to vector<64x16xf32>
    %241 = arith.subf %237, %240 : vector<64x16xf32>
    %242 = math.exp %241 : vector<64x16xf32>
    %cst_91 = arith.constant dense<0.000000e+00> : vector<64xf32>
    %243 = vector.multi_reduction <add>, %242, %cst_91 [1] : vector<64x16xf32> to vector<64xf32>
    %244 = vector.shape_cast %243 : vector<64xf32> to vector<64x1xf32>
    %245 = vector.broadcast %244 : vector<64x1xf32> to vector<64x16xf32>
    %246 = arith.divf %242, %245 : vector<64x16xf32>
    %cst_92 = arith.constant dense<0.000000e+00> : vector<64x128xf32>
    %247 = tpu.matmul %246, %196, %cst_92 {dimension_numbers = #tpu.dot_dimension_numbers<[1], [0], [0], [1], [0, 0, 1, 1], [], []>} : vector<64x16xf32>, vector<16x128xf32>, vector<64x128xf32> -> vector<64x128xf32>
    %248 = vector.extract_strided_slice %247 {offsets = [0, 0], sizes = [16, 128], strides = [1, 1]} : vector<64x128xf32> to vector<16x128xf32>
    %249 = vector.broadcast %204 : vector<1x128xf32> to vector<16x128xf32>
    %250 = arith.mulf %248, %249 : vector<16x128xf32>
    %251 = vector.extract_strided_slice %247 {offsets = [16, 0], sizes = [16, 128], strides = [1, 1]} : vector<64x128xf32> to vector<16x128xf32>
    %252 = vector.broadcast %211 : vector<1x128xf32> to vector<16x128xf32>
    %253 = arith.mulf %251, %252 : vector<16x128xf32>
    %254 = arith.addf %250, %253 : vector<16x128xf32>
    %255 = vector.extract_strided_slice %247 {offsets = [32, 0], sizes = [16, 128], strides = [1, 1]} : vector<64x128xf32> to vector<16x128xf32>
    %256 = vector.broadcast %218 : vector<1x128xf32> to vector<16x128xf32>
    %257 = arith.mulf %255, %256 : vector<16x128xf32>
    %258 = arith.addf %254, %257 : vector<16x128xf32>
    %259 = vector.extract_strided_slice %247 {offsets = [48, 0], sizes = [16, 128], strides = [1, 1]} : vector<64x128xf32> to vector<16x128xf32>
    %260 = vector.broadcast %225 : vector<1x128xf32> to vector<16x128xf32>
    %261 = arith.mulf %259, %260 : vector<16x128xf32>
    %262 = arith.addf %258, %261 : vector<16x128xf32>
    %c1_93 = arith.constant 1 : index
    %c0_94 = arith.constant 0 : index
    %c0_95 = arith.constant 0 : index
    %263 = vector.load %arg31[%c1_93, %c0_94, %c0_95] : memref<2x128x128xbf16, #tpu.memory_space<vmem>>, vector<1x128x128xbf16>
    %264 = vector.shape_cast %263 : vector<1x128x128xbf16> to vector<128x128xbf16>
    %c1_96 = arith.constant 1 : index
    %c0_97 = arith.constant 0 : index
    %c0_98 = arith.constant 0 : index
    %265 = vector.load %arg26[%c1_96, %c0_97, %c0_98] : memref<2x1x128xf32, #tpu.memory_space<vmem>>, vector<1x1x128xf32>
    %266 = vector.shape_cast %265 : vector<1x1x128xf32> to vector<1x128xf32>
    %267 = arith.truncf %262 : vector<16x128xf32> to vector<16x128xbf16>
    %cst_99 = arith.constant dense<0.000000e+00> : vector<16x128xf32>
    %268 = tpu.matmul %267, %264, %cst_99 {dimension_numbers = #tpu.dot_dimension_numbers<[1], [0], [0], [1], [0, 0, 1, 1], [], []>} : vector<16x128xbf16>, vector<128x128xbf16>, vector<16x128xf32> -> vector<16x128xf32>
    %269 = vector.broadcast %266 : vector<1x128xf32> to vector<16x128xf32>
    %270 = arith.addf %268, %269 : vector<16x128xf32>
    %271 = arith.addf %270, %183 : vector<16x128xf32>
    %272 = vector.extract_strided_slice %185 {offsets = [0, 0], sizes = [1, 128], strides = [1, 1]} : vector<4x128xf32> to vector<1x128xf32>
    %273 = vector.extract_strided_slice %185 {offsets = [1, 0], sizes = [1, 128], strides = [1, 1]} : vector<4x128xf32> to vector<1x128xf32>
    %cst_100 = arith.constant dense<0.000000e+00> : vector<16xf32>
    %274 = vector.multi_reduction <add>, %271, %cst_100 [1] : vector<16x128xf32> to vector<16xf32>
    %275 = vector.shape_cast %274 : vector<16xf32> to vector<16x1xf32>
    %cst_101 = arith.constant 3.125000e-02 : f32
    %276 = vector.broadcast %cst_101 : f32 to vector<16x1xf32>
    %277 = arith.mulf %275, %276 : vector<16x1xf32>
    %278 = arith.mulf %271, %271 : vector<16x128xf32>
    %cst_102 = arith.constant dense<0.000000e+00> : vector<16xf32>
    %279 = vector.multi_reduction <add>, %278, %cst_102 [1] : vector<16x128xf32> to vector<16xf32>
    %280 = vector.shape_cast %279 : vector<16xf32> to vector<16x1xf32>
    %cst_103 = arith.constant 3.125000e-02 : f32
    %281 = vector.broadcast %cst_103 : f32 to vector<16x1xf32>
    %282 = arith.mulf %280, %281 : vector<16x1xf32>
    %283 = arith.mulf %277, %277 : vector<16x1xf32>
    %284 = arith.subf %282, %283 : vector<16x1xf32>
    %cst_104 = arith.constant 0.000000e+00 : f32
    %285 = vector.broadcast %cst_104 : f32 to vector<16x1xf32>
    %286 = arith.maximumf %284, %285 : vector<16x1xf32>
    %287 = vector.broadcast %277 : vector<16x1xf32> to vector<16x128xf32>
    %288 = arith.subf %271, %287 : vector<16x128xf32>
    %cst_105 = arith.constant 9.99999974E-6 : f32
    %289 = vector.broadcast %cst_105 : f32 to vector<16x1xf32>
    %290 = arith.addf %286, %289 : vector<16x1xf32>
    %291 = math.rsqrt %290 : vector<16x1xf32>
    %292 = vector.broadcast %291 : vector<16x1xf32> to vector<16x128xf32>
    %293 = arith.mulf %288, %292 : vector<16x128xf32>
    %294 = vector.broadcast %272 : vector<1x128xf32> to vector<16x128xf32>
    %295 = arith.mulf %293, %294 : vector<16x128xf32>
    %296 = vector.broadcast %273 : vector<1x128xf32> to vector<16x128xf32>
    %297 = arith.addf %295, %296 : vector<16x128xf32>
    %c1_106 = arith.constant 1 : index
    %c0_107 = arith.constant 0 : index
    %c0_108 = arith.constant 0 : index
    %298 = vector.load %arg29[%c1_106, %c0_107, %c0_108] : memref<2x128x128xbf16, #tpu.memory_space<vmem>>, vector<1x128x128xbf16>
    %299 = vector.shape_cast %298 : vector<1x128x128xbf16> to vector<128x128xbf16>
    %c1_109 = arith.constant 1 : index
    %c0_110 = arith.constant 0 : index
    %c0_111 = arith.constant 0 : index
    %300 = vector.load %arg24[%c1_109, %c0_110, %c0_111] : memref<2x1x128xf32, #tpu.memory_space<vmem>>, vector<1x1x128xf32>
    %301 = vector.shape_cast %300 : vector<1x1x128xf32> to vector<1x128xf32>
    %302 = arith.truncf %297 : vector<16x128xf32> to vector<16x128xbf16>
    %cst_112 = arith.constant dense<0.000000e+00> : vector<16x128xf32>
    %303 = tpu.matmul %302, %299, %cst_112 {dimension_numbers = #tpu.dot_dimension_numbers<[1], [0], [0], [1], [0, 0, 1, 1], [], []>} : vector<16x128xbf16>, vector<128x128xbf16>, vector<16x128xf32> -> vector<16x128xf32>
    %304 = vector.broadcast %301 : vector<1x128xf32> to vector<16x128xf32>
    %305 = arith.addf %303, %304 : vector<16x128xf32>
    %cst_113 = arith.constant 0.000000e+00 : f32
    %306 = vector.broadcast %cst_113 : f32 to vector<16x128xf32>
    %307 = arith.maximumf %305, %306 : vector<16x128xf32>
    %c1_114 = arith.constant 1 : index
    %c0_115 = arith.constant 0 : index
    %c0_116 = arith.constant 0 : index
    %308 = vector.load %arg30[%c1_114, %c0_115, %c0_116] : memref<2x128x128xbf16, #tpu.memory_space<vmem>>, vector<1x128x128xbf16>
    %309 = vector.shape_cast %308 : vector<1x128x128xbf16> to vector<128x128xbf16>
    %c1_117 = arith.constant 1 : index
    %c0_118 = arith.constant 0 : index
    %c0_119 = arith.constant 0 : index
    %310 = vector.load %arg25[%c1_117, %c0_118, %c0_119] : memref<2x1x128xf32, #tpu.memory_space<vmem>>, vector<1x1x128xf32>
    %311 = vector.shape_cast %310 : vector<1x1x128xf32> to vector<1x128xf32>
    %312 = arith.truncf %307 : vector<16x128xf32> to vector<16x128xbf16>
    %cst_120 = arith.constant dense<0.000000e+00> : vector<16x128xf32>
    %313 = tpu.matmul %312, %309, %cst_120 {dimension_numbers = #tpu.dot_dimension_numbers<[1], [0], [0], [1], [0, 0, 1, 1], [], []>} : vector<16x128xbf16>, vector<128x128xbf16>, vector<16x128xf32> -> vector<16x128xf32>
    %314 = vector.broadcast %311 : vector<1x128xf32> to vector<16x128xf32>
    %315 = arith.addf %313, %314 : vector<16x128xf32>
    %316 = arith.addf %315, %297 : vector<16x128xf32>
    %317 = vector.extract_strided_slice %185 {offsets = [2, 0], sizes = [1, 128], strides = [1, 1]} : vector<4x128xf32> to vector<1x128xf32>
    %318 = vector.extract_strided_slice %185 {offsets = [3, 0], sizes = [1, 128], strides = [1, 1]} : vector<4x128xf32> to vector<1x128xf32>
    %cst_121 = arith.constant dense<0.000000e+00> : vector<16xf32>
    %319 = vector.multi_reduction <add>, %316, %cst_121 [1] : vector<16x128xf32> to vector<16xf32>
    %320 = vector.shape_cast %319 : vector<16xf32> to vector<16x1xf32>
    %cst_122 = arith.constant 3.125000e-02 : f32
    %321 = vector.broadcast %cst_122 : f32 to vector<16x1xf32>
    %322 = arith.mulf %320, %321 : vector<16x1xf32>
    %323 = arith.mulf %316, %316 : vector<16x128xf32>
    %cst_123 = arith.constant dense<0.000000e+00> : vector<16xf32>
    %324 = vector.multi_reduction <add>, %323, %cst_123 [1] : vector<16x128xf32> to vector<16xf32>
    %325 = vector.shape_cast %324 : vector<16xf32> to vector<16x1xf32>
    %cst_124 = arith.constant 3.125000e-02 : f32
    %326 = vector.broadcast %cst_124 : f32 to vector<16x1xf32>
    %327 = arith.mulf %325, %326 : vector<16x1xf32>
    %328 = arith.mulf %322, %322 : vector<16x1xf32>
    %329 = arith.subf %327, %328 : vector<16x1xf32>
    %cst_125 = arith.constant 0.000000e+00 : f32
    %330 = vector.broadcast %cst_125 : f32 to vector<16x1xf32>
    %331 = arith.maximumf %329, %330 : vector<16x1xf32>
    %332 = vector.broadcast %322 : vector<16x1xf32> to vector<16x128xf32>
    %333 = arith.subf %316, %332 : vector<16x128xf32>
    %cst_126 = arith.constant 9.99999974E-6 : f32
    %334 = vector.broadcast %cst_126 : f32 to vector<16x1xf32>
    %335 = arith.addf %331, %334 : vector<16x1xf32>
    %336 = math.rsqrt %335 : vector<16x1xf32>
    %337 = vector.broadcast %336 : vector<16x1xf32> to vector<16x128xf32>
    %338 = arith.mulf %333, %337 : vector<16x128xf32>
    %339 = vector.broadcast %317 : vector<1x128xf32> to vector<16x128xf32>
    %340 = arith.mulf %338, %339 : vector<16x128xf32>
    %341 = vector.broadcast %318 : vector<1x128xf32> to vector<16x128xf32>
    %342 = arith.addf %340, %341 : vector<16x128xf32>
    %c0_127 = arith.constant 0 : index
    %c0_128 = arith.constant 0 : index
    %343 = vector.load %arg33[%c0_127, %c0_128] : memref<2x128xf32, #tpu.memory_space<vmem>>, vector<2x128xf32>
    %344 = vector.extract_strided_slice %343 {offsets = [0, 0], sizes = [1, 128], strides = [1, 1]} : vector<2x128xf32> to vector<1x128xf32>
    %345 = vector.extract_strided_slice %343 {offsets = [1, 0], sizes = [1, 128], strides = [1, 1]} : vector<2x128xf32> to vector<1x128xf32>
    %cst_129 = arith.constant dense<0.000000e+00> : vector<16xf32>
    %346 = vector.multi_reduction <add>, %342, %cst_129 [1] : vector<16x128xf32> to vector<16xf32>
    %347 = vector.shape_cast %346 : vector<16xf32> to vector<16x1xf32>
    %cst_130 = arith.constant 3.125000e-02 : f32
    %348 = vector.broadcast %cst_130 : f32 to vector<16x1xf32>
    %349 = arith.mulf %347, %348 : vector<16x1xf32>
    %350 = arith.mulf %342, %342 : vector<16x128xf32>
    %cst_131 = arith.constant dense<0.000000e+00> : vector<16xf32>
    %351 = vector.multi_reduction <add>, %350, %cst_131 [1] : vector<16x128xf32> to vector<16xf32>
    %352 = vector.shape_cast %351 : vector<16xf32> to vector<16x1xf32>
    %cst_132 = arith.constant 3.125000e-02 : f32
    %353 = vector.broadcast %cst_132 : f32 to vector<16x1xf32>
    %354 = arith.mulf %352, %353 : vector<16x1xf32>
    %355 = arith.mulf %349, %349 : vector<16x1xf32>
    %356 = arith.subf %354, %355 : vector<16x1xf32>
    %cst_133 = arith.constant 0.000000e+00 : f32
    %357 = vector.broadcast %cst_133 : f32 to vector<16x1xf32>
    %358 = arith.maximumf %356, %357 : vector<16x1xf32>
    %359 = vector.broadcast %349 : vector<16x1xf32> to vector<16x128xf32>
    %360 = arith.subf %342, %359 : vector<16x128xf32>
    %cst_134 = arith.constant 9.99999974E-6 : f32
    %361 = vector.broadcast %cst_134 : f32 to vector<16x1xf32>
    %362 = arith.addf %358, %361 : vector<16x1xf32>
    %363 = math.rsqrt %362 : vector<16x1xf32>
    %364 = vector.broadcast %363 : vector<16x1xf32> to vector<16x128xf32>
    %365 = arith.mulf %360, %364 : vector<16x128xf32>
    %366 = vector.broadcast %344 : vector<1x128xf32> to vector<16x128xf32>
    %367 = arith.mulf %365, %366 : vector<16x128xf32>
    %368 = vector.broadcast %345 : vector<1x128xf32> to vector<16x128xf32>
    %369 = arith.addf %367, %368 : vector<16x128xf32>
    %c0_135 = arith.constant 0 : index
    %c0_136 = arith.constant 0 : index
    %c0_137 = arith.constant 0 : index
    %370 = vector.load %arg6[%c0_135, %c0_136, %c0_137] : memref<1x8x128xf32, #tpu.memory_space<vmem>>, vector<1x8x128xf32>
    %371 = vector.shape_cast %370 : vector<1x8x128xf32> to vector<8x128xf32>
    %c0_138 = arith.constant 0 : index
    %c0_139 = arith.constant 0 : index
    %c0_140 = arith.constant 0 : index
    %372 = vector.load %arg14[%c0_138, %c0_139, %c0_140] : memref<2x6x128xf32, #tpu.memory_space<vmem>>, vector<1x6x128xf32>
    %373 = vector.shape_cast %372 : vector<1x6x128xf32> to vector<6x128xf32>
    %c0_141 = arith.constant 0 : index
    %c0_142 = arith.constant 0 : index
    %c0_143 = arith.constant 0 : index
    %374 = vector.load %arg21[%c0_141, %c0_142, %c0_143] : memref<2x128x384xbf16, #tpu.memory_space<vmem>>, vector<1x128x384xbf16>
    %375 = vector.shape_cast %374 : vector<1x128x384xbf16> to vector<128x384xbf16>
    %c0_144 = arith.constant 0 : index
    %c0_145 = arith.constant 0 : index
    %c0_146 = arith.constant 0 : index
    %376 = vector.load %arg13[%c0_144, %c0_145, %c0_146] : memref<2x1x384xf32, #tpu.memory_space<vmem>>, vector<1x1x384xf32>
    %377 = vector.shape_cast %376 : vector<1x1x384xf32> to vector<1x384xf32>
    %378 = arith.truncf %371 : vector<8x128xf32> to vector<8x128xbf16>
    %cst_147 = arith.constant dense<0.000000e+00> : vector<8x384xf32>
    %379 = tpu.matmul %378, %375, %cst_147 {dimension_numbers = #tpu.dot_dimension_numbers<[1], [0], [0], [1], [0, 0, 1, 1], [], []>} : vector<8x128xbf16>, vector<128x384xbf16>, vector<8x384xf32> -> vector<8x384xf32>
    %380 = vector.broadcast %377 : vector<1x384xf32> to vector<8x384xf32>
    %381 = arith.addf %379, %380 : vector<8x384xf32>
    %382 = vector.extract_strided_slice %381 {offsets = [0, 0], sizes = [8, 128], strides = [1, 1]} : vector<8x384xf32> to vector<8x128xf32>
    %383 = vector.extract_strided_slice %381 {offsets = [0, 128], sizes = [8, 128], strides = [1, 1]} : vector<8x384xf32> to vector<8x128xf32>
    %384 = vector.extract_strided_slice %381 {offsets = [0, 256], sizes = [8, 128], strides = [1, 1]} : vector<8x384xf32> to vector<8x128xf32>
    %385 = tpu.iota {dimensions = array<i32: 1>} : vector<1x128xi32>
    %c0_i32_148 = arith.constant 0 : i32
    %386 = vector.broadcast %c0_i32_148 : i32 to vector<1x128xi32>
    %387 = arith.cmpi sge, %385, %386 : vector<1x128xi32>
    %c8_i32_149 = arith.constant 8 : i32
    %388 = vector.broadcast %c8_i32_149 : i32 to vector<1x128xi32>
    %389 = arith.cmpi slt, %385, %388 : vector<1x128xi32>
    %390 = arith.andi %387, %389 : vector<1x128xi1>
    %391 = arith.extui %390 : vector<1x128xi1> to vector<1x128xi32>
    %392 = arith.sitofp %391 : vector<1x128xi32> to vector<1x128xf32>
    %c8_i32_150 = arith.constant 8 : i32
    %393 = vector.broadcast %c8_i32_150 : i32 to vector<1x128xi32>
    %394 = arith.cmpi sge, %385, %393 : vector<1x128xi32>
    %c16_i32_151 = arith.constant 16 : i32
    %395 = vector.broadcast %c16_i32_151 : i32 to vector<1x128xi32>
    %396 = arith.cmpi slt, %385, %395 : vector<1x128xi32>
    %397 = arith.andi %394, %396 : vector<1x128xi1>
    %398 = arith.extui %397 : vector<1x128xi1> to vector<1x128xi32>
    %399 = arith.sitofp %398 : vector<1x128xi32> to vector<1x128xf32>
    %c16_i32_152 = arith.constant 16 : i32
    %400 = vector.broadcast %c16_i32_152 : i32 to vector<1x128xi32>
    %401 = arith.cmpi sge, %385, %400 : vector<1x128xi32>
    %c24_i32_153 = arith.constant 24 : i32
    %402 = vector.broadcast %c24_i32_153 : i32 to vector<1x128xi32>
    %403 = arith.cmpi slt, %385, %402 : vector<1x128xi32>
    %404 = arith.andi %401, %403 : vector<1x128xi1>
    %405 = arith.extui %404 : vector<1x128xi1> to vector<1x128xi32>
    %406 = arith.sitofp %405 : vector<1x128xi32> to vector<1x128xf32>
    %c24_i32_154 = arith.constant 24 : i32
    %407 = vector.broadcast %c24_i32_154 : i32 to vector<1x128xi32>
    %408 = arith.cmpi sge, %385, %407 : vector<1x128xi32>
    %c32_i32_155 = arith.constant 32 : i32
    %409 = vector.broadcast %c32_i32_155 : i32 to vector<1x128xi32>
    %410 = arith.cmpi slt, %385, %409 : vector<1x128xi32>
    %411 = arith.andi %408, %410 : vector<1x128xi1>
    %412 = arith.extui %411 : vector<1x128xi1> to vector<1x128xi32>
    %413 = arith.sitofp %412 : vector<1x128xi32> to vector<1x128xf32>
    %414 = vector.broadcast %392 : vector<1x128xf32> to vector<8x128xf32>
    %415 = arith.mulf %382, %414 : vector<8x128xf32>
    %416 = vector.broadcast %399 : vector<1x128xf32> to vector<8x128xf32>
    %417 = arith.mulf %382, %416 : vector<8x128xf32>
    %418 = vector.broadcast %406 : vector<1x128xf32> to vector<8x128xf32>
    %419 = arith.mulf %382, %418 : vector<8x128xf32>
    %420 = vector.broadcast %413 : vector<1x128xf32> to vector<8x128xf32>
    %421 = arith.mulf %382, %420 : vector<8x128xf32>
    %422 = tpu.concatenate %415, %417, %419, %421 in 0 : vector<8x128xf32>, vector<8x128xf32>, vector<8x128xf32>, vector<8x128xf32> -> vector<32x128xf32>
    %cst_156 = arith.constant dense<0.000000e+00> : vector<32x8xf32>
    %423 = tpu.matmul %422, %383, %cst_156 {dimension_numbers = #tpu.dot_dimension_numbers<[1], [1], [0], [0], [0, 0, 1, 0], [], []>} : vector<32x128xf32>, vector<8x128xf32>, vector<32x8xf32> -> vector<32x8xf32>
    %424 = tpu.concatenate %22, %22, %22, %22 in 0 : vector<8x8xf32>, vector<8x8xf32>, vector<8x8xf32>, vector<8x8xf32> -> vector<32x8xf32>
    %425 = arith.addf %423, %424 : vector<32x8xf32>
    %cst_157 = arith.constant dense<0xFF800000> : vector<32xf32>
    %426 = vector.multi_reduction <maximumf>, %425, %cst_157 [1] : vector<32x8xf32> to vector<32xf32>
    %427 = vector.shape_cast %426 : vector<32xf32> to vector<32x1xf32>
    %428 = vector.broadcast %427 : vector<32x1xf32> to vector<32x8xf32>
    %429 = arith.subf %425, %428 : vector<32x8xf32>
    %430 = math.exp %429 : vector<32x8xf32>
    %cst_158 = arith.constant dense<0.000000e+00> : vector<32xf32>
    %431 = vector.multi_reduction <add>, %430, %cst_158 [1] : vector<32x8xf32> to vector<32xf32>
    %432 = vector.shape_cast %431 : vector<32xf32> to vector<32x1xf32>
    %433 = vector.broadcast %432 : vector<32x1xf32> to vector<32x8xf32>
    %434 = arith.divf %430, %433 : vector<32x8xf32>
    %cst_159 = arith.constant dense<0.000000e+00> : vector<32x128xf32>
    %435 = tpu.matmul %434, %384, %cst_159 {dimension_numbers = #tpu.dot_dimension_numbers<[1], [0], [0], [1], [0, 0, 1, 1], [], []>} : vector<32x8xf32>, vector<8x128xf32>, vector<32x128xf32> -> vector<32x128xf32>
    %436 = vector.extract_strided_slice %435 {offsets = [0, 0], sizes = [8, 128], strides = [1, 1]} : vector<32x128xf32> to vector<8x128xf32>
    %437 = vector.broadcast %392 : vector<1x128xf32> to vector<8x128xf32>
    %438 = arith.mulf %436, %437 : vector<8x128xf32>
    %439 = vector.extract_strided_slice %435 {offsets = [8, 0], sizes = [8, 128], strides = [1, 1]} : vector<32x128xf32> to vector<8x128xf32>
    %440 = vector.broadcast %399 : vector<1x128xf32> to vector<8x128xf32>
    %441 = arith.mulf %439, %440 : vector<8x128xf32>
    %442 = arith.addf %438, %441 : vector<8x128xf32>
    %443 = vector.extract_strided_slice %435 {offsets = [16, 0], sizes = [8, 128], strides = [1, 1]} : vector<32x128xf32> to vector<8x128xf32>
    %444 = vector.broadcast %406 : vector<1x128xf32> to vector<8x128xf32>
    %445 = arith.mulf %443, %444 : vector<8x128xf32>
    %446 = arith.addf %442, %445 : vector<8x128xf32>
    %447 = vector.extract_strided_slice %435 {offsets = [24, 0], sizes = [8, 128], strides = [1, 1]} : vector<32x128xf32> to vector<8x128xf32>
    %448 = vector.broadcast %413 : vector<1x128xf32> to vector<8x128xf32>
    %449 = arith.mulf %447, %448 : vector<8x128xf32>
    %450 = arith.addf %446, %449 : vector<8x128xf32>
    %c0_160 = arith.constant 0 : index
    %c0_161 = arith.constant 0 : index
    %c0_162 = arith.constant 0 : index
    %451 = vector.load %arg18[%c0_160, %c0_161, %c0_162] : memref<2x128x128xbf16, #tpu.memory_space<vmem>>, vector<1x128x128xbf16>
    %452 = vector.shape_cast %451 : vector<1x128x128xbf16> to vector<128x128xbf16>
    %c0_163 = arith.constant 0 : index
    %c0_164 = arith.constant 0 : index
    %c0_165 = arith.constant 0 : index
    %453 = vector.load %arg10[%c0_163, %c0_164, %c0_165] : memref<2x1x128xf32, #tpu.memory_space<vmem>>, vector<1x1x128xf32>
    %454 = vector.shape_cast %453 : vector<1x1x128xf32> to vector<1x128xf32>
    %455 = arith.truncf %450 : vector<8x128xf32> to vector<8x128xbf16>
    %cst_166 = arith.constant dense<0.000000e+00> : vector<8x128xf32>
    %456 = tpu.matmul %455, %452, %cst_166 {dimension_numbers = #tpu.dot_dimension_numbers<[1], [0], [0], [1], [0, 0, 1, 1], [], []>} : vector<8x128xbf16>, vector<128x128xbf16>, vector<8x128xf32> -> vector<8x128xf32>
    %457 = vector.broadcast %454 : vector<1x128xf32> to vector<8x128xf32>
    %458 = arith.addf %456, %457 : vector<8x128xf32>
    %459 = arith.addf %458, %371 : vector<8x128xf32>
    %460 = vector.extract_strided_slice %373 {offsets = [0, 0], sizes = [1, 128], strides = [1, 1]} : vector<6x128xf32> to vector<1x128xf32>
    %461 = vector.extract_strided_slice %373 {offsets = [1, 0], sizes = [1, 128], strides = [1, 1]} : vector<6x128xf32> to vector<1x128xf32>
    %cst_167 = arith.constant dense<0.000000e+00> : vector<8xf32>
    %462 = vector.multi_reduction <add>, %459, %cst_167 [1] : vector<8x128xf32> to vector<8xf32>
    %463 = vector.shape_cast %462 : vector<8xf32> to vector<8x1xf32>
    %cst_168 = arith.constant 3.125000e-02 : f32
    %464 = vector.broadcast %cst_168 : f32 to vector<8x1xf32>
    %465 = arith.mulf %463, %464 : vector<8x1xf32>
    %466 = arith.mulf %459, %459 : vector<8x128xf32>
    %cst_169 = arith.constant dense<0.000000e+00> : vector<8xf32>
    %467 = vector.multi_reduction <add>, %466, %cst_169 [1] : vector<8x128xf32> to vector<8xf32>
    %468 = vector.shape_cast %467 : vector<8xf32> to vector<8x1xf32>
    %cst_170 = arith.constant 3.125000e-02 : f32
    %469 = vector.broadcast %cst_170 : f32 to vector<8x1xf32>
    %470 = arith.mulf %468, %469 : vector<8x1xf32>
    %471 = arith.mulf %465, %465 : vector<8x1xf32>
    %472 = arith.subf %470, %471 : vector<8x1xf32>
    %cst_171 = arith.constant 0.000000e+00 : f32
    %473 = vector.broadcast %cst_171 : f32 to vector<8x1xf32>
    %474 = arith.maximumf %472, %473 : vector<8x1xf32>
    %475 = vector.broadcast %465 : vector<8x1xf32> to vector<8x128xf32>
    %476 = arith.subf %459, %475 : vector<8x128xf32>
    %cst_172 = arith.constant 9.99999974E-6 : f32
    %477 = vector.broadcast %cst_172 : f32 to vector<8x1xf32>
    %478 = arith.addf %474, %477 : vector<8x1xf32>
    %479 = math.rsqrt %478 : vector<8x1xf32>
    %480 = vector.broadcast %479 : vector<8x1xf32> to vector<8x128xf32>
    %481 = arith.mulf %476, %480 : vector<8x128xf32>
    %482 = vector.broadcast %460 : vector<1x128xf32> to vector<8x128xf32>
    %483 = arith.mulf %481, %482 : vector<8x128xf32>
    %484 = vector.broadcast %461 : vector<1x128xf32> to vector<8x128xf32>
    %485 = arith.addf %483, %484 : vector<8x128xf32>
    %c0_173 = arith.constant 0 : index
    %c0_174 = arith.constant 0 : index
    %c0_175 = arith.constant 0 : index
    %486 = vector.load %arg20[%c0_173, %c0_174, %c0_175] : memref<2x128x128xbf16, #tpu.memory_space<vmem>>, vector<1x128x128xbf16>
    %487 = vector.shape_cast %486 : vector<1x128x128xbf16> to vector<128x128xbf16>
    %c0_176 = arith.constant 0 : index
    %c0_177 = arith.constant 0 : index
    %c0_178 = arith.constant 0 : index
    %488 = vector.load %arg12[%c0_176, %c0_177, %c0_178] : memref<2x1x128xf32, #tpu.memory_space<vmem>>, vector<1x1x128xf32>
    %489 = vector.shape_cast %488 : vector<1x1x128xf32> to vector<1x128xf32>
    %490 = arith.truncf %485 : vector<8x128xf32> to vector<8x128xbf16>
    %cst_179 = arith.constant dense<0.000000e+00> : vector<8x128xf32>
    %491 = tpu.matmul %490, %487, %cst_179 {dimension_numbers = #tpu.dot_dimension_numbers<[1], [0], [0], [1], [0, 0, 1, 1], [], []>} : vector<8x128xbf16>, vector<128x128xbf16>, vector<8x128xf32> -> vector<8x128xf32>
    %492 = vector.broadcast %489 : vector<1x128xf32> to vector<8x128xf32>
    %493 = arith.addf %491, %492 : vector<8x128xf32>
    %c0_180 = arith.constant 0 : index
    %c0_181 = arith.constant 0 : index
    %c0_182 = arith.constant 0 : index
    %494 = vector.load %arg17[%c0_180, %c0_181, %c0_182] : memref<2x128x256xbf16, #tpu.memory_space<vmem>>, vector<1x128x256xbf16>
    %495 = vector.shape_cast %494 : vector<1x128x256xbf16> to vector<128x256xbf16>
    %c0_183 = arith.constant 0 : index
    %c0_184 = arith.constant 0 : index
    %c0_185 = arith.constant 0 : index
    %496 = vector.load %arg9[%c0_183, %c0_184, %c0_185] : memref<2x1x256xf32, #tpu.memory_space<vmem>>, vector<1x1x256xf32>
    %497 = vector.shape_cast %496 : vector<1x1x256xf32> to vector<1x256xf32>
    %498 = arith.truncf %369 : vector<16x128xf32> to vector<16x128xbf16>
    %cst_186 = arith.constant dense<0.000000e+00> : vector<16x256xf32>
    %499 = tpu.matmul %498, %495, %cst_186 {dimension_numbers = #tpu.dot_dimension_numbers<[1], [0], [0], [1], [0, 0, 1, 1], [], []>} : vector<16x128xbf16>, vector<128x256xbf16>, vector<16x256xf32> -> vector<16x256xf32>
    %500 = vector.broadcast %497 : vector<1x256xf32> to vector<16x256xf32>
    %501 = arith.addf %499, %500 : vector<16x256xf32>
    %502 = vector.extract_strided_slice %501 {offsets = [0, 0], sizes = [16, 128], strides = [1, 1]} : vector<16x256xf32> to vector<16x128xf32>
    %503 = vector.extract_strided_slice %501 {offsets = [0, 128], sizes = [16, 128], strides = [1, 1]} : vector<16x256xf32> to vector<16x128xf32>
    %504 = tpu.iota {dimensions = array<i32: 1>} : vector<1x128xi32>
    %c0_i32_187 = arith.constant 0 : i32
    %505 = vector.broadcast %c0_i32_187 : i32 to vector<1x128xi32>
    %506 = arith.cmpi sge, %504, %505 : vector<1x128xi32>
    %c8_i32_188 = arith.constant 8 : i32
    %507 = vector.broadcast %c8_i32_188 : i32 to vector<1x128xi32>
    %508 = arith.cmpi slt, %504, %507 : vector<1x128xi32>
    %509 = arith.andi %506, %508 : vector<1x128xi1>
    %510 = arith.extui %509 : vector<1x128xi1> to vector<1x128xi32>
    %511 = arith.sitofp %510 : vector<1x128xi32> to vector<1x128xf32>
    %c8_i32_189 = arith.constant 8 : i32
    %512 = vector.broadcast %c8_i32_189 : i32 to vector<1x128xi32>
    %513 = arith.cmpi sge, %504, %512 : vector<1x128xi32>
    %c16_i32_190 = arith.constant 16 : i32
    %514 = vector.broadcast %c16_i32_190 : i32 to vector<1x128xi32>
    %515 = arith.cmpi slt, %504, %514 : vector<1x128xi32>
    %516 = arith.andi %513, %515 : vector<1x128xi1>
    %517 = arith.extui %516 : vector<1x128xi1> to vector<1x128xi32>
    %518 = arith.sitofp %517 : vector<1x128xi32> to vector<1x128xf32>
    %c16_i32_191 = arith.constant 16 : i32
    %519 = vector.broadcast %c16_i32_191 : i32 to vector<1x128xi32>
    %520 = arith.cmpi sge, %504, %519 : vector<1x128xi32>
    %c24_i32_192 = arith.constant 24 : i32
    %521 = vector.broadcast %c24_i32_192 : i32 to vector<1x128xi32>
    %522 = arith.cmpi slt, %504, %521 : vector<1x128xi32>
    %523 = arith.andi %520, %522 : vector<1x128xi1>
    %524 = arith.extui %523 : vector<1x128xi1> to vector<1x128xi32>
    %525 = arith.sitofp %524 : vector<1x128xi32> to vector<1x128xf32>
    %c24_i32_193 = arith.constant 24 : i32
    %526 = vector.broadcast %c24_i32_193 : i32 to vector<1x128xi32>
    %527 = arith.cmpi sge, %504, %526 : vector<1x128xi32>
    %c32_i32_194 = arith.constant 32 : i32
    %528 = vector.broadcast %c32_i32_194 : i32 to vector<1x128xi32>
    %529 = arith.cmpi slt, %504, %528 : vector<1x128xi32>
    %530 = arith.andi %527, %529 : vector<1x128xi1>
    %531 = arith.extui %530 : vector<1x128xi1> to vector<1x128xi32>
    %532 = arith.sitofp %531 : vector<1x128xi32> to vector<1x128xf32>
    %533 = vector.broadcast %511 : vector<1x128xf32> to vector<8x128xf32>
    %534 = arith.mulf %493, %533 : vector<8x128xf32>
    %535 = vector.broadcast %518 : vector<1x128xf32> to vector<8x128xf32>
    %536 = arith.mulf %493, %535 : vector<8x128xf32>
    %537 = vector.broadcast %525 : vector<1x128xf32> to vector<8x128xf32>
    %538 = arith.mulf %493, %537 : vector<8x128xf32>
    %539 = vector.broadcast %532 : vector<1x128xf32> to vector<8x128xf32>
    %540 = arith.mulf %493, %539 : vector<8x128xf32>
    %541 = tpu.concatenate %534, %536, %538, %540 in 0 : vector<8x128xf32>, vector<8x128xf32>, vector<8x128xf32>, vector<8x128xf32> -> vector<32x128xf32>
    %cst_195 = arith.constant dense<0.000000e+00> : vector<32x16xf32>
    %542 = tpu.matmul %541, %502, %cst_195 {dimension_numbers = #tpu.dot_dimension_numbers<[1], [1], [0], [0], [0, 0, 1, 0], [], []>} : vector<32x128xf32>, vector<16x128xf32>, vector<32x16xf32> -> vector<32x16xf32>
    %543 = tpu.concatenate %24, %24, %24, %24 in 0 : vector<8x16xf32>, vector<8x16xf32>, vector<8x16xf32>, vector<8x16xf32> -> vector<32x16xf32>
    %544 = arith.addf %542, %543 : vector<32x16xf32>
    %cst_196 = arith.constant dense<0xFF800000> : vector<32xf32>
    %545 = vector.multi_reduction <maximumf>, %544, %cst_196 [1] : vector<32x16xf32> to vector<32xf32>
    %546 = vector.shape_cast %545 : vector<32xf32> to vector<32x1xf32>
    %547 = vector.broadcast %546 : vector<32x1xf32> to vector<32x16xf32>
    %548 = arith.subf %544, %547 : vector<32x16xf32>
    %549 = math.exp %548 : vector<32x16xf32>
    %cst_197 = arith.constant dense<0.000000e+00> : vector<32xf32>
    %550 = vector.multi_reduction <add>, %549, %cst_197 [1] : vector<32x16xf32> to vector<32xf32>
    %551 = vector.shape_cast %550 : vector<32xf32> to vector<32x1xf32>
    %552 = vector.broadcast %551 : vector<32x1xf32> to vector<32x16xf32>
    %553 = arith.divf %549, %552 : vector<32x16xf32>
    %cst_198 = arith.constant dense<0.000000e+00> : vector<32x128xf32>
    %554 = tpu.matmul %553, %503, %cst_198 {dimension_numbers = #tpu.dot_dimension_numbers<[1], [0], [0], [1], [0, 0, 1, 1], [], []>} : vector<32x16xf32>, vector<16x128xf32>, vector<32x128xf32> -> vector<32x128xf32>
    %555 = vector.extract_strided_slice %554 {offsets = [0, 0], sizes = [8, 128], strides = [1, 1]} : vector<32x128xf32> to vector<8x128xf32>
    %556 = vector.broadcast %511 : vector<1x128xf32> to vector<8x128xf32>
    %557 = arith.mulf %555, %556 : vector<8x128xf32>
    %558 = vector.extract_strided_slice %554 {offsets = [8, 0], sizes = [8, 128], strides = [1, 1]} : vector<32x128xf32> to vector<8x128xf32>
    %559 = vector.broadcast %518 : vector<1x128xf32> to vector<8x128xf32>
    %560 = arith.mulf %558, %559 : vector<8x128xf32>
    %561 = arith.addf %557, %560 : vector<8x128xf32>
    %562 = vector.extract_strided_slice %554 {offsets = [16, 0], sizes = [8, 128], strides = [1, 1]} : vector<32x128xf32> to vector<8x128xf32>
    %563 = vector.broadcast %525 : vector<1x128xf32> to vector<8x128xf32>
    %564 = arith.mulf %562, %563 : vector<8x128xf32>
    %565 = arith.addf %561, %564 : vector<8x128xf32>
    %566 = vector.extract_strided_slice %554 {offsets = [24, 0], sizes = [8, 128], strides = [1, 1]} : vector<32x128xf32> to vector<8x128xf32>
    %567 = vector.broadcast %532 : vector<1x128xf32> to vector<8x128xf32>
    %568 = arith.mulf %566, %567 : vector<8x128xf32>
    %569 = arith.addf %565, %568 : vector<8x128xf32>
    %c0_199 = arith.constant 0 : index
    %c0_200 = arith.constant 0 : index
    %c0_201 = arith.constant 0 : index
    %570 = vector.load %arg19[%c0_199, %c0_200, %c0_201] : memref<2x128x128xbf16, #tpu.memory_space<vmem>>, vector<1x128x128xbf16>
    %571 = vector.shape_cast %570 : vector<1x128x128xbf16> to vector<128x128xbf16>
    %c0_202 = arith.constant 0 : index
    %c0_203 = arith.constant 0 : index
    %c0_204 = arith.constant 0 : index
    %572 = vector.load %arg11[%c0_202, %c0_203, %c0_204] : memref<2x1x128xf32, #tpu.memory_space<vmem>>, vector<1x1x128xf32>
    %573 = vector.shape_cast %572 : vector<1x1x128xf32> to vector<1x128xf32>
    %574 = arith.truncf %569 : vector<8x128xf32> to vector<8x128xbf16>
    %cst_205 = arith.constant dense<0.000000e+00> : vector<8x128xf32>
    %575 = tpu.matmul %574, %571, %cst_205 {dimension_numbers = #tpu.dot_dimension_numbers<[1], [0], [0], [1], [0, 0, 1, 1], [], []>} : vector<8x128xbf16>, vector<128x128xbf16>, vector<8x128xf32> -> vector<8x128xf32>
    %576 = vector.broadcast %573 : vector<1x128xf32> to vector<8x128xf32>
    %577 = arith.addf %575, %576 : vector<8x128xf32>
    %578 = arith.addf %577, %485 : vector<8x128xf32>
    %579 = vector.extract_strided_slice %373 {offsets = [2, 0], sizes = [1, 128], strides = [1, 1]} : vector<6x128xf32> to vector<1x128xf32>
    %580 = vector.extract_strided_slice %373 {offsets = [3, 0], sizes = [1, 128], strides = [1, 1]} : vector<6x128xf32> to vector<1x128xf32>
    %cst_206 = arith.constant dense<0.000000e+00> : vector<8xf32>
    %581 = vector.multi_reduction <add>, %578, %cst_206 [1] : vector<8x128xf32> to vector<8xf32>
    %582 = vector.shape_cast %581 : vector<8xf32> to vector<8x1xf32>
    %cst_207 = arith.constant 3.125000e-02 : f32
    %583 = vector.broadcast %cst_207 : f32 to vector<8x1xf32>
    %584 = arith.mulf %582, %583 : vector<8x1xf32>
    %585 = arith.mulf %578, %578 : vector<8x128xf32>
    %cst_208 = arith.constant dense<0.000000e+00> : vector<8xf32>
    %586 = vector.multi_reduction <add>, %585, %cst_208 [1] : vector<8x128xf32> to vector<8xf32>
    %587 = vector.shape_cast %586 : vector<8xf32> to vector<8x1xf32>
    %cst_209 = arith.constant 3.125000e-02 : f32
    %588 = vector.broadcast %cst_209 : f32 to vector<8x1xf32>
    %589 = arith.mulf %587, %588 : vector<8x1xf32>
    %590 = arith.mulf %584, %584 : vector<8x1xf32>
    %591 = arith.subf %589, %590 : vector<8x1xf32>
    %cst_210 = arith.constant 0.000000e+00 : f32
    %592 = vector.broadcast %cst_210 : f32 to vector<8x1xf32>
    %593 = arith.maximumf %591, %592 : vector<8x1xf32>
    %594 = vector.broadcast %584 : vector<8x1xf32> to vector<8x128xf32>
    %595 = arith.subf %578, %594 : vector<8x128xf32>
    %cst_211 = arith.constant 9.99999974E-6 : f32
    %596 = vector.broadcast %cst_211 : f32 to vector<8x1xf32>
    %597 = arith.addf %593, %596 : vector<8x1xf32>
    %598 = math.rsqrt %597 : vector<8x1xf32>
    %599 = vector.broadcast %598 : vector<8x1xf32> to vector<8x128xf32>
    %600 = arith.mulf %595, %599 : vector<8x128xf32>
    %601 = vector.broadcast %579 : vector<1x128xf32> to vector<8x128xf32>
    %602 = arith.mulf %600, %601 : vector<8x128xf32>
    %603 = vector.broadcast %580 : vector<1x128xf32> to vector<8x128xf32>
    %604 = arith.addf %602, %603 : vector<8x128xf32>
    %c0_212 = arith.constant 0 : index
    %c0_213 = arith.constant 0 : index
    %c0_214 = arith.constant 0 : index
    %605 = vector.load %arg15[%c0_212, %c0_213, %c0_214] : memref<2x128x128xbf16, #tpu.memory_space<vmem>>, vector<1x128x128xbf16>
    %606 = vector.shape_cast %605 : vector<1x128x128xbf16> to vector<128x128xbf16>
    %c0_215 = arith.constant 0 : index
    %c0_216 = arith.constant 0 : index
    %c0_217 = arith.constant 0 : index
    %607 = vector.load %arg7[%c0_215, %c0_216, %c0_217] : memref<2x1x128xf32, #tpu.memory_space<vmem>>, vector<1x1x128xf32>
    %608 = vector.shape_cast %607 : vector<1x1x128xf32> to vector<1x128xf32>
    %609 = arith.truncf %604 : vector<8x128xf32> to vector<8x128xbf16>
    %cst_218 = arith.constant dense<0.000000e+00> : vector<8x128xf32>
    %610 = tpu.matmul %609, %606, %cst_218 {dimension_numbers = #tpu.dot_dimension_numbers<[1], [0], [0], [1], [0, 0, 1, 1], [], []>} : vector<8x128xbf16>, vector<128x128xbf16>, vector<8x128xf32> -> vector<8x128xf32>
    %611 = vector.broadcast %608 : vector<1x128xf32> to vector<8x128xf32>
    %612 = arith.addf %610, %611 : vector<8x128xf32>
    %cst_219 = arith.constant 0.000000e+00 : f32
    %613 = vector.broadcast %cst_219 : f32 to vector<8x128xf32>
    %614 = arith.maximumf %612, %613 : vector<8x128xf32>
    %c0_220 = arith.constant 0 : index
    %c0_221 = arith.constant 0 : index
    %c0_222 = arith.constant 0 : index
    %615 = vector.load %arg16[%c0_220, %c0_221, %c0_222] : memref<2x128x128xbf16, #tpu.memory_space<vmem>>, vector<1x128x128xbf16>
    %616 = vector.shape_cast %615 : vector<1x128x128xbf16> to vector<128x128xbf16>
    %c0_223 = arith.constant 0 : index
    %c0_224 = arith.constant 0 : index
    %c0_225 = arith.constant 0 : index
    %617 = vector.load %arg8[%c0_223, %c0_224, %c0_225] : memref<2x1x128xf32, #tpu.memory_space<vmem>>, vector<1x1x128xf32>
    %618 = vector.shape_cast %617 : vector<1x1x128xf32> to vector<1x128xf32>
    %619 = arith.truncf %614 : vector<8x128xf32> to vector<8x128xbf16>
    %cst_226 = arith.constant dense<0.000000e+00> : vector<8x128xf32>
    %620 = tpu.matmul %619, %616, %cst_226 {dimension_numbers = #tpu.dot_dimension_numbers<[1], [0], [0], [1], [0, 0, 1, 1], [], []>} : vector<8x128xbf16>, vector<128x128xbf16>, vector<8x128xf32> -> vector<8x128xf32>
    %621 = vector.broadcast %618 : vector<1x128xf32> to vector<8x128xf32>
    %622 = arith.addf %620, %621 : vector<8x128xf32>
    %623 = arith.addf %622, %604 : vector<8x128xf32>
    %624 = vector.extract_strided_slice %373 {offsets = [4, 0], sizes = [1, 128], strides = [1, 1]} : vector<6x128xf32> to vector<1x128xf32>
    %625 = vector.extract_strided_slice %373 {offsets = [5, 0], sizes = [1, 128], strides = [1, 1]} : vector<6x128xf32> to vector<1x128xf32>
    %cst_227 = arith.constant dense<0.000000e+00> : vector<8xf32>
    %626 = vector.multi_reduction <add>, %623, %cst_227 [1] : vector<8x128xf32> to vector<8xf32>
    %627 = vector.shape_cast %626 : vector<8xf32> to vector<8x1xf32>
    %cst_228 = arith.constant 3.125000e-02 : f32
    %628 = vector.broadcast %cst_228 : f32 to vector<8x1xf32>
    %629 = arith.mulf %627, %628 : vector<8x1xf32>
    %630 = arith.mulf %623, %623 : vector<8x128xf32>
    %cst_229 = arith.constant dense<0.000000e+00> : vector<8xf32>
    %631 = vector.multi_reduction <add>, %630, %cst_229 [1] : vector<8x128xf32> to vector<8xf32>
    %632 = vector.shape_cast %631 : vector<8xf32> to vector<8x1xf32>
    %cst_230 = arith.constant 3.125000e-02 : f32
    %633 = vector.broadcast %cst_230 : f32 to vector<8x1xf32>
    %634 = arith.mulf %632, %633 : vector<8x1xf32>
    %635 = arith.mulf %629, %629 : vector<8x1xf32>
    %636 = arith.subf %634, %635 : vector<8x1xf32>
    %cst_231 = arith.constant 0.000000e+00 : f32
    %637 = vector.broadcast %cst_231 : f32 to vector<8x1xf32>
    %638 = arith.maximumf %636, %637 : vector<8x1xf32>
    %639 = vector.broadcast %629 : vector<8x1xf32> to vector<8x128xf32>
    %640 = arith.subf %623, %639 : vector<8x128xf32>
    %cst_232 = arith.constant 9.99999974E-6 : f32
    %641 = vector.broadcast %cst_232 : f32 to vector<8x1xf32>
    %642 = arith.addf %638, %641 : vector<8x1xf32>
    %643 = math.rsqrt %642 : vector<8x1xf32>
    %644 = vector.broadcast %643 : vector<8x1xf32> to vector<8x128xf32>
    %645 = arith.mulf %640, %644 : vector<8x128xf32>
    %646 = vector.broadcast %624 : vector<1x128xf32> to vector<8x128xf32>
    %647 = arith.mulf %645, %646 : vector<8x128xf32>
    %648 = vector.broadcast %625 : vector<1x128xf32> to vector<8x128xf32>
    %649 = arith.addf %647, %648 : vector<8x128xf32>
    %c1_233 = arith.constant 1 : index
    %c0_234 = arith.constant 0 : index
    %c0_235 = arith.constant 0 : index
    %650 = vector.load %arg14[%c1_233, %c0_234, %c0_235] : memref<2x6x128xf32, #tpu.memory_space<vmem>>, vector<1x6x128xf32>
    %651 = vector.shape_cast %650 : vector<1x6x128xf32> to vector<6x128xf32>
    %c1_236 = arith.constant 1 : index
    %c0_237 = arith.constant 0 : index
    %c0_238 = arith.constant 0 : index
    %652 = vector.load %arg21[%c1_236, %c0_237, %c0_238] : memref<2x128x384xbf16, #tpu.memory_space<vmem>>, vector<1x128x384xbf16>
    %653 = vector.shape_cast %652 : vector<1x128x384xbf16> to vector<128x384xbf16>
    %c1_239 = arith.constant 1 : index
    %c0_240 = arith.constant 0 : index
    %c0_241 = arith.constant 0 : index
    %654 = vector.load %arg13[%c1_239, %c0_240, %c0_241] : memref<2x1x384xf32, #tpu.memory_space<vmem>>, vector<1x1x384xf32>
    %655 = vector.shape_cast %654 : vector<1x1x384xf32> to vector<1x384xf32>
    %656 = arith.truncf %649 : vector<8x128xf32> to vector<8x128xbf16>
    %cst_242 = arith.constant dense<0.000000e+00> : vector<8x384xf32>
    %657 = tpu.matmul %656, %653, %cst_242 {dimension_numbers = #tpu.dot_dimension_numbers<[1], [0], [0], [1], [0, 0, 1, 1], [], []>} : vector<8x128xbf16>, vector<128x384xbf16>, vector<8x384xf32> -> vector<8x384xf32>
    %658 = vector.broadcast %655 : vector<1x384xf32> to vector<8x384xf32>
    %659 = arith.addf %657, %658 : vector<8x384xf32>
    %660 = vector.extract_strided_slice %659 {offsets = [0, 0], sizes = [8, 128], strides = [1, 1]} : vector<8x384xf32> to vector<8x128xf32>
    %661 = vector.extract_strided_slice %659 {offsets = [0, 128], sizes = [8, 128], strides = [1, 1]} : vector<8x384xf32> to vector<8x128xf32>
    %662 = vector.extract_strided_slice %659 {offsets = [0, 256], sizes = [8, 128], strides = [1, 1]} : vector<8x384xf32> to vector<8x128xf32>
    %663 = tpu.iota {dimensions = array<i32: 1>} : vector<1x128xi32>
    %c0_i32_243 = arith.constant 0 : i32
    %664 = vector.broadcast %c0_i32_243 : i32 to vector<1x128xi32>
    %665 = arith.cmpi sge, %663, %664 : vector<1x128xi32>
    %c8_i32_244 = arith.constant 8 : i32
    %666 = vector.broadcast %c8_i32_244 : i32 to vector<1x128xi32>
    %667 = arith.cmpi slt, %663, %666 : vector<1x128xi32>
    %668 = arith.andi %665, %667 : vector<1x128xi1>
    %669 = arith.extui %668 : vector<1x128xi1> to vector<1x128xi32>
    %670 = arith.sitofp %669 : vector<1x128xi32> to vector<1x128xf32>
    %c8_i32_245 = arith.constant 8 : i32
    %671 = vector.broadcast %c8_i32_245 : i32 to vector<1x128xi32>
    %672 = arith.cmpi sge, %663, %671 : vector<1x128xi32>
    %c16_i32_246 = arith.constant 16 : i32
    %673 = vector.broadcast %c16_i32_246 : i32 to vector<1x128xi32>
    %674 = arith.cmpi slt, %663, %673 : vector<1x128xi32>
    %675 = arith.andi %672, %674 : vector<1x128xi1>
    %676 = arith.extui %675 : vector<1x128xi1> to vector<1x128xi32>
    %677 = arith.sitofp %676 : vector<1x128xi32> to vector<1x128xf32>
    %c16_i32_247 = arith.constant 16 : i32
    %678 = vector.broadcast %c16_i32_247 : i32 to vector<1x128xi32>
    %679 = arith.cmpi sge, %663, %678 : vector<1x128xi32>
    %c24_i32_248 = arith.constant 24 : i32
    %680 = vector.broadcast %c24_i32_248 : i32 to vector<1x128xi32>
    %681 = arith.cmpi slt, %663, %680 : vector<1x128xi32>
    %682 = arith.andi %679, %681 : vector<1x128xi1>
    %683 = arith.extui %682 : vector<1x128xi1> to vector<1x128xi32>
    %684 = arith.sitofp %683 : vector<1x128xi32> to vector<1x128xf32>
    %c24_i32_249 = arith.constant 24 : i32
    %685 = vector.broadcast %c24_i32_249 : i32 to vector<1x128xi32>
    %686 = arith.cmpi sge, %663, %685 : vector<1x128xi32>
    %c32_i32_250 = arith.constant 32 : i32
    %687 = vector.broadcast %c32_i32_250 : i32 to vector<1x128xi32>
    %688 = arith.cmpi slt, %663, %687 : vector<1x128xi32>
    %689 = arith.andi %686, %688 : vector<1x128xi1>
    %690 = arith.extui %689 : vector<1x128xi1> to vector<1x128xi32>
    %691 = arith.sitofp %690 : vector<1x128xi32> to vector<1x128xf32>
    %692 = vector.broadcast %670 : vector<1x128xf32> to vector<8x128xf32>
    %693 = arith.mulf %660, %692 : vector<8x128xf32>
    %694 = vector.broadcast %677 : vector<1x128xf32> to vector<8x128xf32>
    %695 = arith.mulf %660, %694 : vector<8x128xf32>
    %696 = vector.broadcast %684 : vector<1x128xf32> to vector<8x128xf32>
    %697 = arith.mulf %660, %696 : vector<8x128xf32>
    %698 = vector.broadcast %691 : vector<1x128xf32> to vector<8x128xf32>
    %699 = arith.mulf %660, %698 : vector<8x128xf32>
    %700 = tpu.concatenate %693, %695, %697, %699 in 0 : vector<8x128xf32>, vector<8x128xf32>, vector<8x128xf32>, vector<8x128xf32> -> vector<32x128xf32>
    %cst_251 = arith.constant dense<0.000000e+00> : vector<32x8xf32>
    %701 = tpu.matmul %700, %661, %cst_251 {dimension_numbers = #tpu.dot_dimension_numbers<[1], [1], [0], [0], [0, 0, 1, 0], [], []>} : vector<32x128xf32>, vector<8x128xf32>, vector<32x8xf32> -> vector<32x8xf32>
    %702 = tpu.concatenate %22, %22, %22, %22 in 0 : vector<8x8xf32>, vector<8x8xf32>, vector<8x8xf32>, vector<8x8xf32> -> vector<32x8xf32>
    %703 = arith.addf %701, %702 : vector<32x8xf32>
    %cst_252 = arith.constant dense<0xFF800000> : vector<32xf32>
    %704 = vector.multi_reduction <maximumf>, %703, %cst_252 [1] : vector<32x8xf32> to vector<32xf32>
    %705 = vector.shape_cast %704 : vector<32xf32> to vector<32x1xf32>
    %706 = vector.broadcast %705 : vector<32x1xf32> to vector<32x8xf32>
    %707 = arith.subf %703, %706 : vector<32x8xf32>
    %708 = math.exp %707 : vector<32x8xf32>
    %cst_253 = arith.constant dense<0.000000e+00> : vector<32xf32>
    %709 = vector.multi_reduction <add>, %708, %cst_253 [1] : vector<32x8xf32> to vector<32xf32>
    %710 = vector.shape_cast %709 : vector<32xf32> to vector<32x1xf32>
    %711 = vector.broadcast %710 : vector<32x1xf32> to vector<32x8xf32>
    %712 = arith.divf %708, %711 : vector<32x8xf32>
    %cst_254 = arith.constant dense<0.000000e+00> : vector<32x128xf32>
    %713 = tpu.matmul %712, %662, %cst_254 {dimension_numbers = #tpu.dot_dimension_numbers<[1], [0], [0], [1], [0, 0, 1, 1], [], []>} : vector<32x8xf32>, vector<8x128xf32>, vector<32x128xf32> -> vector<32x128xf32>
    %714 = vector.extract_strided_slice %713 {offsets = [0, 0], sizes = [8, 128], strides = [1, 1]} : vector<32x128xf32> to vector<8x128xf32>
    %715 = vector.broadcast %670 : vector<1x128xf32> to vector<8x128xf32>
    %716 = arith.mulf %714, %715 : vector<8x128xf32>
    %717 = vector.extract_strided_slice %713 {offsets = [8, 0], sizes = [8, 128], strides = [1, 1]} : vector<32x128xf32> to vector<8x128xf32>
    %718 = vector.broadcast %677 : vector<1x128xf32> to vector<8x128xf32>
    %719 = arith.mulf %717, %718 : vector<8x128xf32>
    %720 = arith.addf %716, %719 : vector<8x128xf32>
    %721 = vector.extract_strided_slice %713 {offsets = [16, 0], sizes = [8, 128], strides = [1, 1]} : vector<32x128xf32> to vector<8x128xf32>
    %722 = vector.broadcast %684 : vector<1x128xf32> to vector<8x128xf32>
    %723 = arith.mulf %721, %722 : vector<8x128xf32>
    %724 = arith.addf %720, %723 : vector<8x128xf32>
    %725 = vector.extract_strided_slice %713 {offsets = [24, 0], sizes = [8, 128], strides = [1, 1]} : vector<32x128xf32> to vector<8x128xf32>
    %726 = vector.broadcast %691 : vector<1x128xf32> to vector<8x128xf32>
    %727 = arith.mulf %725, %726 : vector<8x128xf32>
    %728 = arith.addf %724, %727 : vector<8x128xf32>
    %c1_255 = arith.constant 1 : index
    %c0_256 = arith.constant 0 : index
    %c0_257 = arith.constant 0 : index
    %729 = vector.load %arg18[%c1_255, %c0_256, %c0_257] : memref<2x128x128xbf16, #tpu.memory_space<vmem>>, vector<1x128x128xbf16>
    %730 = vector.shape_cast %729 : vector<1x128x128xbf16> to vector<128x128xbf16>
    %c1_258 = arith.constant 1 : index
    %c0_259 = arith.constant 0 : index
    %c0_260 = arith.constant 0 : index
    %731 = vector.load %arg10[%c1_258, %c0_259, %c0_260] : memref<2x1x128xf32, #tpu.memory_space<vmem>>, vector<1x1x128xf32>
    %732 = vector.shape_cast %731 : vector<1x1x128xf32> to vector<1x128xf32>
    %733 = arith.truncf %728 : vector<8x128xf32> to vector<8x128xbf16>
    %cst_261 = arith.constant dense<0.000000e+00> : vector<8x128xf32>
    %734 = tpu.matmul %733, %730, %cst_261 {dimension_numbers = #tpu.dot_dimension_numbers<[1], [0], [0], [1], [0, 0, 1, 1], [], []>} : vector<8x128xbf16>, vector<128x128xbf16>, vector<8x128xf32> -> vector<8x128xf32>
    %735 = vector.broadcast %732 : vector<1x128xf32> to vector<8x128xf32>
    %736 = arith.addf %734, %735 : vector<8x128xf32>
    %737 = arith.addf %736, %649 : vector<8x128xf32>
    %738 = vector.extract_strided_slice %651 {offsets = [0, 0], sizes = [1, 128], strides = [1, 1]} : vector<6x128xf32> to vector<1x128xf32>
    %739 = vector.extract_strided_slice %651 {offsets = [1, 0], sizes = [1, 128], strides = [1, 1]} : vector<6x128xf32> to vector<1x128xf32>
    %cst_262 = arith.constant dense<0.000000e+00> : vector<8xf32>
    %740 = vector.multi_reduction <add>, %737, %cst_262 [1] : vector<8x128xf32> to vector<8xf32>
    %741 = vector.shape_cast %740 : vector<8xf32> to vector<8x1xf32>
    %cst_263 = arith.constant 3.125000e-02 : f32
    %742 = vector.broadcast %cst_263 : f32 to vector<8x1xf32>
    %743 = arith.mulf %741, %742 : vector<8x1xf32>
    %744 = arith.mulf %737, %737 : vector<8x128xf32>
    %cst_264 = arith.constant dense<0.000000e+00> : vector<8xf32>
    %745 = vector.multi_reduction <add>, %744, %cst_264 [1] : vector<8x128xf32> to vector<8xf32>
    %746 = vector.shape_cast %745 : vector<8xf32> to vector<8x1xf32>
    %cst_265 = arith.constant 3.125000e-02 : f32
    %747 = vector.broadcast %cst_265 : f32 to vector<8x1xf32>
    %748 = arith.mulf %746, %747 : vector<8x1xf32>
    %749 = arith.mulf %743, %743 : vector<8x1xf32>
    %750 = arith.subf %748, %749 : vector<8x1xf32>
    %cst_266 = arith.constant 0.000000e+00 : f32
    %751 = vector.broadcast %cst_266 : f32 to vector<8x1xf32>
    %752 = arith.maximumf %750, %751 : vector<8x1xf32>
    %753 = vector.broadcast %743 : vector<8x1xf32> to vector<8x128xf32>
    %754 = arith.subf %737, %753 : vector<8x128xf32>
    %cst_267 = arith.constant 9.99999974E-6 : f32
    %755 = vector.broadcast %cst_267 : f32 to vector<8x1xf32>
    %756 = arith.addf %752, %755 : vector<8x1xf32>
    %757 = math.rsqrt %756 : vector<8x1xf32>
    %758 = vector.broadcast %757 : vector<8x1xf32> to vector<8x128xf32>
    %759 = arith.mulf %754, %758 : vector<8x128xf32>
    %760 = vector.broadcast %738 : vector<1x128xf32> to vector<8x128xf32>
    %761 = arith.mulf %759, %760 : vector<8x128xf32>
    %762 = vector.broadcast %739 : vector<1x128xf32> to vector<8x128xf32>
    %763 = arith.addf %761, %762 : vector<8x128xf32>
    %c1_268 = arith.constant 1 : index
    %c0_269 = arith.constant 0 : index
    %c0_270 = arith.constant 0 : index
    %764 = vector.load %arg20[%c1_268, %c0_269, %c0_270] : memref<2x128x128xbf16, #tpu.memory_space<vmem>>, vector<1x128x128xbf16>
    %765 = vector.shape_cast %764 : vector<1x128x128xbf16> to vector<128x128xbf16>
    %c1_271 = arith.constant 1 : index
    %c0_272 = arith.constant 0 : index
    %c0_273 = arith.constant 0 : index
    %766 = vector.load %arg12[%c1_271, %c0_272, %c0_273] : memref<2x1x128xf32, #tpu.memory_space<vmem>>, vector<1x1x128xf32>
    %767 = vector.shape_cast %766 : vector<1x1x128xf32> to vector<1x128xf32>
    %768 = arith.truncf %763 : vector<8x128xf32> to vector<8x128xbf16>
    %cst_274 = arith.constant dense<0.000000e+00> : vector<8x128xf32>
    %769 = tpu.matmul %768, %765, %cst_274 {dimension_numbers = #tpu.dot_dimension_numbers<[1], [0], [0], [1], [0, 0, 1, 1], [], []>} : vector<8x128xbf16>, vector<128x128xbf16>, vector<8x128xf32> -> vector<8x128xf32>
    %770 = vector.broadcast %767 : vector<1x128xf32> to vector<8x128xf32>
    %771 = arith.addf %769, %770 : vector<8x128xf32>
    %c1_275 = arith.constant 1 : index
    %c0_276 = arith.constant 0 : index
    %c0_277 = arith.constant 0 : index
    %772 = vector.load %arg17[%c1_275, %c0_276, %c0_277] : memref<2x128x256xbf16, #tpu.memory_space<vmem>>, vector<1x128x256xbf16>
    %773 = vector.shape_cast %772 : vector<1x128x256xbf16> to vector<128x256xbf16>
    %c1_278 = arith.constant 1 : index
    %c0_279 = arith.constant 0 : index
    %c0_280 = arith.constant 0 : index
    %774 = vector.load %arg9[%c1_278, %c0_279, %c0_280] : memref<2x1x256xf32, #tpu.memory_space<vmem>>, vector<1x1x256xf32>
    %775 = vector.shape_cast %774 : vector<1x1x256xf32> to vector<1x256xf32>
    %776 = arith.truncf %369 : vector<16x128xf32> to vector<16x128xbf16>
    %cst_281 = arith.constant dense<0.000000e+00> : vector<16x256xf32>
    %777 = tpu.matmul %776, %773, %cst_281 {dimension_numbers = #tpu.dot_dimension_numbers<[1], [0], [0], [1], [0, 0, 1, 1], [], []>} : vector<16x128xbf16>, vector<128x256xbf16>, vector<16x256xf32> -> vector<16x256xf32>
    %778 = vector.broadcast %775 : vector<1x256xf32> to vector<16x256xf32>
    %779 = arith.addf %777, %778 : vector<16x256xf32>
    %780 = vector.extract_strided_slice %779 {offsets = [0, 0], sizes = [16, 128], strides = [1, 1]} : vector<16x256xf32> to vector<16x128xf32>
    %781 = vector.extract_strided_slice %779 {offsets = [0, 128], sizes = [16, 128], strides = [1, 1]} : vector<16x256xf32> to vector<16x128xf32>
    %782 = tpu.iota {dimensions = array<i32: 1>} : vector<1x128xi32>
    %c0_i32_282 = arith.constant 0 : i32
    %783 = vector.broadcast %c0_i32_282 : i32 to vector<1x128xi32>
    %784 = arith.cmpi sge, %782, %783 : vector<1x128xi32>
    %c8_i32_283 = arith.constant 8 : i32
    %785 = vector.broadcast %c8_i32_283 : i32 to vector<1x128xi32>
    %786 = arith.cmpi slt, %782, %785 : vector<1x128xi32>
    %787 = arith.andi %784, %786 : vector<1x128xi1>
    %788 = arith.extui %787 : vector<1x128xi1> to vector<1x128xi32>
    %789 = arith.sitofp %788 : vector<1x128xi32> to vector<1x128xf32>
    %c8_i32_284 = arith.constant 8 : i32
    %790 = vector.broadcast %c8_i32_284 : i32 to vector<1x128xi32>
    %791 = arith.cmpi sge, %782, %790 : vector<1x128xi32>
    %c16_i32_285 = arith.constant 16 : i32
    %792 = vector.broadcast %c16_i32_285 : i32 to vector<1x128xi32>
    %793 = arith.cmpi slt, %782, %792 : vector<1x128xi32>
    %794 = arith.andi %791, %793 : vector<1x128xi1>
    %795 = arith.extui %794 : vector<1x128xi1> to vector<1x128xi32>
    %796 = arith.sitofp %795 : vector<1x128xi32> to vector<1x128xf32>
    %c16_i32_286 = arith.constant 16 : i32
    %797 = vector.broadcast %c16_i32_286 : i32 to vector<1x128xi32>
    %798 = arith.cmpi sge, %782, %797 : vector<1x128xi32>
    %c24_i32_287 = arith.constant 24 : i32
    %799 = vector.broadcast %c24_i32_287 : i32 to vector<1x128xi32>
    %800 = arith.cmpi slt, %782, %799 : vector<1x128xi32>
    %801 = arith.andi %798, %800 : vector<1x128xi1>
    %802 = arith.extui %801 : vector<1x128xi1> to vector<1x128xi32>
    %803 = arith.sitofp %802 : vector<1x128xi32> to vector<1x128xf32>
    %c24_i32_288 = arith.constant 24 : i32
    %804 = vector.broadcast %c24_i32_288 : i32 to vector<1x128xi32>
    %805 = arith.cmpi sge, %782, %804 : vector<1x128xi32>
    %c32_i32_289 = arith.constant 32 : i32
    %806 = vector.broadcast %c32_i32_289 : i32 to vector<1x128xi32>
    %807 = arith.cmpi slt, %782, %806 : vector<1x128xi32>
    %808 = arith.andi %805, %807 : vector<1x128xi1>
    %809 = arith.extui %808 : vector<1x128xi1> to vector<1x128xi32>
    %810 = arith.sitofp %809 : vector<1x128xi32> to vector<1x128xf32>
    %811 = vector.broadcast %789 : vector<1x128xf32> to vector<8x128xf32>
    %812 = arith.mulf %771, %811 : vector<8x128xf32>
    %813 = vector.broadcast %796 : vector<1x128xf32> to vector<8x128xf32>
    %814 = arith.mulf %771, %813 : vector<8x128xf32>
    %815 = vector.broadcast %803 : vector<1x128xf32> to vector<8x128xf32>
    %816 = arith.mulf %771, %815 : vector<8x128xf32>
    %817 = vector.broadcast %810 : vector<1x128xf32> to vector<8x128xf32>
    %818 = arith.mulf %771, %817 : vector<8x128xf32>
    %819 = tpu.concatenate %812, %814, %816, %818 in 0 : vector<8x128xf32>, vector<8x128xf32>, vector<8x128xf32>, vector<8x128xf32> -> vector<32x128xf32>
    %cst_290 = arith.constant dense<0.000000e+00> : vector<32x16xf32>
    %820 = tpu.matmul %819, %780, %cst_290 {dimension_numbers = #tpu.dot_dimension_numbers<[1], [1], [0], [0], [0, 0, 1, 0], [], []>} : vector<32x128xf32>, vector<16x128xf32>, vector<32x16xf32> -> vector<32x16xf32>
    %821 = tpu.concatenate %24, %24, %24, %24 in 0 : vector<8x16xf32>, vector<8x16xf32>, vector<8x16xf32>, vector<8x16xf32> -> vector<32x16xf32>
    %822 = arith.addf %820, %821 : vector<32x16xf32>
    %cst_291 = arith.constant dense<0xFF800000> : vector<32xf32>
    %823 = vector.multi_reduction <maximumf>, %822, %cst_291 [1] : vector<32x16xf32> to vector<32xf32>
    %824 = vector.shape_cast %823 : vector<32xf32> to vector<32x1xf32>
    %825 = vector.broadcast %824 : vector<32x1xf32> to vector<32x16xf32>
    %826 = arith.subf %822, %825 : vector<32x16xf32>
    %827 = math.exp %826 : vector<32x16xf32>
    %cst_292 = arith.constant dense<0.000000e+00> : vector<32xf32>
    %828 = vector.multi_reduction <add>, %827, %cst_292 [1] : vector<32x16xf32> to vector<32xf32>
    %829 = vector.shape_cast %828 : vector<32xf32> to vector<32x1xf32>
    %830 = vector.broadcast %829 : vector<32x1xf32> to vector<32x16xf32>
    %831 = arith.divf %827, %830 : vector<32x16xf32>
    %cst_293 = arith.constant dense<0.000000e+00> : vector<32x128xf32>
    %832 = tpu.matmul %831, %781, %cst_293 {dimension_numbers = #tpu.dot_dimension_numbers<[1], [0], [0], [1], [0, 0, 1, 1], [], []>} : vector<32x16xf32>, vector<16x128xf32>, vector<32x128xf32> -> vector<32x128xf32>
    %833 = vector.extract_strided_slice %832 {offsets = [0, 0], sizes = [8, 128], strides = [1, 1]} : vector<32x128xf32> to vector<8x128xf32>
    %834 = vector.broadcast %789 : vector<1x128xf32> to vector<8x128xf32>
    %835 = arith.mulf %833, %834 : vector<8x128xf32>
    %836 = vector.extract_strided_slice %832 {offsets = [8, 0], sizes = [8, 128], strides = [1, 1]} : vector<32x128xf32> to vector<8x128xf32>
    %837 = vector.broadcast %796 : vector<1x128xf32> to vector<8x128xf32>
    %838 = arith.mulf %836, %837 : vector<8x128xf32>
    %839 = arith.addf %835, %838 : vector<8x128xf32>
    %840 = vector.extract_strided_slice %832 {offsets = [16, 0], sizes = [8, 128], strides = [1, 1]} : vector<32x128xf32> to vector<8x128xf32>
    %841 = vector.broadcast %803 : vector<1x128xf32> to vector<8x128xf32>
    %842 = arith.mulf %840, %841 : vector<8x128xf32>
    %843 = arith.addf %839, %842 : vector<8x128xf32>
    %844 = vector.extract_strided_slice %832 {offsets = [24, 0], sizes = [8, 128], strides = [1, 1]} : vector<32x128xf32> to vector<8x128xf32>
    %845 = vector.broadcast %810 : vector<1x128xf32> to vector<8x128xf32>
    %846 = arith.mulf %844, %845 : vector<8x128xf32>
    %847 = arith.addf %843, %846 : vector<8x128xf32>
    %c1_294 = arith.constant 1 : index
    %c0_295 = arith.constant 0 : index
    %c0_296 = arith.constant 0 : index
    %848 = vector.load %arg19[%c1_294, %c0_295, %c0_296] : memref<2x128x128xbf16, #tpu.memory_space<vmem>>, vector<1x128x128xbf16>
    %849 = vector.shape_cast %848 : vector<1x128x128xbf16> to vector<128x128xbf16>
    %c1_297 = arith.constant 1 : index
    %c0_298 = arith.constant 0 : index
    %c0_299 = arith.constant 0 : index
    %850 = vector.load %arg11[%c1_297, %c0_298, %c0_299] : memref<2x1x128xf32, #tpu.memory_space<vmem>>, vector<1x1x128xf32>
    %851 = vector.shape_cast %850 : vector<1x1x128xf32> to vector<1x128xf32>
    %852 = arith.truncf %847 : vector<8x128xf32> to vector<8x128xbf16>
    %cst_300 = arith.constant dense<0.000000e+00> : vector<8x128xf32>
    %853 = tpu.matmul %852, %849, %cst_300 {dimension_numbers = #tpu.dot_dimension_numbers<[1], [0], [0], [1], [0, 0, 1, 1], [], []>} : vector<8x128xbf16>, vector<128x128xbf16>, vector<8x128xf32> -> vector<8x128xf32>
    %854 = vector.broadcast %851 : vector<1x128xf32> to vector<8x128xf32>
    %855 = arith.addf %853, %854 : vector<8x128xf32>
    %856 = arith.addf %855, %763 : vector<8x128xf32>
    %857 = vector.extract_strided_slice %651 {offsets = [2, 0], sizes = [1, 128], strides = [1, 1]} : vector<6x128xf32> to vector<1x128xf32>
    %858 = vector.extract_strided_slice %651 {offsets = [3, 0], sizes = [1, 128], strides = [1, 1]} : vector<6x128xf32> to vector<1x128xf32>
    %cst_301 = arith.constant dense<0.000000e+00> : vector<8xf32>
    %859 = vector.multi_reduction <add>, %856, %cst_301 [1] : vector<8x128xf32> to vector<8xf32>
    %860 = vector.shape_cast %859 : vector<8xf32> to vector<8x1xf32>
    %cst_302 = arith.constant 3.125000e-02 : f32
    %861 = vector.broadcast %cst_302 : f32 to vector<8x1xf32>
    %862 = arith.mulf %860, %861 : vector<8x1xf32>
    %863 = arith.mulf %856, %856 : vector<8x128xf32>
    %cst_303 = arith.constant dense<0.000000e+00> : vector<8xf32>
    %864 = vector.multi_reduction <add>, %863, %cst_303 [1] : vector<8x128xf32> to vector<8xf32>
    %865 = vector.shape_cast %864 : vector<8xf32> to vector<8x1xf32>
    %cst_304 = arith.constant 3.125000e-02 : f32
    %866 = vector.broadcast %cst_304 : f32 to vector<8x1xf32>
    %867 = arith.mulf %865, %866 : vector<8x1xf32>
    %868 = arith.mulf %862, %862 : vector<8x1xf32>
    %869 = arith.subf %867, %868 : vector<8x1xf32>
    %cst_305 = arith.constant 0.000000e+00 : f32
    %870 = vector.broadcast %cst_305 : f32 to vector<8x1xf32>
    %871 = arith.maximumf %869, %870 : vector<8x1xf32>
    %872 = vector.broadcast %862 : vector<8x1xf32> to vector<8x128xf32>
    %873 = arith.subf %856, %872 : vector<8x128xf32>
    %cst_306 = arith.constant 9.99999974E-6 : f32
    %874 = vector.broadcast %cst_306 : f32 to vector<8x1xf32>
    %875 = arith.addf %871, %874 : vector<8x1xf32>
    %876 = math.rsqrt %875 : vector<8x1xf32>
    %877 = vector.broadcast %876 : vector<8x1xf32> to vector<8x128xf32>
    %878 = arith.mulf %873, %877 : vector<8x128xf32>
    %879 = vector.broadcast %857 : vector<1x128xf32> to vector<8x128xf32>
    %880 = arith.mulf %878, %879 : vector<8x128xf32>
    %881 = vector.broadcast %858 : vector<1x128xf32> to vector<8x128xf32>
    %882 = arith.addf %880, %881 : vector<8x128xf32>
    %c1_307 = arith.constant 1 : index
    %c0_308 = arith.constant 0 : index
    %c0_309 = arith.constant 0 : index
    %883 = vector.load %arg15[%c1_307, %c0_308, %c0_309] : memref<2x128x128xbf16, #tpu.memory_space<vmem>>, vector<1x128x128xbf16>
    %884 = vector.shape_cast %883 : vector<1x128x128xbf16> to vector<128x128xbf16>
    %c1_310 = arith.constant 1 : index
    %c0_311 = arith.constant 0 : index
    %c0_312 = arith.constant 0 : index
    %885 = vector.load %arg7[%c1_310, %c0_311, %c0_312] : memref<2x1x128xf32, #tpu.memory_space<vmem>>, vector<1x1x128xf32>
    %886 = vector.shape_cast %885 : vector<1x1x128xf32> to vector<1x128xf32>
    %887 = arith.truncf %882 : vector<8x128xf32> to vector<8x128xbf16>
    %cst_313 = arith.constant dense<0.000000e+00> : vector<8x128xf32>
    %888 = tpu.matmul %887, %884, %cst_313 {dimension_numbers = #tpu.dot_dimension_numbers<[1], [0], [0], [1], [0, 0, 1, 1], [], []>} : vector<8x128xbf16>, vector<128x128xbf16>, vector<8x128xf32> -> vector<8x128xf32>
    %889 = vector.broadcast %886 : vector<1x128xf32> to vector<8x128xf32>
    %890 = arith.addf %888, %889 : vector<8x128xf32>
    %cst_314 = arith.constant 0.000000e+00 : f32
    %891 = vector.broadcast %cst_314 : f32 to vector<8x128xf32>
    %892 = arith.maximumf %890, %891 : vector<8x128xf32>
    %c1_315 = arith.constant 1 : index
    %c0_316 = arith.constant 0 : index
    %c0_317 = arith.constant 0 : index
    %893 = vector.load %arg16[%c1_315, %c0_316, %c0_317] : memref<2x128x128xbf16, #tpu.memory_space<vmem>>, vector<1x128x128xbf16>
    %894 = vector.shape_cast %893 : vector<1x128x128xbf16> to vector<128x128xbf16>
    %c1_318 = arith.constant 1 : index
    %c0_319 = arith.constant 0 : index
    %c0_320 = arith.constant 0 : index
    %895 = vector.load %arg8[%c1_318, %c0_319, %c0_320] : memref<2x1x128xf32, #tpu.memory_space<vmem>>, vector<1x1x128xf32>
    %896 = vector.shape_cast %895 : vector<1x1x128xf32> to vector<1x128xf32>
    %897 = arith.truncf %892 : vector<8x128xf32> to vector<8x128xbf16>
    %cst_321 = arith.constant dense<0.000000e+00> : vector<8x128xf32>
    %898 = tpu.matmul %897, %894, %cst_321 {dimension_numbers = #tpu.dot_dimension_numbers<[1], [0], [0], [1], [0, 0, 1, 1], [], []>} : vector<8x128xbf16>, vector<128x128xbf16>, vector<8x128xf32> -> vector<8x128xf32>
    %899 = vector.broadcast %896 : vector<1x128xf32> to vector<8x128xf32>
    %900 = arith.addf %898, %899 : vector<8x128xf32>
    %901 = arith.addf %900, %882 : vector<8x128xf32>
    %902 = vector.extract_strided_slice %651 {offsets = [4, 0], sizes = [1, 128], strides = [1, 1]} : vector<6x128xf32> to vector<1x128xf32>
    %903 = vector.extract_strided_slice %651 {offsets = [5, 0], sizes = [1, 128], strides = [1, 1]} : vector<6x128xf32> to vector<1x128xf32>
    %cst_322 = arith.constant dense<0.000000e+00> : vector<8xf32>
    %904 = vector.multi_reduction <add>, %901, %cst_322 [1] : vector<8x128xf32> to vector<8xf32>
    %905 = vector.shape_cast %904 : vector<8xf32> to vector<8x1xf32>
    %cst_323 = arith.constant 3.125000e-02 : f32
    %906 = vector.broadcast %cst_323 : f32 to vector<8x1xf32>
    %907 = arith.mulf %905, %906 : vector<8x1xf32>
    %908 = arith.mulf %901, %901 : vector<8x128xf32>
    %cst_324 = arith.constant dense<0.000000e+00> : vector<8xf32>
    %909 = vector.multi_reduction <add>, %908, %cst_324 [1] : vector<8x128xf32> to vector<8xf32>
    %910 = vector.shape_cast %909 : vector<8xf32> to vector<8x1xf32>
    %cst_325 = arith.constant 3.125000e-02 : f32
    %911 = vector.broadcast %cst_325 : f32 to vector<8x1xf32>
    %912 = arith.mulf %910, %911 : vector<8x1xf32>
    %913 = arith.mulf %907, %907 : vector<8x1xf32>
    %914 = arith.subf %912, %913 : vector<8x1xf32>
    %cst_326 = arith.constant 0.000000e+00 : f32
    %915 = vector.broadcast %cst_326 : f32 to vector<8x1xf32>
    %916 = arith.maximumf %914, %915 : vector<8x1xf32>
    %917 = vector.broadcast %907 : vector<8x1xf32> to vector<8x128xf32>
    %918 = arith.subf %901, %917 : vector<8x128xf32>
    %cst_327 = arith.constant 9.99999974E-6 : f32
    %919 = vector.broadcast %cst_327 : f32 to vector<8x1xf32>
    %920 = arith.addf %916, %919 : vector<8x1xf32>
    %921 = math.rsqrt %920 : vector<8x1xf32>
    %922 = vector.broadcast %921 : vector<8x1xf32> to vector<8x128xf32>
    %923 = arith.mulf %918, %922 : vector<8x128xf32>
    %924 = vector.broadcast %902 : vector<1x128xf32> to vector<8x128xf32>
    %925 = arith.mulf %923, %924 : vector<8x128xf32>
    %926 = vector.broadcast %903 : vector<1x128xf32> to vector<8x128xf32>
    %927 = arith.addf %925, %926 : vector<8x128xf32>
    %c0_328 = arith.constant 0 : index
    %c0_329 = arith.constant 0 : index
    %928 = vector.load %arg22[%c0_328, %c0_329] : memref<2x128xf32, #tpu.memory_space<vmem>>, vector<2x128xf32>
    %929 = vector.extract_strided_slice %928 {offsets = [0, 0], sizes = [1, 128], strides = [1, 1]} : vector<2x128xf32> to vector<1x128xf32>
    %930 = vector.extract_strided_slice %928 {offsets = [1, 0], sizes = [1, 128], strides = [1, 1]} : vector<2x128xf32> to vector<1x128xf32>
    %cst_330 = arith.constant dense<0.000000e+00> : vector<8xf32>
    %931 = vector.multi_reduction <add>, %927, %cst_330 [1] : vector<8x128xf32> to vector<8xf32>
    %932 = vector.shape_cast %931 : vector<8xf32> to vector<8x1xf32>
    %cst_331 = arith.constant 3.125000e-02 : f32
    %933 = vector.broadcast %cst_331 : f32 to vector<8x1xf32>
    %934 = arith.mulf %932, %933 : vector<8x1xf32>
    %935 = arith.mulf %927, %927 : vector<8x128xf32>
    %cst_332 = arith.constant dense<0.000000e+00> : vector<8xf32>
    %936 = vector.multi_reduction <add>, %935, %cst_332 [1] : vector<8x128xf32> to vector<8xf32>
    %937 = vector.shape_cast %936 : vector<8xf32> to vector<8x1xf32>
    %cst_333 = arith.constant 3.125000e-02 : f32
    %938 = vector.broadcast %cst_333 : f32 to vector<8x1xf32>
    %939 = arith.mulf %937, %938 : vector<8x1xf32>
    %940 = arith.mulf %934, %934 : vector<8x1xf32>
    %941 = arith.subf %939, %940 : vector<8x1xf32>
    %cst_334 = arith.constant 0.000000e+00 : f32
    %942 = vector.broadcast %cst_334 : f32 to vector<8x1xf32>
    %943 = arith.maximumf %941, %942 : vector<8x1xf32>
    %944 = vector.broadcast %934 : vector<8x1xf32> to vector<8x128xf32>
    %945 = arith.subf %927, %944 : vector<8x128xf32>
    %cst_335 = arith.constant 9.99999974E-6 : f32
    %946 = vector.broadcast %cst_335 : f32 to vector<8x1xf32>
    %947 = arith.addf %943, %946 : vector<8x1xf32>
    %948 = math.rsqrt %947 : vector<8x1xf32>
    %949 = vector.broadcast %948 : vector<8x1xf32> to vector<8x128xf32>
    %950 = arith.mulf %945, %949 : vector<8x128xf32>
    %951 = vector.broadcast %929 : vector<1x128xf32> to vector<8x128xf32>
    %952 = arith.mulf %950, %951 : vector<8x128xf32>
    %953 = vector.broadcast %930 : vector<1x128xf32> to vector<8x128xf32>
    %954 = arith.addf %952, %953 : vector<8x128xf32>
    %c0_336 = arith.constant 0 : index
    %c0_337 = arith.constant 0 : index
    %955 = vector.load %arg35[%c0_336, %c0_337] : memref<128x128xbf16, #tpu.memory_space<vmem>>, vector<128x128xbf16>
    %c0_338 = arith.constant 0 : index
    %c0_339 = arith.constant 0 : index
    %956 = vector.load %arg34[%c0_338, %c0_339] : memref<1x128xf32, #tpu.memory_space<vmem>>, vector<1x128xf32>
    %957 = arith.truncf %954 : vector<8x128xf32> to vector<8x128xbf16>
    %cst_340 = arith.constant dense<0.000000e+00> : vector<8x128xf32>
    %958 = tpu.matmul %957, %955, %cst_340 {dimension_numbers = #tpu.dot_dimension_numbers<[1], [0], [0], [1], [0, 0, 1, 1], [], []>} : vector<8x128xbf16>, vector<128x128xbf16>, vector<8x128xf32> -> vector<8x128xf32>
    %959 = vector.broadcast %956 : vector<1x128xf32> to vector<8x128xf32>
    %960 = arith.addf %958, %959 : vector<8x128xf32>
    %c0_341 = arith.constant 0 : index
    %c0_342 = arith.constant 0 : index
    %c0_343 = arith.constant 0 : index
    %961 = vector.load %arg38[%c0_341, %c0_342, %c0_343] : memref<1x8x128xf32, #tpu.memory_space<vmem>>, vector<1x8x128xf32>
    %962 = vector.shape_cast %961 : vector<1x8x128xf32> to vector<8x128xf32>
    %963 = vector.shape_cast %960 : vector<8x128xf32> to vector<1x8x128xf32>
    tpu.vector_store %arg38[%c0_341, %c0_342, %c0_343], %963 {strides = array<i32>} : memref<1x8x128xf32, #tpu.memory_space<vmem>>, vector<1x8x128xf32>,
    return
  }
  func.func @transform_0(%arg0: i32) -> (i32, i32, i32) {
    %c0_i32 = arith.constant 0 : i32
    %c0_i32_0 = arith.constant 0 : i32
    %c0_i32_1 = arith.constant 0 : i32
    return %arg0, %c0_i32, %c0_i32_0 : i32, i32, i32
  }
  func.func @transform_1(%arg0: i32) -> (i32, i32, i32) {
    %c0_i32 = arith.constant 0 : i32
    %c0_i32_0 = arith.constant 0 : i32
    %c0_i32_1 = arith.constant 0 : i32
    return %arg0, %c0_i32, %c0_i32_0 : i32, i32, i32
  }
  func.func @transform_2(%arg0: i32) -> (i32, i32, i32) {
    %c0_i32 = arith.constant 0 : i32
    %c0_i32_0 = arith.constant 0 : i32
    %c0_i32_1 = arith.constant 0 : i32
    return %arg0, %c0_i32, %c0_i32_0 : i32, i32, i32
  }
  func.func @transform_3(%arg0: i32) -> (i32, i32, i32) {
    %c0_i32 = arith.constant 0 : i32
    %c0_i32_0 = arith.constant 0 : i32
    %c0_i32_1 = arith.constant 0 : i32
    return %arg0, %c0_i32, %c0_i32_0 : i32, i32, i32
  }
  func.func @transform_4(%arg0: i32) -> (i32, i32, i32) {
    %c0_i32 = arith.constant 0 : i32
    %c0_i32_0 = arith.constant 0 : i32
    %c0_i32_1 = arith.constant 0 : i32
    return %arg0, %c0_i32, %c0_i32_0 : i32, i32, i32
  }
  func.func @transform_5(%arg0: i32) -> (i32, i32, i32) {
    %c0_i32 = arith.constant 0 : i32
    %c0_i32_0 = arith.constant 0 : i32
    %c0_i32_1 = arith.constant 0 : i32
    return %arg0, %c0_i32, %c0_i32_0 : i32, i32, i32
  }
  func.func @transform_6(%arg0: i32) -> (i32, i32, i32) {
    %c0_i32 = arith.constant 0 : i32
    %c0_i32_0 = arith.constant 0 : i32
    %c0_i32_1 = arith.constant 0 : i32
    %c0_i32_2 = arith.constant 0 : i32
    return %c0_i32, %c0_i32_0, %c0_i32_1 : i32, i32, i32
  }
  func.func @transform_7(%arg0: i32) -> (i32, i32, i32) {
    %c0_i32 = arith.constant 0 : i32
    %c0_i32_0 = arith.constant 0 : i32
    %c0_i32_1 = arith.constant 0 : i32
    %c0_i32_2 = arith.constant 0 : i32
    return %c0_i32, %c0_i32_0, %c0_i32_1 : i32, i32, i32
  }
  func.func @transform_8(%arg0: i32) -> (i32, i32, i32) {
    %c0_i32 = arith.constant 0 : i32
    %c0_i32_0 = arith.constant 0 : i32
    %c0_i32_1 = arith.constant 0 : i32
    %c0_i32_2 = arith.constant 0 : i32
    return %c0_i32, %c0_i32_0, %c0_i32_1 : i32, i32, i32
  }
  func.func @transform_9(%arg0: i32) -> (i32, i32, i32) {
    %c0_i32 = arith.constant 0 : i32
    %c0_i32_0 = arith.constant 0 : i32
    %c0_i32_1 = arith.constant 0 : i32
    %c0_i32_2 = arith.constant 0 : i32
    return %c0_i32, %c0_i32_0, %c0_i32_1 : i32, i32, i32
  }
  func.func @transform_10(%arg0: i32) -> (i32, i32, i32) {
    %c0_i32 = arith.constant 0 : i32
    %c0_i32_0 = arith.constant 0 : i32
    %c0_i32_1 = arith.constant 0 : i32
    %c0_i32_2 = arith.constant 0 : i32
    return %c0_i32, %c0_i32_0, %c0_i32_1 : i32, i32, i32
  }
  func.func @transform_11(%arg0: i32) -> (i32, i32, i32) {
    %c0_i32 = arith.constant 0 : i32
    %c0_i32_0 = arith.constant 0 : i32
    %c0_i32_1 = arith.constant 0 : i32
    %c0_i32_2 = arith.constant 0 : i32
    return %c0_i32, %c0_i32_0, %c0_i32_1 : i32, i32, i32
  }
  func.func @transform_12(%arg0: i32) -> (i32, i32, i32) {
    %c0_i32 = arith.constant 0 : i32
    %c0_i32_0 = arith.constant 0 : i32
    %c0_i32_1 = arith.constant 0 : i32
    %c0_i32_2 = arith.constant 0 : i32
    return %c0_i32, %c0_i32_0, %c0_i32_1 : i32, i32, i32
  }
  func.func @transform_13(%arg0: i32) -> (i32, i32, i32) {
    %c0_i32 = arith.constant 0 : i32
    %c0_i32_0 = arith.constant 0 : i32
    %c0_i32_1 = arith.constant 0 : i32
    %c0_i32_2 = arith.constant 0 : i32
    return %c0_i32, %c0_i32_0, %c0_i32_1 : i32, i32, i32
  }
  func.func @transform_14(%arg0: i32) -> (i32, i32, i32) {
    %c0_i32 = arith.constant 0 : i32
    %c0_i32_0 = arith.constant 0 : i32
    %c0_i32_1 = arith.constant 0 : i32
    %c0_i32_2 = arith.constant 0 : i32
    return %c0_i32, %c0_i32_0, %c0_i32_1 : i32, i32, i32
  }
  func.func @transform_15(%arg0: i32) -> (i32, i32, i32) {
    %c0_i32 = arith.constant 0 : i32
    %c0_i32_0 = arith.constant 0 : i32
    %c0_i32_1 = arith.constant 0 : i32
    %c0_i32_2 = arith.constant 0 : i32
    return %c0_i32, %c0_i32_0, %c0_i32_1 : i32, i32, i32
  }
  func.func @transform_16(%arg0: i32) -> (i32, i32, i32) {
    %c0_i32 = arith.constant 0 : i32
    %c0_i32_0 = arith.constant 0 : i32
    %c0_i32_1 = arith.constant 0 : i32
    %c0_i32_2 = arith.constant 0 : i32
    return %c0_i32, %c0_i32_0, %c0_i32_1 : i32, i32, i32
  }
  func.func @transform_17(%arg0: i32) -> (i32, i32, i32) {
    %c0_i32 = arith.constant 0 : i32
    %c0_i32_0 = arith.constant 0 : i32
    %c0_i32_1 = arith.constant 0 : i32
    %c0_i32_2 = arith.constant 0 : i32
    return %c0_i32, %c0_i32_0, %c0_i32_1 : i32, i32, i32
  }
  func.func @transform_18(%arg0: i32) -> (i32, i32, i32) {
    %c0_i32 = arith.constant 0 : i32
    %c0_i32_0 = arith.constant 0 : i32
    %c0_i32_1 = arith.constant 0 : i32
    %c0_i32_2 = arith.constant 0 : i32
    return %c0_i32, %c0_i32_0, %c0_i32_1 : i32, i32, i32
  }
  func.func @transform_19(%arg0: i32) -> (i32, i32, i32) {
    %c0_i32 = arith.constant 0 : i32
    %c0_i32_0 = arith.constant 0 : i32
    %c0_i32_1 = arith.constant 0 : i32
    %c0_i32_2 = arith.constant 0 : i32
    return %c0_i32, %c0_i32_0, %c0_i32_1 : i32, i32, i32
  }
  func.func @transform_20(%arg0: i32) -> (i32, i32, i32) {
    %c0_i32 = arith.constant 0 : i32
    %c0_i32_0 = arith.constant 0 : i32
    %c0_i32_1 = arith.constant 0 : i32
    %c0_i32_2 = arith.constant 0 : i32
    return %c0_i32, %c0_i32_0, %c0_i32_1 : i32, i32, i32
  }
  func.func @transform_21(%arg0: i32) -> (i32, i32) {
    %c0_i32 = arith.constant 0 : i32
    %c0_i32_0 = arith.constant 0 : i32
    %c0_i32_1 = arith.constant 0 : i32
    return %c0_i32, %c0_i32_0 : i32, i32
  }
  func.func @transform_22(%arg0: i32) -> (i32, i32) {
    %c0_i32 = arith.constant 0 : i32
    %c0_i32_0 = arith.constant 0 : i32
    %c0_i32_1 = arith.constant 0 : i32
    return %c0_i32, %c0_i32_0 : i32, i32
  }
  func.func @transform_23(%arg0: i32) -> (i32, i32, i32) {
    %c0_i32 = arith.constant 0 : i32
    %c0_i32_0 = arith.constant 0 : i32
    %c0_i32_1 = arith.constant 0 : i32
    %c0_i32_2 = arith.constant 0 : i32
    return %c0_i32, %c0_i32_0, %c0_i32_1 : i32, i32, i32
  }
  func.func @transform_24(%arg0: i32) -> (i32, i32, i32) {
    %c0_i32 = arith.constant 0 : i32
    %c0_i32_0 = arith.constant 0 : i32
    %c0_i32_1 = arith.constant 0 : i32
    %c0_i32_2 = arith.constant 0 : i32
    return %c0_i32, %c0_i32_0, %c0_i32_1 : i32, i32, i32
  }
  func.func @transform_25(%arg0: i32) -> (i32, i32, i32) {
    %c0_i32 = arith.constant 0 : i32
    %c0_i32_0 = arith.constant 0 : i32
    %c0_i32_1 = arith.constant 0 : i32
    %c0_i32_2 = arith.constant 0 : i32
    return %c0_i32, %c0_i32_0, %c0_i32_1 : i32, i32, i32
  }
  func.func @transform_26(%arg0: i32) -> (i32, i32, i32) {
    %c0_i32 = arith.constant 0 : i32
    %c0_i32_0 = arith.constant 0 : i32
    %c0_i32_1 = arith.constant 0 : i32
    %c0_i32_2 = arith.constant 0 : i32
    return %c0_i32, %c0_i32_0, %c0_i32_1 : i32, i32, i32
  }
  func.func @transform_27(%arg0: i32) -> (i32, i32, i32) {
    %c0_i32 = arith.constant 0 : i32
    %c0_i32_0 = arith.constant 0 : i32
    %c0_i32_1 = arith.constant 0 : i32
    %c0_i32_2 = arith.constant 0 : i32
    return %c0_i32, %c0_i32_0, %c0_i32_1 : i32, i32, i32
  }
  func.func @transform_28(%arg0: i32) -> (i32, i32, i32) {
    %c0_i32 = arith.constant 0 : i32
    %c0_i32_0 = arith.constant 0 : i32
    %c0_i32_1 = arith.constant 0 : i32
    %c0_i32_2 = arith.constant 0 : i32
    return %c0_i32, %c0_i32_0, %c0_i32_1 : i32, i32, i32
  }
  func.func @transform_29(%arg0: i32) -> (i32, i32, i32) {
    %c0_i32 = arith.constant 0 : i32
    %c0_i32_0 = arith.constant 0 : i32
    %c0_i32_1 = arith.constant 0 : i32
    %c0_i32_2 = arith.constant 0 : i32
    return %c0_i32, %c0_i32_0, %c0_i32_1 : i32, i32, i32
  }
  func.func @transform_30(%arg0: i32) -> (i32, i32, i32) {
    %c0_i32 = arith.constant 0 : i32
    %c0_i32_0 = arith.constant 0 : i32
    %c0_i32_1 = arith.constant 0 : i32
    %c0_i32_2 = arith.constant 0 : i32
    return %c0_i32, %c0_i32_0, %c0_i32_1 : i32, i32, i32
  }
  func.func @transform_31(%arg0: i32) -> (i32, i32, i32) {
    %c0_i32 = arith.constant 0 : i32
    %c0_i32_0 = arith.constant 0 : i32
    %c0_i32_1 = arith.constant 0 : i32
    %c0_i32_2 = arith.constant 0 : i32
    return %c0_i32, %c0_i32_0, %c0_i32_1 : i32, i32, i32
  }
  func.func @transform_32(%arg0: i32) -> (i32, i32) {
    %c0_i32 = arith.constant 0 : i32
    %c0_i32_0 = arith.constant 0 : i32
    %c0_i32_1 = arith.constant 0 : i32
    return %c0_i32, %c0_i32_0 : i32, i32
  }
  func.func @transform_33(%arg0: i32) -> (i32, i32) {
    %c0_i32 = arith.constant 0 : i32
    %c0_i32_0 = arith.constant 0 : i32
    %c0_i32_1 = arith.constant 0 : i32
    return %c0_i32, %c0_i32_0 : i32, i32
  }
  func.func @transform_34(%arg0: i32) -> (i32, i32) {
    %c0_i32 = arith.constant 0 : i32
    %c0_i32_0 = arith.constant 0 : i32
    %c0_i32_1 = arith.constant 0 : i32
    return %c0_i32, %c0_i32_0 : i32, i32
  }
  func.func @transform_35(%arg0: i32) -> (i32, i32) {
    %c0_i32 = arith.constant 0 : i32
    %c0_i32_0 = arith.constant 0 : i32
    %c0_i32_1 = arith.constant 0 : i32
    return %c0_i32, %c0_i32_0 : i32, i32
  }
  func.func @transform_36(%arg0: i32) -> (i32, i32) {
    %c0_i32 = arith.constant 0 : i32
    %c0_i32_0 = arith.constant 0 : i32
    %c0_i32_1 = arith.constant 0 : i32
    return %c0_i32, %c0_i32_0 : i32, i32
  }
  func.func @transform_37(%arg0: i32) -> (i32, i32, i32) {
    %c0_i32 = arith.constant 0 : i32
    %c0_i32_0 = arith.constant 0 : i32
    %c0_i32_1 = arith.constant 0 : i32
    return %arg0, %c0_i32, %c0_i32_0 : i32, i32, i32
  }
}

</mosaic_0001>

<bundles_post_ra>
// kernel: transformer_forward.1
= control target key start
LH: loop header
LB: loop body
LE: loop exit
PB: predicated region body
PF: predicated region fallthrough
CT: control target
= control target key end

     0   :  { %s10528_s6 = smov 1   ;;  %s10529_s10 = smov 2   ;;  %s11898_s0 = inlined_call_operand.smem [shape: u32[38], index: -1, kind: input, shape index: {}] }
   0x1   :  { %s10612_s5 = sld [smem:[%s11898_s0]]   ;;  %s10530_s14 = smov 3  }
   0x2   :  { %s10617_s9 = sld [smem:[%s11898_s0 + %s10528_s6]]   ;;  %s10531_s18 = smov 4  }
   0x3   :  { %s10622_s13 = sld [smem:[%s11898_s0 + %s10529_s10]]   ;;  %s10532_s22 = smov 5  }
   0x4   :  { %s10627_s17 = sld [smem:[%s11898_s0 + %s10530_s14]]   ;;  %s10533_s26 = smov 6  }
   0x5   :  { %s10632_s21 = sld [smem:[%s11898_s0 + %s10531_s18]]   ;;  %s10534_s30 = smov 7  }
   0x6   :  { %s10637_s25 = sld [smem:[%s11898_s0 + %s10532_s22]]   ;;  %s10535_s4 = smov 8  }
   0x7   :  { %11917 = sst [smem:[#allocation56_spill]] %s10612_s5  ;;  %s10536_s10 = smov 9  }
   0x8   :  { %11918 = sst [smem:[#allocation57_spill]] %s10617_s9  ;;  %s10537_s15 = smov 10  }
   0x9   :  { %11919 = sst [smem:[#allocation58_spill]] %s10622_s13  ;;  %s10538_s20 = smov 11  }
   0xa   :  { %11920 = sst [smem:[#allocation59_spill]] %s10627_s17  ;;  %s10540_s1 = smov 13  }
   0xb   :  { %11921 = sst [smem:[#allocation60_spill]] %s10632_s21  ;;  %s10541_s7 = smov 14  }
   0xc   :  { %11922 = sst [smem:[#allocation61_spill]] %s10637_s25  ;;  %s10543_s22 = smov 16  }
   0xd   :  { %s10642_s29 = sld [smem:[%s11898_s0 + %s10533_s26]]   ;;  %s10539_s26 = smov 12  }
   0xe   :  { %s10647_s3 = sld [smem:[%s11898_s0 + %s10534_s30]]   ;;  %s10544_s28 = smov 17  }
   0xf   :  { %s10652_s8 = sld [smem:[%s11898_s0 + %s10535_s4]]  }
  0x10   :  { %s10657_s14 = sld [smem:[%s11898_s0 + %s10536_s10]]  }
  0x11   :  { %s10662_s19 = sld [smem:[%s11898_s0 + %s10537_s15]]   ;;  %s10542_s15 = smov 15  }
  0x12   :  { %s10667_s24 = sld [smem:[%s11898_s0 + %s10538_s20]]  }
  0x13   :  { %s10672_s30 = sld [smem:[%s11898_s0 + %s10539_s26]]  }
  0x14   :  { %11923 = sst [smem:[#allocation62_spill]] %s10647_s3 }
  0x15   :  { %11924 = sst [smem:[#allocation63_spill]] %s10652_s8 }
  0x16   :  { %s10677_s6 = sld [smem:[%s11898_s0 + %s10540_s1]]  }
  0x17   :  { %s10682_s12 = sld [smem:[%s11898_s0 + %s10541_s7]]   ;;  %s10545_s7 = smov 18  }
  0x18   :  { %s10687_s20 = sld [smem:[%s11898_s0 + %s10542_s15]]   ;;  %s10546_s15 = smov 19  }
  0x19   :  { %11925 = sst [smem:[#allocation64_spill]] %s10672_s30 }
  0x1a   :  { %s10692_s27 = sld [smem:[%s11898_s0 + %s10543_s22]]   ;;  %s10547_s22 = smov 20  }
  0x1b   :  { %s10697_s4 = sld [smem:[%s11898_s0 + %s10544_s28]]   ;;  %s10548_s28 = smov 21  }
  0x1c   :  { %11926 = sst [smem:[#allocation65_spill]] %s10677_s6 }
  0x1d   :  { %11927 = sst [smem:[#allocation66_spill]] %s10682_s12 }
  0x1e   :  { %s10702_s12 = sld [smem:[%s11898_s0 + %s10545_s7]]   ;;  %s10549_s7 = smov 22  }
  0x1f   :  { %s10707_s5 = sld [smem:[%s11898_s0 + %s10546_s15]]   ;;  %s10550_s15 = smov 23  }
  0x20   :  { %11928 = sst [smem:[#allocation67_spill]] %s10692_s27 }
  0x21   :  { %11929 = sst [smem:[#allocation68_spill]] %s10697_s4 }
  0x22   :  { %s10712_s6 = sld [smem:[%s11898_s0 + %s10547_s22]]   ;;  %s10551_s22 = smov 24  }
  0x23   :  { %s10717_s27 = sld [smem:[%s11898_s0 + %s10548_s28]]   ;;  %s10552_s28 = smov 25  }
  0x24   :  { %11930 = sst [smem:[#allocation69_spill]] %s10702_s12 }
  0x25   :  { %11931 = sst [smem:[#allocation70_spill]] %s10707_s5 }
  0x26   :  { %s10722_s13 = sld [smem:[%s11898_s0 + %s10549_s7]]   ;;  %s10553_s7 = smov 26  }
  0x27   :  { %s10727_s25 = sld [smem:[%s11898_s0 + %s10550_s15]]   ;;  %s10554_s15 = smov 27  }
  0x28   :  { %11932 = sst [smem:[#allocation71_spill]] %s10712_s6 }
  0x29   :  { %s10732_s6 = sld [smem:[%s11898_s0 + %s10551_s22]]   ;;  %s10555_s22 = smov 28  }
  0x2a   :  { %s10737_s9 = sld [smem:[%s11898_s0 + %s10552_s28]]   ;;  %s10556_s28 = smov 29  }
  0x2b   :  { %s10742_s21 = sld [smem:[%s11898_s0 + %s10553_s7]]   ;;  %s10557_s7 = smov 30  }
  0x2c   :  { %11933 = sst [smem:[#allocation72_spill]] %s10722_s13 }
  0x2d   :  { %s10747_s17 = sld [smem:[%s11898_s0 + %s10554_s15]]   ;;  %s10558_s15 = smov 31  }
  0x2e   :  { %s10757_s13 = sld [smem:[%s11898_s0 + %s10556_s28]]   ;;  %s10560_s28 = smov 33  }
  0x2f   :  { %11934 = sst [smem:[#allocation73_spill]] %s10732_s6 }
  0x30   :  { %11935 = sst [smem:[#allocation74_spill]] %s10737_s9 }
  0x31   :  { %11936 = sst [smem:[#allocation75_spill]] %s10742_s21 }
  0x32   :  { %s10752_s6 = sld [smem:[%s11898_s0 + %s10555_s22]]   ;;  %s10559_s22 = smov 32  }
  0x33   :  { %s10762_s21 = sld [smem:[%s11898_s0 + %s10557_s7]]   ;;  %s10561_s7 = smov 34  }
  0x34   :  { %11938 = sst [smem:[#allocation77_spill]] %s10757_s13 }
  0x35   :  { %s10767_s5 = sld [smem:[%s11898_s0 + %s10558_s15]]   ;;  %s10562_s15 = smov 35  }
  0x36   :  { %s10777_s4 = sld [smem:[%s11898_s0 + %s10560_s28]]   ;;  %s10564_s28 = smov 37  }
  0x38   :  { %11937 = sst [smem:[#allocation76_spill]] %s10752_s6 }
  0x39   :  { %11939 = sst [smem:[#allocation78_spill]] %s10762_s21 }
  0x3a   :  { %s10772_s6 = sld [smem:[%s11898_s0 + %s10559_s22]]   ;;  %s10563_s22 = smov 36  }
  0x3b   :  { %11940 = sst [smem:[#allocation79_spill]] %s10767_s5 }
  0x3c   :  { %11942 = sst [smem:[#allocation81_spill]] %s10777_s4 }
  0x3d   :  { %s10782_s21 = sld [smem:[%s11898_s0 + %s10561_s7]]  }
  0x3e   :  { %s10787_s5 = sld [smem:[%s11898_s0 + %s10562_s15]]  }
  0x3f   :  { %s10792_s30 = sld [smem:[%s11898_s0 + %s10563_s22]]  }
  0x40   :  { %11941 = sst [smem:[#allocation80_spill]] %s10772_s6 }
  0x41   :  { %s10797_s4 = sld [smem:[%s11898_s0 + %s10564_s28]]  }
  0x42   :  { %80 = vsyncpa [#allocation3], 0 }
  0x43   :  { %81 = vsyncpa [#allocation5], 0 }
  0x44   :  { %82 = vsyncpa [#allocation8], 0 }
  0x45   :  { %83 = vsyncpa [#allocation11], 0 }
  0x46   :  { %84 = vsyncpa [#allocation14], 0 }
  0x47   :  { %85 = vsyncpa [#allocation17], 0 }
  0x48   :  { %86 = vsyncpa [#allocation20], 0 }
  0x49   :  { %87 = vsyncpa [#allocation23], 0 }
  0x4a   :  { %88 = vsyncpa [#allocation26], 0 }
  0x4b   :  { %89 = vsyncpa [#allocation29], 0 }
  0x4c   :  { %90 = vsyncpa [#allocation32], 0 }
  0x4d   :  { %91 = vsyncpa [#allocation35], 0 }
  0x4e   :  { %92 = vsyncpa [#allocation38], 0 }
  0x4f   :  { %93 = vsyncpa [#allocation41], 0  ;;  %s10799_s7 = smov 0  }
  0x50 LB: > { %s10805_s0 = sadd.s32 4294967295, %s10526_s7   ;;  %p7594_p0 = scmp.ge.s32.totalorder %s10526_s7, 1  ;;  %s10526_s7 = sphi %s10799_s7, %s99_s7  }
  0x51   : > { %p937_p1 = scmp.lt.s32.totalorder %s10526_s7, 3  ;;  %p11909_p2 = scmp.eq.s32.totalorder %s10805_s0, 0 }
  0x52   : > { %s10565_s11 = smov [#allocation4]   ;;  %s10566_s16 = smov [#allocation7]  }
  0x53   : > { %p10810_p3 = pnand %p7594_p0, %p937_p1  ;;  %s962_s15 = sshll.u32 %s10565_s11, 4  ;;  %s963_s15 = int_to_ptr.vmem [resolvable:$true] %s962_s15 }
  0x54   : > { %s988_s18 = sshll.u32 %s10566_s16, 4  ;;  %s10567_s23 = smov [#allocation10]   ;;  %s10816_s18 = int_to_ptr.vmem [resolvable:$true] %s988_s18 }
  0x55   : > { %s11943_s10 = scalar_select %p10810_p3, 1, 0 }
  0x56   : > { %p9064_p4 = pneg %p10810_p3  ;;  %s1014_s26 = sshll.u32 %s10567_s23, 4  ;;  %s10824_s26 = int_to_ptr.vmem [resolvable:$true] %s1014_s26 }
  0x57   : > { %s10568_s28 = smov [#allocation13]   ;;  %s9799_s11 = scalar_lea.vmem %s963_s15, 32 }
  0x58   : > { %p10820_p5 = pnand %p11909_p2, %p9064_p4  ;;  %s10826_s1 = sshll.u32 %s10568_s28, 4  ;;  %s1047_s1 = int_to_ptr.vmem [resolvable:$true] %s10826_s1 }
  0x59   : > { %p9800_p7 = scmp.ne.s32.totalorder %s963_s15, %s9799_s11  ;;  %p9807_p10 = scmp.lt.s32.totalorder %s963_s15, %s963_s15 }
  0x5a   : > { %p10830_p6 = pneg %p10820_p5  ;;  %p9808_p11 = scmp.lt.s32.totalorder %s9799_s11, %s9799_s11 }
  0x5c   : > { %p9802_p8 = pnand %p9800_p7, %p10830_p6  ;;  %p9809_p12 = por %p9808_p11, %p9807_p10 }
  0x5e   : > { %p9803_p9 = pneg %p9802_p8 }
  0x60   : > { %p9810_p13 = pnand %p9809_p12, %p9803_p9 }
  0x62   : > { %9813 = shalt.err (!%p9810_p13)
}
  0x63   : > { %s11905_s16 = smov 16   ;;  %s11946_s3 = sld [smem:[#allocation62_spill]] }
  0x64   : > { %s11907_s23 = smov 1   ;;  %s9825_s28 = scalar_lea.vmem %s10816_s18, 32 }
  0x65   : > { %p9826_p0 = scmp.ne.s32.totalorder %s10816_s18, %s9825_s28  ;;  %p9833_p7 = scmp.lt.s32.totalorder %s10816_s18, %s10816_s18 }
  0x66   : > { %p9834_p8 = scmp.lt.s32.totalorder %s9825_s28, %s9825_s28 }
  0x67   : > { %p9828_p1 = pnand %p9826_p0, %p10830_p6 }
  0x68   : > { %p9835_p9 = por %p9834_p8, %p9833_p7 }
  0x69   : > { %9070 = dma.hbm_to_vmem [thread:$0]  (!%p10820_p5), %s11946_s3, 32, %s963_s15, [#allocation5], %s11905_s16, %s11905_s16, %s11907_s23  }
  0x6a   : > { %p9829_p4 = pneg %p9828_p1 }
  0x6c   : > { %p9836_p10 = pnand %p9835_p9, %p9829_p4 }
  0x6e   : > { %9839 = shalt.err (!%p9836_p10)
}
  0x6f   : > { %9076 = dma.hbm_to_vmem [thread:$0]  (!%p10820_p5), %s10657_s14, 32, %s10816_s18, [#allocation8], %s11905_s16, %s11905_s16, %s11907_s23  }
  0x70   : > { %s9851_s15 = scalar_lea.vmem %s10824_s26, 32  ;;  %p9859_p0 = scmp.lt.s32.totalorder %s10824_s26, %s10824_s26 }
  0x71   : > { %p9852_p11 = scmp.ne.s32.totalorder %s10824_s26, %s9851_s15  ;;  %p9860_p1 = scmp.lt.s32.totalorder %s9851_s15, %s9851_s15 }
  0x73   : > { %p9854_p12 = pnand %p9852_p11, %p10830_p6  ;;  %p9861_p4 = por %p9860_p1, %p9859_p0 }
  0x75   : > { %p9855_p13 = pneg %p9854_p12 }
  0x77   : > { %p9862_p7 = pnand %p9861_p4, %p9855_p13 }
  0x79   : > { %9865 = shalt.err (!%p9862_p7)
}
  0x7a   : > { %9082 = dma.hbm_to_vmem [thread:$0]  (!%p10820_p5), %s10667_s24, 32, %s10824_s26, [#allocation11], %s11905_s16, %s11905_s16, %s11907_s23  }
  0x7b   : > { %s9877_s18 = scalar_lea.vmem %s1047_s1, 2048  ;;  %p9885_p11 = scmp.lt.s32.totalorder %s1047_s1, %s1047_s1 }
  0x7c   : > { %p9878_p8 = scmp.ne.s32.totalorder %s1047_s1, %s9877_s18  ;;  %p9886_p12 = scmp.lt.s32.totalorder %s9877_s18, %s9877_s18 }
  0x7e   : > { %p9880_p9 = pnand %p9878_p8, %p10830_p6  ;;  %p9887_p13 = por %p9886_p12, %p9885_p11 }
  0x80   : > { %p9881_p10 = pneg %p9880_p9 }
  0x82   : > { %p9888_p0 = pnand %p9887_p13, %p9881_p10 }
  0x84   : > { %9891 = shalt.err (!%p9888_p0)
}
  0x85   : > { %s11910_s11 = smov 64   ;;  %s11912_s28 = smov 4  }
  0x86   : > { %9088 = dma.hbm_to_vmem [thread:$0]  (!%p10820_p5), %s10687_s20, 2048, %s1047_s1, [#allocation14], %s11910_s11, %s11910_s11, %s11912_s28  }
  0x87   : > { %s10573_s26 = smov [#allocation16]   ;;  %s10574_s16 = smov [#allocation19]  }
  0x88   : > { %s1075_s15 = sshll.u32 %s10573_s26, 4  ;;  %s1105_s23 = sshll.u32 %s10574_s16, 4  ;;  %s1076_s15 = int_to_ptr.vmem [resolvable:$true] %s1075_s15  ;;  %s1106_s23 = int_to_ptr.vmem [resolvable:$true] %s1105_s23 }
  0x89   : > { %s9903_s3 = scalar_lea.vmem %s1076_s15, 2048  ;;  %p9911_p8 = scmp.lt.s32.totalorder %s1076_s15, %s1076_s15 }
  0x8a   : > { %p9904_p1 = scmp.ne.s32.totalorder %s1076_s15, %s9903_s3  ;;  %p9912_p9 = scmp.lt.s32.totalorder %s9903_s3, %s9903_s3 }
  0x8c   : > { %p9906_p4 = pnand %p9904_p1, %p10830_p6  ;;  %p9913_p10 = por %p9912_p9, %p9911_p8 }
  0x8e   : > { %p9907_p7 = pneg %p9906_p4 }
  0x90   : > { %p9914_p11 = pnand %p9913_p10, %p9907_p7 }
  0x92   : > { %9917 = shalt.err (!%p9914_p11)
}
  0x93   : > { %s11947_s12 = sld [smem:[#allocation69_spill]]  ;;  %s9929_s1 = scalar_lea.vmem %s1106_s23, 32 }
  0x94   : > { %p9930_p12 = scmp.ne.s32.totalorder %s1106_s23, %s9929_s1  ;;  %p9937_p1 = scmp.lt.s32.totalorder %s1106_s23, %s1106_s23 }
  0x95   : > { %p9938_p4 = scmp.lt.s32.totalorder %s9929_s1, %s9929_s1 }
  0x96   : > { %p9932_p13 = pnand %p9930_p12, %p10830_p6 }
  0x97   : > { %p9939_p2 = por %p9938_p4, %p9937_p1 }
  0x98   : > { %p9933_p0 = pneg %p9932_p13 }
  0x99   : > { %9094 = dma.hbm_to_vmem [thread:$0]  (!%p10820_p5), %s11947_s12, 2048, %s1076_s15, [#allocation17], %s11910_s11, %s11910_s11, %s11912_s28  }
  0x9a   : > { %p9940_p8 = pnand %p9939_p2, %p9933_p0 }
  0x9c   : > { %9943 = shalt.err (!%p9940_p8)
}
  0x9d   : > { %9100 = dma.hbm_to_vmem [thread:$0]  (!%p10820_p5), %s10717_s27, 32, %s1106_s23, [#allocation20]  }
  0x9e   : > { %s10575_s3 = smov [#allocation22]   ;;  %s10576_s18 = smov [#allocation25]  }
  0x9f   : > { %s1128_s16 = sshll.u32 %s10575_s3, 4  ;;  %s1154_s26 = sshll.u32 %s10576_s18, 4  ;;  %s1129_s16 = int_to_ptr.vmem [resolvable:$true] %s1128_s16  ;;  %s1155_s26 = int_to_ptr.vmem [resolvable:$true] %s1154_s26 }
  0xa0   : > { %s9955_s15 = scalar_lea.vmem %s1129_s16, 32  ;;  %p9963_p11 = scmp.lt.s32.totalorder %s1129_s16, %s1129_s16 }
  0xa1   : > { %p9956_p7 = scmp.ne.s32.totalorder %s1129_s16, %s9955_s15  ;;  %p9964_p12 = scmp.lt.s32.totalorder %s9955_s15, %s9955_s15 }
  0xa3   : > { %p9958_p9 = pnand %p9956_p7, %p10830_p6  ;;  %p9965_p13 = por %p9964_p12, %p9963_p11 }
  0xa5   : > { %p9959_p10 = pneg %p9958_p9 }
  0xa7   : > { %p9966_p2 = pnand %p9965_p13, %p9959_p10 }
  0xa9   : > { %9969 = shalt.err (!%p9966_p2)
}
  0xaa   : > { %s11948_s1 = smov 1   ;;  %s11949_s11 = smov 16  }
  0xab   : > { %9106 = dma.hbm_to_vmem [thread:$0]  (!%p10820_p5), %s10727_s25, 32, %s1129_s16, [#allocation23], %s11949_s11, %s11949_s11, %s11948_s1  }
  0xac   : > { %s9981_s23 = scalar_lea.vmem %s1155_s26, 32  ;;  %p9989_p8 = scmp.lt.s32.totalorder %s1155_s26, %s1155_s26 }
  0xad   : > { %p9982_p0 = scmp.ne.s32.totalorder %s1155_s26, %s9981_s23  ;;  %p9990_p7 = scmp.lt.s32.totalorder %s9981_s23, %s9981_s23 }
  0xaf   : > { %p9984_p1 = pnand %p9982_p0, %p10830_p6  ;;  %p9991_p9 = por %p9990_p7, %p9989_p8 }
  0xb1   : > { %p9985_p4 = pneg %p9984_p1 }
  0xb3   : > { %p9992_p11 = pnand %p9991_p9, %p9985_p4 }
  0xb5   : > { %9995 = shalt.err (!%p9992_p11)
}
  0xb6   : > { %s11950_s9 = sld [smem:[#allocation74_spill]]  ;;  %s10577_s3 = smov [#allocation28]  }
  0xb7   : > { %s1180_s16 = sshll.u32 %s10577_s3, 4  ;;  %s10578_s18 = smov [#allocation31]   ;;  %s1181_s16 = int_to_ptr.vmem [resolvable:$true] %s1180_s16 }
  0xb8   : > { %s1206_s15 = sshll.u32 %s10578_s18, 4  ;;  %s10007_s28 = scalar_lea.vmem %s1181_s16, 128  ;;  %s1207_s15 = int_to_ptr.vmem [resolvable:$true] %s1206_s15 }
  0xb9   : > { %p10008_p10 = scmp.ne.s32.totalorder %s1181_s16, %s10007_s28  ;;  %p10015_p2 = scmp.lt.s32.totalorder %s1181_s16, %s1181_s16 }
  0xba   : > { %p10016_p0 = scmp.lt.s32.totalorder %s10007_s28, %s10007_s28 }
  0xbb   : > { %p10010_p12 = pnand %p10008_p10, %p10830_p6 }
  0xbc   : > { %9112 = dma.hbm_to_vmem [thread:$0]  (!%p10820_p5), %s11950_s9, 32, %s1155_s26, [#allocation26], %s11949_s11, %s11949_s11, %s11948_s1  }
  0xbd   : > { %p10011_p13 = pneg %p10010_p12  ;;  %p10017_p1 = por %p10016_p0, %p10015_p2 }
  0xbf   : > { %p10018_p4 = pnand %p10017_p1, %p10011_p13 }
  0xc1   : > { %10021 = shalt.err (!%p10018_p4)
}
  0xc2   : > { %s11951_s23 = smov 4   ;;  %s11952_s12 = smov 64  }
  0xc3   : > { %9118 = dma.hbm_to_vmem [thread:$0]  (!%p10820_p5), %s10747_s17, 128, %s1181_s16, [#allocation29], %s11952_s12, %s11952_s12, %s11951_s23  }
  0xc4   : > { %s10033_s26 = scalar_lea.vmem %s1207_s15, 2048  ;;  %p10041_p11 = scmp.lt.s32.totalorder %s1207_s15, %s1207_s15 }
  0xc5   : > { %p10034_p8 = scmp.ne.s32.totalorder %s1207_s15, %s10033_s26  ;;  %p10042_p10 = scmp.lt.s32.totalorder %s10033_s26, %s10033_s26 }
  0xc7   : > { %p10036_p7 = pnand %p10034_p8, %p10830_p6  ;;  %p10043_p12 = por %p10042_p10, %p10041_p11 }
  0xc9   : > { %p10037_p9 = pneg %p10036_p7 }
  0xcb   : > { %p10044_p2 = pnand %p10043_p12, %p10037_p9 }
  0xcd   : > { %10047 = shalt.err (!%p10044_p2)
}
  0xce   : > { %s11953_s13 = sld [smem:[#allocation77_spill]]  ;;  %s10579_s28 = smov [#allocation34]  }
  0xcf   : > { %s1236_s3 = sshll.u32 %s10579_s28, 4  ;;  %s10580_s16 = smov [#allocation37]   ;;  %s1237_s3 = int_to_ptr.vmem [resolvable:$true] %s1236_s3 }
  0xd0   : > { %s1257_s18 = sshll.u32 %s10580_s16, 4  ;;  %s10059_s9 = scalar_lea.vmem %s1237_s3, 32  ;;  %s1258_s18 = int_to_ptr.vmem [resolvable:$true] %s1257_s18 }
  0xd1   : > { %p10060_p13 = scmp.ne.s32.totalorder %s1237_s3, %s10059_s9  ;;  %p10067_p4 = scmp.lt.s32.totalorder %s1237_s3, %s1237_s3 }
  0xd2   : > { %p10068_p8 = scmp.lt.s32.totalorder %s10059_s9, %s10059_s9 }
  0xd3   : > { %p10062_p0 = pnand %p10060_p13, %p10830_p6 }
  0xd4   : > { %9124 = dma.hbm_to_vmem [thread:$0]  (!%p10820_p5), %s11953_s13, 2048, %s1207_s15, [#allocation32], %s11952_s12, %s11952_s12, %s11951_s23  }
  0xd5   : > { %p10063_p1 = pneg %p10062_p0  ;;  %p10069_p7 = por %p10068_p8, %p10067_p4 }
  0xd7   : > { %p10070_p9 = pnand %p10069_p7, %p10063_p1 }
  0xd9   : > { %10073 = shalt.err (!%p10070_p9)
}
  0xda   : > { %s11954_s6 = sld [smem:[#allocation80_spill]]  ;;  %s10085_s15 = scalar_lea.vmem %s1258_s18, 1024 }
  0xdb   : > { %p10086_p11 = scmp.ne.s32.totalorder %s1258_s18, %s10085_s15  ;;  %p10093_p2 = scmp.lt.s32.totalorder %s1258_s18, %s1258_s18 }
  0xdc   : > { %p10094_p3 = scmp.lt.s32.totalorder %s10085_s15, %s10085_s15 }
  0xdd   : > { %p10088_p10 = pnand %p10086_p11, %p10830_p6 }
  0xde   : > { %p10095_p13 = por %p10094_p3, %p10093_p2 }
  0xdf   : > { %p10089_p12 = pneg %p10088_p10 }
  0xe0   : > { %9130 = dma.hbm_to_vmem [thread:$0]  (!%p10820_p5), %s11954_s6, 32, %s1237_s3, [#allocation35]  }
  0xe1   : > { %p10096_p0 = pnand %p10095_p13, %p10089_p12 }
  0xe3   : > { %10099 = shalt.err (!%p10096_p0)
}
  0xe4   : > { %9136 = dma.hbm_to_vmem [thread:$0]  (!%p10820_p5), %s10782_s21, 1024, %s1258_s18, [#allocation38], %s11952_s12, %s11952_s12, %s11951_s23  }
  0xe5   : > { %s10581_s9 = smov [#allocation2]   ;;  %s10582_s28 = smov [#allocation6]  }
  0xe6   : > { %s949_s26 = sshll.u32 %s10581_s9, 4  ;;  %s975_s3 = sshll.u32 %s10582_s28, 4  ;;  %s950_s26 = int_to_ptr.vmem [resolvable:$true] %s949_s26  ;;  %s976_s3 = int_to_ptr.vmem [resolvable:$true] %s975_s3 }
  0xe7   : > { %s10111_s16 = scalar_lea.vmem %s950_s26, 32  ;;  %p10119_p8 = scmp.lt.s32.totalorder %s950_s26, %s950_s26 }
  0xe8   : > { %p10112_p1 = scmp.ne.s32.totalorder %s950_s26, %s10111_s16  ;;  %p10120_p7 = scmp.lt.s32.totalorder %s10111_s16, %s10111_s16 }
  0xea   : > { %p10114_p4 = pnand %p10112_p1, %p10830_p6  ;;  %p10121_p9 = por %p10120_p7, %p10119_p8 }
  0xec   : > { %p10115_p3 = pneg %p10114_p4 }
  0xee   : > { %p10122_p11 = pnand %p10121_p9, %p10115_p3 }
  0xf0   : > { %10125 = shalt.err (!%p10122_p11)
}
  0xf1   : > { %9067 = dma.hbm_to_vmem [thread:$0]  (!%p10820_p5), %s10642_s29, 32, %s950_s26, [#allocation3], %s11949_s11, %s11949_s11, %s11948_s1  }
  0xf2   : > { %s10137_s18 = scalar_lea.vmem %s976_s3, 64  ;;  %p10145_p13 = scmp.lt.s32.totalorder %s976_s3, %s976_s3 }
  0xf3   : > { %p10138_p10 = scmp.ne.s32.totalorder %s976_s3, %s10137_s18  ;;  %p10146_p0 = scmp.lt.s32.totalorder %s10137_s18, %s10137_s18 }
  0xf5   : > { %p10140_p12 = pnand %p10138_p10, %p10830_p6  ;;  %p10147_p1 = por %p10146_p0, %p10145_p13 }
  0xf7   : > { %p10141_p2 = pneg %p10140_p12 }
  0xf9   : > { %p10148_p4 = pnand %p10147_p1, %p10141_p2 }
  0xfb   : > { %10151 = shalt.err (!%p10148_p4)
}
  0xfc   : > { %s10583_s15 = smov 32   ;;  %s11955_s8 = sld [smem:[#allocation63_spill]] }
  0xfd   : > { %s10584_s9 = smov 2   ;;  %s10585_s28 = smov [#allocation9]  }
  0xfe   : > { %s1001_s26 = sshll.u32 %s10585_s28, 4  ;;  %s10586_s16 = smov [#allocation12]   ;;  %s1002_s26 = int_to_ptr.vmem [resolvable:$true] %s1001_s26 }
  0xff   : > { %s1027_s6 = sshll.u32 %s10586_s16, 4  ;;  %s10163_s13 = scalar_lea.vmem %s1002_s26, 32  ;;  %s1028_s6 = int_to_ptr.vmem [resolvable:$true] %s1027_s6 }
 0x100   : > { %p10164_p3 = scmp.ne.s32.totalorder %s1002_s26, %s10163_s13  ;;  %p10171_p9 = scmp.lt.s32.totalorder %s1002_s26, %s1002_s26 }
 0x101   : > { %p10172_p11 = scmp.lt.s32.totalorder %s10163_s13, %s10163_s13 }
 0x102   : > { %9073 = dma.hbm_to_vmem [thread:$0]  (!%p10820_p5), %s11955_s8, 64, %s976_s3, [#allocation5], %s10583_s15, %s10583_s15, %s10584_s9  }
 0x103   : > { %p10166_p8 = pnand %p10164_p3, %p10830_p6  ;;  %p10173_p10 = por %p10172_p11, %p10171_p9 }
 0x105   : > { %p10167_p7 = pneg %p10166_p8 }
 0x107   : > { %p10174_p12 = pnand %p10173_p10, %p10167_p7 }
 0x109   : > { %10177 = shalt.err (!%p10174_p12)
}
 0x10a   : > { %9079 = dma.hbm_to_vmem [thread:$0]  (!%p10820_p5), %s10662_s19, 32, %s1002_s26, [#allocation8], %s11949_s11, %s11949_s11, %s11948_s1  }
 0x10b   : > { %s10189_s3 = scalar_lea.vmem %s1028_s6, 96  ;;  %p10197_p1 = scmp.lt.s32.totalorder %s1028_s6, %s1028_s6 }
 0x10c   : > { %p10190_p2 = scmp.ne.s32.totalorder %s1028_s6, %s10189_s3  ;;  %p10198_p4 = scmp.lt.s32.totalorder %s10189_s3, %s10189_s3 }
 0x10e   : > { %p10192_p13 = pnand %p10190_p2, %p10830_p6  ;;  %p10199_p3 = por %p10198_p4, %p10197_p1 }
 0x110   : > { %p10193_p0 = pneg %p10192_p13 }
 0x112   : > { %p10200_p8 = pnand %p10199_p3, %p10193_p0 }
 0x114   : > { %10203 = shalt.err (!%p10200_p8)
}
 0x115   : > { %s11915_s13 = smov 48   ;;  %s11956_s18 = sld [smem:[#allocation64_spill]] }
 0x116   : > { %s11916_s15 = smov 3   ;;  %s10589_s9 = smov [#allocation15]  }
 0x117   : > { %s1062_s28 = sshll.u32 %s10589_s9, 4  ;;  %s10590_s26 = smov [#allocation18]   ;;  %s1063_s28 = int_to_ptr.vmem [resolvable:$true] %s1062_s28 }
 0x118   : > { %s1088_s16 = sshll.u32 %s10590_s26, 4  ;;  %s10215_s8 = scalar_lea.vmem %s1063_s28, 2048  ;;  %s1089_s16 = int_to_ptr.vmem [resolvable:$true] %s1088_s16 }
 0x119   : > { %p10216_p7 = scmp.ne.s32.totalorder %s1063_s28, %s10215_s8  ;;  %p10223_p10 = scmp.lt.s32.totalorder %s1063_s28, %s1063_s28 }
 0x11a   : > { %p10224_p12 = scmp.lt.s32.totalorder %s10215_s8, %s10215_s8 }
 0x11b   : > { %9085 = dma.hbm_to_vmem [thread:$0]  (!%p10820_p5), %s11956_s18, 96, %s1028_s6, [#allocation11], %s11915_s13, %s11915_s13, %s11916_s15  }
 0x11c   : > { %p10218_p9 = pnand %p10216_p7, %p10830_p6  ;;  %p10225_p2 = por %p10224_p12, %p10223_p10 }
 0x11e   : > { %p10219_p11 = pneg %p10218_p9 }
 0x120   : > { %p10226_p13 = pnand %p10225_p2, %p10219_p11 }
 0x122   : > { %10229 = shalt.err (!%p10226_p13)
}
 0x123   : > { %s11957_s6 = sld [smem:[#allocation68_spill]]  ;;  %s10241_s3 = scalar_lea.vmem %s1089_s16, 2048 }
 0x124   : > { %p10242_p0 = scmp.ne.s32.totalorder %s1089_s16, %s10241_s3  ;;  %p10249_p3 = scmp.lt.s32.totalorder %s1089_s16, %s1089_s16 }
 0x125   : > { %p10250_p8 = scmp.lt.s32.totalorder %s10241_s3, %s10241_s3 }
 0x126   : > { %p10244_p1 = pnand %p10242_p0, %p10830_p6 }
 0x127   : > { %p10251_p7 = por %p10250_p8, %p10249_p3 }
 0x128   : > { %p10245_p4 = pneg %p10244_p1 }
 0x129   : > { %9091 = dma.hbm_to_vmem [thread:$0]  (!%p10820_p5), %s11957_s6, 2048, %s1063_s28, [#allocation14], %s11952_s12, %s11952_s12, %s11951_s23  }
 0x12a   : > { %p10252_p9 = pnand %p10251_p7, %p10245_p4 }
 0x12c   : > { %10255 = shalt.err (!%p10252_p9)
}
 0x12d   : > { %s11958_s8 = sld [smem:[#allocation70_spill]]  ;;  %s10591_s18 = smov [#allocation21]  }
 0x12e   : > { %s1115_s9 = sshll.u32 %s10591_s18, 4  ;;  %s1116_s9 = int_to_ptr.vmem [resolvable:$true] %s1115_s9 }
 0x12f   : > { %s10267_s28 = scalar_lea.vmem %s1116_s9, 2048  ;;  %p10275_p2 = scmp.lt.s32.totalorder %s1116_s9, %s1116_s9 }
 0x130   : > { %p10268_p11 = scmp.ne.s32.totalorder %s1116_s9, %s10267_s28  ;;  %p10276_p13 = scmp.lt.s32.totalorder %s10267_s28, %s10267_s28 }
 0x132   : > { %p10270_p10 = pnand %p10268_p11, %p10830_p6  ;;  %p10277_p0 = por %p10276_p13, %p10275_p2 }
 0x133   : > { %9097 = dma.hbm_to_vmem [thread:$0]  (!%p10820_p5), %s11958_s8, 2048, %s1089_s16, [#allocation17], %s11952_s12, %s11952_s12, %s11951_s23  }
 0x134   : > { %p10271_p12 = pneg %p10270_p10 }
 0x136   : > { %p10278_p1 = pnand %p10277_p0, %p10271_p12 }
 0x138   : > { %10281 = shalt.err (!%p10278_p1)
}
 0x139   : > { %s10592_s26 = smov 128   ;;  %s11959_s6 = sld [smem:[#allocation72_spill]] }
 0x13a   : > { %s10593_s3 = smov 8   ;;  %s10594_s16 = smov [#allocation24]  }
 0x13b   : > { %s1141_s8 = sshll.u32 %s10594_s16, 4  ;;  %s10595_s18 = smov [#allocation27]   ;;  %s1142_s8 = int_to_ptr.vmem [resolvable:$true] %s1141_s8 }
 0x13c   : > { %s1167_s13 = sshll.u32 %s10595_s18, 4  ;;  %s10293_s15 = scalar_lea.vmem %s1142_s8, 32  ;;  %s1168_s13 = int_to_ptr.vmem [resolvable:$true] %s1167_s13 }
 0x13d   : > { %p10294_p4 = scmp.ne.s32.totalorder %s1142_s8, %s10293_s15  ;;  %p10301_p7 = scmp.lt.s32.totalorder %s1142_s8, %s1142_s8 }
 0x13e   : > { %p10302_p9 = scmp.lt.s32.totalorder %s10293_s15, %s10293_s15 }
 0x13f   : > { %9103 = dma.hbm_to_vmem [thread:$0]  (!%p10820_p5), %s11959_s6, 2048, %s1116_s9, [#allocation20], %s10592_s26, %s10592_s26, %s10593_s3  }
 0x140   : > { %p10296_p3 = pnand %p10294_p4, %p10830_p6  ;;  %p10303_p11 = por %p10302_p9, %p10301_p7 }
 0x142   : > { %p10297_p8 = pneg %p10296_p3 }
 0x144   : > { %p10304_p10 = pnand %p10303_p11, %p10297_p8 }
 0x146   : > { %10307 = shalt.err (!%p10304_p10)
}
 0x147   : > { %s11960_s9 = sld [smem:[#allocation73_spill]]  ;;  %s10319_s28 = scalar_lea.vmem %s1168_s13, 96 }
 0x148   : > { %p10320_p12 = scmp.ne.s32.totalorder %s1168_s13, %s10319_s28  ;;  %p10327_p0 = scmp.lt.s32.totalorder %s1168_s13, %s1168_s13 }
 0x149   : > { %p10328_p1 = scmp.lt.s32.totalorder %s10319_s28, %s10319_s28 }
 0x14a   : > { %p10322_p2 = pnand %p10320_p12, %p10830_p6 }
 0x14b   : > { %p10329_p4 = por %p10328_p1, %p10327_p0 }
 0x14c   : > { %p10323_p13 = pneg %p10322_p2 }
 0x14d   : > { %9109 = dma.hbm_to_vmem [thread:$0]  (!%p10820_p5), %s11960_s9, 32, %s1142_s8, [#allocation23], %s11949_s11, %s11949_s11, %s11948_s1  }
 0x14e   : > { %p10330_p3 = pnand %p10329_p4, %p10323_p13 }
 0x150   : > { %10333 = shalt.err (!%p10330_p3)
}
 0x151   : > { %s11961_s15 = smov 3   ;;  %s11962_s26 = smov 48  }
 0x152   : > { %s11963_s6 = sld [smem:[#allocation75_spill]]  ;;  %s10596_s3 = smov [#allocation30]  }
 0x153   : > { %s1193_s11 = sshll.u32 %s10596_s3, 4  ;;  %s10597_s1 = smov [#allocation33]   ;;  %s1194_s11 = int_to_ptr.vmem [resolvable:$true] %s1193_s11 }
 0x154   : > { %s1219_s16 = sshll.u32 %s10597_s1, 4  ;;  %s10345_s8 = scalar_lea.vmem %s1194_s11, 2048  ;;  %s1220_s16 = int_to_ptr.vmem [resolvable:$true] %s1219_s16 }
 0x155   : > { %p10346_p8 = scmp.ne.s32.totalorder %s1194_s11, %s10345_s8  ;;  %p10353_p11 = scmp.lt.s32.totalorder %s1194_s11, %s1194_s11 }
 0x156   : > { %p10354_p10 = scmp.lt.s32.totalorder %s10345_s8, %s10345_s8 }
 0x157   : > { %p10348_p7 = pnand %p10346_p8, %p10830_p6 }
 0x158   : > { %9115 = dma.hbm_to_vmem [thread:$0]  (!%p10820_p5), %s11963_s6, 96, %s1168_s13, [#allocation26], %s11962_s26, %s11962_s26, %s11961_s15  }
 0x159   : > { %p10349_p9 = pneg %p10348_p7  ;;  %p10355_p12 = por %p10354_p10, %p10353_p11 }
 0x15b   : > { %p10356_p2 = pnand %p10355_p12, %p10349_p9 }
 0x15d   : > { %10359 = shalt.err (!%p10356_p2)
}
 0x15e   : > { %s11964_s13 = sld [smem:[#allocation76_spill]]  ;;  %s10371_s18 = scalar_lea.vmem %s1220_s16, 2048 }
 0x15f   : > { %p10372_p13 = scmp.ne.s32.totalorder %s1220_s16, %s10371_s18  ;;  %p10379_p4 = scmp.lt.s32.totalorder %s1220_s16, %s1220_s16 }
 0x160   : > { %p10380_p3 = scmp.lt.s32.totalorder %s10371_s18, %s10371_s18 }
 0x161   : > { %p10374_p0 = pnand %p10372_p13, %p10830_p6 }
 0x162   : > { %p10381_p8 = por %p10380_p3, %p10379_p4 }
 0x163   : > { %p10375_p1 = pneg %p10374_p0 }
 0x164   : > { %9121 = dma.hbm_to_vmem [thread:$0]  (!%p10820_p5), %s11964_s13, 2048, %s1194_s11, [#allocation29], %s11952_s12, %s11952_s12, %s11951_s23  }
 0x165   : > { %p10382_p7 = pnand %p10381_p8, %p10375_p1 }
 0x167   : > { %10385 = shalt.err (!%p10382_p7)
}
 0x168   : > { %s11965_s9 = sld [smem:[#allocation78_spill]]  ;;  %s10598_s28 = smov [#allocation36]  }
 0x169   : > { %s1247_s15 = sshll.u32 %s10598_s28, 4  ;;  %s10599_s26 = smov [#allocation39]   ;;  %s1248_s15 = int_to_ptr.vmem [resolvable:$true] %s1247_s15 }
 0x16a   : > { %s1270_s6 = sshll.u32 %s10599_s26, 4  ;;  %s10397_s3 = scalar_lea.vmem %s1248_s15, 16  ;;  %s1271_s6 = int_to_ptr.vmem [resolvable:$true] %s1270_s6 }
 0x16b   : > { %p10398_p9 = scmp.ne.s32.totalorder %s1248_s15, %s10397_s3  ;;  %s10404_s11 = scalar_lea.vmem %s1248_s15, 32 }
 0x16c   : > { %p10405_p12 = scmp.lt.s32.totalorder %s1248_s15, %s1248_s15  ;;  %p10406_p2 = scmp.lt.s32.totalorder %s10404_s11, %s10397_s3 }
 0x16d   : > { %p10400_p11 = pnand %p10398_p9, %p10830_p6 }
 0x16e   : > { %9127 = dma.hbm_to_vmem [thread:$0]  (!%p10820_p5), %s11965_s9, 2048, %s1220_s16, [#allocation32], %s11952_s12, %s11952_s12, %s11951_s23  }
 0x16f   : > { %p10401_p10 = pneg %p10400_p11  ;;  %p10407_p13 = por %p10406_p2, %p10405_p12 }
 0x171   : > { %p10408_p0 = pnand %p10407_p13, %p10401_p10 }
 0x173   : > { %10411 = shalt.err (!%p10408_p0)
}
 0x174   : > { %s11966_s1 = sld [smem:[#allocation81_spill]]  ;;  %s10423_s16 = scalar_lea.vmem %s1271_s6, 1024 }
 0x175   : > { %p10424_p1 = scmp.ne.s32.totalorder %s1271_s6, %s10423_s16  ;;  %p10431_p8 = scmp.lt.s32.totalorder %s1271_s6, %s1271_s6 }
 0x176   : > { %p10432_p7 = scmp.lt.s32.totalorder %s10423_s16, %s10423_s16 }
 0x177   : > { %p10426_p4 = pnand %p10424_p1, %p10830_p6 }
 0x178   : > { %p10433_p9 = por %p10432_p7, %p10431_p8 }
 0x179   : > { %p10427_p3 = pneg %p10426_p4 }
 0x17a   : > { %9133 = dma.hbm_to_vmem [thread:$0]  (!%p10820_p5), %s11966_s1, 16, %s1248_s15, [#allocation35]  }
 0x17b   : > { %p10434_p11 = pnand %p10433_p9, %p10427_p3 }
 0x17d   : > { %10437 = shalt.err (!%p10434_p11)
}
 0x17e   : > { %9139 = dma.hbm_to_vmem [thread:$0]  (!%p10820_p5), %s10787_s5, 1024, %s1271_s6, [#allocation38], %s11952_s12, %s11952_s12, %s11951_s23  }
 0x17f   : > { %s10600_s8 = smov [#allocation40]  }
 0x180   : > { %s1284_s13 = sshll.u32 %s10600_s8, 4  ;;  %s1285_s13 = int_to_ptr.vmem [resolvable:$true] %s1284_s13 }
 0x181   : > { %s10449_s18 = scalar_lea.vmem %s1285_s13, 16  ;;  %s10456_s9 = scalar_lea.vmem %s1285_s13, 32 }
 0x182   : > { %p10450_p10 = scmp.ne.s32.totalorder %s1285_s13, %s10449_s18  ;;  %p10457_p13 = scmp.lt.s32.totalorder %s1285_s13, %s1285_s13 }
 0x183   : > { %p10458_p0 = scmp.lt.s32.totalorder %s10456_s9, %s10449_s18 }
 0x184   : > { %p10452_p12 = pnand %p10450_p10, %p10830_p6 }
 0x185   : > { %p10459_p1 = por %p10458_p0, %p10457_p13 }
 0x186   : > { %p10453_p2 = pneg %p10452_p12 }
 0x188   : > { %p10460_p4 = pnand %p10459_p1, %p10453_p2 }
 0x18a   : > { %10463 = shalt.err (!%p10460_p4)
}
 0x18b   : > { %9142 = dma.hbm_to_vmem [thread:$0]  (!%p10820_p5), %s10792_s30, 16, %s1285_s13, [#allocation41]  }
 0x18c   : > { %p11967_p3 = scmp.ne.s32.totalorder %s11943_s10, 0 }
 0x18d   : > { %p11968_p8 = scmp.eq.s32.totalorder (!%p11967_p3), %s10805_s0, 0 }
 0x18e   : > { %1340 = sbr.rel (%p11967_p3) target bundleno = 10742 (0x29f6), region = 168 }
 0x193   : > { %10469 = dma.done.wait (%p11968_p8), [#allocation3], 32   ;;  %p11969_p7 = pmov %p11968_p8 }
 0x195   : > { %10471 = vsyncadd (%p11969_p7), [#allocation3], 4294967264  ;;  %p11970_p6 = pmov %p11969_p7 }
 0x197   : > { %10473 = dma.done.wait (%p11970_p6), [#allocation5], 96   ;;  %p11971_p9 = pmov %p11970_p6 }
 0x198   : > { %p11972_p11 = pmov %p11970_p6 }
 0x199   : > { %10475 = vsyncadd (%p11971_p9), [#allocation5], 4294967200 }
 0x19a   : > { %10477 = dma.done.wait (%p11972_p11), [#allocation8], 64   ;;  %p11973_p5 = pmov %p11970_p6 }
 0x19c   : > { %10479 = vsyncadd (%p11973_p5), [#allocation8], 4294967232  ;;  %p11974_p10 = pmov %p11973_p5 }
 0x19d   : > { %p11975_p12 = pmov %p11973_p5 }
 0x19e   : > { %10481 = dma.done.wait (%p11974_p10), [#allocation11], 128  }
 0x19f   : > { %10483 = vsyncadd (%p11975_p12), [#allocation11], 4294967168  ;;  %p11976_p2 = pmov %p11973_p5 }
 0x1a1   : > { %10485 = dma.done.wait (%p11976_p2), [#allocation14], 4096   ;;  %p11977_p13 = pmov %p11976_p2 }
 0x1a2   : > { %p11978_p0 = pmov %p11976_p2 }
 0x1a3   : > { %10487 = vsyncadd (%p11977_p13), [#allocation14], 4294963200 }
 0x1a4   : > { %10489 = dma.done.wait (%p11978_p0), [#allocation17], 4096   ;;  %p11979_p1 = pmov %p11978_p0 }
 0x1a5   : > { %p11980_p4 = pmov %p11978_p0 }
 0x1a6   : > { %10491 = vsyncadd (%p11979_p1), [#allocation17], 4294963200 }
 0x1a7   : > { %10493 = dma.done.wait (%p11980_p4), [#allocation20], 2080   ;;  %p11981_p3 = pmov %p11978_p0 }
 0x1a8   : > { %p11982_p8 = pmov %p11978_p0 }
 0x1a9   : > { %10495 = vsyncadd (%p11981_p3), [#allocation20], 4294965216 }
 0x1aa   : > { %10497 = dma.done.wait (%p11982_p8), [#allocation23], 64   ;;  %p11983_p7 = pmov %p11978_p0 }
 0x1ab   : > { %p11984_p6 = pmov %p11978_p0 }
 0x1ac   : > { %10499 = vsyncadd (%p11983_p7), [#allocation23], 4294967232 }
 0x1ad   : > { %10501 = dma.done.wait (%p11984_p6), [#allocation26], 128   ;;  %p11985_p9 = pmov %p11978_p0 }
 0x1ae   : > { %p11986_p11 = pmov %p11978_p0 }
 0x1af   : > { %10503 = vsyncadd (%p11985_p9), [#allocation26], 4294967168 }
 0x1b0   : > { %10505 = dma.done.wait (%p11986_p11), [#allocation29], 2176   ;;  %p11987_p5 = pmov %p11978_p0 }
 0x1b1   : > { %p11988_p10 = pmov %p11978_p0 }
 0x1b2   : > { %10507 = vsyncadd (%p11987_p5), [#allocation29], 4294965120 }
 0x1b3   : > { %10509 = dma.done.wait (%p11988_p10), [#allocation32], 4096   ;;  %p11989_p12 = pmov %p11978_p0 }
 0x1b4   : > { %p11990_p2 = pmov %p11978_p0 }
 0x1b5   : > { %10511 = vsyncadd (%p11989_p12), [#allocation32], 4294963200 }
 0x1b6   : > { %10513 = dma.done.wait (%p11990_p2), [#allocation35], 48   ;;  %p11991_p13 = pmov %p11978_p0 }
 0x1b8   : > { %10515 = vsyncadd (%p11991_p13), [#allocation35], 4294967248 }
 0x1b9   : > { %10517 = dma.done.wait (%p11978_p0), [#allocation38], 2048   ;;  %p11992_p1 = pmov %p11978_p0 }
 0x1ba   : > { %p11993_p4 = pmov %p11978_p0 }
 0x1bb   : > { %10519 = vsyncadd (%p11992_p1), [#allocation38], 4294965248 }
 0x1bc   : > { %10521 = dma.done.wait (%p11993_p4), [#allocation41], 16   ;;  %p11994_p3 = pmov %p11978_p0 }
 0x1bd   : > { %v10601_v0 = vmov 0   ;;  %v10602_v1 = vmov 0.0   ;;  %s11995_s12 = sld [smem:[#allocation59_spill]]  ;;  %p1551_p8 = scmp.lt.s32.totalorder %s10805_s0, 1  ;;  %v9279_v2 = vld [vmem:[#allocation21 + $0x74] ss:$8 sps:$4 sm:$0xff]  }
 0x1be   : > { %10523 = vsyncadd (%p11994_p3), [#allocation41], 4294967280  ;;  %1717 = vmatprep.mubr.bf16.mxu0 %v10601_v0  ;;  %8384 = vmatprep.subr.bf16.mxu1 %v10602_v1  ;;  %v9281_v3 = vld [vmem:[#allocation21 + $0x70] ss:$8 sps:$4 sm:$0xff]   ;;  %v9282_v4 = vld [vmem:[#allocation21 + $0x64] ss:$8 sps:$4 sm:$0xff]  }
 0x1bf   : > { %1685 = vmatprep.subr.bf16.mxu0 %v9279_v2  ;;  %s12007_s0 = smov (!%p1551_p8, %s10805_s0), 1  ;;  %v9284_v5 = vld [vmem:[#allocation21 + $0x60] ss:$8 sps:$4 sm:$0xff]   ;;  %v9285_v6 = vld [vmem:[#allocation21 + $0x54] ss:$8 sps:$4 sm:$0xff]   ;;  %s11996_s2 = sld [smem:[#allocation79_spill]] }
 0x1c0   : > { %1686 = vmatpush1.bf16.msra.mxu0 %v9281_v3  ;;  %s11100_s10 = sshll.u32 %s12007_s0, 3  ;;  %v9287_v7 = vld [vmem:[#allocation21 + $0x50] ss:$8 sps:$4 sm:$0xff]   ;;  %v9288_v8 = vld [vmem:[#allocation21 + $0x44] ss:$8 sps:$4 sm:$0xff]   ;;  %vm10603_vm0 = vmmov 0  }
 0x1c1   : > { %1687 = vmatprep.subr.bf16.mxu0 %v9282_v4  ;;  %v9290_v9 = vld [vmem:[#allocation21 + $0x40] ss:$8 sps:$4 sm:$0xff]   ;;  %v9291_v10 = vld [vmem:[#allocation21 + $0x34] ss:$8 sps:$4 sm:$0xff]   ;;  %v9293_v12 = vld [vmem:[#allocation21 + $0x30] ss:$8 sps:$4 sm:$0xff]   ;;  %8400 = vmatprep.mubr.msk.bf16.mxu1 %vm10603_vm0, %v10602_v1 }
 0x1c2   : > { %v9304_v11 = vld [vmem:[#allocation39 + $0x38] sm:$0xff]   ;;  %v9305_v13 = vld [vmem:[#allocation39 + $0x30] sm:$0xff]   ;;  %v9306_v15 = vld [vmem:[#allocation39 + $0x28] sm:$0xff]   ;;  %s11997_s23 = sld [smem:[#allocation60_spill]]  ;;  %s8100_s26 = sshll.u32 %s12007_s0, 4  ;;  %vm2258_vm11 = vcmask 130048  }
 0x1c3   : > { %s1568_s22 = scalar_lea.vmem %s11995_s12, %s11100_s10  ;;  %8385 = vmatpush3.bf16.msra.mxu1 %v9304_v11  ;;  %v9294_v14 = vld [vmem:[#allocation21 + $0x24] ss:$8 sps:$4 sm:$0xff]   ;;  %v9296_v16 = vld [vmem:[#allocation21 + $0x20] ss:$8 sps:$4 sm:$0xff]   ;;  %v9297_v17 = vld [vmem:[#allocation21 + $0x14] ss:$8 sps:$4 sm:$0xff]   ;;  %v1896_v11 = vlaneseq }
 0x1c4   : > { %1688 = vmatpush1.bf16.msra.mxu0 %v9284_v5  ;;  %8386 = vmatprep.subr.bf16.mxu1 %v10602_v1  ;;  %v9307_v18 = vld [vmem:[#allocation39 + $0x20] sm:$0xff]   ;;  %v9300_v20 = vld [vmem:[#allocation21 + $0x4] ss:$8 sps:$4 sm:$0xff]   ;;  %v9308_v21 = vld [vmem:[#allocation39 + $0x18] sm:$0xff]   ;;  %s11998_s15 = sld [smem:[#allocation57_spill]]  ;;  %vm4347_vm12 = vcmask 64512  }
 0x1c5   : > { %1689 = vmatprep.subr.bf16.mxu0 %v9285_v6  ;;  %v9299_v19 = vld [vmem:[#allocation21 + $0x10] ss:$8 sps:$4 sm:$0xff]   ;;  %v9302_v22 = vld [vmem:[#allocation21] ss:$8 sps:$4 sm:$0xff]   ;;  %s12000_s3 = sld [smem:[#allocation61_spill]] }
 0x1c6   : > { %v9303_v23 = vld [vmem:[%s1568_s22] sm:$0xff]   ;;  %v9310_v25 = vld [vmem:[#allocation39 + $0x8] sm:$0xff]   ;;  %v9311_v26 = vld [vmem:[#allocation39] sm:$0xff]   ;;  %s12001_s1 = sld [smem:[#allocation58_spill]] }
 0x1c7   : > { %8387 = vmatpush3.bf16.msra.mxu1 %v9305_v13  ;;  %v9309_v24 = vld [vmem:[#allocation39 + $0x10] sm:$0xff]   ;;  %v9312_v27 = vld [vmem:[%s11996_s2 + $0xa8] ss:$12 sps:$4 sm:$0xff]   ;;  %v9314_v28 = vld [vmem:[%s11996_s2 + $0xac] ss:$12 sps:$4 sm:$0xff]   ;;  %s12002_s8 = sld [smem:[#allocation67_spill]] }
 0x1c8   : > { %1690 = vmatpush1.bf16.msra.mxu0 %v9287_v7  ;;  %8388 = vmatprep.subr.bf16.mxu1 %v10602_v1  ;;  %v9318_v29 = vld [vmem:[%s11996_s2 + $0x94] ss:$12 sps:$4 sm:$0xff]   ;;  %v9316_v30 = vld [vmem:[%s11996_s2 + $0x90] ss:$12 sps:$4 sm:$0xff]   ;;  %v9320_v32 = vld [vmem:[%s11996_s2 + $0x78] ss:$12 sps:$4 sm:$0xff]   ;;  %s1571_s28 = scalar_lea.vmem %s11997_s23, %s12007_s0  ;;  %s1579_s23 = scalar_lea.vmem %s10797_s4, %s11100_s10 }
 0x1c9   : > { %1691 = vmatprep.subr.bf16.mxu0 %v9288_v8  ;;  %v9322_v31 = vld [vmem:[%s11996_s2 + $0x7c] ss:$12 sps:$4 sm:$0xff]   ;;  %v9326_v33 = vld [vmem:[%s11996_s2 + $0x64] ss:$12 sps:$4 sm:$0xff]   ;;  %v9324_v34 = vld [vmem:[%s11996_s2 + $0x60] ss:$12 sps:$4 sm:$0xff]  }
 0x1ca   : > { %v9330_v35 = vld [vmem:[%s11996_s2 + $0x4c] ss:$12 sps:$4 sm:$0xff]   ;;  %v9328_v36 = vld [vmem:[%s11996_s2 + $0x48] ss:$12 sps:$4 sm:$0xff]   ;;  %v9332_v38 = vld [vmem:[%s11996_s2 + $0x30] ss:$12 sps:$4 sm:$0xff]   ;;  %s1559_s6 = scalar_lea.vmem %s11998_s15, %s8100_s26 }
 0x1cb   : > { %8389 = vmatpush3.bf16.msra.mxu1 %v9306_v15  ;;  %v9334_v37 = vld [vmem:[%s11996_s2 + $0x34] ss:$12 sps:$4 sm:$0xff]   ;;  %v9315_v49 = vld [vmem:[%s11996_s2 + $0xb0] ss:$12 sps:$4 sm:$0xff]   ;;  %v9319_v51 = vld [vmem:[%s11996_s2 + $0x98] ss:$12 sps:$4 sm:$0xff]   ;;  %s1575_s11 = scalar_lea.vmem %s12000_s3, %s11100_s10 }
 0x1cc   : > { %1692 = vmatpush1.bf16.msra.mxu0 %v9290_v9  ;;  %8390 = vmatprep.subr.bf16.mxu1 %v10602_v1  ;;  %v9323_v52 = vld [vmem:[%s11996_s2 + $0x80] ss:$12 sps:$4 sm:$0xff]   ;;  %v9327_v53 = vld [vmem:[%s11996_s2 + $0x68] ss:$12 sps:$4 sm:$0xff]   ;;  %v9331_v54 = vld [vmem:[%s11996_s2 + $0x50] ss:$12 sps:$4 sm:$0xff]   ;;  %s11516_s16 = scalar_lea.vmem %s12001_s1, %s11100_s10 }
 0x1cd   : > { %1693 = vmatprep.subr.bf16.mxu0 %v9291_v10  ;;  %v9335_v55 = vld [vmem:[%s11996_s2 + $0x38] ss:$12 sps:$4 sm:$0xff]   ;;  %v9338_v56 = vld [vmem:[%s11996_s2 + $0x1c] ss:$12 sps:$4 sm:$0xff]   ;;  %v9339_v58 = vld [vmem:[%s11996_s2 + $0x20] ss:$12 sps:$4 sm:$0xff]  }
 0x1ce   : > { %v9336_v57 = vld [vmem:[%s11996_s2 + $0x18] ss:$12 sps:$4 sm:$0xff]   ;;  %v9340_v60 = vld [vmem:[%s11996_s2] ss:$12 sps:$4 sm:$0xff]   ;;  %v9343_v61 = vld [vmem:[%s11996_s2 + $0x8] ss:$12 sps:$4 sm:$0xff]  }
 0x1cf   : > { %8391 = vmatpush3.bf16.msra.mxu1 %v9307_v18  ;;  %v9342_v59 = vld [vmem:[%s11996_s2 + $0x4] ss:$12 sps:$4 sm:$0xff]   ;;  %v7674_v62 = vld [vmem:[#allocation40] ss:$0 sm:$0xff]  ;;  %v7683_v4 = vld [vmem:[%s1571_s28] ss:$0 sm:$0xff] }
 0x1d0   : > { %1694 = vmatpush1.bf16.msra.mxu0 %v9293_v12  ;;  %8392 = vmatprep.subr.bf16.mxu1 %v10602_v1  ;;  %v11159_v12 = vshrl.u32 %v1896_v11, 7  ;;  %v1893_v15 = vld [vmem:[#allocation27] sm:$0x7]  ;;  %s11999_s0 = sld [smem:[#allocation71_spill]] }
 0x1d1   : > { %1695 = vmatprep.subr.bf16.mxu0 %v9294_v14  ;;  %v2124_v14 = vand.u32 127, %v1896_v11  ;;  %s12003_s13 = sld [smem:[#allocation65_spill]] }
 0x1d2   : > { %v11162_v13 = vsub.s32 0, %v11159_v12  ;;  %s12004_s18 = sld [smem:[#allocation56_spill]] }
 0x1d3   : > { %8393 = vmatpush3.bf16.msra.mxu1 %v9308_v21  ;;  %vm2126_vm1 = vcmp.lt.s32.totalorder %v2124_v14, 8  ;;  %vm2130_vm2 = vcmp.ge.s32.totalorder %v2124_v14, 8  ;;  %vm2131_vm3 = vcmp.lt.s32.totalorder %v2124_v14, 16  ;;  %vm2135_vm5 = vcmp.ge.s32.totalorder %v2124_v14, 16  ;;  %s12005_s22 = sld [smem:[#allocation66_spill]] }
 0x1d4   : > { %1696 = vmatpush1.bf16.msra.mxu0 %v9296_v16  ;;  %8394 = vmatprep.subr.bf16.mxu1 %v10602_v1  ;;  %v1899_v16 = vrot.slane %v1893_v15, %v11162_v13  ;;  %vm2132_vm4 = vmand %vm2130_vm2, %vm2131_vm3  ;;  %vm2136_vm6 = vcmp.lt.s32.totalorder %v2124_v14, 24  ;;  %vm2140_vm8 = vcmp.ge.s32.totalorder %v2124_v14, 24  ;;  %vm2141_vm9 = vcmp.lt.s32.totalorder %v2124_v14, 32 }
 0x1d5   : > { %1697 = vmatprep.subr.bf16.mxu0 %v9297_v17  ;;  %v11166_v17 = vsub.s32 2, %v11159_v12  ;;  %vm2137_vm7 = vmand %vm2135_vm5, %vm2136_vm6 }
 0x1d6   : > { %vm2142_vm10 = vmand %vm2140_vm8, %vm2141_vm9 }
 0x1d7   : > { %8395 = vmatpush3.bf16.msra.mxu1 %v9309_v24 }
 0x1d8   : > { %1698 = vmatpush1.bf16.msra.mxu0 %v9299_v19  ;;  %8396 = vmatprep.subr.bf16.mxu1 %v10602_v1  ;;  %s11624_s9 = scalar_lea.vmem %s12004_s18, %s11100_s10 }
 0x1d9   : > { %1699 = vmatprep.subr.bf16.mxu0 %v9300_v20  ;;  %v11169_v20 = vsel %vm2126_vm1, 1.0, %v10602_v1 }
 0x1db   : > { %8397 = vmatpush3.bf16.msra.mxu1 %v9310_v25  ;;  %v1907_v25 = vrot.slane %v1893_v15, %v11166_v17 }
 0x1dc   : > { %1700 = vmatpush1.bf16.msra.mxu0 %v9302_v22  ;;  %8398 = vmatprep.subr.bf16.mxu1 %v10602_v1  ;;  %v11172_v22 = vsub.s32 1, %v11159_v12 }
 0x1dd   : > { %2039 = vmatprep.subr.bf16.mxu0 %v9314_v28 }
 0x1df   : > { %1718 = vmatmul.mubr.bf16.vlgmr.msra.gmra.mxu0 %v9303_v23  ;;  %8399 = vmatpush3.bf16.msra.mxu1 %v9311_v26 }
 0x1e0   : > { %2071 = vmatprep.mubr.bf16.mxu0 %v10601_v0  ;;  %8404 = vmatprep.subr.bf16.mxu1 %v10602_v1 }
 0x1e1   : > { %2040 = vmatpush1.bf16.msra.mxu0 %v9312_v27 }
 0x1e2   : > { %2041 = vmatprep.subr.bf16.mxu0 %v9318_v29  ;;  %v1903_v29 = vrot.slane %v1893_v15, %v11172_v22 }
 0x1e5   : > { %2042 = vmatpush1.bf16.msra.mxu0 %v9316_v30 }
 0x1e6   : > { %2043 = vmatprep.subr.bf16.mxu0 %v9322_v31 }
 0x1e9   : > { %2044 = vmatpush1.bf16.msra.mxu0 %v9320_v32 }
 0x1ea   : > { %2045 = vmatprep.subr.bf16.mxu0 %v9326_v33 }
 0x1ed   : > { %2046 = vmatpush1.bf16.msra.mxu0 %v9324_v34 }
 0x1ee   : > { %2047 = vmatprep.subr.bf16.mxu0 %v9330_v35 }
 0x1f1   : > { %2048 = vmatpush1.bf16.msra.mxu0 %v9328_v36 }
 0x1f2   : > { %2049 = vmatprep.subr.bf16.mxu0 %v9334_v37  ;;  %v11179_v37 = vsel %vm2132_vm4, 1.0, %v10602_v1 }
 0x1f5   : > { %2050 = vmatpush1.bf16.msra.mxu0 %v9332_v38 }
 0x1f6   : > { %2051 = vmatprep.subr.bf16.mxu0 %v9338_v56 }
 0x1f9   : > { %2052 = vmatpush1.bf16.msra.mxu0 %v9336_v57 }
 0x1fa   : > { %2053 = vmatprep.subr.bf16.mxu0 %v9342_v59 }
 0x1fd   : > { %2054 = vmatpush1.bf16.msra.mxu0 %v9340_v60 }
 0x29f   : > { %v1719_v39 = vpop.f32.mrf.mxu0 }
 0x2a0   : > { %v1728_v44 = vmul.f32 %v1719_v39, %v1719_v39 }
 0x2a1   : > { %v1721_v40 = vpop.f32.mrf.mxu0 }
 0x2a2   : > { %v1730_v42 = vmul.f32 %v1721_v40, %v1721_v40  ;;  %v11185_v40 = vsel %vm2137_vm7, 1.0, %v10602_v1 }
 0x2a3   : > { %v1723_v41 = vpop.f32.mrf.mxu0 }
 0x2a4   : > { %v1729_v45 = vmul.f32 %v1723_v41, %v1723_v41  ;;  %v1732_v47 = vadd.f32 %v1730_v42, %v1728_v44 }
 0x2a5   : > { %v1725_v43 = vpop.f32.mrf.mxu0 }
 0x2a6   : > { %v1731_v46 = vmul.f32 %v1725_v43, %v1725_v43  ;;  %v11190_v43 = vsel %vm2142_vm10, 1.0, %v10602_v1 }
 0x2a8   : > { %v1733_v48 = vadd.f32 %v1731_v46, %v1729_v45 }
 0x2aa   : > { %v1752_v50 = vpack.c.bf16 %v1733_v48, %v1732_v47  ;;  %v11199_v48 = vld [vmem:[%s1559_s6] sm:$0xff] }
 0x2ac   : > { %8401 = vmatmul.mubr.bf16.vlgmr.msra.gmra.mxu1 %v1752_v50 }
 0x2ad   : > { %8405 = vmatpush3.bf16.msra.mxu1 %v9315_v49  ;;  %8420 = vmatprep.mubr.msk.bf16.mxu1 %vm10603_vm0, %v10602_v1  ;;  %v11201_v49 = vld [vmem:[%s1559_s6 + $0x8] sm:$0xff] }
 0x2ae   : > { %8406 = vmatprep.subr.bf16.mxu1 %v10602_v1 }
 0x2b1   : > { %8407 = vmatpush3.bf16.msra.mxu1 %v9319_v51 }
 0x2b2   : > { %8408 = vmatprep.subr.bf16.mxu1 %v10602_v1 }
 0x2b5   : > { %8409 = vmatpush3.bf16.msra.mxu1 %v9323_v52 }
 0x2b6   : > { %8410 = vmatprep.subr.bf16.mxu1 %v10602_v1 }
 0x2b9   : > { %8411 = vmatpush3.bf16.msra.mxu1 %v9327_v53 }
 0x2ba   : > { %8412 = vmatprep.subr.bf16.mxu1 %v10602_v1 }
 0x2bd   : > { %8413 = vmatpush3.bf16.msra.mxu1 %v9331_v54 }
 0x2be   : > { %8414 = vmatprep.subr.bf16.mxu1 %v10602_v1 }
 0x2c1   : > { %8415 = vmatpush3.bf16.msra.mxu1 %v9335_v55 }
 0x2c2   : > { %8416 = vmatprep.subr.bf16.mxu1 %v10602_v1 }
 0x2c5   : > { %8417 = vmatpush3.bf16.msra.mxu1 %v9339_v58 }
 0x2c6   : > { %8418 = vmatprep.subr.bf16.mxu1 %v10602_v1 }
 0x2c9   : > { %8419 = vmatpush3.bf16.msra.mxu1 %v9343_v61 }
 0x36c   : > { %v1841_v63 = vpop.f32.mrf.mxu1 }
 0x36d   : > { %v1842_v3 = vadd.f32 %v7674_v62, %v1841_v63 }
 0x36e   : > { %v8402_v2 = vpop.f32.mrf.mxu1 }
 0x36f   : > { %v11153_v8 = vadd.f32 %v7683_v4, %v1842_v3 }
 0x370   : > { %v1844_v5 = vpop.f32.mrf.mxu1 }
 0x371   : > { %v1845_v6 = vadd.f32 %v7674_v62, %v1844_v5 }
 0x372   : > { %v8403_v7 = vpop.f32.mrf.mxu1 }
 0x373   : > { %v11155_v9 = vadd.f32 %v7683_v4, %v1845_v6 }
 0x375   : > { %v1894_v10 = vpack.c.bf16 %v11155_v9, %v11153_v8 }
 0x377   : > { %2072 = vmatmul.mubr.bf16.vlgmr.msra.gmra.mxu0 %v1894_v10  ;;  %8421 = vmatmul.mubr.bf16.vlgmr.msra.gmra.mxu1 %v1894_v10 }
 0x437   : > { %v2073_v18 = vpop.f32.mrf.mxu0  ;;  %v2116_v19 = vpop.f32.mrf.mxu1 }
 0x438   : > { %v2074_v21 = vadd.f32 %v2073_v18, %v1899_v16  ;;  %v2117_v33 = vadd.f32 %v2116_v19, %v1907_v25 }
 0x439   : > { %v2075_v23 = vpop.f32.mrf.mxu0  ;;  %v8422_v24 = vpop.f32.mrf.mxu1 }
 0x43a   : > { %v2145_v26 = vmul.f32 %v11169_v20, %v2074_v21  ;;  %v2076_v35 = vadd.f32 %v2075_v23, %v1903_v29  ;;  %v2147_v39 = vmul.f32 %v11179_v37, %v2074_v21  ;;  %v2149_v42 = vmul.f32 %v11185_v40, %v2074_v21 }
 0x43b   : > { %v2077_v27 = vpop.f32.mrf.mxu0  ;;  %v2119_v28 = vpop.f32.mrf.mxu1  ;;  %v2151_v45 = vmul.f32 %v11190_v43, %v2074_v21 }
 0x43c   : > { %v2120_v30 = vadd.f32 %v2119_v28, %v1907_v25  ;;  %8428 = vmatprep.mubr.f32.mxu0 %v2145_v26  ;;  %v2078_v36 = vadd.f32 %v2077_v27, %v1899_v16 }
 0x43d   : > { %v2079_v31 = vpop.f32.mrf.mxu0  ;;  %v8423_v32 = vpop.f32.mrf.mxu1 }
 0x43e   : > { %v2080_v34 = vadd.f32 %v2079_v31, %v1903_v29  ;;  %8440 = vmatprep.subr.mxu1 %v2120_v30  ;;  %v2146_v38 = vmul.f32 %v11169_v20, %v2078_v36  ;;  %v2148_v41 = vmul.f32 %v11179_v37, %v2078_v36  ;;  %v2150_v44 = vmul.f32 %v11185_v40, %v2078_v36 }
 0x43f   : > { %8441 = vmatpush3.msra.mxu1 %v2120_v30  ;;  %v2152_v46 = vmul.f32 %v11190_v43, %v2078_v36 }
 0x440   : > { %8424 = vmatprep.subr.mxu0 %v2080_v34  ;;  %8442 = vmatprep.subr.mxu1 %v2117_v33 }
 0x441   : > { %8425 = vmatpush3.xpose.msra.mxu0 %v2080_v34  ;;  %8443 = vmatpush3.msra.mxu1 %v2117_v33 }
 0x442   : > { %8426 = vmatprep.subr.mxu0 %v2076_v35  ;;  %8476 = vmatprep.subr.bf16.mxu1 %v10602_v1 }
 0x445   : > { %8427 = vmatpush3.xpose.msra.mxu0 %v2076_v35 }
 0x446   : > { %8456 = vmatprep.subr.bf16.mxu0 %v10602_v1 }
 0x448   : > { %8429 = vmatmul.mubr.f32.vlgmr.msra.gmra.mxu0 %v2146_v38 }
 0x449   : > { %8431 = vmatprep.mubr.f32.mxu0 %v2147_v39 }
 0x44c   : > { %8432 = vmatmul.mubr.f32.gmra.mxu0 %v2148_v41 }
 0x44d   : > { %8434 = vmatprep.mubr.f32.mxu0 %v2149_v42 }
 0x450   : > { %8435 = vmatmul.mubr.f32.gmra.mxu0 %v2150_v44 }
 0x451   : > { %8437 = vmatprep.mubr.f32.mxu0 %v2151_v45 }
 0x454   : > { %8438 = vmatmul.mubr.f32.gmra.mxu0 %v2152_v46 }
 0x455   : > { %8472 = vmatprep.mubr.msk.bf16.mxu0 %vm10603_vm0, %v10602_v1 }
 0x508   : > { %v8430_v47 = vpop.f32.mrf.mxu0 }
 0x509   : > { %v2225_v53 = vadd.f32 %v8430_v47, %v11201_v49 }
 0x50a   : > { %v2219_v50 = vpop.f32.mrf.mxu0 }
 0x50b   : > { %v2220_v51 = vadd.f32 %v2219_v50, %v11199_v48  ;;  %v2262_v60 = vsel %vm2258_vm11, %v2225_v53, -inf }
 0x50c   : > { %v8433_v52 = vpop.f32.mrf.mxu0 }
 0x50d   : > { %v2259_v54 = vsel %vm2258_vm11, %v2220_v51, -inf  ;;  %v2235_v58 = vadd.f32 %v8433_v52, %v11201_v49 }
 0x50e   : > { %v2229_v55 = vpop.f32.mrf.mxu0  ;;  %2260 = vmax.xlane.f32.xlu0 %v2259_v54 }
 0x50f   : > { %v2230_v56 = vadd.f32 %v2229_v55, %v11199_v48  ;;  %v2268_v3 = vsel %vm2258_vm11, %v2235_v58, -inf }
 0x510   : > { %v8436_v57 = vpop.f32.mrf.mxu0 }
 0x511   : > { %v2265_v59 = vsel %vm2258_vm11, %v2230_v56, -inf  ;;  %v2245_v2 = vadd.f32 %v8436_v57, %v11201_v49 }
 0x512   : > { %v2239_v61 = vpop.f32.mrf.mxu0  ;;  %2266 = vmax.xlane.f32.xlu1 %v2265_v59  ;;  %2263 = vmax.xlane.f32.xlu0 %v2262_v60 }
 0x513   : > { %v2240_v62 = vadd.f32 %v2239_v61, %v11199_v48  ;;  %v2274_v10 = vsel %vm2258_vm11, %v2245_v2, -inf }
 0x514   : > { %v8439_v63 = vpop.f32.mrf.mxu0 }
 0x515   : > { %v2271_v4 = vsel %vm2258_vm11, %v2240_v62, -inf  ;;  %v2255_v7 = vadd.f32 %v8439_v63, %v11201_v49  ;;  %v9344_v63 = vld [vmem:[#allocation33 + $0x38] sm:$0xff]  }
 0x516   : > { %v2249_v5 = vpop.f32.mrf.mxu0  ;;  %2269 = vmax.xlane.f32.xlu1 %v2268_v3  ;;  %2272 = vmax.xlane.f32.xlu0 %v2271_v4  ;;  %v9346_v3 = vld [vmem:[#allocation33 + $0x28] sm:$0xff]  }
 0x517   : > { %v2250_v6 = vadd.f32 %v2249_v5, %v11199_v48  ;;  %v2280_v14 = vsel %vm2258_vm11, %v2255_v7, -inf  ;;  %8457 = vmatpush3.bf16.msra.mxu0 %v9344_v63 }
 0x518   : > { %8458 = vmatprep.subr.bf16.mxu0 %v10602_v1 }
 0x519   : > { %v2277_v11 = vsel %vm2258_vm11, %v2250_v6, -inf }
 0x51a   : > { %2275 = vmax.xlane.f32.xlu1 %v2274_v10  ;;  %2278 = vmax.xlane.f32.xlu0 %v2277_v11 }
 0x51e   : > { %2281 = vmax.xlane.f32.xlu1 %v2280_v14 }
 0x597   : > { %v2261_v15 = vpop.xlane.xlu0 %2260 }
 0x598   : > { %v2283_v16 = vsub.f32 %v2220_v51, %v2261_v15 }
 0x59a   : > { %v2291_v18 = vmul.f32 1.442695, %v2283_v16 }
 0x59b   : > { %v2267_v19 = vpop.xlane.xlu1 %2266  ;;  %v2264_v21 = vpop.xlane.xlu0 %2263 }
 0x59c   : > { %9624 = vpow2.f32 %v2291_v18  ;;  %v2285_v23 = vsub.f32 %v2230_v56, %v2267_v19  ;;  %v2284_v24 = vsub.f32 %v2225_v53, %v2264_v21 }
 0x59e   : > { %v2295_v25 = vmul.f32 1.442695, %v2285_v23  ;;  %v2293_v26 = vmul.f32 1.442695, %v2284_v24 }
 0x59f   : > { %v2270_v27 = vpop.xlane.xlu1 %2269  ;;  %v2273_v28 = vpop.xlane.xlu0 %2272 }
 0x5a0   : > { %9626 = vpow2.f32 %v2295_v25  ;;  %v2286_v29 = vsub.f32 %v2235_v58, %v2270_v27  ;;  %v2287_v30 = vsub.f32 %v2240_v62, %v2273_v28 }
 0x5a1   : > { %9628 = vpow2.f32 %v2293_v26 }
 0x5a2   : > { %v2297_v31 = vmul.f32 1.442695, %v2286_v29  ;;  %v2299_v32 = vmul.f32 1.442695, %v2287_v30 }
 0x5a3   : > { %v2276_v33 = vpop.xlane.xlu1 %2275  ;;  %v2279_v34 = vpop.xlane.xlu0 %2278 }
 0x5a4   : > { %9630 = vpow2.f32 %v2297_v31  ;;  %v2288_v35 = vsub.f32 %v2245_v2, %v2276_v33  ;;  %v2289_v36 = vsub.f32 %v2250_v6, %v2279_v34  ;;  %v9345_v2 = vld [vmem:[#allocation33 + $0x30] sm:$0xff]  }
 0x5a5   : > { %9632 = vpow2.f32 %v2299_v32  ;;  %8459 = vmatpush3.bf16.msra.mxu0 %v9345_v2 }
 0x5a6   : > { %v2301_v38 = vmul.f32 1.442695, %v2288_v35  ;;  %v2303_v39 = vmul.f32 1.442695, %v2289_v36  ;;  %8460 = vmatprep.subr.bf16.mxu0 %v10602_v1  ;;  %v9347_v35 = vld [vmem:[#allocation33 + $0x20] sm:$0xff]   ;;  %v9348_v36 = vld [vmem:[#allocation33 + $0x18] sm:$0xff]  }
 0x5a7   : > { %v2282_v41 = vpop.xlane.xlu1 %2281 }
 0x5a8   : > { %9634 = vpow2.f32 %v2301_v38  ;;  %v2290_v42 = vsub.f32 %v2255_v7, %v2282_v41  ;;  %v9349_v38 = vld [vmem:[#allocation33 + $0x10] sm:$0xff]   ;;  %v9351_v41 = vld [vmem:[#allocation33] sm:$0xff]  }
 0x5a9   : > { %v9625_v44 = vpop.eup %9624  ;;  %9636 = vpow2.f32 %v2303_v39  ;;  %8461 = vmatpush3.bf16.msra.mxu0 %v9346_v3  ;;  %v9350_v39 = vld [vmem:[#allocation33 + $0x8] sm:$0xff]  }
 0x5aa   : > { %v2305_v45 = vmul.f32 1.442695, %v2290_v42  ;;  %v2307_v46 = vsel %vm2258_vm11, %v9625_v44, 0.0  ;;  %8462 = vmatprep.subr.bf16.mxu0 %v10602_v1 }
 0x5ab   : > { %2308 = vadd.xlane.f32.xlu0 %v2307_v46 }
 0x5ac   : > { %9638 = vpow2.f32 %v2305_v45 }
 0x5ad   : > { %v9627_v47 = vpop.eup %9626  ;;  %8463 = vmatpush3.bf16.msra.mxu0 %v9347_v35 }
 0x5ae   : > { %v9629_v50 = vpop.eup %9628  ;;  %v2313_v51 = vsel %vm2258_vm11, %v9627_v47, 0.0  ;;  %8464 = vmatprep.subr.bf16.mxu0 %v10602_v1 }
 0x5af   : > { %2314 = vadd.xlane.f32.xlu0 %v2313_v51  ;;  %v2310_v52 = vsel %vm2258_vm11, %v9629_v50, 0.0 }
 0x5b0   : > { %2311 = vadd.xlane.f32.xlu1 %v2310_v52 }
 0x5b1   : > { %v9631_v53 = vpop.eup %9630  ;;  %8465 = vmatpush3.bf16.msra.mxu0 %v9348_v36 }
 0x5b2   : > { %v9633_v54 = vpop.eup %9632  ;;  %v2316_v55 = vsel %vm2258_vm11, %v9631_v53, 0.0  ;;  %8466 = vmatprep.subr.bf16.mxu0 %v10602_v1 }
 0x5b3   : > { %v2319_v56 = vsel %vm2258_vm11, %v9633_v54, 0.0 }
 0x5b4   : > { %2317 = vadd.xlane.f32.xlu1 %v2316_v55  ;;  %2320 = vadd.xlane.f32.xlu0 %v2319_v56 }
 0x5b5   : > { %v9635_v57 = vpop.eup %9634  ;;  %8467 = vmatpush3.bf16.msra.mxu0 %v9349_v38 }
 0x5b6   : > { %v9637_v58 = vpop.eup %9636  ;;  %v2322_v59 = vsel %vm2258_vm11, %v9635_v57, 0.0  ;;  %8468 = vmatprep.subr.bf16.mxu0 %v10602_v1 }
 0x5b7   : > { %v2325_v60 = vsel %vm2258_vm11, %v9637_v58, 0.0 }
 0x5b8   : > { %2323 = vadd.xlane.f32.xlu1 %v2322_v59  ;;  %2326 = vadd.xlane.f32.xlu0 %v2325_v60 }
 0x5b9   : > { %v9639_v61 = vpop.eup %9638  ;;  %8469 = vmatpush3.bf16.msra.mxu0 %v9350_v39 }
 0x5ba   : > { %v2328_v62 = vsel %vm2258_vm11, %v9639_v61, 0.0  ;;  %8470 = vmatprep.subr.bf16.mxu0 %v10602_v1 }
 0x5bc   : > { %2329 = vadd.xlane.f32.xlu1 %v2328_v62 }
 0x5bd   : > { %8471 = vmatpush3.bf16.msra.mxu0 %v9351_v41 }
 0x5be   : > { %8496 = vmatprep.subr.bf16.mxu0 %v10602_v1 }
 0x634   : > { %v2309_v4 = vpop.xlane.xlu0 %2308 }
 0x635   : > { %9640 = vrcp.f32 %v2309_v4 }
 0x638   : > { %v2315_v5 = vpop.xlane.xlu0 %2314 }
 0x639   : > { %v2312_v6 = vpop.xlane.xlu1 %2311  ;;  %9642 = vrcp.f32 %v2315_v5 }
 0x63a   : > { %9644 = vrcp.f32 %v2312_v6  ;;  %v7720_v6 = vld [vmem:[#allocation25] ss:$0 sm:$0xff] }
 0x63d   : > { %v2318_v7 = vpop.xlane.xlu1 %2317  ;;  %v2321_v10 = vpop.xlane.xlu0 %2320 }
 0x63e   : > { %9646 = vrcp.f32 %v2318_v7 }
 0x63f   : > { %9648 = vrcp.f32 %v2321_v10 }
 0x641   : > { %v2324_v11 = vpop.xlane.xlu1 %2323  ;;  %v2327_v14 = vpop.xlane.xlu0 %2326 }
 0x642   : > { %v9641_v15 = vpop.eup %9640  ;;  %9650 = vrcp.f32 %v2324_v11 }
 0x643   : > { %9652 = vrcp.f32 %v2327_v14  ;;  %v2332_v16 = vmul.f32 %v9641_v15, %v9625_v44 }
 0x645   : > { %v2330_v18 = vpop.xlane.xlu1 %2329  ;;  %8444 = vmatprep.mubr.msk.f32.mxu1 %vm2258_vm11, %v2332_v16 }
 0x646   : > { %v9643_v19 = vpop.eup %9642  ;;  %9654 = vrcp.f32 %v2330_v18 }
 0x647   : > { %v9645_v21 = vpop.eup %9644  ;;  %v2336_v23 = vmul.f32 %v9643_v19, %v9627_v47 }
 0x648   : > { %v2334_v24 = vmul.f32 %v9645_v21, %v9629_v50 }
 0x64a   : > { %8445 = vmatmul.mubr.msk.f32.vlgmr.msra.gmra.mxu1 %vm2258_vm11, %v2334_v24  ;;  %v9353_v24 = vld [vmem:[#allocation30 + $0x30] sm:$0xff]  }
 0x64b   : > { %v9647_v25 = vpop.eup %9646  ;;  %8447 = vmatprep.mubr.msk.f32.mxu1 %vm2258_vm11, %v2336_v23 }
 0x64c   : > { %v9649_v26 = vpop.eup %9648  ;;  %v2338_v27 = vmul.f32 %v9647_v25, %v9631_v53  ;;  %v9355_v25 = vld [vmem:[#allocation30 + $0x20] sm:$0xff]  }
 0x64d   : > { %v2340_v28 = vmul.f32 %v9649_v26, %v9633_v54  ;;  %v9356_v26 = vld [vmem:[#allocation30 + $0x18] sm:$0xff]  }
 0x64e   : > { %8448 = vmatmul.mubr.msk.f32.gmra.mxu1 %vm2258_vm11, %v2338_v27  ;;  %v9357_v27 = vld [vmem:[#allocation30 + $0x10] sm:$0xff]  }
 0x64f   : > { %v9651_v29 = vpop.eup %9650  ;;  %8450 = vmatprep.mubr.msk.f32.mxu1 %vm2258_vm11, %v2340_v28  ;;  %v9358_v28 = vld [vmem:[#allocation30 + $0x8] sm:$0xff]  }
 0x650   : > { %v9653_v30 = vpop.eup %9652  ;;  %v2342_v31 = vmul.f32 %v9651_v29, %v9635_v57  ;;  %v9359_v29 = vld [vmem:[#allocation30] sm:$0xff]  }
 0x651   : > { %v2344_v32 = vmul.f32 %v9653_v30, %v9637_v58  ;;  %v9360_v30 = vld [vmem:[#allocation31 + $0x38] sm:$0xff]  }
 0x652   : > { %8451 = vmatmul.mubr.msk.f32.gmra.mxu1 %vm2258_vm11, %v2342_v31  ;;  %v9361_v31 = vld [vmem:[#allocation31 + $0x30] sm:$0xff]  }
 0x653   : > { %v9655_v33 = vpop.eup %9654  ;;  %8453 = vmatprep.mubr.msk.f32.mxu1 %vm2258_vm11, %v2344_v32  ;;  %v9362_v32 = vld [vmem:[#allocation31 + $0x28] sm:$0xff]  }
 0x654   : > { %v2346_v34 = vmul.f32 %v9655_v33, %v9639_v61  ;;  %v9363_v33 = vld [vmem:[#allocation31 + $0x20] sm:$0xff]  }
 0x656   : > { %8454 = vmatmul.mubr.msk.f32.gmra.mxu1 %vm2258_vm11, %v2346_v34  ;;  %v9364_v34 = vld [vmem:[#allocation31 + $0x18] sm:$0xff]  }
 0x657   : > { %8492 = vmatprep.mubr.msk.bf16.mxu1 %vm10603_vm0, %v10602_v1 }
 0x70a   : > { %v8446_v42 = vpop.f32.mrf.mxu1 }
 0x70b   : > { %v2477_v53 = vmul.f32 %v8446_v42, %v11169_v20 }
 0x70c   : > { %v2437_v44 = vpop.f32.mrf.mxu1 }
 0x70d   : > { %v2476_v54 = vmul.f32 %v11169_v20, %v2437_v44 }
 0x70e   : > { %v8449_v45 = vpop.f32.mrf.mxu1 }
 0x70f   : > { %v2479_v50 = vmul.f32 %v8449_v45, %v11179_v37 }
 0x710   : > { %v2447_v46 = vpop.f32.mrf.mxu1 }
 0x711   : > { %v2478_v51 = vmul.f32 %v11179_v37, %v2447_v46  ;;  %v2481_v58 = vadd.f32 %v2479_v50, %v2477_v53 }
 0x712   : > { %v8452_v47 = vpop.f32.mrf.mxu1 }
 0x713   : > { %v2483_v55 = vmul.f32 %v8452_v47, %v11185_v40  ;;  %v2480_v59 = vadd.f32 %v2478_v51, %v2476_v54 }
 0x714   : > { %v2457_v52 = vpop.f32.mrf.mxu1 }
 0x715   : > { %v2482_v56 = vmul.f32 %v11185_v40, %v2457_v52  ;;  %v2485_v62 = vadd.f32 %v2483_v55, %v2481_v58 }
 0x716   : > { %v8455_v57 = vpop.f32.mrf.mxu1 }
 0x717   : > { %v2487_v60 = vmul.f32 %v8455_v57, %v11190_v43  ;;  %v2484_v63 = vadd.f32 %v2482_v56, %v2480_v59  ;;  %v11279_v56 = vld [vmem:[#allocation28] sm:$0xf] }
 0x718   : > { %v2467_v61 = vpop.f32.mrf.mxu1 }
 0x719   : > { %v2486_v2 = vmul.f32 %v11190_v43, %v2467_v61  ;;  %v2489_v3 = vadd.f32 %v2487_v60, %v2485_v62  ;;  %v2636_v60 = vrot.slane %v11279_v56, %v11162_v13 }
 0x71b   : > { %v2488_v4 = vadd.f32 %v2486_v2, %v2484_v63 }
 0x71d   : > { %v2507_v5 = vpack.c.bf16 %v2489_v3, %v2488_v4  ;;  %v2642_v3 = vrot.slane %v11279_v56, %v11172_v22 }
 0x71f   : > { %8473 = vmatmul.mubr.bf16.vlgmr.msra.gmra.mxu0 %v2507_v5 }
 0x720   : > { %8512 = vmatprep.mubr.msk.bf16.mxu0 %vm10603_vm0, %v10602_v1  ;;  %8497 = vmatpush3.bf16.msra.mxu0 %v9360_v30 }
 0x721   : > { %8498 = vmatprep.subr.bf16.mxu0 %v10602_v1 }
 0x724   : > { %8499 = vmatpush3.bf16.msra.mxu0 %v9361_v31 }
 0x725   : > { %8500 = vmatprep.subr.bf16.mxu0 %v10602_v1 }
 0x728   : > { %8501 = vmatpush3.bf16.msra.mxu0 %v9362_v32 }
 0x729   : > { %8502 = vmatprep.subr.bf16.mxu0 %v10602_v1 }
 0x72c   : > { %8503 = vmatpush3.bf16.msra.mxu0 %v9363_v33 }
 0x72d   : > { %8504 = vmatprep.subr.bf16.mxu0 %v10602_v1 }
 0x730   : > { %8505 = vmatpush3.bf16.msra.mxu0 %v9364_v34 }
 0x731   : > { %8506 = vmatprep.subr.bf16.mxu0 %v10602_v1 }
 0x7df   : > { %v2596_v7 = vpop.f32.mrf.mxu0 }
 0x7e0   : > { %v2597_v10 = vadd.f32 %v7720_v6, %v2596_v7 }
 0x7e1   : > { %v8474_v11 = vpop.f32.mrf.mxu0 }
 0x7e2   : > { %v11256_v14 = vadd.f32 %v2597_v10, %v11153_v8  ;;  %v9352_v8 = vld [vmem:[#allocation30 + $0x38] sm:$0xff]   ;;  %v9365_v10 = vld [vmem:[#allocation31 + $0x10] sm:$0xff]   ;;  %v9366_v11 = vld [vmem:[#allocation31 + $0x8] sm:$0xff]  }
 0x7e3   : > { %v2599_v15 = vpop.f32.mrf.mxu0  ;;  %8477 = vmatpush3.bf16.msra.mxu1 %v9352_v8  ;;  %8507 = vmatpush3.bf16.msra.mxu0 %v9365_v10 }
 0x7e4   : > { %v2600_v16 = vadd.f32 %v7720_v6, %v2599_v15  ;;  %2605 = vadd.xlane.f32.xlu0 %v11256_v14  ;;  %v2611_v21 = vmul.f32 %v11256_v14, %v11256_v14  ;;  %8478 = vmatprep.subr.bf16.mxu1 %v10602_v1  ;;  %v7729_v15 = vld [vmem:[#allocation22] ss:$0 sm:$0xff] }
 0x7e5   : > { %v8475_v18 = vpop.f32.mrf.mxu0  ;;  %8508 = vmatprep.subr.bf16.mxu0 %v10602_v1 }
 0x7e6   : > { %v11260_v19 = vadd.f32 %v2600_v16, %v11155_v9  ;;  %v9354_v9 = vld [vmem:[#allocation30 + $0x28] sm:$0xff]  }
 0x7e7   : > { %8479 = vmatpush3.bf16.msra.mxu1 %v9353_v24  ;;  %8509 = vmatpush3.bf16.msra.mxu0 %v9366_v11 }
 0x7e8   : > { %2613 = vadd.xlane.f32.xlu0 %v2611_v21  ;;  %2607 = vadd.xlane.f32.xlu1 %v11260_v19  ;;  %v2612_v23 = vmul.f32 %v11260_v19, %v11260_v19 }
 0x7e9   : > { %8480 = vmatprep.subr.bf16.mxu1 %v10602_v1  ;;  %8510 = vmatprep.subr.bf16.mxu0 %v10602_v1 }
 0x7eb   : > { %8481 = vmatpush3.bf16.msra.mxu1 %v9354_v9 }
 0x7ec   : > { %2615 = vadd.xlane.f32.xlu1 %v2612_v23  ;;  %8482 = vmatprep.subr.bf16.mxu1 %v10602_v1 }
 0x7ef   : > { %8483 = vmatpush3.bf16.msra.mxu1 %v9355_v25 }
 0x7f0   : > { %8484 = vmatprep.subr.bf16.mxu1 %v10602_v1 }
 0x7f3   : > { %8485 = vmatpush3.bf16.msra.mxu1 %v9356_v26  ;;  %v7738_v26 = vld [vmem:[#allocation24] ss:$0 sm:$0xff] }
 0x7f4   : > { %8486 = vmatprep.subr.bf16.mxu1 %v10602_v1 }
 0x7f7   : > { %8487 = vmatpush3.bf16.msra.mxu1 %v9357_v27 }
 0x7f8   : > { %8488 = vmatprep.subr.bf16.mxu1 %v10602_v1 }
 0x7fb   : > { %8489 = vmatpush3.bf16.msra.mxu1 %v9358_v28 }
 0x7fc   : > { %8490 = vmatprep.subr.bf16.mxu1 %v10602_v1 }
 0x7ff   : > { %8491 = vmatpush3.bf16.msra.mxu1 %v9359_v29 }
 0x86d   : > { %v2606_v35 = vpop.xlane.xlu0 %2605 }
 0x86e   : > { %v2609_v36 = vmul.f32 0.03125, %v2606_v35 }
 0x870   : > { %v2619_v41 = vmul.f32 %v2609_v36, %v2609_v36  ;;  %v2625_v57 = vsub.f32 %v11256_v14, %v2609_v36  ;;  %v9367_v14 = vld [vmem:[#allocation31] sm:$0xff]  }
 0x871   : > { %v2614_v38 = vpop.xlane.xlu0 %2613  ;;  %v2608_v39 = vpop.xlane.xlu1 %2607  ;;  %8511 = vmatpush3.bf16.msra.mxu0 %v9367_v14 }
 0x872   : > { %v2617_v42 = vmul.f32 0.03125, %v2614_v38  ;;  %v2610_v44 = vmul.f32 0.03125, %v2608_v39  ;;  %8516 = vmatprep.subr.bf16.mxu0 %v10602_v1  ;;  %v9370_v38 = vld [vmem:[%s11996_s2 + $0x16c] ss:$12 sps:$4 sm:$0xff]   ;;  %v9368_v39 = vld [vmem:[%s11996_s2 + $0x168] ss:$12 sps:$4 sm:$0xff]  }
 0x873   : > { %3097 = vmatprep.subr.bf16.mxu1 %v9370_v38 }
 0x874   : > { %v2621_v45 = vsub.f32 %v2617_v42, %v2619_v41  ;;  %v2620_v50 = vmul.f32 %v2610_v44, %v2610_v44  ;;  %v2626_v61 = vsub.f32 %v11260_v19, %v2610_v44  ;;  %v9371_v41 = vld [vmem:[%s11996_s2 + $0x170] ss:$12 sps:$4 sm:$0xff]   ;;  %v9374_v42 = vld [vmem:[%s11996_s2 + $0x154] ss:$12 sps:$4 sm:$0xff]  }
 0x875   : > { %v2616_v46 = vpop.xlane.xlu1 %2615  ;;  %v9372_v44 = vld [vmem:[%s11996_s2 + $0x150] ss:$12 sps:$4 sm:$0xff]  }
 0x876   : > { %v2623_v47 = vmax.f32 %v2621_v45, 0.0  ;;  %v2618_v51 = vmul.f32 0.03125, %v2616_v46  ;;  %v9375_v45 = vld [vmem:[%s11996_s2 + $0x158] ss:$12 sps:$4 sm:$0xff]   ;;  %v9378_v46 = vld [vmem:[%s11996_s2 + $0x13c] ss:$12 sps:$4 sm:$0xff]  }
 0x878   : > { %v2627_v52 = vadd.f32 1e-05, %v2623_v47  ;;  %v2622_v53 = vsub.f32 %v2618_v51, %v2620_v50  ;;  %v9376_v47 = vld [vmem:[%s11996_s2 + $0x138] ss:$12 sps:$4 sm:$0xff]   ;;  %v9379_v50 = vld [vmem:[%s11996_s2 + $0x140] ss:$12 sps:$4 sm:$0xff]  }
 0x879   : > { %v9380_v51 = vld [vmem:[%s11996_s2 + $0x120] ss:$12 sps:$4 sm:$0xff]  }
 0x87a   : > { %9656 = vrsqrt.f32 %v2627_v52  ;;  %v2624_v54 = vmax.f32 %v2622_v53, 0.0  ;;  %v9382_v52 = vld [vmem:[%s11996_s2 + $0x124] ss:$12 sps:$4 sm:$0xff]   ;;  %v9383_v53 = vld [vmem:[%s11996_s2 + $0x128] ss:$12 sps:$4 sm:$0xff]  }
 0x87c   : > { %v2628_v55 = vadd.f32 1e-05, %v2624_v54  ;;  %v9386_v54 = vld [vmem:[%s11996_s2 + $0x10c] ss:$12 sps:$4 sm:$0xff]  }
 0x87e   : > { %9658 = vrsqrt.f32 %v2628_v55  ;;  %v9384_v55 = vld [vmem:[%s11996_s2 + $0x108] ss:$12 sps:$4 sm:$0xff]  }
 0x887   : > { %v9657_v58 = vpop.eup %9656 }
 0x888   : > { %v2631_v59 = vmul.f32 %v9657_v58, %v2625_v57  ;;  %v9387_v57 = vld [vmem:[%s11996_s2 + $0x110] ss:$12 sps:$4 sm:$0xff]   ;;  %v9390_v58 = vld [vmem:[%s11996_s2 + $0xf4] ss:$12 sps:$4 sm:$0xff]  }
 0x88a   : > { %v2637_v2 = vmul.f32 %v2636_v60, %v2631_v59  ;;  %v9388_v59 = vld [vmem:[%s11996_s2 + $0xf0] ss:$12 sps:$4 sm:$0xff]  }
 0x88b   : > { %v9659_v62 = vpop.eup %9658 }
 0x88c   : > { %v2632_v63 = vmul.f32 %v9659_v62, %v2626_v61  ;;  %v2643_v5 = vadd.f32 %v2642_v3, %v2637_v2  ;;  %v9394_v61 = vld [vmem:[%s11996_s2 + $0xdc] ss:$12 sps:$4 sm:$0xff]   ;;  %v9392_v62 = vld [vmem:[%s11996_s2 + $0xd8] ss:$12 sps:$4 sm:$0xff]  }
 0x88d   : > { %v9398_v2 = vld [vmem:[%s11996_s2 + $0xc4] ss:$12 sps:$4 sm:$0xff]  }
 0x88e   : > { %v2638_v4 = vmul.f32 %v2636_v60, %v2632_v63  ;;  %v9391_v60 = vld [vmem:[%s11996_s2 + $0xf8] ss:$12 sps:$4 sm:$0xff]   ;;  %v9395_v63 = vld [vmem:[%s11996_s2 + $0xe0] ss:$12 sps:$4 sm:$0xff]  }
 0x890   : > { %v2644_v6 = vadd.f32 %v2642_v3, %v2638_v4  ;;  %v9396_v3 = vld [vmem:[%s11996_s2 + $0xc0] ss:$12 sps:$4 sm:$0xff]   ;;  %v9399_v4 = vld [vmem:[%s11996_s2 + $0xc8] ss:$12 sps:$4 sm:$0xff]  }
 0x892   : > { %v2662_v7 = vpack.c.bf16 %v2644_v6, %v2643_v5 }
 0x894   : > { %8493 = vmatmul.mubr.bf16.vlgmr.msra.gmra.mxu1 %v2662_v7 }
 0x895   : > { %3129 = vmatprep.mubr.bf16.mxu1 %v10601_v0  ;;  %3098 = vmatpush1.bf16.msra.mxu1 %v9368_v39 }
 0x896   : > { %3099 = vmatprep.subr.bf16.mxu1 %v9374_v42 }
 0x899   : > { %3100 = vmatpush1.bf16.msra.mxu1 %v9372_v44 }
 0x89a   : > { %3101 = vmatprep.subr.bf16.mxu1 %v9378_v46 }
 0x89d   : > { %3102 = vmatpush1.bf16.msra.mxu1 %v9376_v47 }
 0x89e   : > { %3103 = vmatprep.subr.bf16.mxu1 %v9382_v52 }
 0x8a1   : > { %3104 = vmatpush1.bf16.msra.mxu1 %v9380_v51 }
 0x8a2   : > { %3105 = vmatprep.subr.bf16.mxu1 %v9386_v54 }
 0x8a5   : > { %3106 = vmatpush1.bf16.msra.mxu1 %v9384_v55 }
 0x8a6   : > { %3107 = vmatprep.subr.bf16.mxu1 %v9390_v58 }
 0x8a9   : > { %3108 = vmatpush1.bf16.msra.mxu1 %v9388_v59 }
 0x8aa   : > { %3109 = vmatprep.subr.bf16.mxu1 %v9394_v61 }
 0x8ad   : > { %3110 = vmatpush1.bf16.msra.mxu1 %v9392_v62 }
 0x8ae   : > { %3111 = vmatprep.subr.bf16.mxu1 %v9398_v2 }
 0x8b1   : > { %3112 = vmatpush1.bf16.msra.mxu1 %v9396_v3 }
 0x954   : > { %v2751_v16 = vpop.f32.mrf.mxu1 }
 0x955   : > { %v2752_v19 = vadd.f32 %v7729_v15, %v2751_v16 }
 0x956   : > { %v8494_v18 = vpop.f32.mrf.mxu1 }
 0x957   : > { %v2758_v24 = vmax.f32 %v2752_v19, 0.0 }
 0x958   : > { %v2754_v21 = vpop.f32.mrf.mxu1 }
 0x959   : > { %v2755_v23 = vadd.f32 %v7729_v15, %v2754_v21 }
 0x95a   : > { %v8495_v8 = vpop.f32.mrf.mxu1 }
 0x95b   : > { %v2759_v9 = vmax.f32 %v2755_v23, 0.0 }
 0x95d   : > { %v2777_v25 = vpack.c.bf16 %v2759_v9, %v2758_v24 }
 0x95f   : > { %8513 = vmatmul.mubr.bf16.vlgmr.msra.gmra.mxu0 %v2777_v25 }
 0x960   : > { %8532 = vmatprep.mubr.msk.bf16.mxu0 %vm10603_vm0, %v10602_v1  ;;  %8517 = vmatpush3.bf16.msra.mxu0 %v9371_v41 }
 0x961   : > { %8518 = vmatprep.subr.bf16.mxu0 %v10602_v1 }
 0x964   : > { %8519 = vmatpush3.bf16.msra.mxu0 %v9375_v45 }
 0x965   : > { %8520 = vmatprep.subr.bf16.mxu0 %v10602_v1 }
 0x968   : > { %8521 = vmatpush3.bf16.msra.mxu0 %v9379_v50 }
 0x969   : > { %8522 = vmatprep.subr.bf16.mxu0 %v10602_v1 }
 0x96c   : > { %8523 = vmatpush3.bf16.msra.mxu0 %v9383_v53 }
 0x96d   : > { %8524 = vmatprep.subr.bf16.mxu0 %v10602_v1 }
 0x970   : > { %8525 = vmatpush3.bf16.msra.mxu0 %v9387_v57 }
 0x971   : > { %8526 = vmatprep.subr.bf16.mxu0 %v10602_v1 }
 0x974   : > { %8527 = vmatpush3.bf16.msra.mxu0 %v9391_v60 }
 0x975   : > { %8528 = vmatprep.subr.bf16.mxu0 %v10602_v1 }
 0x978   : > { %8529 = vmatpush3.bf16.msra.mxu0 %v9395_v63 }
 0x979   : > { %8530 = vmatprep.subr.bf16.mxu0 %v10602_v1 }
 0x97c   : > { %8531 = vmatpush3.bf16.msra.mxu0 %v9399_v4 }
 0x97d   : > { %8588 = vmatprep.subr.bf16.mxu0 %v10602_v1 }
 0xa1f   : > { %v2866_v27 = vpop.f32.mrf.mxu0 }
 0xa20   : > { %v2867_v28 = vadd.f32 %v7738_v26, %v2866_v27 }
 0xa21   : > { %v8514_v29 = vpop.f32.mrf.mxu0 }
 0xa22   : > { %v11293_v30 = vadd.f32 %v2867_v28, %v2643_v5  ;;  %v2906_v29 = vrot.slane %v11279_v56, %v11166_v17 }
 0xa23   : > { %v2869_v31 = vpop.f32.mrf.mxu0 }
 0xa24   : > { %v2870_v32 = vadd.f32 %v7738_v26, %v2869_v31  ;;  %2875 = vadd.xlane.f32.xlu0 %v11293_v30  ;;  %v2881_v35 = vmul.f32 %v11293_v30, %v11293_v30  ;;  %v11339_v31 = vsub.s32 3, %v11159_v12 }
 0xa25   : > { %v8515_v33 = vpop.f32.mrf.mxu0 }
 0xa26   : > { %v11296_v34 = vadd.f32 %v2870_v32, %v2644_v6  ;;  %v2912_v38 = vrot.slane %v11279_v56, %v11339_v31 }
 0xa28   : > { %2883 = vadd.xlane.f32.xlu0 %v2881_v35  ;;  %2877 = vadd.xlane.f32.xlu1 %v11296_v34  ;;  %v2882_v36 = vmul.f32 %v11296_v34, %v11296_v34 }
 0xa2c   : > { %2885 = vadd.xlane.f32.xlu1 %v2882_v36 }
 0xaad   : > { %v2876_v5 = vpop.xlane.xlu0 %2875 }
 0xaae   : > { %v2879_v6 = vmul.f32 0.03125, %v2876_v5 }
 0xab0   : > { %v2889_v11 = vmul.f32 %v2879_v6, %v2879_v6  ;;  %v2895_v26 = vsub.f32 %v11293_v30, %v2879_v6 }
 0xab1   : > { %v2884_v7 = vpop.xlane.xlu0 %2883  ;;  %v2878_v10 = vpop.xlane.xlu1 %2877 }
 0xab2   : > { %v2887_v14 = vmul.f32 0.03125, %v2884_v7  ;;  %v2880_v15 = vmul.f32 0.03125, %v2878_v10 }
 0xab4   : > { %v2891_v16 = vsub.f32 %v2887_v14, %v2889_v11  ;;  %v2890_v21 = vmul.f32 %v2880_v15, %v2880_v15  ;;  %v2896_v32 = vsub.f32 %v11296_v34, %v2880_v15  ;;  %v2951_v34 = vld [vmem:[#allocation27 + $0x3] sm:$0x7] }
 0xab5   : > { %v2886_v18 = vpop.xlane.xlu1 %2885  ;;  %v2957_v44 = vrot.slane %v2951_v34, %v11162_v13  ;;  %v2961_v54 = vrot.slane %v2951_v34, %v11172_v22  ;;  %v2965_v60 = vrot.slane %v2951_v34, %v11166_v17 }
 0xab6   : > { %v2893_v19 = vmax.f32 %v2891_v16, 0.0  ;;  %v2888_v23 = vmul.f32 0.03125, %v2886_v18 }
 0xab8   : > { %v2897_v8 = vadd.f32 1e-05, %v2893_v19  ;;  %v2892_v24 = vsub.f32 %v2888_v23, %v2890_v21 }
 0xaba   : > { %9660 = vrsqrt.f32 %v2897_v8  ;;  %v2894_v9 = vmax.f32 %v2892_v24, 0.0 }
 0xabc   : > { %v2898_v25 = vadd.f32 1e-05, %v2894_v9 }
 0xabe   : > { %9662 = vrsqrt.f32 %v2898_v25 }
 0xac7   : > { %v9661_v27 = vpop.eup %9660 }
 0xac8   : > { %v2901_v28 = vmul.f32 %v9661_v27, %v2895_v26 }
 0xaca   : > { %v2907_v36 = vmul.f32 %v2906_v29, %v2901_v28 }
 0xacb   : > { %v9663_v33 = vpop.eup %9662 }
 0xacc   : > { %v2902_v35 = vmul.f32 %v9663_v33, %v2896_v32  ;;  %v11344_v41 = vadd.f32 %v2912_v38, %v2907_v36 }
 0xace   : > { %v2908_v39 = vmul.f32 %v2906_v29, %v2902_v35 }
 0xad0   : > { %v11346_v30 = vadd.f32 %v2912_v38, %v2908_v39 }
 0xad2   : > { %v2952_v42 = vpack.c.bf16 %v11346_v30, %v11344_v41 }
 0xad4   : > { %3130 = vmatmul.mubr.bf16.vlgmr.msra.gmra.mxu1 %v2952_v42  ;;  %8533 = vmatmul.mubr.bf16.vlgmr.msra.gmra.mxu0 %v2952_v42 }
 0xad5   : > { %8604 = vmatprep.mubr.msk.bf16.mxu0 %vm10603_vm0, %v10602_v1 }
 0xb94   : > { %v3131_v45 = vpop.f32.mrf.mxu1  ;;  %v3174_v46 = vpop.f32.mrf.mxu0 }
 0xb95   : > { %v3132_v47 = vadd.f32 %v3131_v45, %v2957_v44  ;;  %v3175_v3 = vadd.f32 %v3174_v46, %v2965_v60 }
 0xb96   : > { %v3133_v56 = vpop.f32.mrf.mxu1  ;;  %v8534_v50 = vpop.f32.mrf.mxu0 }
 0xb97   : > { %v3181_v51 = vmul.f32 %v11169_v20, %v3132_v47  ;;  %v3134_v59 = vadd.f32 %v3133_v56, %v2961_v54  ;;  %v3183_v2 = vmul.f32 %v11179_v37, %v3132_v47  ;;  %v3185_v5 = vmul.f32 %v11185_v40, %v3132_v47 }
 0xb98   : > { %v3135_v52 = vpop.f32.mrf.mxu1  ;;  %v3177_v53 = vpop.f32.mrf.mxu0  ;;  %v3187_v7 = vmul.f32 %v11190_v43, %v3132_v47 }
 0xb99   : > { %8540 = vmatprep.mubr.f32.mxu1 %v3181_v51  ;;  %v3136_v61 = vadd.f32 %v3135_v52, %v2957_v44  ;;  %v3178_v62 = vadd.f32 %v3177_v53, %v2965_v60 }
 0xb9a   : > { %v3137_v55 = vpop.f32.mrf.mxu1  ;;  %v8535_v57 = vpop.f32.mrf.mxu0 }
 0xb9b   : > { %v3138_v58 = vadd.f32 %v3137_v55, %v2961_v54  ;;  %v3182_v63 = vmul.f32 %v11169_v20, %v3136_v61  ;;  %v3184_v4 = vmul.f32 %v11179_v37, %v3136_v61  ;;  %v3186_v6 = vmul.f32 %v11185_v40, %v3136_v61 }
 0xb9c   : > { %v3188_v10 = vmul.f32 %v11190_v43, %v3136_v61 }
 0xb9d   : > { %8536 = vmatprep.subr.mxu1 %v3138_v58 }
 0xb9e   : > { %8537 = vmatpush3.xpose.msra.mxu1 %v3138_v58 }
 0xb9f   : > { %8538 = vmatprep.subr.mxu1 %v3134_v59 }
 0xba2   : > { %8539 = vmatpush3.xpose.msra.mxu1 %v3134_v59 }
 0xba3   : > { %8552 = vmatprep.subr.mxu1 %v3178_v62 }
 0xba5   : > { %8541 = vmatmul.mubr.f32.vlgmr.msra.gmra.mxu1 %v3182_v63 }
 0xba6   : > { %8543 = vmatprep.mubr.f32.mxu1 %v3183_v2  ;;  %8553 = vmatpush3.msra.mxu1 %v3178_v62 }
 0xba7   : > { %8554 = vmatprep.subr.mxu1 %v3175_v3 }
 0xba8   : > { %8555 = vmatpush3.msra.mxu1 %v3175_v3 }
 0xba9   : > { %8544 = vmatmul.mubr.f32.gmra.mxu1 %v3184_v4  ;;  %8568 = vmatprep.subr.bf16.mxu1 %v10602_v1 }
 0xbaa   : > { %8546 = vmatprep.mubr.f32.mxu1 %v3185_v5 }
 0xbad   : > { %8547 = vmatmul.mubr.f32.gmra.mxu1 %v3186_v6 }
 0xbae   : > { %8549 = vmatprep.mubr.f32.mxu1 %v3187_v7 }
 0xbb1   : > { %8550 = vmatmul.mubr.f32.gmra.mxu1 %v3188_v10 }
 0xc65   : > { %v8542_v11 = vpop.f32.mrf.mxu1 }
 0xc66   : > { %v3261_v14 = vadd.f32 %v8542_v11, %v11201_v49 }
 0xc67   : > { %v3255_v15 = vpop.f32.mrf.mxu1 }
 0xc68   : > { %v3256_v16 = vadd.f32 %v3255_v15, %v11199_v48  ;;  %v3297_v18 = vsel %vm2258_vm11, %v3261_v14, -inf }
 0xc69   : > { %3298 = vmax.xlane.f32.xlu1 %v3297_v18  ;;  %v8545_v19 = vpop.f32.mrf.mxu1 }
 0xc6a   : > { %v3271_v21 = vadd.f32 %v8545_v19, %v11201_v49  ;;  %v3294_v23 = vsel %vm2258_vm11, %v3256_v16, -inf }
 0xc6b   : > { %v3265_v8 = vpop.f32.mrf.mxu1  ;;  %3295 = vmax.xlane.f32.xlu0 %v3294_v23 }
 0xc6c   : > { %v3266_v24 = vadd.f32 %v3265_v8, %v11199_v48  ;;  %v3303_v9 = vsel %vm2258_vm11, %v3271_v21, -inf }
 0xc6d   : > { %3304 = vmax.xlane.f32.xlu1 %v3303_v9  ;;  %v8548_v25 = vpop.f32.mrf.mxu1 }
 0xc6e   : > { %v3281_v26 = vadd.f32 %v8548_v25, %v11201_v49  ;;  %v3300_v27 = vsel %vm2258_vm11, %v3266_v24, -inf }
 0xc6f   : > { %v3275_v28 = vpop.f32.mrf.mxu1  ;;  %3301 = vmax.xlane.f32.xlu0 %v3300_v27 }
 0xc70   : > { %v3276_v29 = vadd.f32 %v3275_v28, %v11199_v48  ;;  %v3309_v32 = vsel %vm2258_vm11, %v3281_v26, -inf }
 0xc71   : > { %3310 = vmax.xlane.f32.xlu1 %v3309_v32  ;;  %v8551_v33 = vpop.f32.mrf.mxu1 }
 0xc72   : > { %v3291_v35 = vadd.f32 %v8551_v33, %v11201_v49  ;;  %v3306_v36 = vsel %vm2258_vm11, %v3276_v29, -inf }
 0xc73   : > { %v3285_v38 = vpop.f32.mrf.mxu1  ;;  %3307 = vmax.xlane.f32.xlu0 %v3306_v36 }
 0xc74   : > { %v3286_v39 = vadd.f32 %v3285_v38, %v11199_v48  ;;  %v3315_v42 = vsel %vm2258_vm11, %v3291_v35, -inf }
 0xc75   : > { %3316 = vmax.xlane.f32.xlu1 %v3315_v42 }
 0xc76   : > { %v3312_v34 = vsel %vm2258_vm11, %v3286_v39, -inf }
 0xc77   : > { %3313 = vmax.xlane.f32.xlu0 %v3312_v34 }
 0xcf2   : > { %v3299_v44 = vpop.xlane.xlu1 %3298 }
 0xcf3   : > { %v3319_v45 = vsub.f32 %v3261_v14, %v3299_v44  ;;  %v9400_v44 = vld [vmem:[#allocation33 + $0x78] sm:$0xff]  }
 0xcf4   : > { %v3296_v46 = vpop.xlane.xlu0 %3295 }
 0xcf5   : > { %v3328_v47 = vmul.f32 1.442695, %v3319_v45  ;;  %v3318_v56 = vsub.f32 %v3256_v16, %v3296_v46 }
 0xcf6   : > { %v3305_v50 = vpop.xlane.xlu1 %3304 }
 0xcf7   : > { %9664 = vpow2.f32 %v3328_v47  ;;  %v3326_v49 = vmul.f32 1.442695, %v3318_v56  ;;  %v3321_v51 = vsub.f32 %v3271_v21, %v3305_v50  ;;  %v9401_v50 = vld [vmem:[#allocation33 + $0x70] sm:$0xff]  }
 0xcf8   : > { %v3302_v52 = vpop.xlane.xlu0 %3301 }
 0xcf9   : > { %9666 = vpow2.f32 %v3326_v49  ;;  %v3332_v53 = vmul.f32 1.442695, %v3321_v51  ;;  %v3320_v54 = vsub.f32 %v3266_v24, %v3302_v52 }
 0xcfa   : > { %v3311_v48 = vpop.xlane.xlu1 %3310 }
 0xcfb   : > { %9668 = vpow2.f32 %v3332_v53  ;;  %v3330_v55 = vmul.f32 1.442695, %v3320_v54  ;;  %v3323_v57 = vsub.f32 %v3281_v26, %v3311_v48  ;;  %v9402_v54 = vld [vmem:[#allocation33 + $0x68] sm:$0xff]  }
 0xcfc   : > { %v3308_v58 = vpop.xlane.xlu0 %3307 }
 0xcfd   : > { %9670 = vpow2.f32 %v3330_v55  ;;  %v3336_v59 = vmul.f32 1.442695, %v3323_v57  ;;  %v3322_v60 = vsub.f32 %v3276_v29, %v3308_v58 }
 0xcfe   : > { %v3317_v61 = vpop.xlane.xlu1 %3316 }
 0xcff   : > { %9672 = vpow2.f32 %v3336_v59  ;;  %v3334_v62 = vmul.f32 1.442695, %v3322_v60  ;;  %v3325_v63 = vsub.f32 %v3291_v35, %v3317_v61  ;;  %v9403_v60 = vld [vmem:[#allocation33 + $0x60] sm:$0xff]   ;;  %v9404_v61 = vld [vmem:[#allocation33 + $0x58] sm:$0xff]  }
 0xd00   : > { %v3314_v2 = vpop.xlane.xlu0 %3313 }
 0xd01   : > { %9674 = vpow2.f32 %v3334_v62  ;;  %v3340_v3 = vmul.f32 1.442695, %v3325_v63  ;;  %v3324_v4 = vsub.f32 %v3286_v39, %v3314_v2  ;;  %v9405_v62 = vld [vmem:[#allocation33 + $0x50] sm:$0xff]   ;;  %v9406_v63 = vld [vmem:[#allocation33 + $0x48] sm:$0xff]   ;;  %v9407_v2 = vld [vmem:[#allocation33 + $0x40] sm:$0xff]  }
 0xd03   : > { %9676 = vpow2.f32 %v3340_v3  ;;  %v3338_v5 = vmul.f32 1.442695, %v3324_v4 }
 0xd04   : > { %v9665_v6 = vpop.eup %9664 }
 0xd05   : > { %9678 = vpow2.f32 %v3338_v5  ;;  %v3345_v7 = vsel %vm2258_vm11, %v9665_v6, 0.0 }
 0xd06   : > { %v9667_v10 = vpop.eup %9666  ;;  %3346 = vadd.xlane.f32.xlu1 %v3345_v7 }
 0xd07   : > { %v3342_v11 = vsel %vm2258_vm11, %v9667_v10, 0.0 }
 0xd08   : > { %v9669_v14 = vpop.eup %9668  ;;  %3343 = vadd.xlane.f32.xlu0 %v3342_v11 }
 0xd09   : > { %v3351_v15 = vsel %vm2258_vm11, %v9669_v14, 0.0 }
 0xd0a   : > { %v9671_v16 = vpop.eup %9670  ;;  %3352 = vadd.xlane.f32.xlu1 %v3351_v15 }
 0xd0b   : > { %v3348_v18 = vsel %vm2258_vm11, %v9671_v16, 0.0 }
 0xd0c   : > { %v9673_v19 = vpop.eup %9672  ;;  %3349 = vadd.xlane.f32.xlu0 %v3348_v18 }
 0xd0d   : > { %v3357_v21 = vsel %vm2258_vm11, %v9673_v19, 0.0 }
 0xd0e   : > { %v9675_v23 = vpop.eup %9674  ;;  %3358 = vadd.xlane.f32.xlu1 %v3357_v21 }
 0xd0f   : > { %v3354_v8 = vsel %vm2258_vm11, %v9675_v23, 0.0 }
 0xd10   : > { %v9677_v24 = vpop.eup %9676  ;;  %3355 = vadd.xlane.f32.xlu0 %v3354_v8 }
 0xd11   : > { %v3363_v9 = vsel %vm2258_vm11, %v9677_v24, 0.0 }
 0xd12   : > { %v9679_v25 = vpop.eup %9678  ;;  %3364 = vadd.xlane.f32.xlu1 %v3363_v9 }
 0xd13   : > { %v3360_v26 = vsel %vm2258_vm11, %v9679_v25, 0.0 }
 0xd14   : > { %3361 = vadd.xlane.f32.xlu0 %v3360_v26 }
 0xd8f   : > { %v3347_v27 = vpop.xlane.xlu1 %3346 }
 0xd90   : > { %9680 = vrcp.f32 %v3347_v27 }
 0xd91   : > { %v3344_v28 = vpop.xlane.xlu0 %3343 }
 0xd92   : > { %9682 = vrcp.f32 %v3344_v28 }
 0xd93   : > { %v3353_v29 = vpop.xlane.xlu1 %3352 }
 0xd94   : > { %9684 = vrcp.f32 %v3353_v29 }
 0xd95   : > { %v3350_v32 = vpop.xlane.xlu0 %3349 }
 0xd96   : > { %9686 = vrcp.f32 %v3350_v32 }
 0xd97   : > { %v3359_v33 = vpop.xlane.xlu1 %3358 }
 0xd98   : > { %9688 = vrcp.f32 %v3359_v33  ;;  %v7811_v33 = vld [vmem:[#allocation25 + $0x1] ss:$0 sm:$0xff] }
 0xd99   : > { %v3356_v35 = vpop.xlane.xlu0 %3355 }
 0xd9a   : > { %9690 = vrcp.f32 %v3356_v35 }
 0xd9b   : > { %v3365_v36 = vpop.xlane.xlu1 %3364 }
 0xd9c   : > { %9692 = vrcp.f32 %v3365_v36 }
 0xd9d   : > { %v3362_v38 = vpop.xlane.xlu0 %3361  ;;  %v9681_v39 = vpop.eup %9680 }
 0xd9e   : > { %9694 = vrcp.f32 %v3362_v38  ;;  %v3369_v45 = vmul.f32 %v9681_v39, %v9665_v6 }
 0xd9f   : > { %v9683_v42 = vpop.eup %9682 }
 0xda0   : > { %v3367_v34 = vmul.f32 %v9683_v42, %v9667_v10 }
 0xda1   : > { %v9685_v46 = vpop.eup %9684 }
 0xda2   : > { %8556 = vmatprep.mubr.msk.f32.mxu1 %vm2258_vm11, %v3367_v34  ;;  %v3373_v49 = vmul.f32 %v9685_v46, %v9669_v14 }
 0xda3   : > { %v9687_v47 = vpop.eup %9686  ;;  %8557 = vmatmul.mubr.msk.f32.vlgmr.msra.gmra.mxu1 %vm2258_vm11, %v3369_v45 }
 0xda4   : > { %v3371_v56 = vmul.f32 %v9687_v47, %v9671_v16  ;;  %8569 = vmatpush3.bf16.msra.mxu1 %v9400_v44 }
 0xda5   : > { %8570 = vmatprep.subr.bf16.mxu1 %v10602_v1  ;;  %v9689_v51 = vpop.eup %9688 }
 0xda6   : > { %8559 = vmatprep.mubr.msk.f32.mxu1 %vm2258_vm11, %v3371_v56  ;;  %v3377_v48 = vmul.f32 %v9689_v51, %v9673_v19  ;;  %v9409_v56 = vld [vmem:[#allocation30 + $0x70] sm:$0xff]  }
 0xda7   : > { %v9691_v52 = vpop.eup %9690  ;;  %8560 = vmatmul.mubr.msk.f32.gmra.mxu1 %vm2258_vm11, %v3373_v49  ;;  %v9412_v49 = vld [vmem:[#allocation30 + $0x58] sm:$0xff]   ;;  %v9413_v51 = vld [vmem:[#allocation30 + $0x50] sm:$0xff]  }
 0xda8   : > { %v3375_v53 = vmul.f32 %v9691_v52, %v9675_v23  ;;  %8571 = vmatpush3.bf16.msra.mxu1 %v9401_v50  ;;  %v9411_v50 = vld [vmem:[#allocation30 + $0x60] sm:$0xff]   ;;  %v9414_v52 = vld [vmem:[#allocation30 + $0x48] sm:$0xff]  }
 0xda9   : > { %8572 = vmatprep.subr.bf16.mxu1 %v10602_v1  ;;  %v9693_v55 = vpop.eup %9692 }
 0xdaa   : > { %8562 = vmatprep.mubr.msk.f32.mxu1 %vm2258_vm11, %v3375_v53  ;;  %v3381_v59 = vmul.f32 %v9693_v55, %v9677_v24  ;;  %v9415_v53 = vld [vmem:[#allocation30 + $0x40] sm:$0xff]   ;;  %v9441_v55 = vld [vmem:[#allocation31 + $0x70] sm:$0xff]  }
 0xdab   : > { %v9695_v57 = vpop.eup %9694  ;;  %8563 = vmatmul.mubr.msk.f32.gmra.mxu1 %vm2258_vm11, %v3377_v48  ;;  %v9440_v48 = vld [vmem:[#allocation31 + $0x78] sm:$0xff]  }
 0xdac   : > { %v3379_v58 = vmul.f32 %v9695_v57, %v9679_v25  ;;  %8573 = vmatpush3.bf16.msra.mxu1 %v9402_v54  ;;  %v9418_v54 = vld [vmem:[%s11999_s0 + $0xac] ss:$12 sps:$4 sm:$0xff]  }
 0xdad   : > { %8574 = vmatprep.subr.bf16.mxu1 %v10602_v1  ;;  %v9442_v57 = vld [vmem:[#allocation31 + $0x68] sm:$0xff]  }
 0xdae   : > { %8565 = vmatprep.mubr.msk.f32.mxu1 %vm2258_vm11, %v3379_v58  ;;  %v9443_v58 = vld [vmem:[#allocation31 + $0x60] sm:$0xff]  }
 0xdaf   : > { %8566 = vmatmul.mubr.msk.f32.gmra.mxu1 %vm2258_vm11, %v3381_v59  ;;  %v9444_v59 = vld [vmem:[#allocation31 + $0x58] sm:$0xff]  }
 0xdb0   : > { %8584 = vmatprep.mubr.msk.bf16.mxu1 %vm10603_vm0, %v10602_v1  ;;  %8575 = vmatpush3.bf16.msra.mxu1 %v9403_v60 }
 0xdb1   : > { %8576 = vmatprep.subr.bf16.mxu1 %v10602_v1 }
 0xdb4   : > { %8577 = vmatpush3.bf16.msra.mxu1 %v9404_v61 }
 0xdb5   : > { %8578 = vmatprep.subr.bf16.mxu1 %v10602_v1 }
 0xdb8   : > { %8579 = vmatpush3.bf16.msra.mxu1 %v9405_v62 }
 0xdb9   : > { %8580 = vmatprep.subr.bf16.mxu1 %v10602_v1 }
 0xdbc   : > { %8581 = vmatpush3.bf16.msra.mxu1 %v9406_v63 }
 0xdbd   : > { %8582 = vmatprep.subr.bf16.mxu1 %v10602_v1 }
 0xdc0   : > { %8583 = vmatpush3.bf16.msra.mxu1 %v9407_v2 }
 0xdc1   : > { %8608 = vmatprep.subr.bf16.mxu1 %v10602_v1 }
 0xe63   : > { %v8558_v3 = vpop.f32.mrf.mxu1 }
 0xe64   : > { %v3512_v15 = vmul.f32 %v8558_v3, %v11169_v20 }
 0xe65   : > { %v3472_v4 = vpop.f32.mrf.mxu1 }
 0xe66   : > { %v3511_v16 = vmul.f32 %v11169_v20, %v3472_v4 }
 0xe67   : > { %v8561_v5 = vpop.f32.mrf.mxu1 }
 0xe68   : > { %v3514_v10 = vmul.f32 %v8561_v5, %v11179_v37 }
 0xe69   : > { %v3482_v6 = vpop.f32.mrf.mxu1 }
 0xe6a   : > { %v3513_v11 = vmul.f32 %v11179_v37, %v3482_v6  ;;  %v3516_v23 = vadd.f32 %v3514_v10, %v3512_v15 }
 0xe6b   : > { %v8564_v7 = vpop.f32.mrf.mxu1 }
 0xe6c   : > { %v3518_v18 = vmul.f32 %v8564_v7, %v11185_v40  ;;  %v3515_v8 = vadd.f32 %v3513_v11, %v3511_v16 }
 0xe6d   : > { %v3492_v14 = vpop.f32.mrf.mxu1 }
 0xe6e   : > { %v3517_v19 = vmul.f32 %v11185_v40, %v3492_v14  ;;  %v3520_v25 = vadd.f32 %v3518_v18, %v3516_v23 }
 0xe6f   : > { %v8567_v21 = vpop.f32.mrf.mxu1 }
 0xe70   : > { %v3522_v24 = vmul.f32 %v8567_v21, %v11190_v43  ;;  %v3519_v26 = vadd.f32 %v3517_v19, %v3515_v8  ;;  %v11441_v19 = vld [vmem:[#allocation28 + $0x4] sm:$0xf] }
 0xe71   : > { %v3502_v9 = vpop.f32.mrf.mxu1 }
 0xe72   : > { %v3521_v27 = vmul.f32 %v11190_v43, %v3502_v9  ;;  %v3524_v28 = vadd.f32 %v3522_v24, %v3520_v25  ;;  %v3673_v24 = vrot.slane %v11441_v19, %v11162_v13 }
 0xe74   : > { %v3523_v29 = vadd.f32 %v3521_v27, %v3519_v26 }
 0xe76   : > { %v3544_v32 = vpack.c.bf16 %v3524_v28, %v3523_v29  ;;  %v3679_v28 = vrot.slane %v11441_v19, %v11172_v22 }
 0xe78   : > { %8585 = vmatmul.mubr.bf16.vlgmr.msra.gmra.mxu1 %v3544_v32 }
 0xe79   : > { %8624 = vmatprep.mubr.msk.bf16.mxu1 %vm10603_vm0, %v10602_v1  ;;  %8609 = vmatpush3.bf16.msra.mxu1 %v9440_v48  ;;  %v9446_v48 = vld [vmem:[#allocation31 + $0x48] sm:$0xff]  }
 0xe7a   : > { %8610 = vmatprep.subr.bf16.mxu1 %v10602_v1 }
 0xe7d   : > { %8611 = vmatpush3.bf16.msra.mxu1 %v9441_v55  ;;  %v9447_v55 = vld [vmem:[#allocation31 + $0x40] sm:$0xff]  }
 0xe7e   : > { %8612 = vmatprep.subr.bf16.mxu1 %v10602_v1 }
 0xe81   : > { %8613 = vmatpush3.bf16.msra.mxu1 %v9442_v57  ;;  %v7820_v57 = vld [vmem:[#allocation22 + $0x1] ss:$0 sm:$0xff] }
 0xe82   : > { %8614 = vmatprep.subr.bf16.mxu1 %v10602_v1 }
 0xe85   : > { %8615 = vmatpush3.bf16.msra.mxu1 %v9443_v58 }
 0xe86   : > { %8616 = vmatprep.subr.bf16.mxu1 %v10602_v1 }
 0xe89   : > { %8617 = vmatpush3.bf16.msra.mxu1 %v9444_v59 }
 0xe8a   : > { %8618 = vmatprep.subr.bf16.mxu1 %v10602_v1 }
 0xf38   : > { %v3633_v35 = vpop.f32.mrf.mxu1 }
 0xf39   : > { %v3634_v36 = vadd.f32 %v7811_v33, %v3633_v35  ;;  %v9416_v35 = vld [vmem:[%s11999_s0 + $0xa8] ss:$12 sps:$4 sm:$0xff]  }
 0xf3a   : > { %v8586_v38 = vpop.f32.mrf.mxu1 }
 0xf3b   : > { %v11417_v39 = vadd.f32 %v3634_v36, %v11344_v41  ;;  %v9408_v41 = vld [vmem:[#allocation30 + $0x78] sm:$0xff]  }
 0xf3c   : > { %v3636_v42 = vpop.f32.mrf.mxu1  ;;  %8589 = vmatpush3.bf16.msra.mxu0 %v9408_v41  ;;  %v9421_v38 = vld [vmem:[%s11999_s0 + $0x94] ss:$12 sps:$4 sm:$0xff]  }
 0xf3d   : > { %v3637_v34 = vadd.f32 %v7811_v33, %v3636_v42  ;;  %3642 = vadd.xlane.f32.xlu0 %v11417_v39  ;;  %v3648_v46 = vmul.f32 %v11417_v39, %v11417_v39  ;;  %8590 = vmatprep.subr.bf16.mxu0 %v10602_v1  ;;  %v9424_v42 = vld [vmem:[%s11999_s0 + $0x7c] ss:$12 sps:$4 sm:$0xff]   ;;  %v9433_v41 = vld [vmem:[%s11999_s0 + $0x34] ss:$12 sps:$4 sm:$0xff]  }
 0xf3e   : > { %v8587_v44 = vpop.f32.mrf.mxu1 }
 0xf3f   : > { %v11421_v45 = vadd.f32 %v3637_v34, %v11346_v30  ;;  %v9410_v30 = vld [vmem:[#allocation30 + $0x68] sm:$0xff]  }
 0xf40   : > { %8591 = vmatpush3.bf16.msra.mxu0 %v9409_v56  ;;  %v9422_v34 = vld [vmem:[%s11999_s0 + $0x78] ss:$12 sps:$4 sm:$0xff]   ;;  %v9431_v56 = vld [vmem:[%s11999_s0 + $0x30] ss:$12 sps:$4 sm:$0xff]  }
 0xf41   : > { %3650 = vadd.xlane.f32.xlu0 %v3648_v46  ;;  %3644 = vadd.xlane.f32.xlu1 %v11421_v45  ;;  %v3649_v47 = vmul.f32 %v11421_v45, %v11421_v45  ;;  %v9427_v44 = vld [vmem:[%s11999_s0 + $0x64] ss:$12 sps:$4 sm:$0xff]   ;;  %v9430_v46 = vld [vmem:[%s11999_s0 + $0x4c] ss:$12 sps:$4 sm:$0xff]  }
 0xf42   : > { %8592 = vmatprep.subr.bf16.mxu0 %v10602_v1 }
 0xf44   : > { %8593 = vmatpush3.bf16.msra.mxu0 %v9410_v30  ;;  %v9436_v30 = vld [vmem:[%s11999_s0 + $0x1c] ss:$12 sps:$4 sm:$0xff]  }
 0xf45   : > { %3652 = vadd.xlane.f32.xlu1 %v3649_v47  ;;  %8594 = vmatprep.subr.bf16.mxu0 %v10602_v1  ;;  %v9428_v47 = vld [vmem:[%s11999_s0 + $0x48] ss:$12 sps:$4 sm:$0xff]  }
 0xf48   : > { %8595 = vmatpush3.bf16.msra.mxu0 %v9411_v50  ;;  %v9434_v50 = vld [vmem:[%s11999_s0 + $0x18] ss:$12 sps:$4 sm:$0xff]  }
 0xf49   : > { %8596 = vmatprep.subr.bf16.mxu0 %v10602_v1 }
 0xf4c   : > { %8597 = vmatpush3.bf16.msra.mxu0 %v9412_v49  ;;  %v9439_v49 = vld [vmem:[%s11999_s0 + $0x4] ss:$12 sps:$4 sm:$0xff]  }
 0xf4d   : > { %8598 = vmatprep.subr.bf16.mxu0 %v10602_v1 }
 0xf50   : > { %8599 = vmatpush3.bf16.msra.mxu0 %v9413_v51  ;;  %v9437_v51 = vld [vmem:[%s11999_s0] ss:$12 sps:$4 sm:$0xff]  }
 0xf51   : > { %8600 = vmatprep.subr.bf16.mxu0 %v10602_v1 }
 0xf54   : > { %8601 = vmatpush3.bf16.msra.mxu0 %v9414_v52  ;;  %v11473_v52 = vld [vmem:[%s1575_s11] sm:$0xff] }
 0xf55   : > { %8602 = vmatprep.subr.bf16.mxu0 %v10602_v1 }
 0xf58   : > { %8603 = vmatpush3.bf16.msra.mxu0 %v9415_v53  ;;  %v11477_v53 = vpack.c.bf16 %v11473_v52, %v11473_v52 }
 0xf59   : > { %4177 = vmatprep.subr.bf16.mxu0 %v9418_v54  ;;  %v9445_v54 = vld [vmem:[#allocation31 + $0x50] sm:$0xff]  }
 0xf5a   : > { %8619 = vmatpush3.bf16.msra.mxu1 %v9445_v54 }
 0xf5b   : > { %8620 = vmatprep.subr.bf16.mxu1 %v10602_v1 }
 0xf5e   : > { %8621 = vmatpush3.bf16.msra.mxu1 %v9446_v48 }
 0xf5f   : > { %8622 = vmatprep.subr.bf16.mxu1 %v10602_v1 }
 0xf62   : > { %8623 = vmatpush3.bf16.msra.mxu1 %v9447_v55 }
 0xf63   : > { %8628 = vmatprep.subr.bf16.mxu1 %v10602_v1 }
 0xfc6   : > { %v3643_v60 = vpop.xlane.xlu0 %3642 }
 0xfc7   : > { %v3646_v61 = vmul.f32 0.03125, %v3643_v60 }
 0xfc9   : > { %v3656_v2 = vmul.f32 %v3646_v61, %v3646_v61  ;;  %v3662_v21 = vsub.f32 %v11417_v39, %v3646_v61  ;;  %v9419_v39 = vld [vmem:[%s11999_s0 + $0x90] ss:$12 sps:$4 sm:$0xff]  }
 0xfca   : > { %v3651_v62 = vpop.xlane.xlu0 %3650  ;;  %v3645_v63 = vpop.xlane.xlu1 %3644 }
 0xfcb   : > { %v3654_v3 = vmul.f32 0.03125, %v3651_v62  ;;  %v3647_v4 = vmul.f32 0.03125, %v3645_v63 }
 0xfcd   : > { %v3658_v5 = vsub.f32 %v3654_v3, %v3656_v2  ;;  %v3657_v10 = vmul.f32 %v3647_v4, %v3647_v4  ;;  %v3663_v9 = vsub.f32 %v11421_v45, %v3647_v4  ;;  %v9425_v45 = vld [vmem:[%s11999_s0 + $0x60] ss:$12 sps:$4 sm:$0xff]  }
 0xfce   : > { %v3653_v6 = vpop.xlane.xlu1 %3652 }
 0xfcf   : > { %v3660_v7 = vmax.f32 %v3658_v5, 0.0  ;;  %v3655_v11 = vmul.f32 0.03125, %v3653_v6  ;;  %v11485_v5 = vld [vmem:[#allocation12] sm:$0x7] }
 0xfd0   : > { %v4037_v6 = vrot.slane %v11485_v5, %v11162_v13 }
 0xfd1   : > { %v3664_v14 = vadd.f32 1e-05, %v3660_v7  ;;  %v3659_v15 = vsub.f32 %v3655_v11, %v3657_v10  ;;  %v4041_v7 = vrot.slane %v11485_v5, %v11172_v22 }
 0xfd3   : > { %9696 = vrsqrt.f32 %v3664_v14  ;;  %v3661_v16 = vmax.f32 %v3659_v15, 0.0 }
 0xfd5   : > { %v3665_v18 = vadd.f32 1e-05, %v3661_v16 }
 0xfd7   : > { %9698 = vrsqrt.f32 %v3665_v18 }
 0xfe0   : > { %v9697_v23 = vpop.eup %9696 }
 0xfe1   : > { %v3668_v8 = vmul.f32 %v9697_v23, %v3662_v21 }
 0xfe3   : > { %v3674_v27 = vmul.f32 %v3673_v24, %v3668_v8 }
 0xfe4   : > { %v9699_v25 = vpop.eup %9698 }
 0xfe5   : > { %v3669_v26 = vmul.f32 %v9699_v25, %v3663_v9  ;;  %v11449_v32 = vadd.f32 %v3679_v28, %v3674_v27  ;;  %v9448_v9 = vld [vmem:[%s11999_s0 + $0xb0] ss:$12 sps:$4 sm:$0xff]   ;;  %v9449_v25 = vld [vmem:[%s11999_s0 + $0x98] ss:$12 sps:$4 sm:$0xff]   ;;  %v9451_v27 = vld [vmem:[%s11999_s0 + $0x68] ss:$12 sps:$4 sm:$0xff]  }
 0xfe7   : > { %v3675_v29 = vmul.f32 %v3673_v24, %v3669_v26  ;;  %v9450_v26 = vld [vmem:[%s11999_s0 + $0x80] ss:$12 sps:$4 sm:$0xff]  }
 0xfe9   : > { %v11451_v33 = vadd.f32 %v3679_v28, %v3675_v29  ;;  %v9452_v28 = vld [vmem:[%s11999_s0 + $0x50] ss:$12 sps:$4 sm:$0xff]   ;;  %v9453_v29 = vld [vmem:[%s11999_s0 + $0x38] ss:$12 sps:$4 sm:$0xff]  }
 0xfeb   : > { %v3701_v36 = vpack.c.bf16 %v11451_v33, %v11449_v32 }
 0xfed   : > { %8605 = vmatmul.mubr.bf16.vlgmr.msra.gmra.mxu0 %v3701_v36  ;;  %v9455_v36 = vld [vmem:[%s11999_s0 + $0x8] ss:$12 sps:$4 sm:$0xff]  }
 0xfee   : > { %4178 = vmatpush1.bf16.msra.mxu0 %v9416_v35  ;;  %4209 = vmatprep.mubr.bf16.mxu0 %v10601_v0  ;;  %v9454_v35 = vld [vmem:[%s11999_s0 + $0x20] ss:$12 sps:$4 sm:$0xff]  }
 0xfef   : > { %4179 = vmatprep.subr.bf16.mxu0 %v9421_v38 }
 0xff2   : > { %4180 = vmatpush1.bf16.msra.mxu0 %v9419_v39 }
 0xff3   : > { %4181 = vmatprep.subr.bf16.mxu0 %v9424_v42 }
 0xff6   : > { %4182 = vmatpush1.bf16.msra.mxu0 %v9422_v34 }
 0xff7   : > { %4183 = vmatprep.subr.bf16.mxu0 %v9427_v44  ;;  %v1858_v44 = vld [vmem:[%s11516_s16] sm:$0xff] }
 0xffa   : > { %4184 = vmatpush1.bf16.msra.mxu0 %v9425_v45 }
 0xffb   : > { %4185 = vmatprep.subr.bf16.mxu0 %v9430_v46 }
 0xffe   : > { %4186 = vmatpush1.bf16.msra.mxu0 %v9428_v47 }
 0xfff   : > { %4187 = vmatprep.subr.bf16.mxu0 %v9433_v41 }
0x1002   : > { %4188 = vmatpush1.bf16.msra.mxu0 %v9431_v56 }
0x1003   : > { %4189 = vmatprep.subr.bf16.mxu0 %v9436_v30 }
0x1006   : > { %4190 = vmatpush1.bf16.msra.mxu0 %v9434_v50 }
0x1007   : > { %4191 = vmatprep.subr.bf16.mxu0 %v9439_v49 }
0x100a   : > { %4192 = vmatpush1.bf16.msra.mxu0 %v9437_v51 }
0x100d   : > { %4210 = vmatmul.mubr.bf16.vlgmr.msra.gmra.mxu0 %v11477_v53 }
0x10ad   : > { %v3790_v58 = vpop.f32.mrf.mxu0 }
0x10ae   : > { %v3791_v60 = vadd.f32 %v7820_v57, %v3790_v58 }
0x10af   : > { %v8606_v59 = vpop.f32.mrf.mxu0 }
0x10b0   : > { %v3797_v2 = vmax.f32 %v3791_v60, 0.0 }
0x10b1   : > { %v3793_v61 = vpop.f32.mrf.mxu0 }
0x10b2   : > { %v3794_v62 = vadd.f32 %v7820_v57, %v3793_v61 }
0x10b3   : > { %v8607_v63 = vpop.f32.mrf.mxu0 }
0x10b4   : > { %v3798_v3 = vmax.f32 %v3794_v62, 0.0 }
0x10b6   : > { %v3818_v4 = vpack.c.bf16 %v3798_v3, %v3797_v2 }
0x10b8   : > { %8625 = vmatmul.mubr.bf16.vlgmr.msra.gmra.mxu1 %v3818_v4 }
0x10b9   : > { %8644 = vmatprep.mubr.msk.bf16.mxu1 %vm10603_vm0, %v10602_v1  ;;  %8629 = vmatpush3.bf16.msra.mxu1 %v9448_v9 }
0x10ba   : > { %8630 = vmatprep.subr.bf16.mxu1 %v10602_v1 }
0x10bd   : > { %8631 = vmatpush3.bf16.msra.mxu1 %v9449_v25 }
0x10be   : > { %8632 = vmatprep.subr.bf16.mxu1 %v10602_v1 }
0x10c1   : > { %8633 = vmatpush3.bf16.msra.mxu1 %v9450_v26 }
0x10c2   : > { %8634 = vmatprep.subr.bf16.mxu1 %v10602_v1 }
0x10c5   : > { %8635 = vmatpush3.bf16.msra.mxu1 %v9451_v27 }
0x10c6   : > { %8636 = vmatprep.subr.bf16.mxu1 %v10602_v1 }
0x10c9   : > { %8637 = vmatpush3.bf16.msra.mxu1 %v9452_v28 }
0x10ca   : > { %8638 = vmatprep.subr.bf16.mxu1 %v10602_v1 }
0x10cd   : > { %v4211_v10 = vpop.f32.mrf.mxu0  ;;  %8639 = vmatpush3.bf16.msra.mxu1 %v9453_v29 }
0x10ce   : > { %v4212_v11 = vadd.f32 %v4211_v10, %v4037_v6  ;;  %8640 = vmatprep.subr.bf16.mxu1 %v10602_v1 }
0x10cf   : > { %v4213_v14 = vpop.f32.mrf.mxu0 }
0x10d0   : > { %v4214_v15 = vadd.f32 %v4213_v14, %v4041_v7  ;;  %v4258_v16 = vmul.f32 %v11169_v20, %v4212_v11  ;;  %v4259_v23 = vmul.f32 %v11179_v37, %v4212_v11  ;;  %v4260_v8 = vmul.f32 %v11185_v40, %v4212_v11  ;;  %v7829_v14 = vld [vmem:[#allocation24 + $0x1] ss:$0 sm:$0xff] }
0x10d1   : > { %v4215_v18 = vpop.f32.mrf.mxu0  ;;  %v4261_v24 = vmul.f32 %v11190_v43, %v4212_v11  ;;  %8641 = vmatpush3.bf16.msra.mxu1 %v9454_v35  ;;  %v4045_v35 = vrot.slane %v11485_v5, %v11166_v17 }
0x10d2   : > { %8648 = vmatprep.subr.mxu0 %v4214_v15  ;;  %8650 = vmatprep.mubr.f32.mxu0 %v4258_v16 }
0x10d3   : > { %v4216_v21 = vpop.f32.mrf.mxu0  ;;  %8649 = vmatpush3.xpose.msra.mxu0 %v4214_v15  ;;  %8642 = vmatprep.subr.bf16.mxu1 %v10602_v1 }
0x10d5   : > { %8643 = vmatpush3.bf16.msra.mxu1 %v9455_v36 }
0x10d6   : > { %8651 = vmatmul.mubr.f32.vlgmr.msra.gmra.mxu0 %v4259_v23  ;;  %8684 = vmatprep.subr.bf16.mxu1 %v10602_v1 }
0x10d7   : > { %8653 = vmatprep.mubr.f32.mxu0 %v4260_v8 }
0x10d8   : > { %8645 = vmatmul.mubr.bf16.vlgmr.msra.gmra.mxu1 %v11477_v53 }
0x10d9   : > { %8700 = vmatprep.mubr.msk.bf16.mxu1 %vm10603_vm0, %v10602_v1 }
0x10da   : > { %8654 = vmatmul.mubr.f32.gmra.mxu0 %v4261_v24 }
0x1178   : > { %v3907_v38 = vpop.f32.mrf.mxu1 }
0x1179   : > { %v3908_v8 = vadd.f32 %v7829_v14, %v3907_v38 }
0x117a   : > { %v8626_v39 = vpop.f32.mrf.mxu1 }
0x117b   : > { %v11529_v25 = vadd.f32 %v3908_v8, %v11449_v32 }
0x117c   : > { %v3910_v42 = vpop.f32.mrf.mxu1 }
0x117d   : > { %v3911_v18 = vadd.f32 %v7829_v14, %v3910_v42  ;;  %v3922_v27 = vmul.f32 %v11529_v25, %v11529_v25  ;;  %v3953_v14 = vrot.slane %v11441_v19, %v11339_v31 }
0x117e   : > { %v8627_v34 = vpop.f32.mrf.mxu1 }
0x117f   : > { %v3915_v9 = vadd.f32 %v3911_v18, %v11451_v33 }
0x1181   : > { %v3923_v26 = vmul.f32 %v3915_v9, %v3915_v9 }
0x1196   : > { %v8652_v45 = vpop.f32.mrf.mxu0 }
0x1197   : > { %v4334_v46 = vadd.f32 %v8652_v45, %v1858_v44 }
0x1198   : > { %v4328_v47 = vpop.f32.mrf.mxu0  ;;  %v4252_v28 = vpop.f32.mrf.mxu1 }
0x1199   : > { %v4329_v41 = vadd.f32 %v4328_v47, %v1858_v44  ;;  %v4351_v56 = vsel %vm4347_vm12, %v4334_v46, -inf  ;;  %v4253_v33 = vadd.f32 %v4252_v28, %v4045_v35  ;;  %v9460_v28 = vld [vmem:[#allocation15 + $0x18] sm:$0xff]   ;;  %v9462_v35 = vld [vmem:[#allocation15 + $0x8] sm:$0xff]  }
0x119a   : > { %4352 = vmax.xlane.f32.xlu1 %v4351_v56  ;;  %v8655_v30 = vpop.f32.mrf.mxu0  ;;  %v8646_v29 = vpop.f32.mrf.mxu1 }
0x119b   : > { %v4344_v50 = vadd.f32 %v8655_v30, %v1858_v44  ;;  %v4348_v49 = vsel %vm4347_vm12, %v4329_v41, -inf  ;;  %8656 = vmatprep.subr.mxu0 %v4253_v33  ;;  %v9461_v29 = vld [vmem:[#allocation15 + $0x10] sm:$0xff]  }
0x119c   : > { %v4338_v51 = vpop.f32.mrf.mxu0  ;;  %4349 = vmax.xlane.f32.xlu0 %v4348_v49  ;;  %v4255_v36 = vpop.f32.mrf.mxu1  ;;  %8657 = vmatpush3.msra.mxu0 %v4253_v33  ;;  %v9466_v33 = vld [vmem:[%s12002_s8 + $0x74] ss:$8 sps:$4 sm:$0xff]  }
0x119d   : > { %v4339_v53 = vadd.f32 %v4338_v51, %v1858_v44  ;;  %v4357_v54 = vsel %vm4347_vm12, %v4344_v50, -inf  ;;  %8664 = vmatprep.subr.bf16.mxu0 %v10602_v1  ;;  %v9463_v36 = vld [vmem:[#allocation15] sm:$0xff]  }
0x119e   : > { %4358 = vmax.xlane.f32.xlu1 %v4357_v54  ;;  %v8647_v38 = vpop.f32.mrf.mxu1 }
0x119f   : > { %v4354_v48 = vsel %vm4347_vm12, %v4339_v53, -inf }
0x11a0   : > { %4355 = vmax.xlane.f32.xlu0 %v4354_v48 }
0x1223   : > { %v4353_v55 = vpop.xlane.xlu1 %4352 }
0x1224   : > { %v4361_v57 = vsub.f32 %v4334_v46, %v4353_v55 }
0x1225   : > { %v4350_v58 = vpop.xlane.xlu0 %4349 }
0x1226   : > { %v4366_v59 = vmul.f32 1.442695, %v4361_v57  ;;  %v4360_v60 = vsub.f32 %v4329_v41, %v4350_v58 }
0x1227   : > { %v4359_v61 = vpop.xlane.xlu1 %4358 }
0x1228   : > { %9700 = vpow2.f32 %v4366_v59  ;;  %v4364_v62 = vmul.f32 1.442695, %v4360_v60  ;;  %v4363_v63 = vsub.f32 %v4344_v50, %v4359_v61 }
0x1229   : > { %v4356_v2 = vpop.xlane.xlu0 %4355 }
0x122a   : > { %9702 = vpow2.f32 %v4364_v62  ;;  %v4370_v3 = vmul.f32 1.442695, %v4363_v63  ;;  %v4362_v4 = vsub.f32 %v4339_v53, %v4356_v2 }
0x122c   : > { %9704 = vpow2.f32 %v4370_v3  ;;  %v4368_v6 = vmul.f32 1.442695, %v4362_v4 }
0x122e   : > { %9706 = vpow2.f32 %v4368_v6  ;;  %v3947_v6 = vrot.slane %v11441_v19, %v11166_v17  ;;  %v9456_v19 = vld [vmem:[#allocation15 + $0x38] sm:$0xff]  }
0x1235   : > { %v9701_v7 = vpop.eup %9700 }
0x1236   : > { %v4375_v10 = vsel %vm4347_vm12, %v9701_v7, 0.0 }
0x1237   : > { %v9703_v11 = vpop.eup %9702  ;;  %4376 = vadd.xlane.f32.xlu1 %v4375_v10 }
0x1238   : > { %v4372_v15 = vsel %vm4347_vm12, %v9703_v11, 0.0 }
0x1239   : > { %v9705_v16 = vpop.eup %9704  ;;  %4373 = vadd.xlane.f32.xlu0 %v4372_v15 }
0x123a   : > { %v4381_v21 = vsel %vm4347_vm12, %v9705_v16, 0.0 }
0x123b   : > { %v9707_v23 = vpop.eup %9706  ;;  %4382 = vadd.xlane.f32.xlu1 %v4381_v21 }
0x123c   : > { %v4378_v24 = vsel %vm4347_vm12, %v9707_v23, 0.0 }
0x123d   : > { %4379 = vadd.xlane.f32.xlu0 %v4378_v24 }
0x123f   : > { %3918 = vadd.xlane.f32.xlu1 %v3915_v9 }
0x1241   : > { %3916 = vadd.xlane.f32.xlu0 %v11529_v25 }
0x1243   : > { %3926 = vadd.xlane.f32.xlu1 %v3923_v26  ;;  %v9458_v26 = vld [vmem:[#allocation15 + $0x28] sm:$0xff]  }
0x1245   : > { %3924 = vadd.xlane.f32.xlu0 %v3922_v27  ;;  %v9459_v27 = vld [vmem:[#allocation15 + $0x20] sm:$0xff]  }
0x12c0   : > { %v4377_v32 = vpop.xlane.xlu1 %4376 }
0x12c1   : > { %9708 = vrcp.f32 %v4377_v32 }
0x12c2   : > { %v4374_v39 = vpop.xlane.xlu0 %4373 }
0x12c3   : > { %9710 = vrcp.f32 %v4374_v39 }
0x12c4   : > { %v4383_v42 = vpop.xlane.xlu1 %4382 }
0x12c5   : > { %9712 = vrcp.f32 %v4383_v42 }
0x12c6   : > { %v4380_v34 = vpop.xlane.xlu0 %4379 }
0x12c7   : > { %9714 = vrcp.f32 %v4380_v34 }
0x12c8   : > { %v3919_v44 = vpop.xlane.xlu1 %3918 }
0x12c9   : > { %v3921_v45 = vmul.f32 0.03125, %v3919_v44 }
0x12ca   : > { %v3917_v46 = vpop.xlane.xlu0 %3916 }
0x12cb   : > { %v3920_v47 = vmul.f32 0.03125, %v3917_v46  ;;  %v3931_v41 = vmul.f32 %v3921_v45, %v3921_v45  ;;  %v3937_v4 = vsub.f32 %v3915_v9, %v3921_v45 }
0x12cc   : > { %v3927_v5 = vpop.xlane.xlu1 %3926 }
0x12cd   : > { %v3929_v56 = vmul.f32 0.03125, %v3927_v5  ;;  %v3930_v49 = vmul.f32 %v3920_v47, %v3920_v47  ;;  %v3936_v10 = vsub.f32 %v11529_v25, %v3920_v47  ;;  %v9457_v25 = vld [vmem:[#allocation15 + $0x30] sm:$0xff]  }
0x12ce   : > { %v3925_v30 = vpop.xlane.xlu0 %3924  ;;  %v9709_v50 = vpop.eup %9708 }
0x12cf   : > { %v3933_v51 = vsub.f32 %v3929_v56, %v3931_v41  ;;  %v3928_v53 = vmul.f32 0.03125, %v3925_v30  ;;  %v4387_v58 = vmul.f32 %v9709_v50, %v9701_v7 }
0x12d0   : > { %v9711_v54 = vpop.eup %9710 }
0x12d1   : > { %v3935_v48 = vmax.f32 %v3933_v51, 0.0  ;;  %v3932_v55 = vsub.f32 %v3928_v53, %v3930_v49  ;;  %v4385_v57 = vmul.f32 %v9711_v54, %v9703_v11 }
0x12d2   : > { %v9713_v59 = vpop.eup %9712 }
0x12d3   : > { %v3939_v60 = vadd.f32 1e-05, %v3935_v48  ;;  %v3934_v61 = vmax.f32 %v3932_v55, 0.0  ;;  %8658 = vmatprep.mubr.msk.f32.mxu0 %vm4347_vm12, %v4385_v57  ;;  %v4391_v3 = vmul.f32 %v9713_v59, %v9705_v16 }
0x12d4   : > { %v9715_v62 = vpop.eup %9714  ;;  %8659 = vmatmul.mubr.msk.f32.vlgmr.msra.gmra.mxu0 %vm4347_vm12, %v4387_v58 }
0x12d5   : > { %9716 = vrsqrt.f32 %v3939_v60  ;;  %v3938_v63 = vadd.f32 1e-05, %v3934_v61  ;;  %v4389_v2 = vmul.f32 %v9715_v62, %v9707_v23  ;;  %8665 = vmatpush3.bf16.msra.mxu0 %v9456_v19  ;;  %v9464_v62 = vld [vmem:[%s12002_s8 + $0x70] ss:$8 sps:$4 sm:$0xff]   ;;  %v9479_v19 = vld [vmem:[%s12002_s8 + $0x20] ss:$8 sps:$4 sm:$0xff]  }
0x12d6   : > { %8666 = vmatprep.subr.bf16.mxu0 %v10602_v1 }
0x12d7   : > { %9718 = vrsqrt.f32 %v3938_v63  ;;  %8661 = vmatprep.mubr.msk.f32.mxu0 %vm4347_vm12, %v4389_v2 }
0x12d8   : > { %8662 = vmatmul.mubr.msk.f32.gmra.mxu0 %vm4347_vm12, %v4391_v3  ;;  %v9469_v3 = vld [vmem:[%s12002_s8 + $0x64] ss:$8 sps:$4 sm:$0xff]  }
0x12d9   : > { %8680 = vmatprep.mubr.msk.bf16.mxu0 %vm10603_vm0, %v10602_v1  ;;  %8667 = vmatpush3.bf16.msra.mxu0 %v9457_v25  ;;  %v3956_v25 = vld [vmem:[#allocation34] sm:$0x3] }
0x12da   : > { %8668 = vmatprep.subr.bf16.mxu0 %v10602_v1 }
0x12dd   : > { %8669 = vmatpush3.bf16.msra.mxu0 %v9458_v26 }
0x12de   : > { %8670 = vmatprep.subr.bf16.mxu0 %v10602_v1 }
0x12e1   : > { %8671 = vmatpush3.bf16.msra.mxu0 %v9459_v27  ;;  %v9484_v27 = vld [vmem:[%s12002_s8 + $0x14] ss:$8 sps:$4 sm:$0xff]  }
0x12e2   : > { %v9717_v7 = vpop.eup %9716  ;;  %8672 = vmatprep.subr.bf16.mxu0 %v10602_v1 }
0x12e3   : > { %v3943_v11 = vmul.f32 %v9717_v7, %v3937_v4  ;;  %v9472_v7 = vld [vmem:[%s12002_s8 + $0x54] ss:$8 sps:$4 sm:$0xff]  }
0x12e4   : > { %v9719_v15 = vpop.eup %9718 }
0x12e5   : > { %v3949_v16 = vmul.f32 %v3947_v6, %v3943_v11  ;;  %v3942_v18 = vmul.f32 %v9719_v15, %v3936_v10  ;;  %8673 = vmatpush3.bf16.msra.mxu0 %v9460_v28  ;;  %v9470_v10 = vld [vmem:[%s12002_s8 + $0x50] ss:$8 sps:$4 sm:$0xff]   ;;  %v9475_v11 = vld [vmem:[%s12002_s8 + $0x44] ss:$8 sps:$4 sm:$0xff]   ;;  %v9478_v15 = vld [vmem:[%s12002_s8 + $0x34] ss:$8 sps:$4 sm:$0xff]  }
0x12e6   : > { %8674 = vmatprep.subr.bf16.mxu0 %v10602_v1 }
0x12e7   : > { %v11548_v21 = vadd.f32 %v3953_v14, %v3949_v16  ;;  %v3948_v23 = vmul.f32 %v3947_v6, %v3942_v18  ;;  %v9467_v6 = vld [vmem:[%s12002_s8 + $0x60] ss:$8 sps:$4 sm:$0xff]   ;;  %v9476_v16 = vld [vmem:[%s12002_s8 + $0x30] ss:$8 sps:$4 sm:$0xff]   ;;  %v9481_v18 = vld [vmem:[%s12002_s8 + $0x24] ss:$8 sps:$4 sm:$0xff]  }
0x12e9   : > { %3959 = vadd.xlane.f32.xlu1 %v11548_v21  ;;  %v11551_v8 = vadd.f32 %v3953_v14, %v3948_v23  ;;  %v3964_v24 = vmul.f32 %v11548_v21, %v11548_v21  ;;  %8675 = vmatpush3.bf16.msra.mxu0 %v9461_v29  ;;  %v9473_v14 = vld [vmem:[%s12002_s8 + $0x40] ss:$8 sps:$4 sm:$0xff]  }
0x12ea   : > { %8676 = vmatprep.subr.bf16.mxu0 %v10602_v1 }
0x12eb   : > { %3957 = vadd.xlane.f32.xlu0 %v11551_v8  ;;  %v3963_v9 = vmul.f32 %v11551_v8, %v11551_v8 }
0x12ed   : > { %3967 = vadd.xlane.f32.xlu1 %v3964_v24  ;;  %8677 = vmatpush3.bf16.msra.mxu0 %v9462_v35  ;;  %v3988_v35 = vrot.slane %v3956_v25, %v11162_v13 }
0x12ee   : > { %8678 = vmatprep.subr.bf16.mxu0 %v10602_v1 }
0x12ef   : > { %3965 = vadd.xlane.f32.xlu0 %v3963_v9 }
0x12f1   : > { %8679 = vmatpush3.bf16.msra.mxu0 %v9463_v36  ;;  %v9482_v36 = vld [vmem:[%s12002_s8 + $0x10] ss:$8 sps:$4 sm:$0xff]  }
0x12f2   : > { %4854 = vmatprep.subr.bf16.mxu0 %v9466_v33  ;;  %v9487_v33 = vld [vmem:[%s12002_s8 + $0x4] ss:$8 sps:$4 sm:$0xff]  }
0x1372   : > { %v3960_v32 = vpop.xlane.xlu1 %3959 }
0x1373   : > { %v3962_v45 = vmul.f32 0.03125, %v3960_v32 }
0x1374   : > { %v3958_v38 = vpop.xlane.xlu0 %3957 }
0x1375   : > { %v3961_v42 = vmul.f32 0.03125, %v3958_v38  ;;  %v3972_v50 = vmul.f32 %v3962_v45, %v3962_v45  ;;  %v3978_v26 = vsub.f32 %v11548_v21, %v3962_v45  ;;  %v9489_v45 = vld [vmem:[#allocation18 + $0x30] sm:$0xff]  }
0x1376   : > { %v3968_v34 = vpop.xlane.xlu1 %3967 }
0x1377   : > { %v3971_v5 = vmul.f32 %v3961_v42, %v3961_v42  ;;  %v3970_v41 = vmul.f32 0.03125, %v3968_v34  ;;  %v3977_v24 = vsub.f32 %v11551_v8, %v3961_v42  ;;  %v3994_v8 = vrot.slane %v3956_v25, %v11172_v22 }
0x1378   : > { %v3966_v39 = vpop.xlane.xlu0 %3965 }
0x1379   : > { %v3969_v46 = vmul.f32 0.03125, %v3966_v39  ;;  %v3974_v54 = vsub.f32 %v3970_v41, %v3972_v50  ;;  %v9485_v39 = vld [vmem:[%s12002_s8] ss:$8 sps:$4 sm:$0xff]  }
0x137a   : > { %v9493_v41 = vld [vmem:[#allocation18 + $0x10] sm:$0xff]  }
0x137b   : > { %v3973_v49 = vsub.f32 %v3969_v46, %v3971_v5  ;;  %v3976_v60 = vmax.f32 %v3974_v54, 0.0  ;;  %v9490_v46 = vld [vmem:[#allocation18 + $0x28] sm:$0xff]   ;;  %v9492_v5 = vld [vmem:[#allocation18 + $0x18] sm:$0xff]   ;;  %v7866_v50 = vld [vmem:[#allocation7] ss:$0 sm:$0xff] }
0x137d   : > { %v3975_v57 = vmax.f32 %v3973_v49, 0.0  ;;  %v3980_v4 = vadd.f32 1e-05, %v3976_v60 }
0x137f   : > { %v3979_v63 = vadd.f32 1e-05, %v3975_v57 }
0x1381   : > { %9720 = vrsqrt.f32 %v3979_v63 }
0x1382   : > { %9722 = vrsqrt.f32 %v3980_v4 }
0x138e   : > { %v9721_v23 = vpop.eup %9720 }
0x138f   : > { %v9723_v9 = vpop.eup %9722  ;;  %v3983_v28 = vmul.f32 %v9721_v23, %v3977_v24 }
0x1390   : > { %v3984_v29 = vmul.f32 %v9723_v9, %v3978_v26 }
0x1391   : > { %v3989_v38 = vmul.f32 %v3988_v35, %v3983_v28 }
0x1392   : > { %v3990_v32 = vmul.f32 %v3988_v35, %v3984_v29 }
0x1393   : > { %v3995_v42 = vadd.f32 %v3994_v8, %v3989_v38 }
0x1394   : > { %v8660_v44 = vpop.f32.mrf.mxu0  ;;  %v3996_v34 = vadd.f32 %v3994_v8, %v3990_v32 }
0x1395   : > { %v4490_v51 = vmul.f32 %v8660_v44, %v11179_v37  ;;  %v9488_v44 = vld [vmem:[#allocation18 + $0x38] sm:$0xff]  }
0x1396   : > { %v4470_v47 = vpop.f32.mrf.mxu0  ;;  %v11590_v21 = vpack.c.bf16 %v3996_v34, %v3995_v42  ;;  %8685 = vmatpush3.bf16.msra.mxu1 %v9488_v44 }
0x1397   : > { %v4489_v56 = vmul.f32 %v11169_v20, %v4470_v47  ;;  %8686 = vmatprep.subr.bf16.mxu1 %v10602_v1  ;;  %v9491_v47 = vld [vmem:[#allocation18 + $0x20] sm:$0xff]  }
0x1398   : > { %v8663_v30 = vpop.f32.mrf.mxu0 }
0x1399   : > { %v4491_v48 = vadd.f32 %v4490_v51, %v4489_v56  ;;  %v4494_v58 = vmul.f32 %v8663_v30, %v11190_v43  ;;  %v9494_v56 = vld [vmem:[#allocation18 + $0x8] sm:$0xff]   ;;  %v9495_v30 = vld [vmem:[#allocation18] sm:$0xff]  }
0x139a   : > { %v4480_v53 = vpop.f32.mrf.mxu0  ;;  %8687 = vmatpush3.bf16.msra.mxu1 %v9489_v45 }
0x139b   : > { %v4492_v55 = vmul.f32 %v11185_v40, %v4480_v53  ;;  %8688 = vmatprep.subr.bf16.mxu1 %v10602_v1 }
0x139d   : > { %v4493_v59 = vadd.f32 %v4492_v55, %v4491_v48 }
0x139e   : > { %8689 = vmatpush3.bf16.msra.mxu1 %v9490_v46  ;;  %v1859_v46 = vld [vmem:[%s11624_s9] sm:$0xff] }
0x139f   : > { %v4495_v61 = vadd.f32 %v4494_v58, %v4493_v59  ;;  %8690 = vmatprep.subr.bf16.mxu1 %v10602_v1  ;;  %v4761_v58 = vld [vmem:[#allocation6] sm:$0x3] }
0x13a0   : > { %v4767_v59 = vrot.slane %v4761_v58, %v11162_v13  ;;  %v4771_v60 = vrot.slane %v4761_v58, %v11172_v22 }
0x13a1   : > { %v4513_v2 = vpack.c.bf16 %v4495_v61, %v4495_v61 }
0x13a2   : > { %8691 = vmatpush3.bf16.msra.mxu1 %v9491_v47 }
0x13a3   : > { %8681 = vmatmul.mubr.bf16.vlgmr.msra.gmra.mxu0 %v4513_v2  ;;  %8692 = vmatprep.subr.bf16.mxu1 %v10602_v1 }
0x13a4   : > { %4855 = vmatpush1.bf16.msra.mxu0 %v9464_v62  ;;  %4886 = vmatprep.mubr.bf16.mxu0 %v10601_v0 }
0x13a5   : > { %4856 = vmatprep.subr.bf16.mxu0 %v9469_v3 }
0x13a6   : > { %8693 = vmatpush3.bf16.msra.mxu1 %v9492_v5 }
0x13a7   : > { %8694 = vmatprep.subr.bf16.mxu1 %v10602_v1 }
0x13a8   : > { %4857 = vmatpush1.bf16.msra.mxu0 %v9467_v6 }
0x13a9   : > { %4858 = vmatprep.subr.bf16.mxu0 %v9472_v7 }
0x13aa   : > { %8695 = vmatpush3.bf16.msra.mxu1 %v9493_v41 }
0x13ab   : > { %8696 = vmatprep.subr.bf16.mxu1 %v10602_v1 }
0x13ac   : > { %4859 = vmatpush1.bf16.msra.mxu0 %v9470_v10 }
0x13ad   : > { %4860 = vmatprep.subr.bf16.mxu0 %v9475_v11 }
0x13ae   : > { %8697 = vmatpush3.bf16.msra.mxu1 %v9494_v56 }
0x13af   : > { %8698 = vmatprep.subr.bf16.mxu1 %v10602_v1 }
0x13b0   : > { %4861 = vmatpush1.bf16.msra.mxu0 %v9473_v14 }
0x13b1   : > { %4862 = vmatprep.subr.bf16.mxu0 %v9478_v15 }
0x13b2   : > { %8699 = vmatpush3.bf16.msra.mxu1 %v9495_v30 }
0x13b4   : > { %4863 = vmatpush1.bf16.msra.mxu0 %v9476_v16 }
0x13b5   : > { %4864 = vmatprep.subr.bf16.mxu0 %v9481_v18  ;;  %v11607_v18 = vld [vmem:[%s12003_s13] sm:$0x3f] }
0x13b6   : > { %v4626_v24 = vrot.slane %v11607_v18, %v11162_v13  ;;  %v4631_v25 = vrot.slane %v11607_v18, %v11172_v22 }
0x13b8   : > { %4865 = vmatpush1.bf16.msra.mxu0 %v9479_v19 }
0x13b9   : > { %4866 = vmatprep.subr.bf16.mxu0 %v9484_v27 }
0x13bc   : > { %4867 = vmatpush1.bf16.msra.mxu0 %v9482_v36  ;;  %v7875_v36 = vld [vmem:[#allocation10] ss:$0 sm:$0xff] }
0x13bd   : > { %4868 = vmatprep.subr.bf16.mxu0 %v9487_v33 }
0x13c0   : > { %4869 = vmatpush1.bf16.msra.mxu0 %v9485_v39 }
0x13c1   : > { %8744 = vmatprep.subr.bf16.mxu0 %v10602_v1 }
0x13c3   : > { %4887 = vmatmul.mubr.bf16.vlgmr.msra.gmra.mxu0 %v11590_v21 }
0x13c4   : > { %8760 = vmatprep.mubr.msk.bf16.mxu0 %vm10603_vm0, %v10602_v1 }
0x1463   : > { %v4602_v49 = vpop.f32.mrf.mxu0 }
0x1464   : > { %v4603_v51 = vadd.f32 %v7866_v50, %v4602_v49 }
0x1465   : > { %v8682_v53 = vpop.f32.mrf.mxu0 }
0x1466   : > { %v4608_v54 = vadd.f32 %v4603_v51, %v11473_v52 }
0x1467   : > { %v4605_v48 = vpop.f32.mrf.mxu0 }
0x1468   : > { %4609 = vadd.xlane.f32.xlu0 %v4608_v54  ;;  %v4612_v55 = vmul.f32 %v4608_v54, %v4608_v54 }
0x1469   : > { %v8683_v57 = vpop.f32.mrf.mxu0 }
0x146a   : > { %4613 = vadd.xlane.f32.xlu1 %v4612_v55 }
0x1483   : > { %v4888_v61 = vpop.f32.mrf.mxu0 }
0x1484   : > { %v4889_v62 = vadd.f32 %v4888_v61, %v4767_v59 }
0x1485   : > { %v4890_v63 = vpop.f32.mrf.mxu0 }
0x1486   : > { %v4891_v2 = vadd.f32 %v4890_v63, %v4771_v60 }
0x1487   : > { %v4892_v3 = vpop.f32.mrf.mxu0 }
0x1488   : > { %v4893_v4 = vadd.f32 %v4892_v3, %v4767_v59 }
0x1489   : > { %v4894_v29 = vpop.f32.mrf.mxu0 }
0x148a   : > { %8704 = vmatprep.subr.mxu1 %v4893_v4  ;;  %v4895_v35 = vadd.f32 %v4894_v29, %v4771_v60 }
0x14f1   : > { %v4610_v6 = vpop.xlane.xlu0 %4609 }
0x14f2   : > { %v4611_v52 = vmul.f32 0.03125, %v4610_v6 }
0x14f3   : > { %v4614_v7 = vpop.xlane.xlu1 %4613 }
0x14f4   : > { %v4616_v10 = vmul.f32 %v4611_v52, %v4611_v52  ;;  %v4615_v11 = vmul.f32 0.03125, %v4614_v7  ;;  %v4619_v23 = vsub.f32 %v4608_v54, %v4611_v52 }
0x14f6   : > { %v4617_v14 = vsub.f32 %v4615_v11, %v4616_v10 }
0x14f8   : > { %v4618_v15 = vmax.f32 %v4617_v14, 0.0 }
0x14fa   : > { %v4620_v16 = vadd.f32 1e-05, %v4618_v15 }
0x14fc   : > { %9724 = vrsqrt.f32 %v4620_v16 }
0x1509   : > { %v9725_v9 = vpop.eup %9724 }
0x150a   : > { %v4622_v19 = vmul.f32 %v9725_v9, %v4619_v23 }
0x150c   : > { %v4627_v26 = vmul.f32 %v4626_v24, %v4622_v19 }
0x150e   : > { %v11613_v27 = vadd.f32 %v4631_v25, %v4627_v26 }
0x1510   : > { %v4650_v28 = vpack.c.bf16 %v11613_v27, %v11613_v27 }
0x1512   : > { %8701 = vmatmul.mubr.bf16.vlgmr.msra.gmra.mxu1 %v4650_v28 }
0x1513   : > { %8705 = vmatpush3.xpose.msra.mxu1 %v4893_v4 }
0x1514   : > { %8706 = vmatprep.subr.mxu1 %v4889_v62 }
0x1517   : > { %8707 = vmatpush3.xpose.msra.mxu1 %v4889_v62 }
0x1518   : > { %8714 = vmatprep.subr.mxu1 %v4895_v35 }
0x15d2   : > { %v4739_v33 = vpop.f32.mrf.mxu1 }
0x15d3   : > { %v4740_v38 = vadd.f32 %v7875_v36, %v4739_v33  ;;  %v9496_v36 = vld [vmem:[#allocation16 + $0x38] sm:$0xff]  }
0x15d4   : > { %v8702_v32 = vpop.f32.mrf.mxu1 }
0x15d5   : > { %v4897_v8 = vmul.f32 %v11169_v20, %v4740_v38  ;;  %v4898_v39 = vmul.f32 %v11179_v37, %v4740_v38  ;;  %v4899_v34 = vmul.f32 %v11185_v40, %v4740_v38  ;;  %v4900_v45 = vmul.f32 %v11190_v43, %v4740_v38 }
0x15d6   : > { %v4742_v42 = vpop.f32.mrf.mxu1 }
0x15d7   : > { %8708 = vmatprep.mubr.f32.mxu1 %v4897_v8 }
0x15d8   : > { %v8703_v44 = vpop.f32.mrf.mxu1  ;;  %8709 = vmatmul.mubr.f32.vlgmr.msra.gmra.mxu1 %v4898_v39  ;;  %v9497_v39 = vld [vmem:[#allocation16 + $0x30] sm:$0xff]  }
0x15d9   : > { %8715 = vmatpush3.msra.mxu1 %v4895_v35  ;;  %8711 = vmatprep.mubr.f32.mxu1 %v4899_v34  ;;  %v9498_v34 = vld [vmem:[#allocation16 + $0x28] sm:$0xff]   ;;  %v9499_v44 = vld [vmem:[#allocation16 + $0x20] sm:$0xff]  }
0x15da   : > { %8716 = vmatprep.subr.mxu1 %v4891_v2 }
0x15db   : > { %8717 = vmatpush3.msra.mxu1 %v4891_v2 }
0x15dc   : > { %8712 = vmatmul.mubr.f32.gmra.mxu1 %v4900_v45  ;;  %8724 = vmatprep.subr.bf16.mxu1 %v10602_v1  ;;  %v9500_v45 = vld [vmem:[#allocation16 + $0x18] sm:$0xff]  }
0x1698   : > { %v8710_v47 = vpop.f32.mrf.mxu1 }
0x1699   : > { %v4973_v5 = vadd.f32 %v8710_v47, %v1859_v46  ;;  %v9502_v47 = vld [vmem:[#allocation16 + $0x8] sm:$0xff]  }
0x169a   : > { %v4967_v41 = vpop.f32.mrf.mxu1 }
0x169b   : > { %v4968_v56 = vadd.f32 %v4967_v41, %v1859_v46  ;;  %v4989_v30 = vsel %vm2258_vm11, %v4973_v5, -inf }
0x169c   : > { %4990 = vmax.xlane.f32.xlu1 %v4989_v30  ;;  %v8713_v50 = vpop.f32.mrf.mxu1 }
0x169d   : > { %v4983_v49 = vadd.f32 %v8713_v50, %v1859_v46  ;;  %v4986_v51 = vsel %vm2258_vm11, %v4968_v56, -inf }
0x169e   : > { %v4977_v53 = vpop.f32.mrf.mxu1  ;;  %4987 = vmax.xlane.f32.xlu0 %v4986_v51 }
0x169f   : > { %v4978_v54 = vadd.f32 %v4977_v53, %v1859_v46  ;;  %v4995_v48 = vsel %vm2258_vm11, %v4983_v49, -inf  ;;  %v9501_v46 = vld [vmem:[#allocation16 + $0x10] sm:$0xff]  }
0x16a0   : > { %4996 = vmax.xlane.f32.xlu1 %v4995_v48 }
0x16a1   : > { %v4992_v55 = vsel %vm2258_vm11, %v4978_v54, -inf }
0x16a2   : > { %4993 = vmax.xlane.f32.xlu0 %v4992_v55 }
0x1725   : > { %v4991_v57 = vpop.xlane.xlu1 %4990 }
0x1726   : > { %v4999_v58 = vsub.f32 %v4973_v5, %v4991_v57  ;;  %v9503_v5 = vld [vmem:[#allocation16] sm:$0xff]  }
0x1727   : > { %v4988_v59 = vpop.xlane.xlu0 %4987 }
0x1728   : > { %v5004_v60 = vmul.f32 1.442695, %v4999_v58  ;;  %v4998_v61 = vsub.f32 %v4968_v56, %v4988_v59  ;;  %v7904_v59 = vld [vmem:[#allocation9] ss:$0 sm:$0xff] }
0x1729   : > { %v4997_v62 = vpop.xlane.xlu1 %4996 }
0x172a   : > { %9726 = vpow2.f32 %v5004_v60  ;;  %v5002_v63 = vmul.f32 1.442695, %v4998_v61  ;;  %v5001_v2 = vsub.f32 %v4983_v49, %v4997_v62 }
0x172b   : > { %v4994_v3 = vpop.xlane.xlu0 %4993 }
0x172c   : > { %9728 = vpow2.f32 %v5002_v63  ;;  %v5008_v4 = vmul.f32 1.442695, %v5001_v2  ;;  %v5000_v6 = vsub.f32 %v4978_v54, %v4994_v3 }
0x172e   : > { %9730 = vpow2.f32 %v5008_v4  ;;  %v5006_v52 = vmul.f32 1.442695, %v5000_v6  ;;  %v9504_v6 = vld [vmem:[%s12005_s22 + $0x38] sm:$0xff]  }
0x172f   : > { %8745 = vmatpush3.bf16.msra.mxu0 %v9504_v6  ;;  %v9526_v6 = vld [vmem:[%s11999_s0 + $0x154] ss:$12 sps:$4 sm:$0xff]  }
0x1730   : > { %9732 = vpow2.f32 %v5006_v52  ;;  %8746 = vmatprep.subr.bf16.mxu0 %v10602_v1  ;;  %v9505_v52 = vld [vmem:[%s12005_s22 + $0x30] sm:$0xff]  }
0x1733   : > { %8747 = vmatpush3.bf16.msra.mxu0 %v9505_v52  ;;  %v9524_v52 = vld [vmem:[%s11999_s0 + $0x150] ss:$12 sps:$4 sm:$0xff]  }
0x1734   : > { %8748 = vmatprep.subr.bf16.mxu0 %v10602_v1 }
0x1737   : > { %v9727_v7 = vpop.eup %9726 }
0x1738   : > { %v5013_v10 = vsel %vm2258_vm11, %v9727_v7, 0.0 }
0x1739   : > { %v9729_v11 = vpop.eup %9728  ;;  %5014 = vadd.xlane.f32.xlu1 %v5013_v10  ;;  %v9508_v10 = vld [vmem:[%s12005_s22 + $0x18] sm:$0xff]  }
0x173a   : > { %v5010_v14 = vsel %vm2258_vm11, %v9729_v11, 0.0 }
0x173b   : > { %v9731_v15 = vpop.eup %9730  ;;  %5011 = vadd.xlane.f32.xlu0 %v5010_v14  ;;  %v9510_v14 = vld [vmem:[%s12005_s22 + $0x8] sm:$0xff]  }
0x173c   : > { %v5019_v16 = vsel %vm2258_vm11, %v9731_v15, 0.0 }
0x173d   : > { %v9733_v23 = vpop.eup %9732  ;;  %5020 = vadd.xlane.f32.xlu1 %v5019_v16  ;;  %v9512_v16 = vld [vmem:[#allocation13 + $0x38] sm:$0xff]  }
0x173e   : > { %v5016_v24 = vsel %vm2258_vm11, %v9733_v23, 0.0 }
0x173f   : > { %5017 = vadd.xlane.f32.xlu0 %v5016_v24  ;;  %v9514_v24 = vld [vmem:[#allocation13 + $0x28] sm:$0xff]  }
0x17c2   : > { %v5015_v9 = vpop.xlane.xlu1 %5014 }
0x17c3   : > { %9734 = vrcp.f32 %v5015_v9  ;;  %v9515_v9 = vld [vmem:[#allocation13 + $0x20] sm:$0xff]  }
0x17c4   : > { %v5012_v19 = vpop.xlane.xlu0 %5011 }
0x17c5   : > { %9736 = vrcp.f32 %v5012_v19  ;;  %v9516_v19 = vld [vmem:[#allocation13 + $0x18] sm:$0xff]  }
0x17c6   : > { %v5021_v25 = vpop.xlane.xlu1 %5020 }
0x17c7   : > { %9738 = vrcp.f32 %v5021_v25  ;;  %v9517_v25 = vld [vmem:[#allocation13 + $0x10] sm:$0xff]  }
0x17c8   : > { %v5018_v26 = vpop.xlane.xlu0 %5017 }
0x17c9   : > { %9740 = vrcp.f32 %v5018_v26 }
0x17d0   : > { %v9735_v28 = vpop.eup %9734 }
0x17d1   : > { %v5025_v33 = vmul.f32 %v9735_v28, %v9727_v7  ;;  %v9506_v7 = vld [vmem:[%s12005_s22 + $0x28] sm:$0xff]  }
0x17d2   : > { %v9737_v29 = vpop.eup %9736  ;;  %8749 = vmatpush3.bf16.msra.mxu0 %v9506_v7  ;;  %v9527_v7 = vld [vmem:[%s11999_s0 + $0x158] ss:$12 sps:$4 sm:$0xff]  }
0x17d3   : > { %v5023_v35 = vmul.f32 %v9737_v29, %v9729_v11  ;;  %8750 = vmatprep.subr.bf16.mxu0 %v10602_v1  ;;  %v9509_v11 = vld [vmem:[%s12005_s22 + $0x10] sm:$0xff]  }
0x17d4   : > { %v9739_v38 = vpop.eup %9738 }
0x17d5   : > { %8718 = vmatprep.mubr.msk.f32.mxu1 %vm2258_vm11, %v5023_v35  ;;  %v5029_v42 = vmul.f32 %v9739_v38, %v9731_v15  ;;  %v9511_v15 = vld [vmem:[%s12005_s22] sm:$0xff]  }
0x17d6   : > { %v9741_v32 = vpop.eup %9740  ;;  %8719 = vmatmul.mubr.msk.f32.vlgmr.msra.gmra.mxu1 %vm2258_vm11, %v5025_v33 }
0x17d7   : > { %v5027_v8 = vmul.f32 %v9741_v32, %v9733_v23  ;;  %8725 = vmatpush3.bf16.msra.mxu1 %v9496_v36  ;;  %v9513_v23 = vld [vmem:[#allocation13 + $0x30] sm:$0xff]  }
0x17d8   : > { %8726 = vmatprep.subr.bf16.mxu1 %v10602_v1 }
0x17d9   : > { %8721 = vmatprep.mubr.msk.f32.mxu1 %vm2258_vm11, %v5027_v8 }
0x17da   : > { %8722 = vmatmul.mubr.msk.f32.gmra.mxu1 %vm2258_vm11, %v5029_v42 }
0x17db   : > { %8727 = vmatpush3.bf16.msra.mxu1 %v9497_v39  ;;  %8740 = vmatprep.mubr.msk.bf16.mxu1 %vm10603_vm0, %v10602_v1  ;;  %v5264_v39 = vrot.slane %v11607_v18, %v11166_v17 }
0x17dc   : > { %8728 = vmatprep.subr.bf16.mxu1 %v10602_v1 }
0x17df   : > { %8729 = vmatpush3.bf16.msra.mxu1 %v9498_v34 }
0x17e0   : > { %8730 = vmatprep.subr.bf16.mxu1 %v10602_v1 }
0x17e3   : > { %8731 = vmatpush3.bf16.msra.mxu1 %v9499_v44  ;;  %v5269_v44 = vrot.slane %v11607_v18, %v11339_v31 }
0x17e4   : > { %8732 = vmatprep.subr.bf16.mxu1 %v10602_v1 }
0x17e7   : > { %8733 = vmatpush3.bf16.msra.mxu1 %v9500_v45 }
0x17e8   : > { %8734 = vmatprep.subr.bf16.mxu1 %v10602_v1 }
0x17eb   : > { %8735 = vmatpush3.bf16.msra.mxu1 %v9501_v46 }
0x17ec   : > { %8736 = vmatprep.subr.bf16.mxu1 %v10602_v1 }
0x17ef   : > { %8737 = vmatpush3.bf16.msra.mxu1 %v9502_v47 }
0x17f0   : > { %8738 = vmatprep.subr.bf16.mxu1 %v10602_v1 }
0x17f3   : > { %8739 = vmatpush3.bf16.msra.mxu1 %v9503_v5  ;;  %v9518_v5 = vld [vmem:[#allocation13 + $0x8] sm:$0xff]  }
0x17f4   : > { %8764 = vmatprep.subr.bf16.mxu1 %v10602_v1 }
0x1896   : > { %v8720_v41 = vpop.f32.mrf.mxu1 }
0x1897   : > { %v5128_v49 = vmul.f32 %v8720_v41, %v11179_v37  ;;  %v9519_v41 = vld [vmem:[#allocation13] sm:$0xff]  }
0x1898   : > { %v5108_v56 = vpop.f32.mrf.mxu1 }
0x1899   : > { %v5127_v30 = vmul.f32 %v11169_v20, %v5108_v56  ;;  %v7913_v56 = vld [vmem:[#allocation2] ss:$0 sm:$0xff] }
0x189a   : > { %v8723_v50 = vpop.f32.mrf.mxu1 }
0x189b   : > { %v5129_v53 = vadd.f32 %v5128_v49, %v5127_v30  ;;  %v5132_v48 = vmul.f32 %v8723_v50, %v11190_v43 }
0x189c   : > { %v5118_v51 = vpop.f32.mrf.mxu1 }
0x189d   : > { %v5130_v54 = vmul.f32 %v11185_v40, %v5118_v51 }
0x189f   : > { %v5131_v55 = vadd.f32 %v5130_v54, %v5129_v53 }
0x18a1   : > { %v5133_v57 = vadd.f32 %v5132_v48, %v5131_v55  ;;  %v7922_v55 = vld [vmem:[#allocation4] ss:$0 sm:$0xff] }
0x18a3   : > { %v5151_v58 = vpack.c.bf16 %v5133_v57, %v5133_v57 }
0x18a5   : > { %8741 = vmatmul.mubr.bf16.vlgmr.msra.gmra.mxu1 %v5151_v58 }
0x18a6   : > { %8780 = vmatprep.mubr.msk.bf16.mxu1 %vm10603_vm0, %v10602_v1  ;;  %8765 = vmatpush3.bf16.msra.mxu1 %v9512_v16  ;;  %v9535_v16 = vld [vmem:[%s11999_s0 + $0x128] ss:$12 sps:$4 sm:$0xff]  }
0x18a7   : > { %8766 = vmatprep.subr.bf16.mxu1 %v10602_v1 }
0x18aa   : > { %8767 = vmatpush3.bf16.msra.mxu1 %v9513_v23  ;;  %v9538_v23 = vld [vmem:[%s11999_s0 + $0x10c] ss:$12 sps:$4 sm:$0xff]  }
0x18ab   : > { %8768 = vmatprep.subr.bf16.mxu1 %v10602_v1 }
0x18ae   : > { %8769 = vmatpush3.bf16.msra.mxu1 %v9514_v24  ;;  %v9536_v24 = vld [vmem:[%s11999_s0 + $0x108] ss:$12 sps:$4 sm:$0xff]  }
0x18af   : > { %8770 = vmatprep.subr.bf16.mxu1 %v10602_v1 }
0x18b2   : > { %8771 = vmatpush3.bf16.msra.mxu1 %v9515_v9  ;;  %v9539_v9 = vld [vmem:[%s11999_s0 + $0x110] ss:$12 sps:$4 sm:$0xff]  }
0x18b3   : > { %8772 = vmatprep.subr.bf16.mxu1 %v10602_v1 }
0x18b6   : > { %8773 = vmatpush3.bf16.msra.mxu1 %v9516_v19  ;;  %v9542_v19 = vld [vmem:[%s11999_s0 + $0xf4] ss:$12 sps:$4 sm:$0xff]  }
0x18b7   : > { %8774 = vmatprep.subr.bf16.mxu1 %v10602_v1 }
0x18ba   : > { %8775 = vmatpush3.bf16.msra.mxu1 %v9517_v25  ;;  %v9540_v25 = vld [vmem:[%s11999_s0 + $0xf0] ss:$12 sps:$4 sm:$0xff]  }
0x18bb   : > { %8776 = vmatprep.subr.bf16.mxu1 %v10602_v1 }
0x18be   : > { %8777 = vmatpush3.bf16.msra.mxu1 %v9518_v5  ;;  %v5518_v5 = vsub.s32 5, %v11159_v12 }
0x18bf   : > { %8778 = vmatprep.subr.bf16.mxu1 %v10602_v1 }
0x18c2   : > { %8779 = vmatpush3.bf16.msra.mxu1 %v9519_v41 }
0x18c3   : > { %8784 = vmatprep.subr.bf16.mxu1 %v10602_v1 }
0x1965   : > { %v5240_v60 = vpop.f32.mrf.mxu1 }
0x1966   : > { %v5241_v61 = vadd.f32 %v7904_v59, %v5240_v60 }
0x1967   : > { %v8742_v62 = vpop.f32.mrf.mxu1 }
0x1968   : > { %v5246_v63 = vadd.f32 %v5241_v61, %v11613_v27  ;;  %v9507_v27 = vld [vmem:[%s12005_s22 + $0x20] sm:$0xff]  }
0x1969   : > { %v5243_v2 = vpop.f32.mrf.mxu1  ;;  %8751 = vmatpush3.bf16.msra.mxu0 %v9507_v27  ;;  %v9530_v27 = vld [vmem:[%s11999_s0 + $0x13c] ss:$12 sps:$4 sm:$0xff]  }
0x196a   : > { %5247 = vadd.xlane.f32.xlu0 %v5246_v63  ;;  %v5250_v3 = vmul.f32 %v5246_v63, %v5246_v63  ;;  %8752 = vmatprep.subr.bf16.mxu0 %v10602_v1  ;;  %v9522_v2 = vld [vmem:[%s11999_s0 + $0x16c] ss:$12 sps:$4 sm:$0xff]  }
0x196b   : > { %v8743_v4 = vpop.f32.mrf.mxu1 }
0x196c   : > { %5251 = vadd.xlane.f32.xlu1 %v5250_v3  ;;  %v9520_v3 = vld [vmem:[%s11999_s0 + $0x168] ss:$12 sps:$4 sm:$0xff]   ;;  %v9523_v4 = vld [vmem:[%s11999_s0 + $0x170] ss:$12 sps:$4 sm:$0xff]  }
0x196d   : > { %8753 = vmatpush3.bf16.msra.mxu0 %v9508_v10  ;;  %v9528_v10 = vld [vmem:[%s11999_s0 + $0x138] ss:$12 sps:$4 sm:$0xff]  }
0x196e   : > { %8754 = vmatprep.subr.bf16.mxu0 %v10602_v1 }
0x1971   : > { %8755 = vmatpush3.bf16.msra.mxu0 %v9509_v11  ;;  %v9531_v11 = vld [vmem:[%s11999_s0 + $0x140] ss:$12 sps:$4 sm:$0xff]  }
0x1972   : > { %8756 = vmatprep.subr.bf16.mxu0 %v10602_v1 }
0x1975   : > { %8757 = vmatpush3.bf16.msra.mxu0 %v9510_v14  ;;  %v9532_v14 = vld [vmem:[%s11999_s0 + $0x120] ss:$12 sps:$4 sm:$0xff]  }
0x1976   : > { %8758 = vmatprep.subr.bf16.mxu0 %v10602_v1 }
0x1979   : > { %8759 = vmatpush3.bf16.msra.mxu0 %v9511_v15  ;;  %v9534_v15 = vld [vmem:[%s11999_s0 + $0x124] ss:$12 sps:$4 sm:$0xff]  }
0x197a   : > { %5703 = vmatprep.subr.bf16.mxu0 %v9522_v2 }
0x19f3   : > { %v5248_v26 = vpop.xlane.xlu0 %5247 }
0x19f4   : > { %v5249_v28 = vmul.f32 0.03125, %v5248_v26  ;;  %v9543_v26 = vld [vmem:[%s11999_s0 + $0xf8] ss:$12 sps:$4 sm:$0xff]  }
0x19f5   : > { %v5252_v29 = vpop.xlane.xlu1 %5251 }
0x19f6   : > { %v5254_v35 = vmul.f32 %v5249_v28, %v5249_v28  ;;  %v5253_v36 = vmul.f32 0.03125, %v5252_v29  ;;  %v5257_v8 = vsub.f32 %v5246_v63, %v5249_v28  ;;  %v9546_v28 = vld [vmem:[%s11999_s0 + $0xdc] ss:$12 sps:$4 sm:$0xff]   ;;  %v9544_v29 = vld [vmem:[%s11999_s0 + $0xd8] ss:$12 sps:$4 sm:$0xff]  }
0x19f8   : > { %v5255_v33 = vsub.f32 %v5253_v36, %v5254_v35  ;;  %v9547_v35 = vld [vmem:[%s11999_s0 + $0xe0] ss:$12 sps:$4 sm:$0xff]   ;;  %v9550_v36 = vld [vmem:[%s11999_s0 + $0xc4] ss:$12 sps:$4 sm:$0xff]  }
0x19fa   : > { %v5256_v38 = vmax.f32 %v5255_v33, 0.0  ;;  %v9548_v33 = vld [vmem:[%s11999_s0 + $0xc0] ss:$12 sps:$4 sm:$0xff]  }
0x19fc   : > { %v5258_v32 = vadd.f32 1e-05, %v5256_v38  ;;  %v9551_v38 = vld [vmem:[%s11999_s0 + $0xc8] ss:$12 sps:$4 sm:$0xff]  }
0x19fe   : > { %9742 = vrsqrt.f32 %v5258_v32 }
0x1a0b   : > { %v9743_v42 = vpop.eup %9742 }
0x1a0c   : > { %v5260_v34 = vmul.f32 %v9743_v42, %v5257_v8 }
0x1a0e   : > { %v5265_v45 = vmul.f32 %v5264_v39, %v5260_v34 }
0x1a10   : > { %v5270_v46 = vadd.f32 %v5269_v44, %v5265_v45 }
0x1a12   : > { %v5288_v47 = vpack.c.bf16 %v5270_v46, %v5270_v46 }
0x1a14   : > { %8761 = vmatmul.mubr.bf16.vlgmr.msra.gmra.mxu0 %v5288_v47  ;;  %v5513_v47 = vsub.s32 4, %v11159_v12  ;;  %v9620_v12 = vld [vmem:[#allocation37 + $0x18] sm:$0xff]  }
0x1a15   : > { %5735 = vmatprep.mubr.bf16.mxu0 %v10601_v0  ;;  %5704 = vmatpush1.bf16.msra.mxu0 %v9520_v3 }
0x1a16   : > { %5705 = vmatprep.subr.bf16.mxu0 %v9526_v6 }
0x1a19   : > { %5706 = vmatpush1.bf16.msra.mxu0 %v9524_v52 }
0x1a1a   : > { %5707 = vmatprep.subr.bf16.mxu0 %v9530_v27 }
0x1a1d   : > { %5708 = vmatpush1.bf16.msra.mxu0 %v9528_v10 }
0x1a1e   : > { %5709 = vmatprep.subr.bf16.mxu0 %v9534_v15  ;;  %v9786_v15 = vld [vmem:[%s11516_s16] sm:$0xff] }
0x1a21   : > { %5710 = vmatpush1.bf16.msra.mxu0 %v9532_v14 }
0x1a22   : > { %5711 = vmatprep.subr.bf16.mxu0 %v9538_v23 }
0x1a25   : > { %5712 = vmatpush1.bf16.msra.mxu0 %v9536_v24 }
0x1a26   : > { %5713 = vmatprep.subr.bf16.mxu0 %v9542_v19 }
0x1a29   : > { %5714 = vmatpush1.bf16.msra.mxu0 %v9540_v25 }
0x1a2a   : > { %5715 = vmatprep.subr.bf16.mxu0 %v9546_v28 }
0x1a2d   : > { %5716 = vmatpush1.bf16.msra.mxu0 %v9544_v29 }
0x1a2e   : > { %5717 = vmatprep.subr.bf16.mxu0 %v9550_v36 }
0x1a31   : > { %5718 = vmatpush1.bf16.msra.mxu0 %v9548_v33 }
0x1ad4   : > { %v5377_v30 = vpop.f32.mrf.mxu0 }
0x1ad5   : > { %v5378_v50 = vadd.f32 %v7913_v56, %v5377_v30  ;;  %v5514_v56 = vrot.slane %v11607_v18, %v5513_v47 }
0x1ad6   : > { %v8762_v49 = vpop.f32.mrf.mxu0 }
0x1ad7   : > { %v5383_v51 = vmax.f32 %v5378_v50, 0.0  ;;  %v5519_v49 = vrot.slane %v11607_v18, %v5518_v5 }
0x1ad8   : > { %v5380_v53 = vpop.f32.mrf.mxu0 }
0x1ad9   : > { %v5401_v54 = vpack.c.bf16 %v5383_v51, %v5383_v51 }
0x1ada   : > { %v8763_v48 = vpop.f32.mrf.mxu0 }
0x1adb   : > { %8781 = vmatmul.mubr.bf16.vlgmr.msra.gmra.mxu1 %v5401_v54  ;;  %v5557_v48 = vld [vmem:[#allocation12 + $0x3] sm:$0x7] }
0x1adc   : > { %8800 = vmatprep.mubr.msk.bf16.mxu1 %vm10603_vm0, %v10602_v1  ;;  %8785 = vmatpush3.bf16.msra.mxu1 %v9523_v4  ;;  %v5571_v18 = vrot.slane %v5557_v48, %v11166_v17 }
0x1add   : > { %8786 = vmatprep.subr.bf16.mxu1 %v10602_v1 }
0x1ae0   : > { %8787 = vmatpush3.bf16.msra.mxu1 %v9527_v7 }
0x1ae1   : > { %8788 = vmatprep.subr.bf16.mxu1 %v10602_v1 }
0x1ae4   : > { %8789 = vmatpush3.bf16.msra.mxu1 %v9531_v11 }
0x1ae5   : > { %8790 = vmatprep.subr.bf16.mxu1 %v10602_v1 }
0x1ae8   : > { %8791 = vmatpush3.bf16.msra.mxu1 %v9535_v16 }
0x1ae9   : > { %8792 = vmatprep.subr.bf16.mxu1 %v10602_v1 }
0x1aec   : > { %8793 = vmatpush3.bf16.msra.mxu1 %v9539_v9 }
0x1aed   : > { %8794 = vmatprep.subr.bf16.mxu1 %v10602_v1 }
0x1af0   : > { %8795 = vmatpush3.bf16.msra.mxu1 %v9543_v26 }
0x1af1   : > { %8796 = vmatprep.subr.bf16.mxu1 %v10602_v1 }
0x1af4   : > { %8797 = vmatpush3.bf16.msra.mxu1 %v9547_v35 }
0x1af5   : > { %8798 = vmatprep.subr.bf16.mxu1 %v10602_v1 }
0x1af8   : > { %8799 = vmatpush3.bf16.msra.mxu1 %v9551_v38 }
0x1af9   : > { %8840 = vmatprep.subr.bf16.mxu1 %v10602_v1 }
0x1b9b   : > { %v5490_v57 = vpop.f32.mrf.mxu1 }
0x1b9c   : > { %v5491_v58 = vadd.f32 %v7922_v55, %v5490_v57  ;;  %v5563_v55 = vrot.slane %v5557_v48, %v11162_v13  ;;  %v5567_v57 = vrot.slane %v5557_v48, %v11172_v22 }
0x1b9d   : > { %v8782_v59 = vpop.f32.mrf.mxu1 }
0x1b9e   : > { %v11686_v60 = vadd.f32 %v5491_v58, %v5270_v46 }
0x1b9f   : > { %v5493_v61 = vpop.f32.mrf.mxu1 }
0x1ba0   : > { %5497 = vadd.xlane.f32.xlu0 %v11686_v60  ;;  %v5500_v62 = vmul.f32 %v11686_v60, %v11686_v60 }
0x1ba1   : > { %v8783_v63 = vpop.f32.mrf.mxu1 }
0x1ba2   : > { %5501 = vadd.xlane.f32.xlu1 %v5500_v62 }
0x1c29   : > { %v5498_v32 = vpop.xlane.xlu0 %5497 }
0x1c2a   : > { %v5499_v8 = vmul.f32 0.03125, %v5498_v32 }
0x1c2b   : > { %v5502_v39 = vpop.xlane.xlu1 %5501 }
0x1c2c   : > { %v5504_v42 = vmul.f32 %v5499_v8, %v5499_v8  ;;  %v5503_v34 = vmul.f32 0.03125, %v5502_v39  ;;  %v5507_v41 = vsub.f32 %v11686_v60, %v5499_v8 }
0x1c2e   : > { %v5505_v44 = vsub.f32 %v5503_v34, %v5504_v42 }
0x1c30   : > { %v5506_v45 = vmax.f32 %v5505_v44, 0.0 }
0x1c32   : > { %v5508_v46 = vadd.f32 1e-05, %v5506_v45 }
0x1c34   : > { %9744 = vrsqrt.f32 %v5508_v46 }
0x1c41   : > { %v9745_v30 = vpop.eup %9744 }
0x1c42   : > { %v5510_v50 = vmul.f32 %v9745_v30, %v5507_v41 }
0x1c44   : > { %v5515_v51 = vmul.f32 %v5514_v56, %v5510_v50 }
0x1c46   : > { %v11732_v53 = vadd.f32 %v5519_v49, %v5515_v51 }
0x1c48   : > { %v5558_v54 = vpack.c.bf16 %v11732_v53, %v11732_v53 }
0x1c4a   : > { %5736 = vmatmul.mubr.bf16.vlgmr.msra.gmra.mxu0 %v5558_v54  ;;  %8801 = vmatmul.mubr.bf16.vlgmr.msra.gmra.mxu1 %v5558_v54 }
0x1c4b   : > { %8856 = vmatprep.mubr.msk.bf16.mxu1 %vm10603_vm0, %v10602_v1 }
0x1d0a   : > { %v5737_v58 = vpop.f32.mrf.mxu0  ;;  %v5778_v59 = vpop.f32.mrf.mxu1 }
0x1d0b   : > { %v5738_v60 = vadd.f32 %v5737_v58, %v5563_v55  ;;  %v5779_v6 = vadd.f32 %v5778_v59, %v5571_v18 }
0x1d0c   : > { %v5739_v61 = vpop.f32.mrf.mxu0  ;;  %v8802_v62 = vpop.f32.mrf.mxu1 }
0x1d0d   : > { %v5740_v63 = vadd.f32 %v5739_v61, %v5567_v57  ;;  %v5784_v2 = vmul.f32 %v11169_v20, %v5738_v60  ;;  %v5785_v27 = vmul.f32 %v11179_v37, %v5738_v60  ;;  %v5786_v10 = vmul.f32 %v11185_v40, %v5738_v60 }
0x1d0e   : > { %v5741_v3 = vpop.f32.mrf.mxu0  ;;  %v5781_v4 = vpop.f32.mrf.mxu1  ;;  %v5787_v11 = vmul.f32 %v11190_v43, %v5738_v60 }
0x1d0f   : > { %8804 = vmatprep.subr.mxu0 %v5740_v63  ;;  %8806 = vmatprep.mubr.f32.mxu0 %v5784_v2  ;;  %v9552_v2 = vld [vmem:[#allocation15 + $0x78] sm:$0xff]  }
0x1d10   : > { %v5742_v52 = vpop.f32.mrf.mxu0  ;;  %v8803_v7 = vpop.f32.mrf.mxu1  ;;  %8805 = vmatpush3.xpose.msra.mxu0 %v5740_v63 }
0x1d11   : > { %8812 = vmatprep.subr.mxu0 %v5779_v6  ;;  %v9553_v7 = vld [vmem:[#allocation15 + $0x70] sm:$0xff]  }
0x1d13   : > { %8807 = vmatmul.mubr.f32.vlgmr.msra.gmra.mxu0 %v5785_v27 }
0x1d14   : > { %8809 = vmatprep.mubr.f32.mxu0 %v5786_v10  ;;  %8813 = vmatpush3.msra.mxu0 %v5779_v6  ;;  %v9554_v10 = vld [vmem:[#allocation15 + $0x68] sm:$0xff]  }
0x1d15   : > { %8820 = vmatprep.subr.bf16.mxu0 %v10602_v1 }
0x1d17   : > { %8810 = vmatmul.mubr.f32.gmra.mxu0 %v5787_v11  ;;  %v9555_v11 = vld [vmem:[#allocation15 + $0x60] sm:$0xff]  }
0x1dd3   : > { %v8808_v14 = vpop.f32.mrf.mxu0 }
0x1dd4   : > { %v5860_v16 = vadd.f32 %v9786_v15, %v8808_v14  ;;  %v9556_v14 = vld [vmem:[#allocation15 + $0x58] sm:$0xff]  }
0x1dd5   : > { %v5854_v23 = vpop.f32.mrf.mxu0 }
0x1dd6   : > { %v5855_v24 = vadd.f32 %v9786_v15, %v5854_v23  ;;  %v5876_v9 = vsel %vm4347_vm12, %v5860_v16, -inf  ;;  %v9559_v23 = vld [vmem:[#allocation15 + $0x40] sm:$0xff]  }
0x1dd7   : > { %5877 = vmax.xlane.f32.xlu1 %v5876_v9  ;;  %v8811_v19 = vpop.f32.mrf.mxu0 }
0x1dd8   : > { %v5870_v25 = vadd.f32 %v9786_v15, %v8811_v19  ;;  %v5873_v26 = vsel %vm4347_vm12, %v5855_v24, -inf }
0x1dd9   : > { %v5864_v28 = vpop.f32.mrf.mxu0  ;;  %5874 = vmax.xlane.f32.xlu0 %v5873_v26 }
0x1dda   : > { %v5865_v29 = vadd.f32 %v9786_v15, %v5864_v28  ;;  %v5882_v35 = vsel %vm4347_vm12, %v5870_v25, -inf  ;;  %v9557_v15 = vld [vmem:[#allocation15 + $0x50] sm:$0xff]  }
0x1ddb   : > { %5883 = vmax.xlane.f32.xlu1 %v5882_v35 }
0x1ddc   : > { %v5879_v36 = vsel %vm4347_vm12, %v5865_v29, -inf }
0x1ddd   : > { %5880 = vmax.xlane.f32.xlu0 %v5879_v36 }
0x1e60   : > { %v5878_v33 = vpop.xlane.xlu1 %5877 }
0x1e61   : > { %v5886_v38 = vsub.f32 %v5860_v16, %v5878_v33  ;;  %v9558_v16 = vld [vmem:[#allocation15 + $0x48] sm:$0xff]  }
0x1e62   : > { %v5875_v32 = vpop.xlane.xlu0 %5874 }
0x1e63   : > { %v5891_v8 = vmul.f32 1.442695, %v5886_v38  ;;  %v5885_v39 = vsub.f32 %v5855_v24, %v5875_v32  ;;  %v9562_v24 = vld [vmem:[%s12002_s8 + $0xf4] ss:$8 sps:$4 sm:$0xff]  }
0x1e64   : > { %v5884_v42 = vpop.xlane.xlu1 %5883 }
0x1e65   : > { %9746 = vpow2.f32 %v5891_v8  ;;  %v5889_v34 = vmul.f32 1.442695, %v5885_v39  ;;  %v5888_v44 = vsub.f32 %v5870_v25, %v5884_v42  ;;  %v9560_v8 = vld [vmem:[%s12002_s8 + $0xf0] ss:$8 sps:$4 sm:$0xff]   ;;  %v9565_v42 = vld [vmem:[%s12002_s8 + $0xe4] ss:$8 sps:$4 sm:$0xff]  }
0x1e66   : > { %v5881_v45 = vpop.xlane.xlu0 %5880 }
0x1e67   : > { %9748 = vpow2.f32 %v5889_v34  ;;  %v5895_v46 = vmul.f32 1.442695, %v5888_v44  ;;  %v5887_v41 = vsub.f32 %v5865_v29, %v5881_v45  ;;  %v9563_v34 = vld [vmem:[%s12002_s8 + $0xe0] ss:$8 sps:$4 sm:$0xff]   ;;  %v9568_v44 = vld [vmem:[%s12002_s8 + $0xd4] ss:$8 sps:$4 sm:$0xff]  }
0x1e68   : > { %v9566_v45 = vld [vmem:[%s12002_s8 + $0xd0] ss:$8 sps:$4 sm:$0xff]  }
0x1e69   : > { %9750 = vpow2.f32 %v5895_v46  ;;  %v5893_v56 = vmul.f32 1.442695, %v5887_v41  ;;  %v9571_v46 = vld [vmem:[%s12002_s8 + $0xc4] ss:$8 sps:$4 sm:$0xff]   ;;  %v9569_v41 = vld [vmem:[%s12002_s8 + $0xc0] ss:$8 sps:$4 sm:$0xff]  }
0x1e6b   : > { %9752 = vpow2.f32 %v5893_v56  ;;  %v9574_v56 = vld [vmem:[%s12002_s8 + $0xb4] ss:$8 sps:$4 sm:$0xff]  }
0x1e72   : > { %v9747_v30 = vpop.eup %9746 }
0x1e73   : > { %v5900_v50 = vsel %vm4347_vm12, %v9747_v30, 0.0 }
0x1e74   : > { %v9749_v49 = vpop.eup %9748  ;;  %5901 = vadd.xlane.f32.xlu1 %v5900_v50  ;;  %v9577_v50 = vld [vmem:[%s12002_s8 + $0xa4] ss:$8 sps:$4 sm:$0xff]  }
0x1e75   : > { %v5897_v51 = vsel %vm4347_vm12, %v9749_v49, 0.0 }
0x1e76   : > { %v9751_v54 = vpop.eup %9750  ;;  %5898 = vadd.xlane.f32.xlu0 %v5897_v51  ;;  %v9578_v51 = vld [vmem:[%s12002_s8 + $0x90] ss:$8 sps:$4 sm:$0xff]  }
0x1e77   : > { %v5906_v48 = vsel %vm4347_vm12, %v9751_v54, 0.0 }
0x1e78   : > { %v9753_v55 = vpop.eup %9752  ;;  %5907 = vadd.xlane.f32.xlu1 %v5906_v48  ;;  %v9581_v48 = vld [vmem:[%s12002_s8 + $0x80] ss:$8 sps:$4 sm:$0xff]  }
0x1e79   : > { %v5903_v57 = vsel %vm4347_vm12, %v9753_v55, 0.0 }
0x1e7a   : > { %5904 = vadd.xlane.f32.xlu0 %v5903_v57  ;;  %v9585_v57 = vld [vmem:[#allocation18 + $0x70] sm:$0xff]  }
0x1efd   : > { %v5902_v58 = vpop.xlane.xlu1 %5901 }
0x1efe   : > { %9754 = vrcp.f32 %v5902_v58  ;;  %v9586_v58 = vld [vmem:[#allocation18 + $0x68] sm:$0xff]  }
0x1eff   : > { %v5899_v59 = vpop.xlane.xlu0 %5898 }
0x1f00   : > { %9756 = vrcp.f32 %v5899_v59  ;;  %v9587_v59 = vld [vmem:[#allocation18 + $0x60] sm:$0xff]  }
0x1f01   : > { %v5908_v60 = vpop.xlane.xlu1 %5907 }
0x1f02   : > { %9758 = vrcp.f32 %v5908_v60  ;;  %v9588_v60 = vld [vmem:[#allocation18 + $0x58] sm:$0xff]  }
0x1f03   : > { %v5905_v18 = vpop.xlane.xlu0 %5904 }
0x1f04   : > { %9760 = vrcp.f32 %v5905_v18  ;;  %v9590_v18 = vld [vmem:[#allocation18 + $0x48] sm:$0xff]  }
0x1f0b   : > { %v9755_v61 = vpop.eup %9754 }
0x1f0c   : > { %v5912_v3 = vmul.f32 %v9755_v61, %v9747_v30  ;;  %v9572_v30 = vld [vmem:[%s12002_s8 + $0xb0] ss:$8 sps:$4 sm:$0xff]  }
0x1f0d   : > { %v9757_v62 = vpop.eup %9756  ;;  %v9591_v61 = vld [vmem:[#allocation18 + $0x40] sm:$0xff]  }
0x1f0e   : > { %v5910_v63 = vmul.f32 %v9757_v62, %v9749_v49  ;;  %v9580_v49 = vld [vmem:[%s12002_s8 + $0x94] ss:$8 sps:$4 sm:$0xff]   ;;  %v7992_v62 = vld [vmem:[#allocation7 + $0x1] ss:$0 sm:$0xff] }
0x1f0f   : > { %v9759_v4 = vpop.eup %9758 }
0x1f10   : > { %8814 = vmatprep.mubr.msk.f32.mxu0 %vm4347_vm12, %v5910_v63  ;;  %v5916_v27 = vmul.f32 %v9759_v4, %v9751_v54  ;;  %v9583_v54 = vld [vmem:[%s12002_s8 + $0x84] ss:$8 sps:$4 sm:$0xff]  }
0x1f11   : > { %v9761_v6 = vpop.eup %9760  ;;  %8815 = vmatmul.mubr.msk.f32.vlgmr.msra.gmra.mxu0 %vm4347_vm12, %v5912_v3 }
0x1f12   : > { %v5914_v52 = vmul.f32 %v9761_v6, %v9753_v55  ;;  %8821 = vmatpush3.bf16.msra.mxu0 %v9552_v2  ;;  %v9584_v55 = vld [vmem:[#allocation18 + $0x78] sm:$0xff]  }
0x1f13   : > { %8822 = vmatprep.subr.bf16.mxu0 %v10602_v1  ;;  %8841 = vmatpush3.bf16.msra.mxu1 %v9584_v55 }
0x1f14   : > { %8817 = vmatprep.mubr.msk.f32.mxu0 %vm4347_vm12, %v5914_v52  ;;  %8842 = vmatprep.subr.bf16.mxu1 %v10602_v1 }
0x1f15   : > { %8818 = vmatmul.mubr.msk.f32.gmra.mxu0 %vm4347_vm12, %v5916_v27  ;;  %v6292_v27 = vld [vmem:[#allocation6 + $0x2] sm:$0x3] }
0x1f16   : > { %8823 = vmatpush3.bf16.msra.mxu0 %v9553_v7  ;;  %8836 = vmatprep.mubr.msk.bf16.mxu0 %vm10603_vm0, %v10602_v1 }
0x1f17   : > { %8824 = vmatprep.subr.bf16.mxu0 %v10602_v1  ;;  %8843 = vmatpush3.bf16.msra.mxu1 %v9585_v57 }
0x1f18   : > { %8844 = vmatprep.subr.bf16.mxu1 %v10602_v1 }
0x1f1a   : > { %8825 = vmatpush3.bf16.msra.mxu0 %v9554_v10  ;;  %v6297_v10 = vrot.slane %v6292_v27, %v11162_v13 }
0x1f1b   : > { %8826 = vmatprep.subr.bf16.mxu0 %v10602_v1  ;;  %8845 = vmatpush3.bf16.msra.mxu1 %v9586_v58 }
0x1f1c   : > { %8846 = vmatprep.subr.bf16.mxu1 %v10602_v1 }
0x1f1e   : > { %8827 = vmatpush3.bf16.msra.mxu0 %v9555_v11  ;;  %v6301_v11 = vrot.slane %v6292_v27, %v11172_v22 }
0x1f1f   : > { %8828 = vmatprep.subr.bf16.mxu0 %v10602_v1  ;;  %8847 = vmatpush3.bf16.msra.mxu1 %v9587_v59  ;;  %v9787_v59 = vld [vmem:[%s11624_s9] sm:$0xff] }
0x1f20   : > { %8848 = vmatprep.subr.bf16.mxu1 %v10602_v1 }
0x1f22   : > { %8829 = vmatpush3.bf16.msra.mxu0 %v9556_v14 }
0x1f23   : > { %8830 = vmatprep.subr.bf16.mxu0 %v10602_v1  ;;  %8849 = vmatpush3.bf16.msra.mxu1 %v9588_v60 }
0x1f24   : > { %8850 = vmatprep.subr.bf16.mxu1 %v10602_v1 }
0x1f26   : > { %8831 = vmatpush3.bf16.msra.mxu0 %v9557_v15 }
0x1f27   : > { %8832 = vmatprep.subr.bf16.mxu0 %v10602_v1 }
0x1f2a   : > { %8833 = vmatpush3.bf16.msra.mxu0 %v9558_v16 }
0x1f2b   : > { %8834 = vmatprep.subr.bf16.mxu0 %v10602_v1 }
0x1f2e   : > { %8835 = vmatpush3.bf16.msra.mxu0 %v9559_v23 }
0x1f2f   : > { %6384 = vmatprep.subr.bf16.mxu0 %v9562_v24 }
0x1fd1   : > { %v8816_v9 = vpop.f32.mrf.mxu0 }
0x1fd2   : > { %v6015_v28 = vmul.f32 %v8816_v9, %v11179_v37 }
0x1fd3   : > { %v5995_v19 = vpop.f32.mrf.mxu0 }
0x1fd4   : > { %v6014_v25 = vmul.f32 %v11169_v20, %v5995_v19 }
0x1fd5   : > { %v8819_v26 = vpop.f32.mrf.mxu0 }
0x1fd6   : > { %v6016_v35 = vadd.f32 %v6015_v28, %v6014_v25  ;;  %v6019_v33 = vmul.f32 %v8819_v26, %v11190_v43 }
0x1fd7   : > { %v6005_v29 = vpop.f32.mrf.mxu0 }
0x1fd8   : > { %v6017_v36 = vmul.f32 %v11185_v40, %v6005_v29 }
0x1fda   : > { %v6018_v38 = vadd.f32 %v6017_v36, %v6016_v35 }
0x1fdc   : > { %v6020_v32 = vadd.f32 %v6019_v33, %v6018_v38  ;;  %v11804_v33 = vld [vmem:[%s12003_s13 + $0x8] sm:$0x3f] }
0x1fde   : > { %v6040_v39 = vpack.c.bf16 %v6020_v32, %v6020_v32  ;;  %v6153_v32 = vrot.slane %v11804_v33, %v11162_v13 }
0x1fe0   : > { %8837 = vmatmul.mubr.bf16.vlgmr.msra.gmra.mxu0 %v6040_v39 }
0x1fe1   : > { %6385 = vmatpush1.bf16.msra.mxu0 %v9560_v8  ;;  %6416 = vmatprep.mubr.bf16.mxu0 %v10601_v0  ;;  %v9575_v0 = vld [vmem:[%s12002_s8 + $0xa0] ss:$8 sps:$4 sm:$0xff]  }
0x1fe2   : > { %6386 = vmatprep.subr.bf16.mxu0 %v9565_v42  ;;  %v6158_v42 = vrot.slane %v11804_v33, %v11172_v22 }
0x1fe5   : > { %6387 = vmatpush1.bf16.msra.mxu0 %v9563_v34 }
0x1fe6   : > { %6388 = vmatprep.subr.bf16.mxu0 %v9568_v44 }
0x1fe9   : > { %6389 = vmatpush1.bf16.msra.mxu0 %v9566_v45 }
0x1fea   : > { %6390 = vmatprep.subr.bf16.mxu0 %v9571_v46 }
0x1fed   : > { %6391 = vmatpush1.bf16.msra.mxu0 %v9569_v41 }
0x1fee   : > { %6392 = vmatprep.subr.bf16.mxu0 %v9574_v56  ;;  %v8001_v56 = vld [vmem:[#allocation10 + $0x1] ss:$0 sm:$0xff] }
0x1ff1   : > { %6393 = vmatpush1.bf16.msra.mxu0 %v9572_v30 }
0x1ff2   : > { %6394 = vmatprep.subr.bf16.mxu0 %v9577_v50 }
0x1ff5   : > { %6395 = vmatpush1.bf16.msra.mxu0 %v9575_v0 }
0x1ff6   : > { %6396 = vmatprep.subr.bf16.mxu0 %v9580_v49 }
0x1ff9   : > { %6397 = vmatpush1.bf16.msra.mxu0 %v9578_v51 }
0x1ffa   : > { %6398 = vmatprep.subr.bf16.mxu0 %v9583_v54 }
0x1ffd   : > { %6399 = vmatpush1.bf16.msra.mxu0 %v9581_v48 }
0x1ffe   : > { %8900 = vmatprep.subr.bf16.mxu0 %v10602_v1 }
0x2000   : > { %6417 = vmatmul.mubr.bf16.vlgmr.msra.gmra.mxu0 %v11590_v21  ;;  %v9589_v21 = vld [vmem:[#allocation18 + $0x50] sm:$0xff]  }
0x2001   : > { %8916 = vmatprep.mubr.msk.bf16.mxu0 %vm10603_vm0, %v10602_v1  ;;  %8851 = vmatpush3.bf16.msra.mxu1 %v9589_v21 }
0x2002   : > { %8852 = vmatprep.subr.bf16.mxu1 %v10602_v1 }
0x2005   : > { %8853 = vmatpush3.bf16.msra.mxu1 %v9590_v18 }
0x2006   : > { %8854 = vmatprep.subr.bf16.mxu1 %v10602_v1 }
0x2009   : > { %8855 = vmatpush3.bf16.msra.mxu1 %v9591_v61 }
0x20a0   : > { %v6129_v63 = vpop.f32.mrf.mxu0 }
0x20a1   : > { %v6130_v2 = vadd.f32 %v7992_v62, %v6129_v63 }
0x20a2   : > { %v8838_v3 = vpop.f32.mrf.mxu0 }
0x20a3   : > { %v6135_v4 = vadd.f32 %v6130_v2, %v11732_v53 }
0x20a4   : > { %v6132_v6 = vpop.f32.mrf.mxu0 }
0x20a5   : > { %6136 = vadd.xlane.f32.xlu0 %v6135_v4  ;;  %v6139_v52 = vmul.f32 %v6135_v4, %v6135_v4 }
0x20a6   : > { %v8839_v7 = vpop.f32.mrf.mxu0 }
0x20a7   : > { %6140 = vadd.xlane.f32.xlu1 %v6139_v52 }
0x20c0   : > { %v6418_v14 = vpop.f32.mrf.mxu0 }
0x20c1   : > { %v6419_v15 = vadd.f32 %v6418_v14, %v6297_v10 }
0x20c2   : > { %v6420_v16 = vpop.f32.mrf.mxu0 }
0x20c3   : > { %v6421_v23 = vadd.f32 %v6420_v16, %v6301_v11 }
0x20c4   : > { %v6422_v24 = vpop.f32.mrf.mxu0 }
0x20c5   : > { %v6423_v9 = vadd.f32 %v6422_v24, %v6297_v10 }
0x20c6   : > { %v6424_v46 = vpop.f32.mrf.mxu0 }
0x20c7   : > { %8860 = vmatprep.subr.mxu1 %v6423_v9  ;;  %v6425_v41 = vadd.f32 %v6424_v46, %v6301_v11 }
0x212e   : > { %v6137_v19 = vpop.xlane.xlu0 %6136 }
0x212f   : > { %v6138_v53 = vmul.f32 0.03125, %v6137_v19 }
0x2130   : > { %v6141_v25 = vpop.xlane.xlu1 %6140 }
0x2131   : > { %v6143_v26 = vmul.f32 %v6138_v53, %v6138_v53  ;;  %v6142_v28 = vmul.f32 0.03125, %v6141_v25  ;;  %v6146_v38 = vsub.f32 %v6135_v4, %v6138_v53 }
0x2133   : > { %v6144_v29 = vsub.f32 %v6142_v28, %v6143_v26 }
0x2135   : > { %v6145_v35 = vmax.f32 %v6144_v29, 0.0 }
0x2137   : > { %v6147_v36 = vadd.f32 1e-05, %v6145_v35 }
0x2139   : > { %9762 = vrsqrt.f32 %v6147_v36 }
0x2146   : > { %v9763_v8 = vpop.eup %9762 }
0x2147   : > { %v6149_v39 = vmul.f32 %v9763_v8, %v6146_v38 }
0x2149   : > { %v6154_v34 = vmul.f32 %v6153_v32, %v6149_v39 }
0x214b   : > { %v11810_v44 = vadd.f32 %v6158_v42, %v6154_v34 }
0x214d   : > { %v6179_v45 = vpack.c.bf16 %v11810_v44, %v11810_v44 }
0x214f   : > { %8857 = vmatmul.mubr.bf16.vlgmr.msra.gmra.mxu1 %v6179_v45 }
0x2150   : > { %8861 = vmatpush3.xpose.msra.mxu1 %v6423_v9 }
0x2151   : > { %8862 = vmatprep.subr.mxu1 %v6419_v15 }
0x2154   : > { %8863 = vmatpush3.xpose.msra.mxu1 %v6419_v15 }
0x2155   : > { %8870 = vmatprep.subr.mxu1 %v6425_v41 }
0x220f   : > { %v6268_v30 = vpop.f32.mrf.mxu1 }
0x2210   : > { %v6269_v50 = vadd.f32 %v8001_v56, %v6268_v30  ;;  %v9592_v56 = vld [vmem:[#allocation16 + $0x78] sm:$0xff]  }
0x2211   : > { %v8858_v0 = vpop.f32.mrf.mxu1 }
0x2212   : > { %v6427_v49 = vmul.f32 %v11169_v20, %v6269_v50  ;;  %v6428_v51 = vmul.f32 %v11179_v37, %v6269_v50  ;;  %v6429_v48 = vmul.f32 %v11185_v40, %v6269_v50  ;;  %v6430_v57 = vmul.f32 %v11190_v43, %v6269_v50 }
0x2213   : > { %v6271_v54 = vpop.f32.mrf.mxu1 }
0x2214   : > { %8864 = vmatprep.mubr.f32.mxu1 %v6427_v49 }
0x2215   : > { %v8859_v55 = vpop.f32.mrf.mxu1  ;;  %8865 = vmatmul.mubr.f32.vlgmr.msra.gmra.mxu1 %v6428_v51  ;;  %v9593_v51 = vld [vmem:[#allocation16 + $0x70] sm:$0xff]  }
0x2216   : > { %8871 = vmatpush3.msra.mxu1 %v6425_v41  ;;  %8867 = vmatprep.mubr.f32.mxu1 %v6429_v48  ;;  %v9594_v48 = vld [vmem:[#allocation16 + $0x68] sm:$0xff]   ;;  %v9595_v55 = vld [vmem:[#allocation16 + $0x60] sm:$0xff]  }
0x2217   : > { %8872 = vmatprep.subr.mxu1 %v6421_v23 }
0x2218   : > { %8873 = vmatpush3.msra.mxu1 %v6421_v23 }
0x2219   : > { %8868 = vmatmul.mubr.f32.gmra.mxu1 %v6430_v57  ;;  %8880 = vmatprep.subr.bf16.mxu1 %v10602_v1  ;;  %v9596_v57 = vld [vmem:[#allocation16 + $0x58] sm:$0xff]  }
0x22d5   : > { %v8866_v58 = vpop.f32.mrf.mxu1 }
0x22d6   : > { %v6503_v60 = vadd.f32 %v9787_v59, %v8866_v58  ;;  %v9597_v58 = vld [vmem:[#allocation16 + $0x50] sm:$0xff]  }
0x22d7   : > { %v6497_v21 = vpop.f32.mrf.mxu1 }
0x22d8   : > { %v6498_v18 = vadd.f32 %v9787_v59, %v6497_v21  ;;  %v6519_v61 = vsel %vm2258_vm11, %v6503_v60, -inf }
0x22d9   : > { %6520 = vmax.xlane.f32.xlu1 %v6519_v61  ;;  %v8869_v62 = vpop.f32.mrf.mxu1 }
0x22da   : > { %v6513_v63 = vadd.f32 %v9787_v59, %v8869_v62  ;;  %v6516_v2 = vsel %vm2258_vm11, %v6498_v18, -inf }
0x22db   : > { %v6507_v3 = vpop.f32.mrf.mxu1  ;;  %6517 = vmax.xlane.f32.xlu0 %v6516_v2 }
0x22dc   : > { %v6508_v4 = vadd.f32 %v9787_v59, %v6507_v3  ;;  %v6525_v6 = vsel %vm2258_vm11, %v6513_v63, -inf  ;;  %v9598_v59 = vld [vmem:[#allocation16 + $0x48] sm:$0xff]  }
0x22dd   : > { %6526 = vmax.xlane.f32.xlu1 %v6525_v6 }
0x22de   : > { %v6522_v52 = vsel %vm2258_vm11, %v6508_v4, -inf }
0x22df   : > { %6523 = vmax.xlane.f32.xlu0 %v6522_v52 }
0x2362   : > { %v6521_v7 = vpop.xlane.xlu1 %6520 }
0x2363   : > { %v6529_v27 = vsub.f32 %v6503_v60, %v6521_v7  ;;  %v9599_v60 = vld [vmem:[#allocation16 + $0x40] sm:$0xff]  }
0x2364   : > { %v6518_v10 = vpop.xlane.xlu0 %6517 }
0x2365   : > { %v6534_v11 = vmul.f32 1.442695, %v6529_v27  ;;  %v6528_v14 = vsub.f32 %v6498_v18, %v6518_v10  ;;  %v8046_v10 = vld [vmem:[#allocation9 + $0x1] ss:$0 sm:$0xff] }
0x2366   : > { %v6527_v15 = vpop.xlane.xlu1 %6526 }
0x2367   : > { %9764 = vpow2.f32 %v6534_v11  ;;  %v6532_v16 = vmul.f32 1.442695, %v6528_v14  ;;  %v6531_v23 = vsub.f32 %v6513_v63, %v6527_v15 }
0x2368   : > { %v6524_v24 = vpop.xlane.xlu0 %6523 }
0x2369   : > { %9766 = vpow2.f32 %v6532_v16  ;;  %v6538_v9 = vmul.f32 1.442695, %v6531_v23  ;;  %v6530_v19 = vsub.f32 %v6508_v4, %v6524_v24  ;;  %v9600_v16 = vld [vmem:[%s12005_s22 + $0x78] sm:$0xff]   ;;  %v9601_v23 = vld [vmem:[%s12005_s22 + $0x70] sm:$0xff]   ;;  %v9602_v24 = vld [vmem:[%s12005_s22 + $0x68] sm:$0xff]  }
0x236a   : > { %8901 = vmatpush3.bf16.msra.mxu0 %v9600_v16  ;;  %v7050_v16 = vrot.slane %v11804_v33, %v5513_v47  ;;  %v9618_v47 = vld [vmem:[#allocation37 + $0x28] sm:$0xff]  }
0x236b   : > { %9768 = vpow2.f32 %v6538_v9  ;;  %v6536_v53 = vmul.f32 1.442695, %v6530_v19  ;;  %8902 = vmatprep.subr.bf16.mxu0 %v10602_v1  ;;  %v9604_v9 = vld [vmem:[%s12005_s22 + $0x58] sm:$0xff]   ;;  %v9605_v19 = vld [vmem:[%s12005_s22 + $0x50] sm:$0xff]  }
0x236d   : > { %9770 = vpow2.f32 %v6536_v53  ;;  %v9606_v53 = vld [vmem:[%s12005_s22 + $0x48] sm:$0xff]  }
0x236e   : > { %8903 = vmatpush3.bf16.msra.mxu0 %v9601_v23 }
0x236f   : > { %8904 = vmatprep.subr.bf16.mxu0 %v10602_v1 }
0x2372   : > { %8905 = vmatpush3.bf16.msra.mxu0 %v9602_v24 }
0x2373   : > { %8906 = vmatprep.subr.bf16.mxu0 %v10602_v1 }
0x2374   : > { %v9765_v25 = vpop.eup %9764 }
0x2375   : > { %v6543_v26 = vsel %vm2258_vm11, %v9765_v25, 0.0 }
0x2376   : > { %v9767_v28 = vpop.eup %9766  ;;  %6544 = vadd.xlane.f32.xlu1 %v6543_v26  ;;  %v9608_v26 = vld [vmem:[#allocation13 + $0x78] sm:$0xff]  }
0x2377   : > { %v6540_v29 = vsel %vm2258_vm11, %v9767_v28, 0.0 }
0x2378   : > { %v9769_v35 = vpop.eup %9768  ;;  %6541 = vadd.xlane.f32.xlu0 %v6540_v29  ;;  %v9610_v29 = vld [vmem:[#allocation13 + $0x68] sm:$0xff]  }
0x2379   : > { %v6549_v36 = vsel %vm2258_vm11, %v9769_v35, 0.0 }
0x237a   : > { %v9771_v38 = vpop.eup %9770  ;;  %6550 = vadd.xlane.f32.xlu1 %v6549_v36  ;;  %v9612_v36 = vld [vmem:[#allocation13 + $0x58] sm:$0xff]  }
0x237b   : > { %v6546_v32 = vsel %vm2258_vm11, %v9771_v38, 0.0 }
0x237c   : > { %6547 = vadd.xlane.f32.xlu0 %v6546_v32 }
0x23ff   : > { %v6545_v8 = vpop.xlane.xlu1 %6544 }
0x2400   : > { %9772 = vrcp.f32 %v6545_v8 }
0x2401   : > { %v6542_v39 = vpop.xlane.xlu0 %6541 }
0x2402   : > { %9774 = vrcp.f32 %v6542_v39 }
0x2403   : > { %v6551_v42 = vpop.xlane.xlu1 %6550 }
0x2404   : > { %9776 = vrcp.f32 %v6551_v42 }
0x2405   : > { %v6548_v34 = vpop.xlane.xlu0 %6547 }
0x2406   : > { %9778 = vrcp.f32 %v6548_v34 }
0x240d   : > { %v9773_v45 = vpop.eup %9772 }
0x240e   : > { %v6555_v30 = vmul.f32 %v9773_v45, %v9765_v25  ;;  %v9607_v25 = vld [vmem:[%s12005_s22 + $0x40] sm:$0xff]  }
0x240f   : > { %v9775_v46 = vpop.eup %9774 }
0x2410   : > { %v6553_v41 = vmul.f32 %v9775_v46, %v9767_v28  ;;  %v9609_v28 = vld [vmem:[#allocation13 + $0x70] sm:$0xff]  }
0x2411   : > { %v9777_v50 = vpop.eup %9776 }
0x2412   : > { %8874 = vmatprep.mubr.msk.f32.mxu1 %vm2258_vm11, %v6553_v41  ;;  %v6559_v54 = vmul.f32 %v9777_v50, %v9769_v35  ;;  %v9611_v35 = vld [vmem:[#allocation13 + $0x60] sm:$0xff]  }
0x2413   : > { %v9779_v0 = vpop.eup %9778  ;;  %8875 = vmatmul.mubr.msk.f32.vlgmr.msra.gmra.mxu1 %vm2258_vm11, %v6555_v30  ;;  %v6796_v30 = vrot.slane %v11804_v33, %v11166_v17 }
0x2414   : > { %v6557_v49 = vmul.f32 %v9779_v0, %v9771_v38  ;;  %8881 = vmatpush3.bf16.msra.mxu1 %v9592_v56  ;;  %v9613_v38 = vld [vmem:[#allocation13 + $0x50] sm:$0xff]  }
0x2415   : > { %8882 = vmatprep.subr.bf16.mxu1 %v10602_v1 }
0x2416   : > { %8877 = vmatprep.mubr.msk.f32.mxu1 %vm2258_vm11, %v6557_v49  ;;  %v6801_v49 = vrot.slane %v11804_v33, %v11339_v31 }
0x2417   : > { %8878 = vmatmul.mubr.msk.f32.gmra.mxu1 %vm2258_vm11, %v6559_v54 }
0x2418   : > { %8883 = vmatpush3.bf16.msra.mxu1 %v9593_v51  ;;  %8896 = vmatprep.mubr.msk.bf16.mxu1 %vm10603_vm0, %v10602_v1 }
0x2419   : > { %8884 = vmatprep.subr.bf16.mxu1 %v10602_v1 }
0x241c   : > { %8885 = vmatpush3.bf16.msra.mxu1 %v9594_v48 }
0x241d   : > { %8886 = vmatprep.subr.bf16.mxu1 %v10602_v1 }
0x2420   : > { %8887 = vmatpush3.bf16.msra.mxu1 %v9595_v55  ;;  %v9614_v55 = vld [vmem:[#allocation13 + $0x48] sm:$0xff]  }
0x2421   : > { %8888 = vmatprep.subr.bf16.mxu1 %v10602_v1 }
0x2424   : > { %8889 = vmatpush3.bf16.msra.mxu1 %v9596_v57  ;;  %v9615_v57 = vld [vmem:[#allocation13 + $0x40] sm:$0xff]  }
0x2425   : > { %8890 = vmatprep.subr.bf16.mxu1 %v10602_v1 }
0x2428   : > { %8891 = vmatpush3.bf16.msra.mxu1 %v9597_v58  ;;  %v8071_v58 = vld [vmem:[#allocation2 + $0x1] ss:$0 sm:$0xff] }
0x2429   : > { %8892 = vmatprep.subr.bf16.mxu1 %v10602_v1 }
0x242c   : > { %8893 = vmatpush3.bf16.msra.mxu1 %v9598_v59 }
0x242d   : > { %8894 = vmatprep.subr.bf16.mxu1 %v10602_v1 }
0x2430   : > { %8895 = vmatpush3.bf16.msra.mxu1 %v9599_v60 }
0x2431   : > { %8920 = vmatprep.subr.bf16.mxu1 %v10602_v1 }
0x24d3   : > { %v8876_v21 = vpop.f32.mrf.mxu1 }
0x24d4   : > { %v6658_v63 = vmul.f32 %v8876_v21, %v11179_v37 }
0x24d5   : > { %v6638_v18 = vpop.f32.mrf.mxu1 }
0x24d6   : > { %v6657_v61 = vmul.f32 %v11169_v20, %v6638_v18 }
0x24d7   : > { %v8879_v62 = vpop.f32.mrf.mxu1 }
0x24d8   : > { %v6659_v3 = vadd.f32 %v6658_v63, %v6657_v61  ;;  %v6662_v6 = vmul.f32 %v8879_v62, %v11190_v43  ;;  %v8080_v62 = vld [vmem:[#allocation4 + $0x1] ss:$0 sm:$0xff] }
0x24d9   : > { %v6648_v2 = vpop.f32.mrf.mxu1 }
0x24da   : > { %v6660_v4 = vmul.f32 %v11185_v40, %v6648_v2 }
0x24dc   : > { %v6661_v52 = vadd.f32 %v6660_v4, %v6659_v3 }
0x24de   : > { %v6663_v7 = vadd.f32 %v6662_v6, %v6661_v52 }
0x24e0   : > { %v6683_v27 = vpack.c.bf16 %v6663_v7, %v6663_v7 }
0x24e2   : > { %8897 = vmatmul.mubr.bf16.vlgmr.msra.gmra.mxu1 %v6683_v27 }
0x24e3   : > { %8936 = vmatprep.mubr.msk.bf16.mxu1 %vm10603_vm0, %v10602_v1  ;;  %8921 = vmatpush3.bf16.msra.mxu1 %v9608_v26  ;;  %v9617_v26 = vld [vmem:[#allocation37 + $0x30] sm:$0xff]  }
0x24e4   : > { %8922 = vmatprep.subr.bf16.mxu1 %v10602_v1 }
0x24e7   : > { %8923 = vmatpush3.bf16.msra.mxu1 %v9609_v28  ;;  %v9619_v28 = vld [vmem:[#allocation37 + $0x20] sm:$0xff]  }
0x24e8   : > { %8924 = vmatprep.subr.bf16.mxu1 %v10602_v1 }
0x24eb   : > { %8925 = vmatpush3.bf16.msra.mxu1 %v9610_v29  ;;  %v9623_v29 = vld [vmem:[#allocation37] sm:$0xff]  }
0x24ec   : > { %8926 = vmatprep.subr.bf16.mxu1 %v10602_v1 }
0x24ef   : > { %8927 = vmatpush3.bf16.msra.mxu1 %v9611_v35 }
0x24f0   : > { %8928 = vmatprep.subr.bf16.mxu1 %v10602_v1 }
0x24f3   : > { %8929 = vmatpush3.bf16.msra.mxu1 %v9612_v36 }
0x24f4   : > { %8930 = vmatprep.subr.bf16.mxu1 %v10602_v1 }
0x24f7   : > { %8931 = vmatpush3.bf16.msra.mxu1 %v9613_v38 }
0x24f8   : > { %8932 = vmatprep.subr.bf16.mxu1 %v10602_v1 }
0x24fb   : > { %8933 = vmatpush3.bf16.msra.mxu1 %v9614_v55 }
0x24fc   : > { %8934 = vmatprep.subr.bf16.mxu1 %v10602_v1 }
0x24ff   : > { %8935 = vmatpush3.bf16.msra.mxu1 %v9615_v57 }
0x25a2   : > { %v6772_v20 = vpop.f32.mrf.mxu1 }
0x25a3   : > { %v6773_v11 = vadd.f32 %v8046_v10, %v6772_v20 }
0x25a4   : > { %v8898_v37 = vpop.f32.mrf.mxu1 }
0x25a5   : > { %v6778_v14 = vadd.f32 %v6773_v11, %v11810_v44  ;;  %v9603_v44 = vld [vmem:[%s12005_s22 + $0x60] sm:$0xff]  }
0x25a6   : > { %v6775_v40 = vpop.f32.mrf.mxu1  ;;  %8907 = vmatpush3.bf16.msra.mxu0 %v9603_v44  ;;  %v7055_v44 = vrot.slane %v11804_v33, %v5518_v5  ;;  %v9621_v5 = vld [vmem:[#allocation37 + $0x10] sm:$0xff]   ;;  %v9622_v33 = vld [vmem:[#allocation37 + $0x8] sm:$0xff]  }
0x25a7   : > { %6779 = vadd.xlane.f32.xlu0 %v6778_v14  ;;  %v6782_v43 = vmul.f32 %v6778_v14, %v6778_v14  ;;  %8908 = vmatprep.subr.bf16.mxu0 %v10602_v1 }
0x25a8   : > { %v8899_v15 = vpop.f32.mrf.mxu1 }
0x25a9   : > { %6783 = vadd.xlane.f32.xlu1 %v6782_v43 }
0x25aa   : > { %8909 = vmatpush3.bf16.msra.mxu0 %v9604_v9 }
0x25ab   : > { %8910 = vmatprep.subr.bf16.mxu0 %v10602_v1 }
0x25ae   : > { %8911 = vmatpush3.bf16.msra.mxu0 %v9605_v19 }
0x25af   : > { %8912 = vmatprep.subr.bf16.mxu0 %v10602_v1 }
0x25b2   : > { %8913 = vmatpush3.bf16.msra.mxu0 %v9606_v53 }
0x25b3   : > { %8914 = vmatprep.subr.bf16.mxu0 %v10602_v1 }
0x25b6   : > { %8915 = vmatpush3.bf16.msra.mxu0 %v9607_v25  ;;  %v9616_v25 = vld [vmem:[#allocation37 + $0x38] sm:$0xff]  }
0x25b7   : > { %8940 = vmatprep.subr.bf16.mxu0 %v10602_v1 }
0x2630   : > { %v6780_v32 = vpop.xlane.xlu0 %6779 }
0x2631   : > { %v6781_v8 = vmul.f32 0.03125, %v6780_v32 }
0x2632   : > { %v6784_v39 = vpop.xlane.xlu1 %6783 }
0x2633   : > { %v6786_v42 = vmul.f32 %v6781_v8, %v6781_v8  ;;  %v6785_v34 = vmul.f32 0.03125, %v6784_v39  ;;  %v6789_v56 = vsub.f32 %v6778_v14, %v6781_v8 }
0x2635   : > { %v6787_v45 = vsub.f32 %v6785_v34, %v6786_v42 }
0x2637   : > { %v6788_v46 = vmax.f32 %v6787_v45, 0.0  ;;  %v7057_v45 = vld [vmem:[#allocation19] sm:$0x3] }
0x2639   : > { %v6790_v41 = vadd.f32 1e-05, %v6788_v46 }
0x263b   : > { %9780 = vrsqrt.f32 %v6790_v41  ;;  %v7075_v41 = vrot.slane %v7057_v45, %v11162_v13 }
0x2648   : > { %v9781_v50 = vpop.eup %9780 }
0x2649   : > { %v6792_v0 = vmul.f32 %v9781_v50, %v6789_v56 }
0x264b   : > { %v6797_v51 = vmul.f32 %v6796_v30, %v6792_v0 }
0x264d   : > { %v6802_v54 = vadd.f32 %v6801_v49, %v6797_v51  ;;  %v8089_v51 = vld [vmem:[#allocation36] ss:$0 sm:$0xff] }
0x264f   : > { %v6822_v48 = vpack.c.bf16 %v6802_v54, %v6802_v54 }
0x2651   : > { %8917 = vmatmul.mubr.bf16.vlgmr.msra.gmra.mxu0 %v6822_v48 }
0x2652   : > { %8956 = vmatprep.mubr.msk.bf16.mxu0 %vm10603_vm0, %v10602_v1  ;;  %8941 = vmatpush3.bf16.msra.mxu0 %v9616_v25 }
0x2653   : > { %8942 = vmatprep.subr.bf16.mxu0 %v10602_v1 }
0x2656   : > { %8943 = vmatpush3.bf16.msra.mxu0 %v9617_v26 }
0x2657   : > { %8944 = vmatprep.subr.bf16.mxu0 %v10602_v1 }
0x265a   : > { %8945 = vmatpush3.bf16.msra.mxu0 %v9618_v47 }
0x265b   : > { %8946 = vmatprep.subr.bf16.mxu0 %v10602_v1 }
0x265e   : > { %8947 = vmatpush3.bf16.msra.mxu0 %v9619_v28 }
0x265f   : > { %8948 = vmatprep.subr.bf16.mxu0 %v10602_v1 }
0x2662   : > { %8949 = vmatpush3.bf16.msra.mxu0 %v9620_v12 }
0x2663   : > { %8950 = vmatprep.subr.bf16.mxu0 %v10602_v1 }
0x2666   : > { %8951 = vmatpush3.bf16.msra.mxu0 %v9621_v5 }
0x2667   : > { %8952 = vmatprep.subr.bf16.mxu0 %v10602_v1 }
0x266a   : > { %8953 = vmatpush3.bf16.msra.mxu0 %v9622_v33 }
0x266b   : > { %8954 = vmatprep.subr.bf16.mxu0 %v10602_v1  ;;  %v7080_v1 = vrot.slane %v7057_v45, %v11172_v22 }
0x266e   : > { %8955 = vmatpush3.bf16.msra.mxu0 %v9623_v29 }
0x2711   : > { %v6911_v17 = vpop.f32.mrf.mxu0 }
0x2712   : > { %v6912_v59 = vadd.f32 %v8071_v58, %v6911_v17 }
0x2713   : > { %v8918_v60 = vpop.f32.mrf.mxu0 }
0x2714   : > { %v6917_v21 = vmax.f32 %v6912_v59, 0.0 }
0x2715   : > { %v6914_v18 = vpop.f32.mrf.mxu0 }
0x2716   : > { %v6937_v31 = vpack.c.bf16 %v6917_v21, %v6917_v21 }
0x2717   : > { %v8919_v61 = vpop.f32.mrf.mxu0 }
0x2718   : > { %8937 = vmatmul.mubr.bf16.vlgmr.msra.gmra.mxu1 %v6937_v31 }
0x27d8   : > { %v7026_v63 = vpop.f32.mrf.mxu1 }
0x27d9   : > { %v7027_v2 = vadd.f32 %v8080_v62, %v7026_v63 }
0x27da   : > { %v8938_v3 = vpop.f32.mrf.mxu1 }
0x27db   : > { %v7032_v4 = vadd.f32 %v7027_v2, %v6802_v54 }
0x27dc   : > { %v7029_v6 = vpop.f32.mrf.mxu1 }
0x27dd   : > { %7033 = vadd.xlane.f32.xlu0 %v7032_v4  ;;  %v7036_v52 = vmul.f32 %v7032_v4, %v7032_v4 }
0x27de   : > { %v8939_v7 = vpop.f32.mrf.mxu1 }
0x27df   : > { %7037 = vadd.xlane.f32.xlu1 %v7036_v52 }
0x2866   : > { %v7034_v27 = vpop.xlane.xlu0 %7033 }
0x2867   : > { %v7035_v10 = vmul.f32 0.03125, %v7034_v27 }
0x2868   : > { %v7038_v20 = vpop.xlane.xlu1 %7037 }
0x2869   : > { %v7040_v11 = vmul.f32 %v7035_v10, %v7035_v10  ;;  %v7039_v37 = vmul.f32 0.03125, %v7038_v20  ;;  %v7043_v15 = vsub.f32 %v7032_v4, %v7035_v10 }
0x286b   : > { %v7041_v14 = vsub.f32 %v7039_v37, %v7040_v11 }
0x286d   : > { %v7042_v40 = vmax.f32 %v7041_v14, 0.0 }
0x286f   : > { %v7044_v43 = vadd.f32 1e-05, %v7042_v40 }
0x2871   : > { %9782 = vrsqrt.f32 %v7044_v43 }
0x287e   : > { %v9783_v23 = vpop.eup %9782 }
0x287f   : > { %v7046_v24 = vmul.f32 %v9783_v23, %v7043_v15 }
0x2881   : > { %v7051_v9 = vmul.f32 %v7050_v16, %v7046_v24 }
0x2883   : > { %v7056_v19 = vadd.f32 %v7055_v44, %v7051_v9 }
0x2885   : > { %7058 = vadd.xlane.f32.xlu0 %v7056_v19  ;;  %v7061_v53 = vmul.f32 %v7056_v19, %v7056_v19 }
0x2887   : > { %7062 = vadd.xlane.f32.xlu1 %v7061_v53 }
0x290e   : > { %v7059_v35 = vpop.xlane.xlu0 %7058 }
0x290f   : > { %v7060_v36 = vmul.f32 0.03125, %v7059_v35 }
0x2910   : > { %v7063_v38 = vpop.xlane.xlu1 %7062 }
0x2911   : > { %v7065_v32 = vmul.f32 %v7060_v36, %v7060_v36  ;;  %v7064_v8 = vmul.f32 0.03125, %v7063_v38  ;;  %v7068_v46 = vsub.f32 %v7056_v19, %v7060_v36 }
0x2913   : > { %v7066_v39 = vsub.f32 %v7064_v8, %v7065_v32 }
0x2915   : > { %v7067_v42 = vmax.f32 %v7066_v39, 0.0 }
0x2917   : > { %v7069_v34 = vadd.f32 1e-05, %v7067_v42 }
0x2919   : > { %9784 = vrsqrt.f32 %v7069_v34 }
0x2926   : > { %v9785_v56 = vpop.eup %9784 }
0x2927   : > { %v7071_v30 = vmul.f32 %v9785_v56, %v7068_v46 }
0x2929   : > { %v7076_v50 = vmul.f32 %v7075_v41, %v7071_v30 }
0x292b   : > { %v7081_v0 = vadd.f32 %v7080_v1, %v7076_v50 }
0x292d   : > { %v7099_v49 = vpack.c.bf16 %v7081_v0, %v7081_v0 }
0x292f   : > { %8957 = vmatmul.mubr.bf16.vlgmr.msra.gmra.mxu0 %v7099_v49 }
0x29ef   : > { %v7188_v54 = vpop.f32.mrf.mxu0 }
0x29f0   : > { %v7189_v48 = vadd.f32 %v8089_v51, %v7188_v54 }
0x29f1   : > { %v8958_v55 = vpop.f32.mrf.mxu0 }
0x29f2   : > { %7194 = vst [vmem:[%s1579_s23] sm:$0xff] %v7189_v48 }
0x29f3   : > { %v7191_v57 = vpop.f32.mrf.mxu0 }
0x29f5   : > { %v8959_v58 = vpop.f32.mrf.mxu0 }
0x29f6 PF: > { %s99_s7 = sadd.s32 1, %s10526_s7  }
0x29f7   : > { %p96_p7 = scmp.ge.s32.totalorder %s99_s7, 4  }
0x29f9   :  { %98 = sbr.rel (!%p96_p7) target bundleno = 80 (0x50), region = 379 }
0x29fe   :  { %7214 = vsyncpa [#allocation3], 1 }
0x29ff   :  { %7216 = vsyncpa [#allocation3 + $0x1], 1 }
0x2a00   :  { %7217 = vsyncpa [#allocation5], 1 }
0x2a01   :  { %7218 = vsyncpa [#allocation8], 1 }
0x2a02   :  { %7219 = vsyncpa [#allocation11], 1 }
0x2a03   :  { %7220 = vsyncpa [#allocation14], 1 }
0x2a04   :  { %7221 = vsyncpa [#allocation17], 1 }
0x2a05   :  { %7222 = vsyncpa [#allocation20], 1 }
0x2a06   :  { %7223 = vsyncpa [#allocation23], 1 }
0x2a07   :  { %7224 = vsyncpa [#allocation26], 1 }
0x2a08   :  { %7225 = vsyncpa [#allocation29], 1 }
0x2a09   :  { %7226 = vsyncpa [#allocation32], 1 }
0x2a0a   :  { %7227 = vsyncpa [#allocation35], 1 }
0x2a0b   :  { %7228 = vsyncpa [#allocation38], 1 }
0x2a0c   :  { %7229 = vsyncpa [#allocation41], 1 }

</bundles_post_ra>
